<compile_context>
chip_gen: v6e
topology: v6e:2x2x1
jax: 0.10.0
libtpu: 0.0.40
codegen_flags: <defaults>
</compile_context>

<pallas_src>
import jax
import jax.numpy as jnp
from jax.experimental import pallas as pl
from jax.experimental.pallas import tpu as pltpu

B = 2                  # batch
C, HH, WW = 4, 64, 64  # module-implied input channels / spatial (fixed by fc1)
K = C * HH * WW        # 16384 = fc1 in_features
H = 8 * 64             # 512   = fc1 out_features
TK = 8192              # K-tile -> 2 grid steps (int8 tiles: 4 MiB each)


def fc_kernel(x_ref, w1q_ref, scale_ref, b1_ref, w2_ref, b2_ref, o_ref, acc_ref):
    """Fused fc1 -> ReLU -> fc2 over a K-reduction grid.

    Grid axis 0 walks the K (input-feature) dimension.  Per step: cast the
    (TK, H) int8 weight tile to bf16 (exact) and accumulate a bf16 MXU matmul
    into the f32 (B, H) VMEM scratch.  The epilogue (int8 scale + bias + ReLU
    + fc2 lane reduction + bias) runs on the last step.
    """
    k = pl.program_id(0)

    @pl.when(k == 0)
    def _():
        acc_ref[...] = jnp.zeros_like(acc_ref)

    # Unscaled int8 -> bf16 cast (values in [-127, 127] are exact in bf16);
    # per-output-feature scales are deferred to the epilogue.
    w_tile = w1q_ref[...].astype(jnp.bfloat16)                    # (TK, H)
    acc_ref[...] += jnp.dot(x_ref[...], w_tile,
                            preferred_element_type=jnp.float32)   # (B, H) f32

    @pl.when(k == pl.num_programs(0) - 1)
    def _():
        # Dequantize (scale depends only on H), bias, ReLU -- all in f32.
        h = jnp.maximum(acc_ref[...] * scale_ref[...] + b1_ref[...], 0.0)
        # fc2 as VPU multiply + lane reduction (avoids an N=1 MXU matmul).
        out = jnp.sum(h * w2_ref[...], axis=-1, keepdims=True)    # (B, 1)
        o_ref[...] = (out + b2_ref[0, 0]).astype(o_ref.dtype)


def quantize_w1(w1):
    """One-time setup: (H, K) f32 PyTorch weight -> ((K, H) int8, (1, H) f32 scale).

    Per-output-feature symmetric quantization; the transpose to (K, H) happens
    here (once), NOT per call, so the kernel streams a lane-dense, transpose-
    free weight layout.
    """
    amax = jnp.max(jnp.abs(w1), axis=1)                        # (H,)
    scale = jnp.maximum(amax, 1e-30) / 127.0                   # (H,)
    q = jnp.clip(jnp.round(w1 / scale[:, None]), -127, 127).astype(jnp.int8)
    return q.T, scale.reshape(1, H).astype(jnp.float32)        # (K, H), (1, H)


@jax.jit
def fc_forward(x, w1_q, w1_scale, b1, w2, b2):
    """x: (B, C, HH, WW) f32; w1_q: (K, H) int8; w1_scale: (1, H) f32;
    b1: (H,) f32; w2: (1, H) f32; b2: (1,) f32.  Returns (B, 1) f32."""
    # Never let an unquantized (f32/bf16) W1 stream execute: enforce int8.
    assert w1_q.dtype == jnp.int8 and w1_q.shape == (K, H), (
        "W1 must be pre-quantized to int8 (K, H) via quantize_w1() at setup.")

    x2d = x.reshape(B, K).astype(jnp.bfloat16)   # same flatten order as torch .view
    b1r = b1.reshape(1, H)
    w2r = w2.reshape(1, H)                       # lane-dense, no transpose
    b2r = b2.reshape(1, 1)

    grid = (K // TK,)                            # 2 reduction steps

    return pl.pallas_call(
        fc_kernel,
        out_shape=jax.ShapeDtypeStruct((B, 1), jnp.float32),
        grid_spec=pltpu.PrefetchScalarGridSpec(
            num_scalar_prefetch=0,
            grid=grid,
            in_specs=[
                pl.BlockSpec((B, TK), lambda k: (0, k)),        # x tile (bf16)
                pl.BlockSpec((TK, H), lambda k: (k, 0)),        # W1 int8 tile, (K, H) layout
                pl.BlockSpec((1, H), lambda k: (0, 0)),         # per-feature scales (resident)
                pl.BlockSpec((1, H), lambda k: (0, 0)),         # b1 (resident)
                pl.BlockSpec((1, H), lambda k: (0, 0)),         # w2 (resident, lane-dense)
                pl.BlockSpec(memory_space=pltpu.MemorySpace.SMEM),  # b2 scalar
            ],
            out_specs=pl.BlockSpec((B, 1), lambda k: (0, 0)),
            scratch_shapes=[pltpu.VMEM((B, H), jnp.float32)],
        ),
        compiler_params=pltpu.CompilerParams(
            dimension_semantics=("arbitrary",),      # single K-reduction axis
            vmem_limit_bytes=32 * 1024 * 1024,       # 8 MiB dbl-buffered int8 + ~8 MiB cast temp
        ),
        # TODO(synk): on v7x only, split H across the 2 TensorCores (leading
        # "parallel" axis of size 2, (TK, 256) weight blocks, wrapper adds the
        # two (B, 1) partials) if one TC cannot saturate chip HBM bandwidth.
        # TODO(synk): in the full model, hide the 8 MiB W1 stream behind the
        # backbone by starting the HBM->VMEM copy in an earlier pallas_call and
        # consuming the semaphore + VMEM ref here (cross-call DMA future).
    )(x2d, w1_q, w1_scale, b1r, w2r, b2r)


if __name__ == "__main__":
    key = jax.random.PRNGKey(0)
    kx, k1, k2, k3, k4 = jax.random.split(key, 5)

    # Deterministic synthetic parameters (PyTorch-like uniform(+-1/sqrt(fan_in))).
    bound1 = 1.0 / (K ** 0.5)
    bound2 = 1.0 / (H ** 0.5)
    x = jax.random.normal(kx, (B, C, HH, WW), dtype=jnp.float32)
    w1 = jax.random.uniform(k1, (H, K), jnp.float32, -bound1, bound1)
    b1 = jax.random.uniform(k2, (H,), jnp.float32, -bound1, bound1)
    w2 = jax.random.uniform(k3, (1, H), jnp.float32, -bound2, bound2)
    b2 = jax.random.uniform(k4, (1,), jnp.float32, -bound2, bound2)

    # Weights are static: quantize + relayout ONCE, outside the per-call hot
    # path, so the kernel streams 8 MiB of int8 instead of 32 MiB of f32.
    w1_q, w1_scale = jax.block_until_ready(quantize_w1(w1))

    out = jax.block_until_ready(fc_forward(x, w1_q, w1_scale, b1, w2, b2))
    assert out.shape == (B, 1)

    # Pure-JAX f32 reference (int8 weights + bf16 activations change numerics;
    # tolerance reflects the documented precision contract).
    x2d = x.reshape(B, K)
    ref_f32 = jnp.maximum(x2d @ w1.T + b1, 0.0) @ w2.T + b2
    assert jnp.allclose(out, ref_f32, atol=2e-2, rtol=2e-2), (out, ref_f32)

    # Tighter check against a reference using the SAME quantized weight stream
    # and bf16 activations as the kernel.
    x2d_bf = x2d.astype(jnp.bfloat16)
    acc = jnp.dot(x2d_bf, w1_q.astype(jnp.bfloat16),
                  preferred_element_type=jnp.float32)
    h_ref = jnp.maximum(acc * w1_scale + b1, 0.0)
    ref_q = jnp.sum(h_ref * w2, axis=-1, keepdims=True) + b2
    assert jnp.allclose(out, ref_q, atol=1e-3, rtol=1e-3), (out, ref_q)

    print("KERNEL_OK")
</pallas_src>

<mosaic_0001>
module attributes {stable_mosaic.version = 11 : i64} {
  func.func @fc_kernel(%arg0: i32, %arg1: memref<2x8192xbf16, #tpu.memory_space<vmem>>, %arg2: memref<8192x512xi8, #tpu.memory_space<vmem>>, %arg3: memref<1x512xf32, #tpu.memory_space<vmem>>, %arg4: memref<1x512xf32, #tpu.memory_space<vmem>>, %arg5: memref<1x512xf32, #tpu.memory_space<vmem>>, %arg6: memref<1x1xf32, #tpu.memory_space<smem>>, %arg7: memref<2x1xf32, #tpu.memory_space<vmem>>, %arg8: memref<2x512xf32, #tpu.memory_space<vmem>>) attributes {dimension_semantics = [#tpu.dimension_semantics<arbitrary>], iteration_bounds = array<i64: 2>, scalar_prefetch = 0 : i64, scratch_operands = 1 : i64, tpu.core_type = #tpu.core_type<tc>, window_params = [{transform_indices = @transform_0, window_bounds = array<i64: 2, 8192>}, {transform_indices = @transform_1, window_bounds = array<i64: 8192, 512>}, {pipeline_mode = #tpu.pipeline_mode<synchronous>, transform_indices = @transform_2, window_bounds = array<i64: 1, 512>}, {pipeline_mode = #tpu.pipeline_mode<synchronous>, transform_indices = @transform_3, window_bounds = array<i64: 1, 512>}, {pipeline_mode = #tpu.pipeline_mode<synchronous>, transform_indices = @transform_4, window_bounds = array<i64: 1, 512>}, {transform_indices = @transform_5, window_bounds = array<i64: 1, 1>}, {pipeline_mode = #tpu.pipeline_mode<synchronous>, transform_indices = @transform_6, window_bounds = array<i64: 2, 1>}]} {
    %c0_i32 = arith.constant 0 : i32
    %0 = arith.cmpi eq, %arg0, %c0_i32 : i32
    %1 = arith.extui %0 : i1 to i32
    %c0_i32_0 = arith.constant 0 : i32
    %2 = arith.cmpi ne, %1, %c0_i32_0 : i32
    scf.if %2 {
      %cst_9 = arith.constant 0.000000e+00 : f32
      %13 = vector.broadcast %cst_9 : f32 to vector<2x512xf32>
      %c0_10 = arith.constant 0 : index
      %c0_11 = arith.constant 0 : index
      %14 = vector.load %arg8[%c0_10, %c0_11] : memref<2x512xf32, #tpu.memory_space<vmem>>, vector<2x512xf32>
      tpu.vector_store %arg8[%c0_10, %c0_11], %13 {strides = array<i32>} : memref<2x512xf32, #tpu.memory_space<vmem>>, vector<2x512xf32>,
    } else {
    }
    %c0 = arith.constant 0 : index
    %c0_1 = arith.constant 0 : index
    %3 = vector.load %arg2[%c0, %c0_1] : memref<8192x512xi8, #tpu.memory_space<vmem>>, vector<8192x512xi8>
    %4 = arith.sitofp %3 : vector<8192x512xi8> to vector<8192x512xbf16>
    %c0_2 = arith.constant 0 : index
    %c0_3 = arith.constant 0 : index
    %5 = vector.load %arg8[%c0_2, %c0_3] : memref<2x512xf32, #tpu.memory_space<vmem>>, vector<2x512xf32>
    %c0_4 = arith.constant 0 : index
    %c0_5 = arith.constant 0 : index
    %6 = vector.load %arg1[%c0_4, %c0_5] : memref<2x8192xbf16, #tpu.memory_space<vmem>>, vector<2x8192xbf16>
    %cst = arith.constant dense<0.000000e+00> : vector<2x512xf32>
    %7 = tpu.matmul %6, %4, %cst {dimension_numbers = #tpu.dot_dimension_numbers<[1], [0], [0], [1], [0, 0, 1, 1], [], []>} : vector<2x8192xbf16>, vector<8192x512xbf16>, vector<2x512xf32> -> vector<2x512xf32>
    %8 = arith.addf %5, %7 : vector<2x512xf32>
    %c0_6 = arith.constant 0 : index
    %c0_7 = arith.constant 0 : index
    %9 = vector.load %arg8[%c0_6, %c0_7] : memref<2x512xf32, #tpu.memory_space<vmem>>, vector<2x512xf32>
    tpu.vector_store %arg8[%c0_6, %c0_7], %8 {strides = array<i32>} : memref<2x512xf32, #tpu.memory_space<vmem>>, vector<2x512xf32>,
    %c1_i32 = arith.constant 1 : i32
    %10 = arith.cmpi eq, %arg0, %c1_i32 : i32
    %11 = arith.extui %10 : i1 to i32
    %c0_i32_8 = arith.constant 0 : i32
    %12 = arith.cmpi ne, %11, %c0_i32_8 : i32
    scf.if %12 {
      %c0_9 = arith.constant 0 : index
      %c0_10 = arith.constant 0 : index
      %13 = vector.load %arg8[%c0_9, %c0_10] : memref<2x512xf32, #tpu.memory_space<vmem>>, vector<2x512xf32>
      %c0_11 = arith.constant 0 : index
      %c0_12 = arith.constant 0 : index
      %14 = vector.load %arg3[%c0_11, %c0_12] : memref<1x512xf32, #tpu.memory_space<vmem>>, vector<1x512xf32>
      %15 = vector.broadcast %14 : vector<1x512xf32> to vector<2x512xf32>
      %16 = arith.mulf %13, %15 : vector<2x512xf32>
      %c0_13 = arith.constant 0 : index
      %c0_14 = arith.constant 0 : index
      %17 = vector.load %arg4[%c0_13, %c0_14] : memref<1x512xf32, #tpu.memory_space<vmem>>, vector<1x512xf32>
      %18 = vector.broadcast %17 : vector<1x512xf32> to vector<2x512xf32>
      %19 = arith.addf %16, %18 : vector<2x512xf32>
      %cst_15 = arith.constant 0.000000e+00 : f32
      %20 = vector.broadcast %cst_15 : f32 to vector<2x512xf32>
      %21 = arith.maximumf %19, %20 : vector<2x512xf32>
      %c0_16 = arith.constant 0 : index
      %c0_17 = arith.constant 0 : index
      %22 = vector.load %arg5[%c0_16, %c0_17] : memref<1x512xf32, #tpu.memory_space<vmem>>, vector<1x512xf32>
      %23 = vector.broadcast %22 : vector<1x512xf32> to vector<2x512xf32>
      %24 = arith.mulf %21, %23 : vector<2x512xf32>
      %cst_18 = arith.constant dense<0.000000e+00> : vector<2xf32>
      %25 = vector.multi_reduction <add>, %24, %cst_18 [1] : vector<2x512xf32> to vector<2xf32>
      %26 = vector.shape_cast %25 : vector<2xf32> to vector<2x1xf32>
      %c0_19 = arith.constant 0 : index
      %c0_20 = arith.constant 0 : index
      %27 = memref.load %arg6[%c0_19, %c0_20] : memref<1x1xf32, #tpu.memory_space<smem>>
      %28 = vector.broadcast %27 : f32 to vector<2x1xf32>
      %29 = arith.addf %26, %28 : vector<2x1xf32>
      %c0_21 = arith.constant 0 : index
      %c0_22 = arith.constant 0 : index
      %30 = vector.load %arg7[%c0_21, %c0_22] : memref<2x1xf32, #tpu.memory_space<vmem>>, vector<2x1xf32>
      tpu.vector_store %arg7[%c0_21, %c0_22], %29 {strides = array<i32>} : memref<2x1xf32, #tpu.memory_space<vmem>>, vector<2x1xf32>,
    } else {
    }
    return
  }
  func.func @transform_0(%arg0: i32) -> (i32, i32) {
    %c0_i32 = arith.constant 0 : i32
    %c0_i32_0 = arith.constant 0 : i32
    return %c0_i32, %arg0 : i32, i32
  }
  func.func @transform_1(%arg0: i32) -> (i32, i32) {
    %c0_i32 = arith.constant 0 : i32
    %c0_i32_0 = arith.constant 0 : i32
    return %arg0, %c0_i32 : i32, i32
  }
  func.func @transform_2(%arg0: i32) -> (i32, i32) {
    %c0_i32 = arith.constant 0 : i32
    %c0_i32_0 = arith.constant 0 : i32
    %c0_i32_1 = arith.constant 0 : i32
    return %c0_i32, %c0_i32_0 : i32, i32
  }
  func.func @transform_3(%arg0: i32) -> (i32, i32) {
    %c0_i32 = arith.constant 0 : i32
    %c0_i32_0 = arith.constant 0 : i32
    %c0_i32_1 = arith.constant 0 : i32
    return %c0_i32, %c0_i32_0 : i32, i32
  }
  func.func @transform_4(%arg0: i32) -> (i32, i32) {
    %c0_i32 = arith.constant 0 : i32
    %c0_i32_0 = arith.constant 0 : i32
    %c0_i32_1 = arith.constant 0 : i32
    return %c0_i32, %c0_i32_0 : i32, i32
  }
  func.func @transform_5(%arg0: i32) -> (i32, i32) {
    %c0_i32 = arith.constant 0 : i32
    %c0_i32_0 = arith.constant 0 : i32
    %c0_i32_1 = arith.constant 0 : i32
    return %c0_i32, %c0_i32_0 : i32, i32
  }
  func.func @transform_6(%arg0: i32) -> (i32, i32) {
    %c0_i32 = arith.constant 0 : i32
    %c0_i32_0 = arith.constant 0 : i32
    %c0_i32_1 = arith.constant 0 : i32
    return %c0_i32, %c0_i32_0 : i32, i32
  }
}

</mosaic_0001>

<bundles_post_ra>
// kernel: fc_forward.1
= control target key start
LH: loop header
LB: loop body
LE: loop exit
PB: predicated region body
PF: predicated region fallthrough
CT: control target
= control target key end

     0   :  { %s8915_s0 = inlined_call_operand.vmem [shape: bf16[2,16384], index: 0, kind: input, shape index: {}]   ;;  %s8916_s1 = inlined_call_operand.hbm [shape: s8[16384,512], index: 1, kind: input, shape index: {}]   ;;  %s8917_s2 = inlined_call_operand.hbm [shape: f32[1,512], index: 2, kind: input, shape index: {}]   ;;  %s8918_s3 = inlined_call_operand.hbm [shape: f32[1,512], index: 3, kind: input, shape index: {}]   ;;  %s8919_s4 = inlined_call_operand.hbm [shape: f32[1,512], index: 4, kind: input, shape index: {}]   ;;  %s8920_s5 = inlined_call_operand.<no memory space> [shape: f32[1,1], index: 5, kind: input, shape index: {}]   ;;  %s8921_s6 = inlined_call_operand.vmem [shape: f32[2,1], index: 6, kind: output, shape index: {}]  }
   0x1   :  { %11 = sst [smem:[#allocation3]] %s8920_s5 }
   0x2   :  { %12 = vsyncpa [#allocation5], 0 }
   0x3   :  { %14 = vsyncpa [#allocation5 + $0x1], 0 }
   0x4   :  { %15 = vsyncpa [#allocation7], 0 }
   0x5   :  { %16 = vsyncpa [#allocation10], 0  ;;  %s7048_s23 = smov 0   ;;  %s7050_s24 = smov 0  }
   0x6   :  { %s7052_s25 = smov 0   ;;  %s7054_s26 = smov 0  }
   0x7 LB: > { %s7067_s5 = sadd.s32 4294967295, %s6999_s26   ;;  %p68_p0 = scmp.ne.s32.totalorder %s6991_s24, %s6987_s23  ;;  %s6999_s26 = sphi %s7054_s26, %s9013_s26   ;;  %s6995_s25 = sphi %s7052_s25, %s9012_s25   ;;  %s6991_s24 = sphi %s7050_s24, %s9011_s24   ;;  %s6987_s23 = sphi %s7048_s23, %s9010_s23  }
   0x8   : > { %p8922_p1 = scmp.eq.s32.totalorder %s7067_s5, 0  ;;  %p6747_p2 = scmp.ge.s32.totalorder %s6999_s26, 1 }
   0x9   : > { %p184_p3 = scmp.lt.s32.totalorder %s6999_s26, 3  ;;  %s7001_s29 = smov [#allocation6]  }
   0xa   : > { %p7076_p5 = por %p8922_p1, %p68_p0  ;;  %s197_s30 = sshll.u32 %s7001_s29, 4  ;;  %s198_s30 = int_to_ptr.vmem [resolvable:$true] %s197_s30 }
   0xb   : > { %p7080_p6 = pnand %p6747_p2, %p184_p3  ;;  %s7002_s7 = smov [#allocation8]  }
   0xc   : > { %s8950_s27 = scalar_select %p7076_p5, 1, 0 }
   0xd   : > { %s8951_s28 = scalar_select %p7080_p6, 1, 0 }
   0xe   : > { %p6782_p7 = pneg %p7080_p6  ;;  %s208_s8 = sshll.u32 %s7002_s7, 4  ;;  %s209_s8 = int_to_ptr.vmem [resolvable:$true] %s208_s8 }
   0xf   : > { %s7003_s10 = smov [#allocation9]   ;;  %s6862_s12 = scalar_lea.vmem %s198_s30, 64 }
  0x10   : > { %p7088_p8 = pnand %p6782_p7, %p8922_p1  ;;  %s219_s11 = sshll.u32 %s7003_s10, 4  ;;  %s7092_s11 = int_to_ptr.vmem [resolvable:$true] %s219_s11 }
  0x11   : > { %p6863_p10 = scmp.ne.s32.totalorder %s198_s30, %s6862_s12  ;;  %p6870_p13 = scmp.lt.s32.totalorder %s198_s30, %s198_s30 }
  0x12   : > { %p6853_p9 = pneg %p7088_p8  ;;  %p6871_p0 = scmp.lt.s32.totalorder %s6862_s12, %s6862_s12 }
  0x14   : > { %p6865_p11 = pnand %p6863_p10, %p6853_p9  ;;  %p6872_p2 = por %p6871_p0, %p6870_p13 }
  0x16   : > { %p6866_p12 = pneg %p6865_p11 }
  0x18   : > { %p6873_p3 = pnand %p6872_p2, %p6866_p12 }
  0x1a   : > { %6876 = shalt.err (!%p6873_p3)
}
  0x1b   : > { %6785 = dma.hbm_to_vmem [thread:$0]  (!%p7088_p8), %s8917_s2, 64, %s198_s30, [#allocation7]  }
  0x1c   : > { %s6888_s15 = scalar_lea.vmem %s209_s8, 64  ;;  %p6896_p10 = scmp.lt.s32.totalorder %s209_s8, %s209_s8 }
  0x1d   : > { %p6889_p7 = scmp.ne.s32.totalorder %s209_s8, %s6888_s15  ;;  %p6897_p11 = scmp.lt.s32.totalorder %s6888_s15, %s6888_s15 }
  0x1f   : > { %p6891_p4 = pnand %p6889_p7, %p6853_p9  ;;  %p6898_p5 = por %p6897_p11, %p6896_p10 }
  0x21   : > { %p6892_p1 = pneg %p6891_p4 }
  0x23   : > { %p6899_p6 = pnand %p6898_p5, %p6892_p1 }
  0x25   : > { %6902 = shalt.err (!%p6899_p6)
}
  0x26   : > { %6788 = dma.hbm_to_vmem [thread:$0]  (!%p7088_p8), %s8918_s3, 64, %s209_s8, [#allocation7]  }
  0x27   : > { %s6914_s18 = scalar_lea.vmem %s7092_s11, 64  ;;  %p6922_p0 = scmp.lt.s32.totalorder %s7092_s11, %s7092_s11 }
  0x28   : > { %p6915_p12 = scmp.ne.s32.totalorder %s7092_s11, %s6914_s18  ;;  %p6923_p1 = scmp.lt.s32.totalorder %s6914_s18, %s6914_s18 }
  0x2a   : > { %p6917_p4 = pnand %p6915_p12, %p6853_p9  ;;  %p6924_p5 = por %p6923_p1, %p6922_p0 }
  0x2c   : > { %p6918_p13 = pneg %p6917_p4 }
  0x2e   : > { %p6925_p6 = pnand %p6924_p5, %p6918_p13 }
  0x30   : > { %6928 = shalt.err (!%p6925_p6)
}
  0x31   : > { %6791 = dma.hbm_to_vmem [thread:$0]  (!%p7088_p8), %s8919_s4, 64, %s7092_s11, [#allocation10]  }
  0x32   : > { %s7126_s21 = sadd.s32 1, %s6999_s26   ;;  %s55_s23 = sadd.s32 1, %s6995_s25 }
  0x33   : > { %s52_s22 = ssub.s32 %s6999_s26, %s7126_s21  ;;  %p62_p2 = scmp.ne.s32.totalorder %s6995_s25, %s6991_s24 }
  0x34   : > { %p53_p9 = scmp.eq.s32.totalorder %s52_s22, 0  ;;  %p63_p3 = scmp.eq.s32.totalorder %s6999_s26, 0 }
  0x35   : > { %p6799_p7 = scmp.lt.s32.totalorder %s6999_s26, 2  ;;  %s241_s30 = sand.u32 1, %s6995_s25  }
  0x36   : > { %s7136_s29 = scalar_select %p53_p9, %s6995_s25, %s55_s23  }
  0x37   : > { %p64_p10 = por %p63_p3, %p62_p2  ;;  %s6752_s7 = sshll.u32 %s241_s30, 13 }
  0x38   : > { %s6767_s8 = sshll.u32 %s6999_s26, 17  ;;  %s245_s11 = scalar_lea.vmem [#allocation4], %s6752_s7 }
  0x39   : > { %s7143_s12 = scalar_lea.hbm %s8916_s1, %s6767_s8  ;;  %s253_s13 = sshll.u32 %s245_s11, 4  ;;  %s7145_s13 = int_to_ptr.vmem [resolvable:$true] %s253_s13 }
  0x3a   : > { %p7147_p8 = pnand %p6799_p7, %p64_p10  ;;  %s7151_s15 = scalar_lea.sflag [#allocation5], %s241_s30 }
  0x3b   : > { %s6929_s26 = scalar_lea.hbm %s7143_s12, 131072  ;;  %s6934_s18 = scalar_lea.hbm %s8916_s1, 262144 }
  0x3c   : > { %p6930_p11 = scmp.ne.s32.totalorder %s7143_s12, %s6929_s26  ;;  %p6931_p12 = pneg %p7147_p8 }
  0x3d   : > { %p6935_p0 = scmp.lt.s32.totalorder %s7143_s12, %s8916_s1  ;;  %p6936_p1 = scmp.lt.s32.totalorder %s6934_s18, %s6929_s26 }
  0x3e   : > { %p6932_p4 = pnand %p6931_p12, %p6930_p11 }
  0x3f   : > { %p6937_p5 = por %p6936_p1, %p6935_p0 }
  0x40   : > { %p6933_p13 = pneg %p6932_p4 }
  0x42   : > { %p6938_p6 = pnand %p6937_p5, %p6933_p13 }
  0x44   : > { %6941 = shalt.err (!%p6938_p6)
}
  0x45   : > { %s6942_s22 = scalar_lea.vmem %s7145_s13, 131072  ;;  %s7004_s23 = smov [#allocation4]  }
  0x46   : > { %p6943_p9 = scmp.ne.s32.totalorder %s7145_s13, %s6942_s22  ;;  %s6947_s30 = sshll.u32 %s7004_s23, 4  ;;  %s6948_s30 = int_to_ptr.vmem [resolvable:$false] %s6947_s30 }
  0x47   : > { %s6949_s7 = scalar_lea.vmem %s6948_s30, 262144  ;;  %p6950_p7 = scmp.lt.s32.totalorder %s7145_s13, %s6948_s30 }
  0x48   : > { %p6945_p2 = pnand %p6943_p9, %p6931_p12  ;;  %p6951_p10 = scmp.lt.s32.totalorder %s6949_s7, %s6942_s22 }
  0x4a   : > { %p6946_p3 = pneg %p6945_p2  ;;  %p6952_p11 = por %p6951_p10, %p6950_p7 }
  0x4c   : > { %p6953_p4 = pnand %p6952_p11, %p6946_p3 }
  0x4e   : > { %6956 = shalt.err (!%p6953_p4)
}
  0x4f   : > { %s7005_s8 = smov 512   ;;  %s7006_s9 = smov 32  }
  0x50   : > { %6795 = dma.hbm_to_vmem [thread:$0]  (!%p7147_p8), %s7143_s12, 131072, %s7145_s13, %s7151_s15, %s7005_s8, %s7005_s8, %s7006_s9  }
  0x51   : > { %p8954_p12 = scmp.ne.s32.totalorder %s8951_s28, 0 }
  0x53   : > { %265 = sbr.rel (%p8954_p12) target bundleno = 2538 (0x9ea), region = 44 }
  0x58   : > { %s267_s10 = sand.u32 1, %s6991_s24   ;;  %p8955_p13 = scmp.ne.s32.totalorder %s8950_s27, 0 }
  0x59   : > { %s6757_s11 = sshll.u32 %s267_s10, 13  ;;  %s268_s26 = scalar_lea.sflag [#allocation5], %s267_s10 }
  0x5a   : > { %s7175_s16 = scalar_lea.vmem [#allocation4], %s6757_s11 }
  0x5b   : > { %6974 = dma.done.wait (%p8955_p13), %s268_s26, 131072  }
  0x5c   : > { %6976 = vsyncadd (%p8955_p13), %s268_s26, 4294836224  ;;  %p8956_p0 = scmp.eq.s32.totalorder %s7067_s5, 0 }
  0x5e   : > { %6978 = dma.done.wait (%p8956_p0), [#allocation7], 128   ;;  %p8957_p8 = pmov %p8956_p0 }
  0x5f   : > { %p8958_p1 = pmov %p8956_p0 }
  0x60   : > { %6980 = vsyncadd (%p8957_p8), [#allocation7], 4294967168 }
  0x61   : > { %6982 = dma.done.wait (%p8958_p1), [#allocation10], 64   ;;  %p8959_p5 = pmov %p8956_p0 }
  0x62   : > { %s6761_s28 = sshll.u32 %s7067_s5, 6  ;;  %p8960_p9 = scmp.ne.s32.totalorder %s7067_s5, 0 }
  0x63   : > { %6984 = vsyncadd (%p8959_p5), [#allocation10], 4294967232  ;;  %p312_p6 = scmp.lt.s32.totalorder %s6761_s28, 127 }
  0x64   : > { %320 = sbr.rel (%p8960_p9) target bundleno = 107 (0x6b), region = 64 }
  0x65   : > { %s9015_s28 = smov (!%p312_p6, %s6761_s28), 127 }
  0x66   : > { %s7193_s27 = scalar_lea.vmem %s8915_s0, %s9015_s28 }
  0x69   : > { %v7007_v0 = vmov 0.0  }
  0x6a   : > { %321 = vst [vmem:[#allocation2] sm:$0xff] %v7007_v0 }
  0x6b PF: > { %v335_v1 = vld [vmem:[%s7175_s16 + $0x68] sm:$0xff]  ;;  %v334_v3 = vld [vmem:[%s7175_s16 + $0x60] sm:$0xff]  ;;  %v3415_v31 = vlaneseq  ;;  %v7008_v36 = vmov 1966171168   ;;  %v7214_v44 = vld [vmem:[%s7193_s27] sm:$0xff]  ;;  %p6763_p2 = scmp.ne.s32.totalorder %s7067_s5, 1 }
  0x6c   : > { %v367_v2 = vld [vmem:[%s7175_s16 + $0x168] sm:$0xff]  ;;  %v1371_v4 = vunpack.c.l.s8.bf16 %v335_v1  ;;  %v1375_v5 = vunpack.c.h.s8.bf16 %v335_v1  ;;  %v366_v8 = vld [vmem:[%s7175_s16 + $0x160] sm:$0xff]  ;;  %v1374_v9 = vunpack.c.h.s8.bf16 %v334_v3  ;;  %v1370_v13 = vunpack.c.l.s8.bf16 %v334_v3  ;;  %s6664_s5 = sld [smem:[#allocation3]] (!%p6763_p2) }
  0x6d   : > { %v1435_v6 = vunpack.c.l.s8.bf16 %v367_v2  ;;  %v1439_v7 = vunpack.c.h.s8.bf16 %v367_v2  ;;  %v1438_v10 = vunpack.c.h.s8.bf16 %v366_v8  ;;  %v331_v11 = vld [vmem:[%s7175_s16 + $0x48] sm:$0xff]  ;;  %v1434_v14 = vunpack.c.l.s8.bf16 %v366_v8  ;;  %v330_v17 = vld [vmem:[%s7175_s16 + $0x40] sm:$0xff] }
  0x6e   : > { %v363_v12 = vld [vmem:[%s7175_s16 + $0x148] sm:$0xff]  ;;  %3867 = vmatprep.subr.bf16.mxu0 %v1375_v5  ;;  %v1367_v15 = vunpack.c.h.s8.bf16 %v331_v11  ;;  %v362_v18 = vld [vmem:[%s7175_s16 + $0x140] sm:$0xff]  ;;  %v1366_v19 = vunpack.c.h.s8.bf16 %v330_v17  ;;  %v1363_v21 = vunpack.c.l.s8.bf16 %v331_v11  ;;  %v1362_v25 = vunpack.c.l.s8.bf16 %v330_v17 }
  0x6f   : > { %3908 = vmatprep.subr.bf16.mxu1 %v1439_v7  ;;  %3868 = vmatpush1.bf16.msra.mxu0 %v1374_v9  ;;  %v1431_v16 = vunpack.c.h.s8.bf16 %v363_v12  ;;  %v1430_v20 = vunpack.c.h.s8.bf16 %v362_v18  ;;  %v1427_v22 = vunpack.c.l.s8.bf16 %v363_v12  ;;  %v327_v23 = vld [vmem:[%s7175_s16 + $0x28] sm:$0xff]  ;;  %v1426_v26 = vunpack.c.l.s8.bf16 %v362_v18  ;;  %v326_v29 = vld [vmem:[%s7175_s16 + $0x20] sm:$0xff] }
  0x70   : > { %3909 = vmatpush1.bf16.msra.mxu1 %v1438_v10  ;;  %3869 = vmatprep.subr.bf16.mxu0 %v1371_v4  ;;  %v359_v24 = vld [vmem:[%s7175_s16 + $0x128] sm:$0xff]  ;;  %v1359_v27 = vunpack.c.h.s8.bf16 %v327_v23  ;;  %v358_v30 = vld [vmem:[%s7175_s16 + $0x120] sm:$0xff]  ;;  %v1358_v32 = vunpack.c.h.s8.bf16 %v326_v29  ;;  %v1355_v34 = vunpack.c.l.s8.bf16 %v327_v23  ;;  %v3413_v37 = vunpack.c.l.s4 %v7008_v36 }
  0x71   : > { %3910 = vmatprep.subr.bf16.mxu1 %v1435_v6  ;;  %v1423_v28 = vunpack.c.h.s8.bf16 %v359_v24  ;;  %v1422_v33 = vunpack.c.h.s8.bf16 %v358_v30  ;;  %v1419_v35 = vunpack.c.l.s8.bf16 %v359_v24  ;;  %v7209_v38 = vshrl.u32 %v3415_v31, 7  ;;  %v323_v39 = vld [vmem:[%s7175_s16 + $0x8] sm:$0xff]  ;;  %v322_v47 = vld [vmem:[%s7175_s16] sm:$0xff] }
  0x72   : > { %v355_v40 = vld [vmem:[%s7175_s16 + $0x108] sm:$0xff]  ;;  %v3414_v41 = vunpack.c.0.s8 %v3413_v37  ;;  %v1354_v42 = vunpack.c.l.s8.bf16 %v326_v29  ;;  %v1418_v43 = vunpack.c.l.s8.bf16 %v358_v30  ;;  %v1351_v45 = vunpack.c.h.s8.bf16 %v323_v39  ;;  %v354_v48 = vld [vmem:[%s7175_s16 + $0x100] sm:$0xff] }
  0x73   : > { %3870 = vmatpush1.bf16.msra.mxu0 %v1370_v13  ;;  %8961 = vst [vmem:[#allocation14_spill] sm:$0xff] %v7209_v38  ;;  %v1415_v46 = vunpack.c.h.s8.bf16 %v355_v40  ;;  %v1350_v51 = vunpack.c.h.s8.bf16 %v322_v47  ;;  %v1414_v52 = vunpack.c.h.s8.bf16 %v354_v48  ;;  %v1347_v53 = vunpack.c.l.s8.bf16 %v323_v39  ;;  %v351_v56 = vld [vmem:[%s7175_s16 + $0xe8] sm:$0xff]  ;;  %v350_v63 = vld [vmem:[%s7175_s16 + $0xe0] sm:$0xff] }
  0x74   : > { %3911 = vmatpush1.bf16.msra.mxu1 %v1434_v14  ;;  %3871 = vmatprep.subr.bf16.mxu0 %v1367_v15  ;;  %v7219_v49 = vsub.s32 %v3414_v41, %v7209_v38  ;;  %v1411_v54 = vunpack.c.l.s8.bf16 %v355_v40  ;;  %v383_v57 = vld [vmem:[%s7175_s16 + $0x1e8] sm:$0xff]  ;;  %v1346_v59 = vunpack.c.l.s8.bf16 %v322_v47  ;;  %v1410_v60 = vunpack.c.l.s8.bf16 %v354_v48  ;;  %v382_v0 = vld [vmem:[%s7175_s16 + $0x1e0] sm:$0xff] }
  0x75   : > { %3912 = vmatprep.subr.bf16.mxu1 %v1431_v16  ;;  %v1407_v61 = vunpack.c.h.s8.bf16 %v351_v56  ;;  %v1471_v62 = vunpack.c.h.s8.bf16 %v383_v57  ;;  %v1406_v2 = vunpack.c.h.s8.bf16 %v350_v63  ;;  %v1470_v3 = vunpack.c.h.s8.bf16 %v382_v0  ;;  %v347_v6 = vld [vmem:[%s7175_s16 + $0xc8] sm:$0xff]  ;;  %v346_v12 = vld [vmem:[%s7175_s16 + $0xc0] sm:$0xff] }
  0x76   : > { %v7223_v50 = vrot.slane %v7214_v44, %v7219_v49  ;;  %v1403_v4 = vunpack.c.l.s8.bf16 %v351_v56  ;;  %v1467_v5 = vunpack.c.l.s8.bf16 %v383_v57  ;;  %v379_v7 = vld [vmem:[%s7175_s16 + $0x1c8] sm:$0xff]  ;;  %v1402_v8 = vunpack.c.l.s8.bf16 %v350_v63  ;;  %v378_v13 = vld [vmem:[%s7175_s16 + $0x1c0] sm:$0xff] }
  0x77   : > { %3872 = vmatpush1.bf16.msra.mxu0 %v1366_v19  ;;  %v1466_v9 = vunpack.c.l.s8.bf16 %v382_v0  ;;  %v1399_v10 = vunpack.c.h.s8.bf16 %v347_v6  ;;  %v1463_v11 = vunpack.c.h.s8.bf16 %v379_v7  ;;  %v1398_v14 = vunpack.c.h.s8.bf16 %v346_v12  ;;  %v343_v18 = vld [vmem:[%s7175_s16 + $0xa8] sm:$0xff]  ;;  %v342_v24 = vld [vmem:[%s7175_s16 + $0xa0] sm:$0xff] }
  0x78   : > { %3913 = vmatpush1.bf16.msra.mxu1 %v1430_v20  ;;  %3873 = vmatprep.subr.bf16.mxu0 %v1363_v21  ;;  %v3426_v55 = vcombine.high %v7223_v50, %v7223_v50  ;;  %v1462_v15 = vunpack.c.h.s8.bf16 %v378_v13  ;;  %v1395_v16 = vunpack.c.l.s8.bf16 %v347_v6  ;;  %v1459_v17 = vunpack.c.l.s8.bf16 %v379_v7  ;;  %v375_v19 = vld [vmem:[%s7175_s16 + $0x1a8] sm:$0xff]  ;;  %v338_v37 = vld [vmem:[%s7175_s16 + $0x80] sm:$0xff] }
  0x79   : > { %3914 = vmatprep.subr.bf16.mxu1 %v1427_v22  ;;  %v1394_v20 = vunpack.c.l.s8.bf16 %v346_v12  ;;  %v1458_v21 = vunpack.c.l.s8.bf16 %v378_v13  ;;  %v1391_v22 = vunpack.c.h.s8.bf16 %v343_v18  ;;  %v1455_v23 = vunpack.c.h.s8.bf16 %v375_v19  ;;  %v339_v30 = vld [vmem:[%s7175_s16 + $0x88] sm:$0xff]  ;;  %v370_v39 = vld [vmem:[%s7175_s16 + $0x180] sm:$0xff] }
  0x7a   : > { %v7230_v58 = vrot.slane %v3426_v55, %v7219_v49  ;;  %v1451_v29 = vunpack.c.l.s8.bf16 %v375_v19  ;;  %v371_v31 = vld [vmem:[%s7175_s16 + $0x188] sm:$0xff]  ;;  %v1382_v41 = vunpack.c.h.s8.bf16 %v338_v37  ;;  %v7263_v48 = vrot.slane %v7223_v50, %v7219_v49  ;;  %v398_v55 = vld [vmem:[%s7175_s16 + $0x260] sm:$0xff] }
  0x7b   : > { %3874 = vmatpush1.bf16.msra.mxu0 %v1362_v25  ;;  %v374_v25 = vld [vmem:[%s7175_s16 + $0x1a0] sm:$0xff]  ;;  %v1447_v36 = vunpack.c.h.s8.bf16 %v371_v31  ;;  %v1502_v50 = vunpack.c.h.s8.bf16 %v398_v55  ;;  %v395_v63 = vld [vmem:[%s7175_s16 + $0x248] sm:$0xff] }
  0x7c   : > { %3915 = vmatpush1.bf16.msra.mxu1 %v1426_v26  ;;  %3875 = vmatprep.subr.bf16.mxu0 %v1359_v27  ;;  %v7236_v1 = vcombine.high %v7230_v58, %v7230_v58  ;;  %v1390_v26 = vunpack.c.h.s8.bf16 %v342_v24  ;;  %v1454_v27 = vunpack.c.h.s8.bf16 %v374_v25  ;;  %v430_v56 = vld [vmem:[%s7175_s16 + $0x360] sm:$0xff]  ;;  %v427_v0 = vld [vmem:[%s7175_s16 + $0x348] sm:$0xff] }
  0x7d   : > { %3916 = vmatprep.subr.bf16.mxu1 %v1423_v28  ;;  %3899 = vmatprep.mubr.bf16.mxu0 %v7230_v58  ;;  %v1387_v28 = vunpack.c.l.s8.bf16 %v343_v18  ;;  %v1559_v6 = vunpack.c.h.s8.bf16 %v427_v0  ;;  %v394_v7 = vld [vmem:[%s7175_s16 + $0x240] sm:$0xff]  ;;  %v1555_v12 = vunpack.c.l.s8.bf16 %v427_v0  ;;  %v391_v13 = vld [vmem:[%s7175_s16 + $0x228] sm:$0xff] }
  0x7e   : > { %3940 = vmatprep.mubr.bf16.mxu1 %v7236_v1  ;;  %v390_v19 = vld [vmem:[%s7175_s16 + $0x220] sm:$0xff] }
  0x7f   : > { %3876 = vmatpush1.bf16.msra.mxu0 %v1358_v32  ;;  %v3411_v32 = vcombine.high %v7214_v44, %v7214_v44  ;;  %v1443_v44 = vunpack.c.l.s8.bf16 %v371_v31  ;;  %v386_v31 = vld [vmem:[%s7175_s16 + $0x200] sm:$0xff] }
  0x80   : > { %3917 = vmatpush1.bf16.msra.mxu1 %v1422_v33  ;;  %3877 = vmatprep.subr.bf16.mxu0 %v1355_v34  ;;  %v1386_v33 = vunpack.c.l.s8.bf16 %v342_v24  ;;  %v1450_v34 = vunpack.c.l.s8.bf16 %v374_v25  ;;  %v387_v25 = vld [vmem:[%s7175_s16 + $0x208] sm:$0xff] }
  0x81   : > { %3918 = vmatprep.subr.bf16.mxu1 %v1419_v35  ;;  %v1383_v35 = vunpack.c.h.s8.bf16 %v339_v30  ;;  %v7255_v40 = vrot.slane %v3411_v32, %v7219_v49  ;;  %v418_v32 = vld [vmem:[%s7175_s16 + $0x300] sm:$0xff] }
  0x83   : > { %3878 = vmatpush1.bf16.msra.mxu0 %v1354_v42  ;;  %v1446_v42 = vunpack.c.h.s8.bf16 %v370_v39  ;;  %v3427_v47 = vcombine.high %v7255_v40, %v7255_v40 }
  0x84   : > { %3919 = vmatpush1.bf16.msra.mxu1 %v1418_v43  ;;  %3879 = vmatprep.subr.bf16.mxu0 %v1351_v45  ;;  %v1379_v43 = vunpack.c.l.s8.bf16 %v339_v30  ;;  %v399_v45 = vld [vmem:[%s7175_s16 + $0x268] sm:$0xff] }
  0x85   : > { %3920 = vmatprep.subr.bf16.mxu1 %v1415_v46  ;;  %v431_v46 = vld [vmem:[%s7175_s16 + $0x368] sm:$0xff]  ;;  %v7268_v57 = vrot.slane %v3427_v47, %v7219_v49 }
  0x87   : > { %3880 = vmatpush1.bf16.msra.mxu0 %v1350_v51  ;;  %v1378_v51 = vunpack.c.l.s8.bf16 %v338_v37  ;;  %v415_v37 = vld [vmem:[%s7175_s16 + $0x2e8] sm:$0xff] }
  0x88   : > { %3921 = vmatpush1.bf16.msra.mxu1 %v1414_v52  ;;  %3881 = vmatprep.subr.bf16.mxu0 %v1347_v53  ;;  %v1442_v52 = vunpack.c.l.s8.bf16 %v370_v39  ;;  %v1503_v53 = vunpack.c.h.s8.bf16 %v399_v45  ;;  %v447_v39 = vld [vmem:[%s7175_s16 + $0x3e8] sm:$0xff] }
  0x89   : > { %3922 = vmatprep.subr.bf16.mxu1 %v1411_v54  ;;  %v1567_v54 = vunpack.c.h.s8.bf16 %v431_v46 }
  0x8b   : > { %3882 = vmatpush1.bf16.msra.mxu0 %v1346_v59  ;;  %v7272_v59 = vcombine.high %v7263_v48, %v7263_v48 }
  0x8c   : > { %3923 = vmatpush1.bf16.msra.mxu1 %v1410_v60  ;;  %3883 = vmatprep.subr.bf16.mxu0 %v1407_v61  ;;  %v1566_v60 = vunpack.c.h.s8.bf16 %v430_v56  ;;  %v1499_v61 = vunpack.c.l.s8.bf16 %v399_v45  ;;  %v414_v45 = vld [vmem:[%s7175_s16 + $0x2e0] sm:$0xff] }
  0x8d   : > { %3924 = vmatprep.subr.bf16.mxu1 %v1471_v62  ;;  %v1563_v62 = vunpack.c.l.s8.bf16 %v431_v46  ;;  %v446_v46 = vld [vmem:[%s7175_s16 + $0x3e0] sm:$0xff]  ;;  %v1534_v47 = vunpack.c.h.s8.bf16 %v414_v45 }
  0x8f   : > { %3884 = vmatpush2.bf16.msra.mxu0 %v1406_v2  ;;  %v7278_v2 = vcombine.high %v7268_v57, %v7268_v57 }
  0x90   : > { %3925 = vmatpush2.bf16.msra.mxu1 %v1470_v3  ;;  %3885 = vmatprep.subr.bf16.mxu0 %v1403_v4  ;;  %v1498_v3 = vunpack.c.l.s8.bf16 %v398_v55  ;;  %v1562_v4 = vunpack.c.l.s8.bf16 %v430_v56  ;;  %v443_v55 = vld [vmem:[%s7175_s16 + $0x3c8] sm:$0xff]  ;;  %v1530_v56 = vunpack.c.l.s8.bf16 %v414_v45 }
  0x91   : > { %3926 = vmatprep.subr.bf16.mxu1 %v1467_v5  ;;  %v1495_v5 = vunpack.c.h.s8.bf16 %v395_v63 }
  0x93   : > { %3886 = vmatpush2.bf16.msra.mxu0 %v1402_v8  ;;  %v426_v8 = vld [vmem:[%s7175_s16 + $0x340] sm:$0xff] }
  0x94   : > { %3927 = vmatpush2.bf16.msra.mxu1 %v1466_v9  ;;  %3887 = vmatprep.subr.bf16.mxu0 %v1399_v10  ;;  %v1494_v9 = vunpack.c.h.s8.bf16 %v394_v7  ;;  %v1558_v10 = vunpack.c.h.s8.bf16 %v426_v8 }
  0x95   : > { %3928 = vmatprep.subr.bf16.mxu1 %v1463_v11  ;;  %v1491_v11 = vunpack.c.l.s8.bf16 %v395_v63  ;;  %v442_v63 = vld [vmem:[%s7175_s16 + $0x3c0] sm:$0xff] }
  0x97   : > { %3888 = vmatpush2.bf16.msra.mxu0 %v1398_v14  ;;  %v423_v14 = vld [vmem:[%s7175_s16 + $0x328] sm:$0xff] }
  0x98   : > { %3929 = vmatpush2.bf16.msra.mxu1 %v1462_v15  ;;  %3889 = vmatprep.subr.bf16.mxu0 %v1395_v16  ;;  %v1490_v15 = vunpack.c.l.s8.bf16 %v394_v7  ;;  %v1554_v16 = vunpack.c.l.s8.bf16 %v426_v8  ;;  %v1551_v18 = vunpack.c.h.s8.bf16 %v423_v14  ;;  %v1547_v24 = vunpack.c.l.s8.bf16 %v423_v14  ;;  %v439_v7 = vld [vmem:[%s7175_s16 + $0x3a8] sm:$0xff] }
  0x99   : > { %3930 = vmatprep.subr.bf16.mxu1 %v1459_v17  ;;  %v1487_v17 = vunpack.c.h.s8.bf16 %v391_v13 }
  0x9b   : > { %3890 = vmatpush2.bf16.msra.mxu0 %v1394_v20  ;;  %v422_v20 = vld [vmem:[%s7175_s16 + $0x320] sm:$0xff] }
  0x9c   : > { %3931 = vmatpush2.bf16.msra.mxu1 %v1458_v21  ;;  %3891 = vmatprep.subr.bf16.mxu0 %v1391_v22  ;;  %v1486_v21 = vunpack.c.h.s8.bf16 %v390_v19  ;;  %v1550_v22 = vunpack.c.h.s8.bf16 %v422_v20 }
  0x9d   : > { %3932 = vmatprep.subr.bf16.mxu1 %v1455_v23  ;;  %v1483_v23 = vunpack.c.l.s8.bf16 %v391_v13  ;;  %v438_v13 = vld [vmem:[%s7175_s16 + $0x3a0] sm:$0xff] }
  0x9f   : > { %3892 = vmatpush2.bf16.msra.mxu0 %v1390_v26  ;;  %v419_v26 = vld [vmem:[%s7175_s16 + $0x308] sm:$0xff] }
  0xa0   : > { %3933 = vmatpush2.bf16.msra.mxu1 %v1454_v27  ;;  %3893 = vmatprep.subr.bf16.mxu0 %v1387_v28  ;;  %v1482_v27 = vunpack.c.l.s8.bf16 %v390_v19  ;;  %v1546_v28 = vunpack.c.l.s8.bf16 %v422_v20  ;;  %v1543_v30 = vunpack.c.h.s8.bf16 %v419_v26  ;;  %v435_v19 = vld [vmem:[%s7175_s16 + $0x388] sm:$0xff]  ;;  %v7309_v20 = vld [vmem:[%s7193_s27 + $0x8] sm:$0xff] }
  0xa1   : > { %3934 = vmatprep.subr.bf16.mxu1 %v1451_v29  ;;  %v1479_v29 = vunpack.c.h.s8.bf16 %v387_v25 }
  0xa3   : > { %3894 = vmatpush2.bf16.msra.mxu0 %v1386_v33  ;;  %v1478_v33 = vunpack.c.h.s8.bf16 %v386_v31 }
  0xa4   : > { %3935 = vmatpush2.bf16.msra.mxu1 %v1450_v34  ;;  %3895 = vmatprep.subr.bf16.mxu0 %v1383_v35  ;;  %v1542_v34 = vunpack.c.h.s8.bf16 %v418_v32  ;;  %v1475_v35 = vunpack.c.l.s8.bf16 %v387_v25  ;;  %v402_v25 = vld [vmem:[%s7175_s16 + $0x280] sm:$0xff] }
  0xa5   : > { %3936 = vmatprep.subr.bf16.mxu1 %v1447_v36  ;;  %v1539_v36 = vunpack.c.l.s8.bf16 %v419_v26  ;;  %v434_v26 = vld [vmem:[%s7175_s16 + $0x380] sm:$0xff] }
  0xa7   : > { %3896 = vmatpush2.bf16.msra.mxu0 %v1382_v41  ;;  %v1474_v41 = vunpack.c.l.s8.bf16 %v386_v31  ;;  %v1571_v31 = vunpack.c.l.s8.bf16 %v435_v19 }
  0xa8   : > { %3937 = vmatpush2.bf16.msra.mxu1 %v1446_v42  ;;  %3897 = vmatprep.subr.bf16.mxu0 %v1379_v43  ;;  %v1538_v42 = vunpack.c.l.s8.bf16 %v418_v32  ;;  %v1535_v43 = vunpack.c.h.s8.bf16 %v415_v37  ;;  %v463_v32 = vld [vmem:[%s7175_s16 + $0x468] sm:$0xff] }
  0xa9   : > { %3938 = vmatprep.subr.bf16.mxu1 %v1443_v44  ;;  %v1599_v44 = vunpack.c.h.s8.bf16 %v447_v39 }
  0xab   : > { %3898 = vmatpush2.bf16.msra.mxu0 %v1378_v51  ;;  %v1598_v51 = vunpack.c.h.s8.bf16 %v446_v46 }
  0xac   : > { %3939 = vmatpush2.bf16.msra.mxu1 %v1442_v52  ;;  %3949 = vmatprep.subr.bf16.mxu0 %v1503_v53  ;;  %v1531_v52 = vunpack.c.l.s8.bf16 %v415_v37  ;;  %v1595_v53 = vunpack.c.l.s8.bf16 %v447_v39  ;;  %v1570_v37 = vunpack.c.l.s8.bf16 %v434_v26  ;;  %v1631_v39 = vunpack.c.h.s8.bf16 %v463_v32 }
  0xad   : > { %3990 = vmatprep.subr.bf16.mxu1 %v1567_v54  ;;  %v411_v54 = vld [vmem:[%s7175_s16 + $0x2c8] sm:$0xff] }
  0xae   : > { %3900 = vmatmul.mubr.bf16.vlgmr.msra.gmra.mxu0 %v7263_v48 }
  0xaf   : > { %3941 = vmatmul.mubr.bf16.vlgmr.msra.gmra.mxu1 %v7272_v59  ;;  %3950 = vmatpush1.bf16.msra.mxu0 %v1502_v50  ;;  %v1594_v50 = vunpack.c.l.s8.bf16 %v446_v46 }
  0xb0   : > { %3991 = vmatpush1.bf16.msra.mxu1 %v1566_v60  ;;  %3951 = vmatprep.subr.bf16.mxu0 %v1499_v61  ;;  %v1527_v60 = vunpack.c.h.s8.bf16 %v411_v54  ;;  %v1591_v61 = vunpack.c.h.s8.bf16 %v443_v55 }
  0xb1   : > { %3992 = vmatprep.subr.bf16.mxu1 %v1563_v62  ;;  %3981 = vmatprep.mubr.bf16.mxu0 %v7268_v57  ;;  %v410_v62 = vld [vmem:[%s7175_s16 + $0x2c0] sm:$0xff] }
  0xb2   : > { %4022 = vmatprep.mubr.bf16.mxu1 %v7278_v2  ;;  %v1526_v0 = vunpack.c.h.s8.bf16 %v410_v62  ;;  %v1522_v8 = vunpack.c.l.s8.bf16 %v410_v62  ;;  %v490_v62 = vld [vmem:[%s7175_s16 + $0x540] sm:$0xff] }
  0xb3   : > { %3952 = vmatpush1.bf16.msra.mxu0 %v1498_v3  ;;  %v1590_v3 = vunpack.c.h.s8.bf16 %v442_v63 }
  0xb4   : > { %3993 = vmatpush1.bf16.msra.mxu1 %v1562_v4  ;;  %3953 = vmatprep.subr.bf16.mxu0 %v1495_v5  ;;  %v1523_v4 = vunpack.c.l.s8.bf16 %v411_v54  ;;  %v1587_v5 = vunpack.c.l.s8.bf16 %v443_v55 }
  0xb5   : > { %3994 = vmatprep.subr.bf16.mxu1 %v1559_v6  ;;  %v407_v6 = vld [vmem:[%s7175_s16 + $0x2a8] sm:$0xff] }
  0xb7   : > { %3954 = vmatpush1.bf16.msra.mxu0 %v1494_v9  ;;  %v1586_v9 = vunpack.c.l.s8.bf16 %v442_v63 }
  0xb8   : > { %3995 = vmatpush1.bf16.msra.mxu1 %v1558_v10  ;;  %3955 = vmatprep.subr.bf16.mxu0 %v1491_v11  ;;  %v1519_v10 = vunpack.c.h.s8.bf16 %v407_v6  ;;  %v1583_v11 = vunpack.c.h.s8.bf16 %v439_v7 }
  0xb9   : > { %3996 = vmatprep.subr.bf16.mxu1 %v1555_v12  ;;  %v406_v12 = vld [vmem:[%s7175_s16 + $0x2a0] sm:$0xff] }
  0xba   : > { %v1518_v14 = vunpack.c.h.s8.bf16 %v406_v12 }
  0xbb   : > { %3956 = vmatpush1.bf16.msra.mxu0 %v1490_v15  ;;  %v1582_v15 = vunpack.c.h.s8.bf16 %v438_v13 }
  0xbc   : > { %3997 = vmatpush1.bf16.msra.mxu1 %v1554_v16  ;;  %3957 = vmatprep.subr.bf16.mxu0 %v1487_v17  ;;  %v1515_v16 = vunpack.c.l.s8.bf16 %v407_v6  ;;  %v1579_v17 = vunpack.c.l.s8.bf16 %v439_v7  ;;  %v487_v6 = vld [vmem:[%s7175_s16 + $0x528] sm:$0xff] }
  0xbd   : > { %3998 = vmatprep.subr.bf16.mxu1 %v1551_v18  ;;  %v403_v18 = vld [vmem:[%s7175_s16 + $0x288] sm:$0xff] }
  0xbf   : > { %3958 = vmatpush1.bf16.msra.mxu0 %v1486_v21  ;;  %v1514_v21 = vunpack.c.l.s8.bf16 %v406_v12  ;;  %v486_v12 = vld [vmem:[%s7175_s16 + $0x520] sm:$0xff] }
  0xc0   : > { %3999 = vmatpush1.bf16.msra.mxu1 %v1550_v22  ;;  %3959 = vmatprep.subr.bf16.mxu0 %v1483_v23  ;;  %v1578_v22 = vunpack.c.l.s8.bf16 %v438_v13  ;;  %v1511_v23 = vunpack.c.h.s8.bf16 %v403_v18 }
  0xc1   : > { %4000 = vmatprep.subr.bf16.mxu1 %v1547_v24  ;;  %v1575_v24 = vunpack.c.h.s8.bf16 %v435_v19 }
  0xc3   : > { %3960 = vmatpush1.bf16.msra.mxu0 %v1482_v27  ;;  %v7315_v27 = vrot.slane %v7309_v20, %v7219_v49 }
  0xc4   : > { %4001 = vmatpush1.bf16.msra.mxu1 %v1546_v28  ;;  %3961 = vmatprep.subr.bf16.mxu0 %v1479_v29  ;;  %v1510_v28 = vunpack.c.h.s8.bf16 %v402_v25  ;;  %v1574_v29 = vunpack.c.h.s8.bf16 %v434_v26 }
  0xc5   : > { %4002 = vmatprep.subr.bf16.mxu1 %v1543_v30  ;;  %v1507_v30 = vunpack.c.l.s8.bf16 %v403_v18  ;;  %v483_v18 = vld [vmem:[%s7175_s16 + $0x508] sm:$0xff] }
  0xc7   : > { %3962 = vmatpush1.bf16.msra.mxu0 %v1478_v33  ;;  %v495_v33 = vld [vmem:[%s7175_s16 + $0x568] sm:$0xff] }
  0xc8   : > { %4003 = vmatpush1.bf16.msra.mxu1 %v1542_v34  ;;  %3963 = vmatprep.subr.bf16.mxu0 %v1475_v35  ;;  %v3475_v34 = vcombine.high %v7315_v27, %v7315_v27  ;;  %v7323_v35 = vrot.slane %v7255_v40, %v7219_v49 }
  0xc9   : > { %4004 = vmatprep.subr.bf16.mxu1 %v1539_v36  ;;  %v1506_v36 = vunpack.c.l.s8.bf16 %v402_v25  ;;  %v482_v25 = vld [vmem:[%s7175_s16 + $0x500] sm:$0xff] }
  0xca   : > { %v7332_v45 = vcombine.high %v7323_v35, %v7323_v35 }
  0xcb   : > { %3964 = vmatpush1.bf16.msra.mxu0 %v1474_v41  ;;  %v1695_v41 = vunpack.c.h.s8.bf16 %v495_v33 }
  0xcc   : > { %4005 = vmatpush1.bf16.msra.mxu1 %v1538_v42  ;;  %3965 = vmatprep.subr.bf16.mxu0 %v1535_v43  ;;  %v462_v42 = vld [vmem:[%s7175_s16 + $0x460] sm:$0xff] }
  0xcd   : > { %4006 = vmatprep.subr.bf16.mxu1 %v1599_v44  ;;  %v494_v43 = vld [vmem:[%s7175_s16 + $0x560] sm:$0xff]  ;;  %v7328_v44 = vrot.slane %v3475_v34, %v7219_v49  ;;  %v1630_v40 = vunpack.c.h.s8.bf16 %v462_v42  ;;  %v1626_v55 = vunpack.c.l.s8.bf16 %v462_v42  ;;  %v1666_v34 = vunpack.c.l.s8.bf16 %v482_v25 }
  0xce   : > { %v1694_v46 = vunpack.c.h.s8.bf16 %v494_v43 }
  0xcf   : > { %3966 = vmatpush2.bf16.msra.mxu0 %v1534_v47  ;;  %v1627_v47 = vunpack.c.l.s8.bf16 %v463_v32  ;;  %v7338_v54 = vcombine.high %v7328_v44, %v7328_v44  ;;  %v511_v32 = vld [vmem:[%s7175_s16 + $0x5e8] sm:$0xff] }
  0xd0   : > { %4007 = vmatpush2.bf16.msra.mxu1 %v1598_v51  ;;  %3967 = vmatprep.subr.bf16.mxu0 %v1531_v52  ;;  %v1691_v51 = vunpack.c.l.s8.bf16 %v495_v33  ;;  %v459_v52 = vld [vmem:[%s7175_s16 + $0x448] sm:$0xff] }
  0xd1   : > { %4008 = vmatprep.subr.bf16.mxu1 %v1595_v53  ;;  %v491_v53 = vld [vmem:[%s7175_s16 + $0x548] sm:$0xff] }
  0xd3   : > { %3968 = vmatpush2.bf16.msra.mxu0 %v1530_v56  ;;  %v1690_v56 = vunpack.c.l.s8.bf16 %v494_v43 }
  0xd4   : > { %4009 = vmatpush2.bf16.msra.mxu1 %v1594_v50  ;;  %3969 = vmatprep.subr.bf16.mxu0 %v1527_v60  ;;  %v1623_v50 = vunpack.c.h.s8.bf16 %v459_v52  ;;  %v1687_v60 = vunpack.c.h.s8.bf16 %v491_v53 }
  0xd5   : > { %4010 = vmatprep.subr.bf16.mxu1 %v1591_v61  ;;  %v458_v61 = vld [vmem:[%s7175_s16 + $0x440] sm:$0xff] }
  0xd6   : > { %v1622_v63 = vunpack.c.h.s8.bf16 %v458_v61  ;;  %v1618_v7 = vunpack.c.l.s8.bf16 %v458_v61 }
  0xd7   : > { %3970 = vmatpush2.bf16.msra.mxu0 %v1526_v0  ;;  %v1686_v0 = vunpack.c.h.s8.bf16 %v490_v62 }
  0xd8   : > { %4011 = vmatpush2.bf16.msra.mxu1 %v1590_v3  ;;  %3971 = vmatprep.subr.bf16.mxu0 %v1523_v4  ;;  %v1619_v3 = vunpack.c.l.s8.bf16 %v459_v52  ;;  %v1683_v4 = vunpack.c.l.s8.bf16 %v491_v53 }
  0xd9   : > { %4012 = vmatprep.subr.bf16.mxu1 %v1587_v5  ;;  %v455_v5 = vld [vmem:[%s7175_s16 + $0x428] sm:$0xff] }
  0xdb   : > { %3972 = vmatpush2.bf16.msra.mxu0 %v1522_v8  ;;  %v1682_v8 = vunpack.c.l.s8.bf16 %v490_v62 }
  0xdc   : > { %4013 = vmatpush2.bf16.msra.mxu1 %v1586_v9  ;;  %3973 = vmatprep.subr.bf16.mxu0 %v1519_v10  ;;  %v1615_v9 = vunpack.c.h.s8.bf16 %v455_v5  ;;  %v1679_v10 = vunpack.c.h.s8.bf16 %v487_v6 }
  0xdd   : > { %4014 = vmatprep.subr.bf16.mxu1 %v1583_v11  ;;  %v454_v11 = vld [vmem:[%s7175_s16 + $0x420] sm:$0xff] }
  0xde   : > { %v1614_v13 = vunpack.c.h.s8.bf16 %v454_v11  ;;  %v1610_v19 = vunpack.c.l.s8.bf16 %v454_v11 }
  0xdf   : > { %3974 = vmatpush2.bf16.msra.mxu0 %v1518_v14  ;;  %v1678_v14 = vunpack.c.h.s8.bf16 %v486_v12 }
  0xe0   : > { %4015 = vmatpush2.bf16.msra.mxu1 %v1582_v15  ;;  %3975 = vmatprep.subr.bf16.mxu0 %v1515_v16  ;;  %v1611_v15 = vunpack.c.l.s8.bf16 %v455_v5  ;;  %v1675_v16 = vunpack.c.l.s8.bf16 %v487_v6 }
  0xe1   : > { %4016 = vmatprep.subr.bf16.mxu1 %v1579_v17  ;;  %v451_v17 = vld [vmem:[%s7175_s16 + $0x408] sm:$0xff] }
  0xe3   : > { %3976 = vmatpush2.bf16.msra.mxu0 %v1514_v21  ;;  %v1674_v21 = vunpack.c.l.s8.bf16 %v486_v12 }
  0xe4   : > { %4017 = vmatpush2.bf16.msra.mxu1 %v1578_v22  ;;  %3977 = vmatprep.subr.bf16.mxu0 %v1511_v23  ;;  %v1607_v22 = vunpack.c.h.s8.bf16 %v451_v17  ;;  %v1671_v23 = vunpack.c.h.s8.bf16 %v483_v18 }
  0xe5   : > { %4018 = vmatprep.subr.bf16.mxu1 %v1575_v24  ;;  %v450_v24 = vld [vmem:[%s7175_s16 + $0x400] sm:$0xff] }
  0xe6   : > { %v1606_v26 = vunpack.c.h.s8.bf16 %v450_v24  ;;  %v1602_v33 = vunpack.c.l.s8.bf16 %v450_v24  ;;  %v498_v24 = vld [vmem:[%s7175_s16 + $0x580] sm:$0xff] }
  0xe7   : > { %3978 = vmatpush2.bf16.msra.mxu0 %v1510_v28  ;;  %v1670_v28 = vunpack.c.h.s8.bf16 %v482_v25 }
  0xe8   : > { %4019 = vmatpush2.bf16.msra.mxu1 %v1574_v29  ;;  %3979 = vmatprep.subr.bf16.mxu0 %v1507_v30  ;;  %v1603_v29 = vunpack.c.l.s8.bf16 %v451_v17  ;;  %v1667_v30 = vunpack.c.l.s8.bf16 %v483_v18  ;;  %v3460_v17 = vcombine.high %v7309_v20, %v7309_v20 }
  0xe9   : > { %4020 = vmatprep.subr.bf16.mxu1 %v1571_v31  ;;  %v479_v31 = vld [vmem:[%s7175_s16 + $0x4e8] sm:$0xff] }
  0xea   : > { %v7373_v25 = vrot.slane %v3460_v17, %v7219_v49 }
  0xeb   : > { %3980 = vmatpush2.bf16.msra.mxu0 %v1506_v36  ;;  %v1663_v36 = vunpack.c.h.s8.bf16 %v479_v31 }
  0xec   : > { %4021 = vmatpush2.bf16.msra.mxu1 %v1570_v37  ;;  %4031 = vmatprep.subr.bf16.mxu0 %v1631_v39  ;;  %v1727_v37 = vunpack.c.h.s8.bf16 %v511_v32  ;;  %v478_v39 = vld [vmem:[%s7175_s16 + $0x4e0] sm:$0xff] }
  0xed   : > { %4072 = vmatprep.subr.bf16.mxu1 %v1695_v41  ;;  %v510_v41 = vld [vmem:[%s7175_s16 + $0x5e0] sm:$0xff]  ;;  %v1662_v42 = vunpack.c.h.s8.bf16 %v478_v39  ;;  %v1658_v52 = vunpack.c.l.s8.bf16 %v478_v39 }
  0xee   : > { %3982 = vmatmul.mubr.bf16.vlgmr.msra.gmra.mxu0 %v7323_v35  ;;  %v1726_v43 = vunpack.c.h.s8.bf16 %v510_v41  ;;  %v1722_v53 = vunpack.c.l.s8.bf16 %v510_v41  ;;  %v526_v41 = vld [vmem:[%s7175_s16 + $0x660] sm:$0xff] }
  0xef   : > { %4023 = vmatmul.mubr.bf16.vlgmr.msra.gmra.mxu1 %v7332_v45  ;;  %4032 = vmatpush1.bf16.msra.mxu0 %v1630_v40  ;;  %v1659_v40 = vunpack.c.l.s8.bf16 %v479_v31  ;;  %v559_v31 = vld [vmem:[%s7175_s16 + $0x768] sm:$0xff] }
  0xf0   : > { %4073 = vmatpush1.bf16.msra.mxu1 %v1694_v46  ;;  %4033 = vmatprep.subr.bf16.mxu0 %v1627_v47  ;;  %v1723_v46 = vunpack.c.l.s8.bf16 %v511_v32  ;;  %v475_v47 = vld [vmem:[%s7175_s16 + $0x4c8] sm:$0xff]  ;;  %v3476_v32 = vcombine.high %v7373_v25, %v7373_v25  ;;  %v1823_v39 = vunpack.c.h.s8.bf16 %v559_v31 }
  0xf1   : > { %4074 = vmatprep.subr.bf16.mxu1 %v1691_v51  ;;  %4063 = vmatprep.mubr.bf16.mxu0 %v7328_v44  ;;  %v507_v51 = vld [vmem:[%s7175_s16 + $0x5c8] sm:$0xff] }
  0xf2   : > { %4104 = vmatprep.mubr.bf16.mxu1 %v7338_v54 }
  0xf3   : > { %4034 = vmatpush1.bf16.msra.mxu0 %v1626_v55  ;;  %v1655_v55 = vunpack.c.h.s8.bf16 %v475_v47 }
  0xf4   : > { %4075 = vmatpush1.bf16.msra.mxu1 %v1690_v56  ;;  %4035 = vmatprep.subr.bf16.mxu0 %v1623_v50  ;;  %v1719_v56 = vunpack.c.h.s8.bf16 %v507_v51  ;;  %v474_v50 = vld [vmem:[%s7175_s16 + $0x4c0] sm:$0xff] }
  0xf5   : > { %4076 = vmatprep.subr.bf16.mxu1 %v1687_v60  ;;  %v506_v60 = vld [vmem:[%s7175_s16 + $0x5c0] sm:$0xff]  ;;  %v1654_v61 = vunpack.c.h.s8.bf16 %v474_v50  ;;  %v1650_v5 = vunpack.c.l.s8.bf16 %v474_v50 }
  0xf6   : > { %v1718_v62 = vunpack.c.h.s8.bf16 %v506_v60  ;;  %v1714_v6 = vunpack.c.l.s8.bf16 %v506_v60 }
  0xf7   : > { %4036 = vmatpush1.bf16.msra.mxu0 %v1622_v63  ;;  %v1651_v63 = vunpack.c.l.s8.bf16 %v475_v47 }
  0xf8   : > { %4077 = vmatpush1.bf16.msra.mxu1 %v1686_v0  ;;  %4037 = vmatprep.subr.bf16.mxu0 %v1619_v3  ;;  %v1715_v0 = vunpack.c.l.s8.bf16 %v507_v51  ;;  %v471_v3 = vld [vmem:[%s7175_s16 + $0x4a8] sm:$0xff]  ;;  %v1819_v51 = vunpack.c.l.s8.bf16 %v559_v31 }
  0xf9   : > { %4078 = vmatprep.subr.bf16.mxu1 %v1683_v4  ;;  %v503_v4 = vld [vmem:[%s7175_s16 + $0x5a8] sm:$0xff] }
  0xfb   : > { %4038 = vmatpush1.bf16.msra.mxu0 %v1618_v7  ;;  %v1647_v7 = vunpack.c.h.s8.bf16 %v471_v3 }
  0xfc   : > { %4079 = vmatpush1.bf16.msra.mxu1 %v1682_v8  ;;  %4039 = vmatprep.subr.bf16.mxu0 %v1615_v9  ;;  %v1711_v8 = vunpack.c.h.s8.bf16 %v503_v4  ;;  %v470_v9 = vld [vmem:[%s7175_s16 + $0x4a0] sm:$0xff] }
  0xfd   : > { %4080 = vmatprep.subr.bf16.mxu1 %v1679_v10  ;;  %v502_v10 = vld [vmem:[%s7175_s16 + $0x5a0] sm:$0xff]  ;;  %v1646_v11 = vunpack.c.h.s8.bf16 %v470_v9  ;;  %v1642_v18 = vunpack.c.l.s8.bf16 %v470_v9 }
  0xfe   : > { %v1710_v12 = vunpack.c.h.s8.bf16 %v502_v10 }
  0xff   : > { %4040 = vmatpush1.bf16.msra.mxu0 %v1614_v13  ;;  %v1643_v13 = vunpack.c.l.s8.bf16 %v471_v3 }
 0x100   : > { %4081 = vmatpush1.bf16.msra.mxu1 %v1678_v14  ;;  %4041 = vmatprep.subr.bf16.mxu0 %v1611_v15  ;;  %v1707_v14 = vunpack.c.l.s8.bf16 %v503_v4  ;;  %v467_v15 = vld [vmem:[%s7175_s16 + $0x488] sm:$0xff] }
 0x101   : > { %4082 = vmatprep.subr.bf16.mxu1 %v1675_v16  ;;  %v499_v16 = vld [vmem:[%s7175_s16 + $0x588] sm:$0xff]  ;;  %v1635_v20 = vunpack.c.l.s8.bf16 %v467_v15 }
 0x103   : > { %4042 = vmatpush1.bf16.msra.mxu0 %v1610_v19  ;;  %v1706_v19 = vunpack.c.l.s8.bf16 %v502_v10 }
 0x104   : > { %4083 = vmatpush1.bf16.msra.mxu1 %v1674_v21  ;;  %4043 = vmatprep.subr.bf16.mxu0 %v1607_v22  ;;  %v1639_v21 = vunpack.c.h.s8.bf16 %v467_v15  ;;  %v1703_v22 = vunpack.c.h.s8.bf16 %v499_v16 }
 0x105   : > { %4084 = vmatprep.subr.bf16.mxu1 %v1671_v23  ;;  %v466_v23 = vld [vmem:[%s7175_s16 + $0x480] sm:$0xff] }
 0x107   : > { %4044 = vmatpush1.bf16.msra.mxu0 %v1606_v26  ;;  %v1638_v26 = vunpack.c.h.s8.bf16 %v466_v23 }
 0x108   : > { %4085 = vmatpush1.bf16.msra.mxu1 %v1670_v28  ;;  %4045 = vmatprep.subr.bf16.mxu0 %v1603_v29  ;;  %v1702_v28 = vunpack.c.h.s8.bf16 %v498_v24  ;;  %v1699_v29 = vunpack.c.l.s8.bf16 %v499_v16 }
 0x109   : > { %4086 = vmatprep.subr.bf16.mxu1 %v1667_v30  ;;  %v527_v30 = vld [vmem:[%s7175_s16 + $0x668] sm:$0xff] }
 0x10a   : > { %v1755_v47 = vunpack.c.l.s8.bf16 %v527_v30 }
 0x10b   : > { %4046 = vmatpush1.bf16.msra.mxu0 %v1602_v33  ;;  %v7381_v33 = vrot.slane %v7315_v27, %v7219_v49  ;;  %v1758_v27 = vunpack.c.h.s8.bf16 %v526_v41 }
 0x10c   : > { %4087 = vmatpush1.bf16.msra.mxu1 %v1666_v34  ;;  %4047 = vmatprep.subr.bf16.mxu0 %v1663_v36  ;;  %v1634_v34 = vunpack.c.l.s8.bf16 %v466_v23  ;;  %v1698_v36 = vunpack.c.l.s8.bf16 %v498_v24 }
 0x10d   : > { %4088 = vmatprep.subr.bf16.mxu1 %v1727_v37  ;;  %v1759_v37 = vunpack.c.h.s8.bf16 %v527_v30 }
 0x10f   : > { %4048 = vmatpush2.bf16.msra.mxu0 %v1662_v42  ;;  %v558_v42 = vld [vmem:[%s7175_s16 + $0x760] sm:$0xff] }
 0x110   : > { %4089 = vmatpush2.bf16.msra.mxu1 %v1726_v43  ;;  %4049 = vmatprep.subr.bf16.mxu0 %v1659_v40  ;;  %v7386_v43 = vrot.slane %v3476_v32, %v7219_v49  ;;  %v7390_v40 = vcombine.high %v7381_v33, %v7381_v33  ;;  %v1818_v50 = vunpack.c.l.s8.bf16 %v558_v42  ;;  %v543_v32 = vld [vmem:[%s7175_s16 + $0x6e8] sm:$0xff] }
 0x111   : > { %4090 = vmatprep.subr.bf16.mxu1 %v1723_v46  ;;  %v1822_v46 = vunpack.c.h.s8.bf16 %v558_v42  ;;  %v542_v42 = vld [vmem:[%s7175_s16 + $0x6e0] sm:$0xff] }
 0x113   : > { %4050 = vmatpush2.bf16.msra.mxu0 %v1658_v52  ;;  %v523_v52 = vld [vmem:[%s7175_s16 + $0x648] sm:$0xff] }
 0x114   : > { %4091 = vmatpush2.bf16.msra.mxu1 %v1722_v53  ;;  %4051 = vmatprep.subr.bf16.mxu0 %v1655_v55  ;;  %v555_v53 = vld [vmem:[%s7175_s16 + $0x748] sm:$0xff]  ;;  %v7396_v55 = vcombine.high %v7386_v43, %v7386_v43  ;;  %v1751_v60 = vunpack.c.h.s8.bf16 %v523_v52  ;;  %v1747_v4 = vunpack.c.l.s8.bf16 %v523_v52 }
 0x115   : > { %4092 = vmatprep.subr.bf16.mxu1 %v1719_v56  ;;  %v1754_v56 = vunpack.c.l.s8.bf16 %v526_v41 }
 0x117   : > { %4052 = vmatpush2.bf16.msra.mxu0 %v1654_v61  ;;  %v1815_v61 = vunpack.c.h.s8.bf16 %v555_v53 }
 0x118   : > { %4093 = vmatpush2.bf16.msra.mxu1 %v1718_v62  ;;  %4053 = vmatprep.subr.bf16.mxu0 %v1651_v63  ;;  %v522_v62 = vld [vmem:[%s7175_s16 + $0x640] sm:$0xff] }
 0x119   : > { %4094 = vmatprep.subr.bf16.mxu1 %v1715_v0  ;;  %v554_v63 = vld [vmem:[%s7175_s16 + $0x740] sm:$0xff]  ;;  %v1750_v0 = vunpack.c.h.s8.bf16 %v522_v62 }
 0x11a   : > { %v1814_v3 = vunpack.c.h.s8.bf16 %v554_v63  ;;  %v1810_v9 = vunpack.c.l.s8.bf16 %v554_v63  ;;  %v538_v63 = vld [vmem:[%s7175_s16 + $0x6c0] sm:$0xff] }
 0x11b   : > { %4054 = vmatpush2.bf16.msra.mxu0 %v1650_v5  ;;  %v1811_v5 = vunpack.c.l.s8.bf16 %v555_v53  ;;  %v539_v53 = vld [vmem:[%s7175_s16 + $0x6c8] sm:$0xff] }
 0x11c   : > { %4095 = vmatpush2.bf16.msra.mxu1 %v1714_v6  ;;  %4055 = vmatprep.subr.bf16.mxu0 %v1647_v7  ;;  %v519_v6 = vld [vmem:[%s7175_s16 + $0x628] sm:$0xff] }
 0x11d   : > { %4096 = vmatprep.subr.bf16.mxu1 %v1711_v8  ;;  %v551_v7 = vld [vmem:[%s7175_s16 + $0x728] sm:$0xff]  ;;  %v1746_v8 = vunpack.c.l.s8.bf16 %v522_v62  ;;  %v1743_v10 = vunpack.c.h.s8.bf16 %v519_v6  ;;  %v1739_v16 = vunpack.c.l.s8.bf16 %v519_v6 }
 0x11e   : > { %v1803_v17 = vunpack.c.l.s8.bf16 %v551_v7 }
 0x11f   : > { %4056 = vmatpush2.bf16.msra.mxu0 %v1646_v11  ;;  %v1807_v11 = vunpack.c.h.s8.bf16 %v551_v7  ;;  %v535_v7 = vld [vmem:[%s7175_s16 + $0x6a8] sm:$0xff] }
 0x120   : > { %4097 = vmatpush2.bf16.msra.mxu1 %v1710_v12  ;;  %4057 = vmatprep.subr.bf16.mxu0 %v1643_v13  ;;  %v518_v12 = vld [vmem:[%s7175_s16 + $0x620] sm:$0xff] }
 0x121   : > { %4098 = vmatprep.subr.bf16.mxu1 %v1707_v14  ;;  %v550_v13 = vld [vmem:[%s7175_s16 + $0x720] sm:$0xff]  ;;  %v1742_v14 = vunpack.c.h.s8.bf16 %v518_v12 }
 0x122   : > { %v1806_v15 = vunpack.c.h.s8.bf16 %v550_v13 }
 0x123   : > { %4058 = vmatpush2.bf16.msra.mxu0 %v1642_v18  ;;  %v515_v18 = vld [vmem:[%s7175_s16 + $0x608] sm:$0xff] }
 0x124   : > { %4099 = vmatpush2.bf16.msra.mxu1 %v1706_v19  ;;  %4059 = vmatprep.subr.bf16.mxu0 %v1639_v21  ;;  %v547_v19 = vld [vmem:[%s7175_s16 + $0x708] sm:$0xff]  ;;  %v1738_v21 = vunpack.c.l.s8.bf16 %v518_v12  ;;  %v1735_v23 = vunpack.c.h.s8.bf16 %v515_v18  ;;  %v1731_v30 = vunpack.c.l.s8.bf16 %v515_v18 }
 0x125   : > { %4100 = vmatprep.subr.bf16.mxu1 %v1703_v22  ;;  %v1802_v22 = vunpack.c.l.s8.bf16 %v550_v13  ;;  %v1799_v24 = vunpack.c.h.s8.bf16 %v547_v19  ;;  %v1795_v31 = vunpack.c.l.s8.bf16 %v547_v19  ;;  %v534_v13 = vld [vmem:[%s7175_s16 + $0x6a0] sm:$0xff]  ;;  %v531_v19 = vld [vmem:[%s7175_s16 + $0x688] sm:$0xff] }
 0x127   : > { %4060 = vmatpush2.bf16.msra.mxu0 %v1638_v26  ;;  %v514_v26 = vld [vmem:[%s7175_s16 + $0x600] sm:$0xff] }
 0x128   : > { %4101 = vmatpush2.bf16.msra.mxu1 %v1702_v28  ;;  %4061 = vmatprep.subr.bf16.mxu0 %v1635_v20  ;;  %v546_v28 = vld [vmem:[%s7175_s16 + $0x700] sm:$0xff]  ;;  %v1734_v20 = vunpack.c.h.s8.bf16 %v514_v26 }
 0x129   : > { %4102 = vmatprep.subr.bf16.mxu1 %v1699_v29  ;;  %v1798_v29 = vunpack.c.h.s8.bf16 %v546_v28 }
 0x12b   : > { %4062 = vmatpush2.bf16.msra.mxu0 %v1634_v34  ;;  %v575_v34 = vld [vmem:[%s7175_s16 + $0x7e8] sm:$0xff] }
 0x12c   : > { %4103 = vmatpush2.bf16.msra.mxu1 %v1698_v36  ;;  %4113 = vmatprep.subr.bf16.mxu0 %v1759_v37  ;;  %v1730_v36 = vunpack.c.l.s8.bf16 %v514_v26  ;;  %v1794_v37 = vunpack.c.l.s8.bf16 %v546_v28  ;;  %v1855_v41 = vunpack.c.h.s8.bf16 %v575_v34  ;;  %v1851_v52 = vunpack.c.l.s8.bf16 %v575_v34 }
 0x12d   : > { %4154 = vmatprep.subr.bf16.mxu1 %v1823_v39  ;;  %v1791_v39 = vunpack.c.h.s8.bf16 %v543_v32  ;;  %v1767_v26 = vunpack.c.h.s8.bf16 %v531_v19  ;;  %v1763_v34 = vunpack.c.l.s8.bf16 %v531_v19 }
 0x12e   : > { %4064 = vmatmul.mubr.bf16.vlgmr.msra.gmra.mxu0 %v7381_v33 }
 0x12f   : > { %4105 = vmatmul.mubr.bf16.vlgmr.msra.gmra.mxu1 %v7390_v40  ;;  %4114 = vmatpush1.bf16.msra.mxu0 %v1758_v27  ;;  %v574_v27 = vld [vmem:[%s7175_s16 + $0x7e0] sm:$0xff] }
 0x130   : > { %4155 = vmatpush1.bf16.msra.mxu1 %v1822_v46  ;;  %4115 = vmatprep.subr.bf16.mxu0 %v1755_v47  ;;  %v1790_v46 = vunpack.c.h.s8.bf16 %v542_v42  ;;  %v1854_v47 = vunpack.c.h.s8.bf16 %v574_v27 }
 0x131   : > { %4156 = vmatprep.subr.bf16.mxu1 %v1819_v51  ;;  %4145 = vmatprep.mubr.bf16.mxu0 %v7386_v43  ;;  %v1787_v51 = vunpack.c.l.s8.bf16 %v543_v32 }
 0x132   : > { %4186 = vmatprep.mubr.bf16.mxu1 %v7396_v55 }
 0x133   : > { %4116 = vmatpush1.bf16.msra.mxu0 %v1754_v56  ;;  %v571_v56 = vld [vmem:[%s7175_s16 + $0x7c8] sm:$0xff] }
 0x134   : > { %4157 = vmatpush1.bf16.msra.mxu1 %v1818_v50  ;;  %4117 = vmatprep.subr.bf16.mxu0 %v1751_v60  ;;  %v1786_v50 = vunpack.c.l.s8.bf16 %v542_v42  ;;  %v1850_v60 = vunpack.c.l.s8.bf16 %v574_v27  ;;  %v1847_v62 = vunpack.c.h.s8.bf16 %v571_v56  ;;  %v1843_v6 = vunpack.c.l.s8.bf16 %v571_v56 }
 0x135   : > { %4158 = vmatprep.subr.bf16.mxu1 %v1815_v61  ;;  %v1783_v61 = vunpack.c.h.s8.bf16 %v539_v53  ;;  %v7441_v42 = vrot.slane %v7373_v25, %v7219_v49 }
 0x137   : > { %4118 = vmatpush1.bf16.msra.mxu0 %v1750_v0  ;;  %v570_v0 = vld [vmem:[%s7175_s16 + $0x7c0] sm:$0xff] }
 0x138   : > { %4159 = vmatpush1.bf16.msra.mxu1 %v1814_v3  ;;  %4119 = vmatprep.subr.bf16.mxu0 %v1747_v4  ;;  %v1782_v3 = vunpack.c.h.s8.bf16 %v538_v63  ;;  %v1846_v4 = vunpack.c.h.s8.bf16 %v570_v0 }
 0x139   : > { %4160 = vmatprep.subr.bf16.mxu1 %v1811_v5  ;;  %v1779_v5 = vunpack.c.l.s8.bf16 %v539_v53  ;;  %v622_v53 = vld [vmem:[%s7175_s16 + $0x960] sm:$0xff] }
 0x13b   : > { %4120 = vmatpush1.bf16.msra.mxu0 %v1746_v8  ;;  %v567_v8 = vld [vmem:[%s7175_s16 + $0x7a8] sm:$0xff] }
 0x13c   : > { %4161 = vmatpush1.bf16.msra.mxu1 %v1810_v9  ;;  %4121 = vmatprep.subr.bf16.mxu0 %v1743_v10  ;;  %v1778_v9 = vunpack.c.l.s8.bf16 %v538_v63  ;;  %v1842_v10 = vunpack.c.l.s8.bf16 %v570_v0  ;;  %v1839_v12 = vunpack.c.h.s8.bf16 %v567_v8  ;;  %v1835_v18 = vunpack.c.l.s8.bf16 %v567_v8  ;;  %v587_v63 = vld [vmem:[%s7175_s16 + $0x848] sm:$0xff] }
 0x13d   : > { %4162 = vmatprep.subr.bf16.mxu1 %v1807_v11  ;;  %v1775_v11 = vunpack.c.h.s8.bf16 %v535_v7  ;;  %v619_v0 = vld [vmem:[%s7175_s16 + $0x948] sm:$0xff]  ;;  %v1946_v8 = vunpack.c.l.s8.bf16 %v622_v53 }
 0x13f   : > { %4122 = vmatpush1.bf16.msra.mxu0 %v1742_v14  ;;  %v566_v14 = vld [vmem:[%s7175_s16 + $0x7a0] sm:$0xff] }
 0x140   : > { %4163 = vmatpush1.bf16.msra.mxu1 %v1806_v15  ;;  %4123 = vmatprep.subr.bf16.mxu0 %v1739_v16  ;;  %v1774_v15 = vunpack.c.h.s8.bf16 %v534_v13  ;;  %v1838_v16 = vunpack.c.h.s8.bf16 %v566_v14 }
 0x141   : > { %4164 = vmatprep.subr.bf16.mxu1 %v1803_v17  ;;  %v1771_v17 = vunpack.c.l.s8.bf16 %v535_v7 }
 0x143   : > { %4124 = vmatpush1.bf16.msra.mxu0 %v1738_v21  ;;  %v563_v21 = vld [vmem:[%s7175_s16 + $0x788] sm:$0xff] }
 0x144   : > { %4165 = vmatpush1.bf16.msra.mxu1 %v1802_v22  ;;  %4125 = vmatprep.subr.bf16.mxu0 %v1735_v23  ;;  %v7427_v22 = vld [vmem:[%s7193_s27 + $0x10] sm:$0xff]  ;;  %v1770_v23 = vunpack.c.l.s8.bf16 %v534_v13  ;;  %v1831_v28 = vunpack.c.h.s8.bf16 %v563_v21  ;;  %v586_v13 = vld [vmem:[%s7175_s16 + $0x840] sm:$0xff] }
 0x145   : > { %4166 = vmatprep.subr.bf16.mxu1 %v1799_v24  ;;  %v1834_v24 = vunpack.c.l.s8.bf16 %v566_v14  ;;  %v618_v14 = vld [vmem:[%s7175_s16 + $0x940] sm:$0xff] }
 0x146   : > { %v1942_v19 = vunpack.c.h.s8.bf16 %v618_v14 }
 0x147   : > { %4126 = vmatpush1.bf16.msra.mxu0 %v1734_v20  ;;  %v530_v20 = vld [vmem:[%s7175_s16 + $0x680] sm:$0xff] }
 0x148   : > { %4167 = vmatpush1.bf16.msra.mxu1 %v1798_v29  ;;  %4127 = vmatprep.subr.bf16.mxu0 %v1731_v30  ;;  %v562_v29 = vld [vmem:[%s7175_s16 + $0x780] sm:$0xff]  ;;  %v7433_v30 = vrot.slane %v7427_v22, %v7219_v49  ;;  %v1762_v27 = vunpack.c.l.s8.bf16 %v530_v20 }
 0x149   : > { %4168 = vmatprep.subr.bf16.mxu1 %v1795_v31  ;;  %v1766_v31 = vunpack.c.h.s8.bf16 %v530_v20  ;;  %v1830_v32 = vunpack.c.h.s8.bf16 %v562_v29  ;;  %v615_v20 = vld [vmem:[%s7175_s16 + $0x928] sm:$0xff] }
 0x14b   : > { %4128 = vmatpush1.bf16.msra.mxu0 %v1730_v36  ;;  %v1827_v36 = vunpack.c.l.s8.bf16 %v563_v21 }
 0x14c   : > { %4169 = vmatpush1.bf16.msra.mxu1 %v1794_v37  ;;  %4129 = vmatprep.subr.bf16.mxu0 %v1791_v39  ;;  %v591_v37 = vld [vmem:[%s7175_s16 + $0x868] sm:$0xff] }
 0x14d   : > { %4170 = vmatprep.subr.bf16.mxu1 %v1855_v41  ;;  %v623_v39 = vld [vmem:[%s7175_s16 + $0x968] sm:$0xff]  ;;  %v3524_v41 = vcombine.high %v7433_v30, %v7433_v30 }
 0x14f   : > { %4130 = vmatpush2.bf16.msra.mxu0 %v1790_v46  ;;  %v1826_v46 = vunpack.c.l.s8.bf16 %v562_v29  ;;  %v7446_v56 = vrot.slane %v3524_v41, %v7219_v49  ;;  %v1874_v29 = vunpack.c.l.s8.bf16 %v586_v13 }
 0x150   : > { %4171 = vmatpush2.bf16.msra.mxu1 %v1854_v47  ;;  %4131 = vmatprep.subr.bf16.mxu0 %v1787_v51  ;;  %v1887_v47 = vunpack.c.h.s8.bf16 %v591_v37  ;;  %v1951_v51 = vunpack.c.h.s8.bf16 %v623_v39 }
 0x151   : > { %4172 = vmatprep.subr.bf16.mxu1 %v1851_v52  ;;  %v590_v52 = vld [vmem:[%s7175_s16 + $0x860] sm:$0xff] }
 0x152   : > { %v1886_v25 = vunpack.c.h.s8.bf16 %v590_v52  ;;  %v1882_v7 = vunpack.c.l.s8.bf16 %v590_v52 }
 0x153   : > { %4132 = vmatpush2.bf16.msra.mxu0 %v1786_v50  ;;  %v7450_v50 = vcombine.high %v7441_v42, %v7441_v42 }
 0x154   : > { %4173 = vmatpush2.bf16.msra.mxu1 %v1850_v60  ;;  %4133 = vmatprep.subr.bf16.mxu0 %v1783_v61  ;;  %v1950_v60 = vunpack.c.h.s8.bf16 %v622_v53  ;;  %v1883_v61 = vunpack.c.l.s8.bf16 %v591_v37  ;;  %v614_v37 = vld [vmem:[%s7175_s16 + $0x920] sm:$0xff] }
 0x155   : > { %4174 = vmatprep.subr.bf16.mxu1 %v1847_v62  ;;  %v1947_v62 = vunpack.c.l.s8.bf16 %v623_v39  ;;  %v1934_v41 = vunpack.c.h.s8.bf16 %v614_v37  ;;  %v1930_v53 = vunpack.c.l.s8.bf16 %v614_v37 }
 0x157   : > { %4134 = vmatpush2.bf16.msra.mxu0 %v1782_v3  ;;  %v7456_v3 = vcombine.high %v7446_v56, %v7446_v56 }
 0x158   : > { %4175 = vmatpush2.bf16.msra.mxu1 %v1846_v4  ;;  %4135 = vmatprep.subr.bf16.mxu0 %v1779_v5 }
 0x159   : > { %4176 = vmatprep.subr.bf16.mxu1 %v1843_v6 }
 0x15b   : > { %4136 = vmatpush2.bf16.msra.mxu0 %v1778_v9 }
 0x15c   : > { %4177 = vmatpush2.bf16.msra.mxu1 %v1842_v10  ;;  %4137 = vmatprep.subr.bf16.mxu0 %v1775_v11  ;;  %v1879_v11 = vunpack.c.h.s8.bf16 %v587_v63 }
 0x15d   : > { %4178 = vmatprep.subr.bf16.mxu1 %v1839_v12  ;;  %v1943_v12 = vunpack.c.h.s8.bf16 %v619_v0 }
 0x15f   : > { %4138 = vmatpush2.bf16.msra.mxu0 %v1774_v15 }
 0x160   : > { %4179 = vmatpush2.bf16.msra.mxu1 %v1838_v16  ;;  %4139 = vmatprep.subr.bf16.mxu0 %v1771_v17 }
 0x161   : > { %4180 = vmatprep.subr.bf16.mxu1 %v1835_v18  ;;  %v1878_v18 = vunpack.c.h.s8.bf16 %v586_v13  ;;  %v606_v13 = vld [vmem:[%s7175_s16 + $0x8e0] sm:$0xff] }
 0x163   : > { %4140 = vmatpush2.bf16.msra.mxu0 %v1770_v23 }
 0x164   : > { %4181 = vmatpush2.bf16.msra.mxu1 %v1834_v24  ;;  %4141 = vmatprep.subr.bf16.mxu0 %v1767_v26  ;;  %v1875_v24 = vunpack.c.l.s8.bf16 %v587_v63  ;;  %v1939_v26 = vunpack.c.l.s8.bf16 %v619_v0 }
 0x165   : > { %4182 = vmatprep.subr.bf16.mxu1 %v1831_v28  ;;  %v583_v28 = vld [vmem:[%s7175_s16 + $0x828] sm:$0xff] }
 0x167   : > { %4142 = vmatpush2.bf16.msra.mxu0 %v1766_v31  ;;  %v1938_v31 = vunpack.c.l.s8.bf16 %v618_v14  ;;  %v638_v14 = vld [vmem:[%s7175_s16 + $0x9e0] sm:$0xff] }
 0x168   : > { %4183 = vmatpush2.bf16.msra.mxu1 %v1830_v32  ;;  %4143 = vmatprep.subr.bf16.mxu0 %v1763_v34  ;;  %v1871_v32 = vunpack.c.h.s8.bf16 %v583_v28  ;;  %v1935_v34 = vunpack.c.h.s8.bf16 %v615_v20 }
 0x169   : > { %4184 = vmatprep.subr.bf16.mxu1 %v1827_v36  ;;  %v582_v36 = vld [vmem:[%s7175_s16 + $0x820] sm:$0xff] }
 0x16a   : > { %v1870_v39 = vunpack.c.h.s8.bf16 %v582_v36  ;;  %v1866_v52 = vunpack.c.l.s8.bf16 %v582_v36 }
 0x16b   : > { %4144 = vmatpush2.bf16.msra.mxu0 %v1762_v27  ;;  %v1867_v27 = vunpack.c.l.s8.bf16 %v583_v28 }
 0x16c   : > { %4185 = vmatpush2.bf16.msra.mxu1 %v1826_v46  ;;  %4195 = vmatprep.subr.bf16.mxu0 %v1887_v47  ;;  %v1931_v46 = vunpack.c.l.s8.bf16 %v615_v20  ;;  %v579_v47 = vld [vmem:[%s7175_s16 + $0x808] sm:$0xff] }
 0x16d   : > { %4236 = vmatprep.subr.bf16.mxu1 %v1951_v51  ;;  %v611_v51 = vld [vmem:[%s7175_s16 + $0x908] sm:$0xff] }
 0x16e   : > { %v3901_v4 = vpop.f32.mrf.mxu0  ;;  %4146 = vmatmul.mubr.bf16.vlgmr.msra.gmra.mxu0 %v7441_v42 }
 0x16f   : > { %v3942_v5 = vpop.f32.mrf.mxu1  ;;  %4187 = vmatmul.mubr.bf16.vlgmr.msra.gmra.mxu1 %v7450_v50  ;;  %4196 = vmatpush1.bf16.msra.mxu0 %v1886_v25  ;;  %v1863_v25 = vunpack.c.h.s8.bf16 %v579_v47 }
 0x170   : > { %v7460_v6 = vadd.f32 %v3942_v5, %v3901_v4  ;;  %4237 = vmatpush1.bf16.msra.mxu1 %v1950_v60  ;;  %v3903_v9 = vpop.f32.mrf.mxu0  ;;  %4197 = vmatprep.subr.bf16.mxu0 %v1883_v61  ;;  %v1927_v60 = vunpack.c.h.s8.bf16 %v611_v51  ;;  %v578_v61 = vld [vmem:[%s7175_s16 + $0x800] sm:$0xff]  ;;  %v1859_v4 = vunpack.c.l.s8.bf16 %v579_v47  ;;  %v1923_v5 = vunpack.c.l.s8.bf16 %v611_v51 }
 0x171   : > { %v3944_v10 = vpop.f32.mrf.mxu1  ;;  %4238 = vmatprep.subr.bf16.mxu1 %v1947_v62  ;;  %4227 = vmatprep.mubr.bf16.mxu0 %v7446_v56  ;;  %v610_v62 = vld [vmem:[%s7175_s16 + $0x900] sm:$0xff]  ;;  %v1862_v63 = vunpack.c.h.s8.bf16 %v578_v61 }
 0x172   : > { %v7464_v15 = vadd.f32 %v3944_v10, %v3903_v9  ;;  %4268 = vmatprep.mubr.bf16.mxu1 %v7456_v3  ;;  %v3905_v16 = vpop.f32.mrf.mxu0  ;;  %v1926_v0 = vunpack.c.h.s8.bf16 %v610_v62  ;;  %v1858_v9 = vunpack.c.l.s8.bf16 %v578_v61  ;;  %v1922_v10 = vunpack.c.l.s8.bf16 %v610_v62 }
 0x173   : > { %v3946_v17 = vpop.f32.mrf.mxu1  ;;  %4198 = vmatpush1.bf16.msra.mxu0 %v1882_v7  ;;  %v607_v7 = vld [vmem:[%s7175_s16 + $0x8e8] sm:$0xff]  ;;  %v1918_v16 = vunpack.c.h.s8.bf16 %v606_v13 }
 0x174   : > { %4239 = vmatpush1.bf16.msra.mxu1 %v1946_v8  ;;  %v3906_v21 = vpop.f32.mrf.mxu0  ;;  %4199 = vmatprep.subr.bf16.mxu0 %v1879_v11  ;;  %v639_v8 = vld [vmem:[%s7175_s16 + $0x9e8] sm:$0xff]  ;;  %v1919_v11 = vunpack.c.h.s8.bf16 %v607_v7  ;;  %v1982_v17 = vunpack.c.h.s8.bf16 %v638_v14 }
 0x175   : > { %v3947_v23 = vpop.f32.mrf.mxu1  ;;  %4240 = vmatprep.subr.bf16.mxu1 %v1943_v12  ;;  %v1983_v12 = vunpack.c.h.s8.bf16 %v639_v8  ;;  %v603_v21 = vld [vmem:[%s7175_s16 + $0x8c8] sm:$0xff] }
 0x176   : > { %v635_v23 = vld [vmem:[%s7175_s16 + $0x9c8] sm:$0xff]  ;;  %v1911_v28 = vunpack.c.h.s8.bf16 %v603_v21  ;;  %v1907_v36 = vunpack.c.l.s8.bf16 %v603_v21  ;;  %v7503_v21 = vrot.slane %v7433_v30, %v7219_v49 }
 0x177   : > { %4200 = vmatpush1.bf16.msra.mxu0 %v1878_v18  ;;  %v1915_v18 = vunpack.c.l.s8.bf16 %v607_v7  ;;  %v1975_v20 = vunpack.c.h.s8.bf16 %v635_v23  ;;  %v1971_v37 = vunpack.c.l.s8.bf16 %v635_v23 }
 0x178   : > { %4241 = vmatpush1.bf16.msra.mxu1 %v1942_v19  ;;  %4201 = vmatprep.subr.bf16.mxu0 %v1875_v24  ;;  %v1979_v19 = vunpack.c.l.s8.bf16 %v639_v8  ;;  %v1914_v24 = vunpack.c.l.s8.bf16 %v606_v13 }
 0x179   : > { %4242 = vmatprep.subr.bf16.mxu1 %v1939_v26  ;;  %v1978_v26 = vunpack.c.l.s8.bf16 %v638_v14 }
 0x17b   : > { %4202 = vmatpush1.bf16.msra.mxu0 %v1874_v29  ;;  %v602_v29 = vld [vmem:[%s7175_s16 + $0x8c0] sm:$0xff] }
 0x17c   : > { %4243 = vmatpush1.bf16.msra.mxu1 %v1938_v31  ;;  %4203 = vmatprep.subr.bf16.mxu0 %v1871_v32  ;;  %v634_v31 = vld [vmem:[%s7175_s16 + $0x9c0] sm:$0xff]  ;;  %v1910_v32 = vunpack.c.h.s8.bf16 %v602_v29 }
 0x17d   : > { %4244 = vmatprep.subr.bf16.mxu1 %v1935_v34  ;;  %v1974_v34 = vunpack.c.h.s8.bf16 %v634_v31 }
 0x17f   : > { %4204 = vmatpush1.bf16.msra.mxu0 %v1870_v39  ;;  %v599_v39 = vld [vmem:[%s7175_s16 + $0x8a8] sm:$0xff] }
 0x180   : > { %4245 = vmatpush1.bf16.msra.mxu1 %v1934_v41  ;;  %4205 = vmatprep.subr.bf16.mxu0 %v1867_v27  ;;  %v631_v41 = vld [vmem:[%s7175_s16 + $0x9a8] sm:$0xff]  ;;  %v1906_v27 = vunpack.c.l.s8.bf16 %v602_v29  ;;  %v1903_v47 = vunpack.c.h.s8.bf16 %v599_v39  ;;  %v1899_v61 = vunpack.c.l.s8.bf16 %v599_v39  ;;  %v686_v29 = vld [vmem:[%s7175_s16 + $0xb60] sm:$0xff] }
 0x181   : > { %4246 = vmatprep.subr.bf16.mxu1 %v1931_v46  ;;  %v1970_v46 = vunpack.c.l.s8.bf16 %v634_v31  ;;  %v1967_v51 = vunpack.c.h.s8.bf16 %v631_v41  ;;  %v1963_v62 = vunpack.c.l.s8.bf16 %v631_v41  ;;  %v651_v39 = vld [vmem:[%s7175_s16 + $0xa48] sm:$0xff] }
 0x182   : > { %v683_v41 = vld [vmem:[%s7175_s16 + $0xb48] sm:$0xff] }
 0x183   : > { %4206 = vmatpush1.bf16.msra.mxu0 %v1866_v52  ;;  %v598_v52 = vld [vmem:[%s7175_s16 + $0x8a0] sm:$0xff] }
 0x184   : > { %4247 = vmatpush1.bf16.msra.mxu1 %v1930_v53  ;;  %4207 = vmatprep.subr.bf16.mxu0 %v1863_v25  ;;  %v630_v53 = vld [vmem:[%s7175_s16 + $0x9a0] sm:$0xff]  ;;  %v1902_v25 = vunpack.c.h.s8.bf16 %v598_v52 }
 0x185   : > { %4248 = vmatprep.subr.bf16.mxu1 %v1927_v60  ;;  %v1966_v60 = vunpack.c.h.s8.bf16 %v630_v53  ;;  %v1962_v7 = vunpack.c.l.s8.bf16 %v630_v53  ;;  %v2074_v53 = vunpack.c.l.s8.bf16 %v686_v29 }
 0x187   : > { %4208 = vmatpush1.bf16.msra.mxu0 %v1862_v63  ;;  %v595_v63 = vld [vmem:[%s7175_s16 + $0x888] sm:$0xff] }
 0x188   : > { %4249 = vmatpush1.bf16.msra.mxu1 %v1926_v0  ;;  %4209 = vmatprep.subr.bf16.mxu0 %v1859_v4  ;;  %v627_v0 = vld [vmem:[%s7175_s16 + $0x988] sm:$0xff]  ;;  %v3509_v4 = vcombine.high %v7427_v22, %v7427_v22  ;;  %v1895_v8 = vunpack.c.h.s8.bf16 %v595_v63  ;;  %v1891_v22 = vunpack.c.l.s8.bf16 %v595_v63  ;;  %v650_v63 = vld [vmem:[%s7175_s16 + $0xa40] sm:$0xff] }
 0x189   : > { %4250 = vmatprep.subr.bf16.mxu1 %v1923_v5  ;;  %v1898_v5 = vunpack.c.l.s8.bf16 %v598_v52 }
 0x18b   : > { %4210 = vmatpush1.bf16.msra.mxu0 %v1858_v9  ;;  %v1959_v9 = vunpack.c.h.s8.bf16 %v627_v0 }
 0x18c   : > { %4251 = vmatpush1.bf16.msra.mxu1 %v1922_v10  ;;  %4211 = vmatprep.subr.bf16.mxu0 %v1919_v11  ;;  %v594_v10 = vld [vmem:[%s7175_s16 + $0x880] sm:$0xff] }
 0x18d   : > { %4252 = vmatprep.subr.bf16.mxu1 %v1983_v12  ;;  %v626_v11 = vld [vmem:[%s7175_s16 + $0x980] sm:$0xff]  ;;  %v7495_v12 = vrot.slane %v3509_v4, %v7219_v49  ;;  %v1894_v13 = vunpack.c.h.s8.bf16 %v594_v10  ;;  %v1890_v23 = vunpack.c.l.s8.bf16 %v594_v10 }
 0x18e   : > { %v1958_v14 = vunpack.c.h.s8.bf16 %v626_v11 }
 0x18f   : > { %4212 = vmatpush2.bf16.msra.mxu0 %v1918_v16  ;;  %v1955_v16 = vunpack.c.l.s8.bf16 %v627_v0  ;;  %v682_v0 = vld [vmem:[%s7175_s16 + $0xb40] sm:$0xff] }
 0x190   : > { %4253 = vmatpush2.bf16.msra.mxu1 %v1982_v17  ;;  %4213 = vmatprep.subr.bf16.mxu0 %v1915_v18  ;;  %v655_v17 = vld [vmem:[%s7175_s16 + $0xa68] sm:$0xff]  ;;  %v2070_v10 = vunpack.c.h.s8.bf16 %v682_v0 }
 0x191   : > { %4254 = vmatprep.subr.bf16.mxu1 %v1979_v19  ;;  %v687_v18 = vld [vmem:[%s7175_s16 + $0xb68] sm:$0xff]  ;;  %v3525_v19 = vcombine.high %v7495_v12, %v7495_v12 }
 0x193   : > { %4214 = vmatpush2.bf16.msra.mxu0 %v1914_v24  ;;  %v1954_v24 = vunpack.c.l.s8.bf16 %v626_v11  ;;  %v7508_v31 = vrot.slane %v3525_v19, %v7219_v49 }
 0x194   : > { %4255 = vmatpush2.bf16.msra.mxu1 %v1978_v26  ;;  %4215 = vmatprep.subr.bf16.mxu0 %v1911_v28  ;;  %v2015_v26 = vunpack.c.h.s8.bf16 %v655_v17  ;;  %v2079_v28 = vunpack.c.h.s8.bf16 %v687_v18 }
 0x195   : > { %4256 = vmatprep.subr.bf16.mxu1 %v1975_v20  ;;  %v654_v20 = vld [vmem:[%s7175_s16 + $0xa60] sm:$0xff] }
 0x196   : > { %v2014_v30 = vunpack.c.h.s8.bf16 %v654_v20  ;;  %v2010_v52 = vunpack.c.l.s8.bf16 %v654_v20 }
 0x197   : > { %4216 = vmatpush2.bf16.msra.mxu0 %v1910_v32  ;;  %v7512_v32 = vcombine.high %v7503_v21, %v7503_v21 }
 0x198   : > { %4257 = vmatpush2.bf16.msra.mxu1 %v1974_v34  ;;  %4217 = vmatprep.subr.bf16.mxu0 %v1907_v36  ;;  %v2078_v34 = vunpack.c.h.s8.bf16 %v686_v29  ;;  %v2011_v36 = vunpack.c.l.s8.bf16 %v655_v17  ;;  %v2002_v17 = vunpack.c.l.s8.bf16 %v650_v63 }
 0x199   : > { %4258 = vmatprep.subr.bf16.mxu1 %v1971_v37  ;;  %v2075_v37 = vunpack.c.l.s8.bf16 %v687_v18  ;;  %v2066_v18 = vunpack.c.l.s8.bf16 %v682_v0 }
 0x19b   : > { %4218 = vmatpush2.bf16.msra.mxu0 %v1906_v27  ;;  %v7518_v27 = vcombine.high %v7508_v31, %v7508_v31 }
 0x19c   : > { %4259 = vmatpush2.bf16.msra.mxu1 %v1970_v46  ;;  %4219 = vmatprep.subr.bf16.mxu0 %v1903_v47 }
 0x19d   : > { %4260 = vmatprep.subr.bf16.mxu1 %v1967_v51 }
 0x19f   : > { %4220 = vmatpush2.bf16.msra.mxu0 %v1902_v25 }
 0x1a0   : > { %4261 = vmatpush2.bf16.msra.mxu1 %v1966_v60  ;;  %4221 = vmatprep.subr.bf16.mxu0 %v1899_v61  ;;  %v2007_v61 = vunpack.c.h.s8.bf16 %v651_v39 }
 0x1a1   : > { %4262 = vmatprep.subr.bf16.mxu1 %v1963_v62  ;;  %v2071_v62 = vunpack.c.h.s8.bf16 %v683_v41 }
 0x1a3   : > { %4222 = vmatpush2.bf16.msra.mxu0 %v1898_v5 }
 0x1a4   : > { %4263 = vmatpush2.bf16.msra.mxu1 %v1962_v7  ;;  %4223 = vmatprep.subr.bf16.mxu0 %v1895_v8 }
 0x1a5   : > { %4264 = vmatprep.subr.bf16.mxu1 %v1959_v9  ;;  %v2006_v9 = vunpack.c.h.s8.bf16 %v650_v63 }
 0x1a7   : > { %4224 = vmatpush2.bf16.msra.mxu0 %v1894_v13 }
 0x1a8   : > { %4265 = vmatpush2.bf16.msra.mxu1 %v1958_v14  ;;  %4225 = vmatprep.subr.bf16.mxu0 %v1891_v22  ;;  %v2067_v14 = vunpack.c.l.s8.bf16 %v683_v41  ;;  %v647_v22 = vld [vmem:[%s7175_s16 + $0xa28] sm:$0xff] }
 0x1a9   : > { %4266 = vmatprep.subr.bf16.mxu1 %v1955_v16  ;;  %v679_v16 = vld [vmem:[%s7175_s16 + $0xb28] sm:$0xff]  ;;  %v1999_v19 = vunpack.c.h.s8.bf16 %v647_v22  ;;  %v1995_v29 = vunpack.c.l.s8.bf16 %v647_v22 }
 0x1aa   : > { %v699_v22 = vld [vmem:[%s7175_s16 + $0xbc8] sm:$0xff] }
 0x1ab   : > { %4226 = vmatpush2.bf16.msra.mxu0 %v1890_v23  ;;  %v2063_v23 = vunpack.c.h.s8.bf16 %v679_v16 }
 0x1ac   : > { %4267 = vmatpush2.bf16.msra.mxu1 %v1954_v24  ;;  %4277 = vmatprep.subr.bf16.mxu0 %v2015_v26  ;;  %v646_v24 = vld [vmem:[%s7175_s16 + $0xa20] sm:$0xff] }
 0x1ad   : > { %4318 = vmatprep.subr.bf16.mxu1 %v2079_v28  ;;  %v678_v26 = vld [vmem:[%s7175_s16 + $0xb20] sm:$0xff]  ;;  %v1998_v28 = vunpack.c.h.s8.bf16 %v646_v24 }
 0x1ae   : > { %v3983_v46 = vpop.f32.mrf.mxu0  ;;  %4228 = vmatmul.mubr.bf16.vlgmr.msra.gmra.mxu0 %v7503_v21  ;;  %v2062_v20 = vunpack.c.h.s8.bf16 %v678_v26 }
 0x1af   : > { %v4024_v47 = vpop.f32.mrf.mxu1  ;;  %4269 = vmatmul.mubr.bf16.vlgmr.msra.gmra.mxu1 %v7512_v32  ;;  %v3984_v51 = vadd.f32 %v3983_v46, %v7460_v6  ;;  %4278 = vmatpush1.bf16.msra.mxu0 %v2014_v30  ;;  %v2059_v30 = vunpack.c.l.s8.bf16 %v679_v16 }
 0x1b0   : > { %4319 = vmatpush1.bf16.msra.mxu1 %v2078_v34  ;;  %v3985_v25 = vpop.f32.mrf.mxu0  ;;  %4279 = vmatprep.subr.bf16.mxu0 %v2011_v36  ;;  %v643_v34 = vld [vmem:[%s7175_s16 + $0xa08] sm:$0xff] }
 0x1b1   : > { %v4026_v60 = vpop.f32.mrf.mxu1  ;;  %4320 = vmatprep.subr.bf16.mxu1 %v2075_v37  ;;  %v7525_v4 = vadd.f32 %v4024_v47, %v3984_v51  ;;  %v3986_v5 = vadd.f32 %v3985_v25, %v7464_v15  ;;  %4309 = vmatprep.mubr.bf16.mxu0 %v7508_v31  ;;  %v2003_v15 = vunpack.c.l.s8.bf16 %v651_v39  ;;  %v675_v36 = vld [vmem:[%s7175_s16 + $0xb08] sm:$0xff]  ;;  %v1994_v37 = vunpack.c.l.s8.bf16 %v646_v24  ;;  %v642_v47 = vld [vmem:[%s7175_s16 + $0xa00] sm:$0xff] }
 0x1b2   : > { %4350 = vmatprep.mubr.bf16.mxu1 %v7518_v27  ;;  %v3987_v6 = vpop.f32.mrf.mxu0  ;;  %v2058_v39 = vunpack.c.l.s8.bf16 %v678_v26  ;;  %v1991_v41 = vunpack.c.h.s8.bf16 %v643_v34  ;;  %v2055_v46 = vunpack.c.h.s8.bf16 %v675_v36  ;;  %v674_v51 = vld [vmem:[%s7175_s16 + $0xb00] sm:$0xff]  ;;  %v1987_v25 = vunpack.c.l.s8.bf16 %v643_v34  ;;  %v695_v34 = vld [vmem:[%s7175_s16 + $0xba8] sm:$0xff] }
 0x1b3   : > { %v4028_v7 = vpop.f32.mrf.mxu1  ;;  %v7530_v8 = vadd.f32 %v4026_v60, %v3986_v5  ;;  %4280 = vmatpush1.bf16.msra.mxu0 %v2010_v52  ;;  %v1990_v52 = vunpack.c.h.s8.bf16 %v642_v47  ;;  %v2051_v60 = vunpack.c.l.s8.bf16 %v675_v36  ;;  %v1986_v63 = vunpack.c.l.s8.bf16 %v642_v47  ;;  %v698_v24 = vld [vmem:[%s7175_s16 + $0xbc0] sm:$0xff] }
 0x1b4   : > { %4321 = vmatpush1.bf16.msra.mxu1 %v2074_v53  ;;  %v3988_v11 = vpop.f32.mrf.mxu0  ;;  %4281 = vmatprep.subr.bf16.mxu0 %v2007_v61  ;;  %v2054_v53 = vunpack.c.h.s8.bf16 %v674_v51  ;;  %v671_v61 = vld [vmem:[%s7175_s16 + $0xae8] sm:$0xff]  ;;  %v2050_v0 = vunpack.c.l.s8.bf16 %v674_v51  ;;  %v670_v7 = vld [vmem:[%s7175_s16 + $0xae0] sm:$0xff] }
 0x1b5   : > { %v4029_v13 = vpop.f32.mrf.mxu1  ;;  %4322 = vmatprep.subr.bf16.mxu1 %v2071_v62  ;;  %v703_v62 = vld [vmem:[%s7175_s16 + $0xbe8] sm:$0xff]  ;;  %v2047_v5 = vunpack.c.h.s8.bf16 %v671_v61  ;;  %v2042_v16 = vunpack.c.l.s8.bf16 %v670_v7  ;;  %v694_v47 = vld [vmem:[%s7175_s16 + $0xba0] sm:$0xff] }
 0x1b6   : > { %v2111_v6 = vunpack.c.h.s8.bf16 %v703_v62  ;;  %v2043_v13 = vunpack.c.l.s8.bf16 %v671_v61  ;;  %v691_v61 = vld [vmem:[%s7175_s16 + $0xb88] sm:$0xff] }
 0x1b7   : > { %4282 = vmatpush1.bf16.msra.mxu0 %v2006_v9  ;;  %v702_v9 = vld [vmem:[%s7175_s16 + $0xbe0] sm:$0xff] }
 0x1b8   : > { %4323 = vmatpush1.bf16.msra.mxu1 %v2070_v10  ;;  %4283 = vmatprep.subr.bf16.mxu0 %v2003_v15  ;;  %v2046_v10 = vunpack.c.h.s8.bf16 %v670_v7  ;;  %v2110_v11 = vunpack.c.h.s8.bf16 %v702_v9  ;;  %v2107_v15 = vunpack.c.l.s8.bf16 %v703_v62  ;;  %v7555_v62 = vld [vmem:[%s7193_s27 + $0x18] sm:$0xff]  ;;  %v658_v7 = vld [vmem:[%s7175_s16 + $0xa80] sm:$0xff] }
 0x1b9   : > { %4324 = vmatprep.subr.bf16.mxu1 %v2067_v14  ;;  %v667_v14 = vld [vmem:[%s7175_s16 + $0xac8] sm:$0xff] }
 0x1bb   : > { %4284 = vmatpush1.bf16.msra.mxu0 %v2002_v17  ;;  %v2106_v17 = vunpack.c.l.s8.bf16 %v702_v9  ;;  %v690_v9 = vld [vmem:[%s7175_s16 + $0xb80] sm:$0xff] }
 0x1bc   : > { %4325 = vmatpush1.bf16.msra.mxu1 %v2066_v18  ;;  %4285 = vmatprep.subr.bf16.mxu0 %v1999_v19  ;;  %v2039_v18 = vunpack.c.h.s8.bf16 %v667_v14  ;;  %v2103_v19 = vunpack.c.h.s8.bf16 %v699_v22 }
 0x1bd   : > { %4326 = vmatprep.subr.bf16.mxu1 %v2063_v23  ;;  %v666_v23 = vld [vmem:[%s7175_s16 + $0xac0] sm:$0xff] }
 0x1be   : > { %v2038_v26 = vunpack.c.h.s8.bf16 %v666_v23  ;;  %v2034_v36 = vunpack.c.l.s8.bf16 %v666_v23  ;;  %v2082_v23 = vunpack.c.l.s8.bf16 %v690_v9 }
 0x1bf   : > { %4286 = vmatpush1.bf16.msra.mxu0 %v1998_v28  ;;  %v2102_v28 = vunpack.c.h.s8.bf16 %v698_v24 }
 0x1c0   : > { %4327 = vmatpush1.bf16.msra.mxu1 %v2062_v20  ;;  %4287 = vmatprep.subr.bf16.mxu0 %v1995_v29  ;;  %v2035_v20 = vunpack.c.l.s8.bf16 %v667_v14  ;;  %v2099_v29 = vunpack.c.l.s8.bf16 %v699_v22  ;;  %v2083_v14 = vunpack.c.l.s8.bf16 %v691_v61  ;;  %v719_v22 = vld [vmem:[%s7175_s16 + $0xc68] sm:$0xff] }
 0x1c1   : > { %4328 = vmatprep.subr.bf16.mxu1 %v2059_v30  ;;  %v663_v30 = vld [vmem:[%s7175_s16 + $0xaa8] sm:$0xff] }
 0x1c3   : > { %4288 = vmatpush1.bf16.msra.mxu0 %v1994_v37  ;;  %v2098_v37 = vunpack.c.l.s8.bf16 %v698_v24  ;;  %v2143_v24 = vunpack.c.h.s8.bf16 %v719_v22 }
 0x1c4   : > { %4329 = vmatpush1.bf16.msra.mxu1 %v2058_v39  ;;  %4289 = vmatprep.subr.bf16.mxu0 %v1991_v41  ;;  %v2031_v39 = vunpack.c.h.s8.bf16 %v663_v30  ;;  %v2095_v41 = vunpack.c.h.s8.bf16 %v695_v34 }
 0x1c5   : > { %4330 = vmatprep.subr.bf16.mxu1 %v2055_v46  ;;  %v662_v46 = vld [vmem:[%s7175_s16 + $0xaa0] sm:$0xff] }
 0x1c6   : > { %v2030_v51 = vunpack.c.h.s8.bf16 %v662_v46 }
 0x1c7   : > { %4290 = vmatpush1.bf16.msra.mxu0 %v1990_v52  ;;  %v2094_v52 = vunpack.c.h.s8.bf16 %v694_v47 }
 0x1c8   : > { %4331 = vmatpush1.bf16.msra.mxu1 %v2054_v53  ;;  %4291 = vmatprep.subr.bf16.mxu0 %v1987_v25  ;;  %v2027_v53 = vunpack.c.l.s8.bf16 %v663_v30  ;;  %v2091_v25 = vunpack.c.l.s8.bf16 %v695_v34 }
 0x1c9   : > { %4332 = vmatprep.subr.bf16.mxu1 %v2051_v60  ;;  %v659_v60 = vld [vmem:[%s7175_s16 + $0xa88] sm:$0xff] }
 0x1cb   : > { %4292 = vmatpush1.bf16.msra.mxu0 %v1986_v63  ;;  %v2026_v63 = vunpack.c.l.s8.bf16 %v662_v46 }
 0x1cc   : > { %4333 = vmatpush1.bf16.msra.mxu1 %v2050_v0  ;;  %4293 = vmatprep.subr.bf16.mxu0 %v2047_v5  ;;  %v2090_v0 = vunpack.c.l.s8.bf16 %v694_v47  ;;  %v2023_v5 = vunpack.c.h.s8.bf16 %v659_v60 }
 0x1cd   : > { %4334 = vmatprep.subr.bf16.mxu1 %v2111_v6  ;;  %v2087_v6 = vunpack.c.h.s8.bf16 %v691_v61 }
 0x1cf   : > { %4294 = vmatpush2.bf16.msra.mxu0 %v2046_v10  ;;  %v7561_v10 = vrot.slane %v7555_v62, %v7219_v49 }
 0x1d0   : > { %4335 = vmatpush2.bf16.msra.mxu1 %v2110_v11  ;;  %4295 = vmatprep.subr.bf16.mxu0 %v2043_v13  ;;  %v2022_v11 = vunpack.c.h.s8.bf16 %v658_v7  ;;  %v2086_v13 = vunpack.c.h.s8.bf16 %v690_v9 }
 0x1d1   : > { %4336 = vmatprep.subr.bf16.mxu1 %v2107_v15  ;;  %v2019_v15 = vunpack.c.l.s8.bf16 %v659_v60 }
 0x1d3   : > { %4296 = vmatpush2.bf16.msra.mxu0 %v2042_v16  ;;  %v751_v16 = vld [vmem:[%s7175_s16 + $0xd68] sm:$0xff] }
 0x1d4   : > { %4337 = vmatpush2.bf16.msra.mxu1 %v2106_v17  ;;  %4297 = vmatprep.subr.bf16.mxu0 %v2039_v18  ;;  %v3573_v17 = vcombine.high %v7561_v10, %v7561_v10  ;;  %v7569_v18 = vrot.slane %v7495_v12, %v7219_v49 }
 0x1d5   : > { %4338 = vmatprep.subr.bf16.mxu1 %v2103_v19  ;;  %v2018_v19 = vunpack.c.l.s8.bf16 %v658_v7 }
 0x1d6   : > { %v7578_v30 = vcombine.high %v7569_v18, %v7569_v18 }
 0x1d7   : > { %4298 = vmatpush2.bf16.msra.mxu0 %v2038_v26  ;;  %v2207_v26 = vunpack.c.h.s8.bf16 %v751_v16 }
 0x1d8   : > { %4339 = vmatpush2.bf16.msra.mxu1 %v2102_v28  ;;  %4299 = vmatprep.subr.bf16.mxu0 %v2035_v20  ;;  %v718_v28 = vld [vmem:[%s7175_s16 + $0xc60] sm:$0xff] }
 0x1d9   : > { %4340 = vmatprep.subr.bf16.mxu1 %v2099_v29  ;;  %v750_v20 = vld [vmem:[%s7175_s16 + $0xd60] sm:$0xff]  ;;  %v7574_v29 = vrot.slane %v3573_v17, %v7219_v49  ;;  %v2142_v12 = vunpack.c.h.s8.bf16 %v718_v28 }
 0x1da   : > { %v2206_v34 = vunpack.c.h.s8.bf16 %v750_v20 }
 0x1db   : > { %4300 = vmatpush2.bf16.msra.mxu0 %v2034_v36  ;;  %v2139_v36 = vunpack.c.l.s8.bf16 %v719_v22  ;;  %v7584_v46 = vcombine.high %v7574_v29, %v7574_v29 }
 0x1dc   : > { %4341 = vmatpush2.bf16.msra.mxu1 %v2098_v37  ;;  %4301 = vmatprep.subr.bf16.mxu0 %v2031_v39  ;;  %v2203_v37 = vunpack.c.l.s8.bf16 %v751_v16  ;;  %v715_v39 = vld [vmem:[%s7175_s16 + $0xc48] sm:$0xff] }
 0x1dd   : > { %4342 = vmatprep.subr.bf16.mxu1 %v2095_v41  ;;  %v747_v41 = vld [vmem:[%s7175_s16 + $0xd48] sm:$0xff] }
 0x1de   : > { %v2195_v17 = vunpack.c.l.s8.bf16 %v747_v41 }
 0x1df   : > { %4302 = vmatpush2.bf16.msra.mxu0 %v2030_v51 }
 0x1e0   : > { %4343 = vmatpush2.bf16.msra.mxu1 %v2094_v52  ;;  %4303 = vmatprep.subr.bf16.mxu0 %v2027_v53  ;;  %v2138_v53 = vunpack.c.l.s8.bf16 %v718_v28 }
 0x1e1   : > { %4344 = vmatprep.subr.bf16.mxu1 %v2091_v25  ;;  %v2202_v25 = vunpack.c.l.s8.bf16 %v750_v20 }
 0x1e3   : > { %4304 = vmatpush2.bf16.msra.mxu0 %v2026_v63  ;;  %v2135_v63 = vunpack.c.h.s8.bf16 %v715_v39 }
 0x1e4   : > { %4345 = vmatpush2.bf16.msra.mxu1 %v2090_v0  ;;  %4305 = vmatprep.subr.bf16.mxu0 %v2023_v5  ;;  %v2199_v0 = vunpack.c.h.s8.bf16 %v747_v41  ;;  %v714_v5 = vld [vmem:[%s7175_s16 + $0xc40] sm:$0xff] }
 0x1e5   : > { %4346 = vmatprep.subr.bf16.mxu1 %v2087_v6  ;;  %v746_v6 = vld [vmem:[%s7175_s16 + $0xd40] sm:$0xff] }
 0x1e7   : > { %4306 = vmatpush2.bf16.msra.mxu0 %v2022_v11 }
 0x1e8   : > { %4347 = vmatpush2.bf16.msra.mxu1 %v2086_v13  ;;  %4307 = vmatprep.subr.bf16.mxu0 %v2019_v15  ;;  %v2134_v15 = vunpack.c.h.s8.bf16 %v714_v5 }
 0x1e9   : > { %4348 = vmatprep.subr.bf16.mxu1 %v2083_v14  ;;  %v2198_v14 = vunpack.c.h.s8.bf16 %v746_v6 }
 0x1eb   : > { %4308 = vmatpush2.bf16.msra.mxu0 %v2018_v19  ;;  %v711_v19 = vld [vmem:[%s7175_s16 + $0xc28] sm:$0xff] }
 0x1ec   : > { %4349 = vmatpush2.bf16.msra.mxu1 %v2082_v23  ;;  %4359 = vmatprep.subr.bf16.mxu0 %v2143_v24  ;;  %v743_v23 = vld [vmem:[%s7175_s16 + $0xd28] sm:$0xff]  ;;  %v2130_v24 = vunpack.c.l.s8.bf16 %v714_v5  ;;  %v2127_v28 = vunpack.c.h.s8.bf16 %v711_v19 }
 0x1ed   : > { %4400 = vmatprep.subr.bf16.mxu1 %v2207_v26  ;;  %v2194_v26 = vunpack.c.l.s8.bf16 %v746_v6  ;;  %v2191_v20 = vunpack.c.h.s8.bf16 %v743_v23  ;;  %v2187_v41 = vunpack.c.l.s8.bf16 %v743_v23 }
 0x1ee   : > { %v4065_v47 = vpop.f32.mrf.mxu0  ;;  %4310 = vmatmul.mubr.bf16.vlgmr.msra.gmra.mxu0 %v7569_v18 }
 0x1ef   : > { %v4106_v51 = vpop.f32.mrf.mxu1  ;;  %4351 = vmatmul.mubr.bf16.vlgmr.msra.gmra.mxu1 %v7578_v30  ;;  %v4066_v52 = vadd.f32 %v4065_v47, %v7525_v4  ;;  %4360 = vmatpush1.bf16.msra.mxu0 %v2142_v12  ;;  %v710_v12 = vld [vmem:[%s7175_s16 + $0xc20] sm:$0xff]  ;;  %v707_v47 = vld [vmem:[%s7175_s16 + $0xc08] sm:$0xff] }
 0x1f0   : > { %4401 = vmatpush1.bf16.msra.mxu1 %v2206_v34  ;;  %v4067_v60 = vpop.f32.mrf.mxu0  ;;  %4361 = vmatprep.subr.bf16.mxu0 %v2139_v36  ;;  %v742_v34 = vld [vmem:[%s7175_s16 + $0xd20] sm:$0xff]  ;;  %v2126_v36 = vunpack.c.h.s8.bf16 %v710_v12  ;;  %v2115_v6 = vunpack.c.l.s8.bf16 %v707_v47 }
 0x1f1   : > { %v4108_v61 = vpop.f32.mrf.mxu1  ;;  %4402 = vmatprep.subr.bf16.mxu1 %v2203_v37  ;;  %v7591_v7 = vadd.f32 %v4106_v51, %v4066_v52  ;;  %v4068_v9 = vadd.f32 %v4067_v60, %v7530_v8  ;;  %4391 = vmatprep.mubr.bf16.mxu0 %v7574_v29  ;;  %v2131_v8 = vunpack.c.l.s8.bf16 %v715_v39  ;;  %v2190_v37 = vunpack.c.h.s8.bf16 %v742_v34  ;;  %v739_v51 = vld [vmem:[%s7175_s16 + $0xd08] sm:$0xff] }
 0x1f2   : > { %4432 = vmatprep.mubr.bf16.mxu1 %v7584_v46  ;;  %v4069_v4 = vpop.f32.mrf.mxu0  ;;  %v2123_v39 = vunpack.c.l.s8.bf16 %v711_v19  ;;  %v2122_v52 = vunpack.c.l.s8.bf16 %v710_v12  ;;  %v2183_v60 = vunpack.c.h.s8.bf16 %v739_v51 }
 0x1f3   : > { %v4110_v11 = vpop.f32.mrf.mxu1  ;;  %v7596_v13 = vadd.f32 %v4108_v61, %v4068_v9  ;;  %4362 = vmatpush1.bf16.msra.mxu0 %v2138_v53  ;;  %v2186_v53 = vunpack.c.l.s8.bf16 %v742_v34  ;;  %v706_v61 = vld [vmem:[%s7175_s16 + $0xc00] sm:$0xff]  ;;  %v2179_v9 = vunpack.c.l.s8.bf16 %v739_v51  ;;  %v735_v4 = vld [vmem:[%s7175_s16 + $0xce8] sm:$0xff] }
 0x1f4   : > { %4403 = vmatpush1.bf16.msra.mxu1 %v2202_v25  ;;  %v4070_v22 = vpop.f32.mrf.mxu0  ;;  %4363 = vmatprep.subr.bf16.mxu0 %v2135_v63  ;;  %v2119_v25 = vunpack.c.h.s8.bf16 %v707_v47  ;;  %v738_v63 = vld [vmem:[%s7175_s16 + $0xd00] sm:$0xff]  ;;  %v767_v11 = vld [vmem:[%s7175_s16 + $0xde8] sm:$0xff] }
 0x1f5   : > { %v4111_v16 = vpop.f32.mrf.mxu1  ;;  %4404 = vmatprep.subr.bf16.mxu1 %v2199_v0  ;;  %v2118_v0 = vunpack.c.h.s8.bf16 %v706_v61  ;;  %v2182_v5 = vunpack.c.h.s8.bf16 %v738_v63  ;;  %v2175_v22 = vunpack.c.h.s8.bf16 %v735_v4 }
 0x1f6   : > { %v2239_v16 = vunpack.c.h.s8.bf16 %v767_v11 }
 0x1f7   : > { %4364 = vmatpush1.bf16.msra.mxu0 %v2134_v15  ;;  %v2114_v15 = vunpack.c.l.s8.bf16 %v706_v61 }
 0x1f8   : > { %4405 = vmatpush1.bf16.msra.mxu1 %v2198_v14  ;;  %4365 = vmatprep.subr.bf16.mxu0 %v2131_v8  ;;  %v2178_v14 = vunpack.c.l.s8.bf16 %v738_v63  ;;  %v734_v8 = vld [vmem:[%s7175_s16 + $0xce0] sm:$0xff] }
 0x1f9   : > { %4406 = vmatprep.subr.bf16.mxu1 %v2195_v17  ;;  %v766_v17 = vld [vmem:[%s7175_s16 + $0xde0] sm:$0xff]  ;;  %v2174_v19 = vunpack.c.h.s8.bf16 %v734_v8  ;;  %v2170_v12 = vunpack.c.l.s8.bf16 %v734_v8  ;;  %v3558_v8 = vcombine.high %v7555_v62, %v7555_v62 }
 0x1fa   : > { %v2238_v23 = vunpack.c.h.s8.bf16 %v766_v17  ;;  %v2234_v34 = vunpack.c.l.s8.bf16 %v766_v17 }
 0x1fb   : > { %4366 = vmatpush1.bf16.msra.mxu0 %v2130_v24  ;;  %v2171_v24 = vunpack.c.l.s8.bf16 %v735_v4 }
 0x1fc   : > { %4407 = vmatpush1.bf16.msra.mxu1 %v2194_v26  ;;  %4367 = vmatprep.subr.bf16.mxu0 %v2127_v28  ;;  %v2235_v26 = vunpack.c.l.s8.bf16 %v767_v11  ;;  %v731_v28 = vld [vmem:[%s7175_s16 + $0xcc8] sm:$0xff] }
 0x1fd   : > { %4408 = vmatprep.subr.bf16.mxu1 %v2191_v20  ;;  %v763_v20 = vld [vmem:[%s7175_s16 + $0xdc8] sm:$0xff] }
 0x1ff   : > { %4368 = vmatpush1.bf16.msra.mxu0 %v2126_v36  ;;  %v2167_v36 = vunpack.c.h.s8.bf16 %v731_v28 }
 0x200   : > { %4409 = vmatpush1.bf16.msra.mxu1 %v2190_v37  ;;  %4369 = vmatprep.subr.bf16.mxu0 %v2123_v39  ;;  %v2231_v37 = vunpack.c.h.s8.bf16 %v763_v20  ;;  %v730_v39 = vld [vmem:[%s7175_s16 + $0xcc0] sm:$0xff] }
 0x201   : > { %4410 = vmatprep.subr.bf16.mxu1 %v2187_v41  ;;  %v762_v41 = vld [vmem:[%s7175_s16 + $0xdc0] sm:$0xff]  ;;  %v2166_v47 = vunpack.c.h.s8.bf16 %v730_v39  ;;  %v2162_v61 = vunpack.c.l.s8.bf16 %v730_v39  ;;  %v815_v39 = vld [vmem:[%s7175_s16 + $0xf68] sm:$0xff] }
 0x202   : > { %v2230_v51 = vunpack.c.h.s8.bf16 %v762_v41  ;;  %v2226_v63 = vunpack.c.l.s8.bf16 %v762_v41 }
 0x203   : > { %4370 = vmatpush1.bf16.msra.mxu0 %v2122_v52  ;;  %v2163_v52 = vunpack.c.l.s8.bf16 %v731_v28  ;;  %v754_v28 = vld [vmem:[%s7175_s16 + $0xd80] sm:$0xff] }
 0x204   : > { %4411 = vmatpush1.bf16.msra.mxu1 %v2186_v53  ;;  %4371 = vmatprep.subr.bf16.mxu0 %v2119_v25  ;;  %v2227_v53 = vunpack.c.l.s8.bf16 %v763_v20  ;;  %v727_v25 = vld [vmem:[%s7175_s16 + $0xca8] sm:$0xff]  ;;  %v7625_v20 = vrot.slane %v3558_v8, %v7219_v49 }
 0x205   : > { %4412 = vmatprep.subr.bf16.mxu1 %v2183_v60  ;;  %v759_v60 = vld [vmem:[%s7175_s16 + $0xda8] sm:$0xff] }
 0x206   : > { %v3574_v41 = vcombine.high %v7625_v20, %v7625_v20 }
 0x207   : > { %4372 = vmatpush1.bf16.msra.mxu0 %v2118_v0  ;;  %v2159_v0 = vunpack.c.h.s8.bf16 %v727_v25 }
 0x208   : > { %4413 = vmatpush1.bf16.msra.mxu1 %v2182_v5  ;;  %4373 = vmatprep.subr.bf16.mxu0 %v2115_v6  ;;  %v2223_v5 = vunpack.c.h.s8.bf16 %v759_v60  ;;  %v726_v6 = vld [vmem:[%s7175_s16 + $0xca0] sm:$0xff] }
 0x209   : > { %4414 = vmatprep.subr.bf16.mxu1 %v2179_v9  ;;  %v758_v9 = vld [vmem:[%s7175_s16 + $0xda0] sm:$0xff]  ;;  %v2158_v4 = vunpack.c.h.s8.bf16 %v726_v6  ;;  %v2154_v17 = vunpack.c.l.s8.bf16 %v726_v6 }
 0x20a   : > { %v2222_v11 = vunpack.c.h.s8.bf16 %v758_v9 }
 0x20b   : > { %4374 = vmatpush1.bf16.msra.mxu0 %v2114_v15  ;;  %v2155_v15 = vunpack.c.l.s8.bf16 %v727_v25  ;;  %v2335_v25 = vunpack.c.h.s8.bf16 %v815_v39 }
 0x20c   : > { %4415 = vmatpush1.bf16.msra.mxu1 %v2178_v14  ;;  %4375 = vmatprep.subr.bf16.mxu0 %v2175_v22  ;;  %v2219_v14 = vunpack.c.l.s8.bf16 %v759_v60  ;;  %v723_v22 = vld [vmem:[%s7175_s16 + $0xc88] sm:$0xff]  ;;  %v782_v60 = vld [vmem:[%s7175_s16 + $0xe60] sm:$0xff] }
 0x20d   : > { %4416 = vmatprep.subr.bf16.mxu1 %v2239_v16  ;;  %v755_v16 = vld [vmem:[%s7175_s16 + $0xd88] sm:$0xff]  ;;  %v2147_v62 = vunpack.c.l.s8.bf16 %v723_v22  ;;  %v2266_v8 = vunpack.c.l.s8.bf16 %v782_v60 }
 0x20f   : > { %4376 = vmatpush2.bf16.msra.mxu0 %v2174_v19  ;;  %v2218_v19 = vunpack.c.l.s8.bf16 %v758_v9  ;;  %v2331_v9 = vunpack.c.l.s8.bf16 %v815_v39 }
 0x210   : > { %4417 = vmatpush2.bf16.msra.mxu1 %v2238_v23  ;;  %4377 = vmatprep.subr.bf16.mxu0 %v2171_v24  ;;  %v2151_v23 = vunpack.c.h.s8.bf16 %v723_v22  ;;  %v2215_v24 = vunpack.c.h.s8.bf16 %v755_v16 }
 0x211   : > { %4418 = vmatprep.subr.bf16.mxu1 %v2235_v26  ;;  %v722_v26 = vld [vmem:[%s7175_s16 + $0xc80] sm:$0xff] }
 0x213   : > { %4378 = vmatpush2.bf16.msra.mxu0 %v2170_v12  ;;  %v2150_v12 = vunpack.c.h.s8.bf16 %v722_v26 }
 0x214   : > { %4419 = vmatpush2.bf16.msra.mxu1 %v2234_v34  ;;  %4379 = vmatprep.subr.bf16.mxu0 %v2167_v36  ;;  %v2214_v34 = vunpack.c.h.s8.bf16 %v754_v28  ;;  %v2211_v36 = vunpack.c.l.s8.bf16 %v755_v16 }
 0x215   : > { %4420 = vmatprep.subr.bf16.mxu1 %v2231_v37  ;;  %v783_v37 = vld [vmem:[%s7175_s16 + $0xe68] sm:$0xff] }
 0x216   : > { %v2267_v6 = vunpack.c.l.s8.bf16 %v783_v37 }
 0x217   : > { %4380 = vmatpush2.bf16.msra.mxu0 %v2166_v47  ;;  %v7633_v47 = vrot.slane %v7561_v10, %v7219_v49  ;;  %v2270_v10 = vunpack.c.h.s8.bf16 %v782_v60  ;;  %v807_v60 = vld [vmem:[%s7175_s16 + $0xf28] sm:$0xff] }
 0x218   : > { %4421 = vmatpush2.bf16.msra.mxu1 %v2230_v51  ;;  %4381 = vmatprep.subr.bf16.mxu0 %v2163_v52  ;;  %v2146_v51 = vunpack.c.l.s8.bf16 %v722_v26  ;;  %v2210_v52 = vunpack.c.l.s8.bf16 %v754_v28  ;;  %v778_v28 = vld [vmem:[%s7175_s16 + $0xe40] sm:$0xff] }
 0x219   : > { %4422 = vmatprep.subr.bf16.mxu1 %v2227_v53  ;;  %v2271_v53 = vunpack.c.h.s8.bf16 %v783_v37  ;;  %v2262_v39 = vunpack.c.h.s8.bf16 %v778_v28 }
 0x21b   : > { %4382 = vmatpush2.bf16.msra.mxu0 %v2162_v61  ;;  %v814_v61 = vld [vmem:[%s7175_s16 + $0xf60] sm:$0xff] }
 0x21c   : > { %4423 = vmatpush2.bf16.msra.mxu1 %v2226_v63  ;;  %4383 = vmatprep.subr.bf16.mxu0 %v2159_v0  ;;  %v7638_v63 = vrot.slane %v3574_v41, %v7219_v49  ;;  %v7642_v0 = vcombine.high %v7633_v47, %v7633_v47 }
 0x21d   : > { %4424 = vmatprep.subr.bf16.mxu1 %v2223_v5  ;;  %v2334_v5 = vunpack.c.h.s8.bf16 %v814_v61 }
 0x21f   : > { %4384 = vmatpush2.bf16.msra.mxu0 %v2158_v4  ;;  %v779_v4 = vld [vmem:[%s7175_s16 + $0xe48] sm:$0xff] }
 0x220   : > { %4425 = vmatpush2.bf16.msra.mxu1 %v2222_v11  ;;  %4385 = vmatprep.subr.bf16.mxu0 %v2155_v15  ;;  %v811_v11 = vld [vmem:[%s7175_s16 + $0xf48] sm:$0xff]  ;;  %v7648_v15 = vcombine.high %v7638_v63, %v7638_v63 }
 0x221   : > { %4426 = vmatprep.subr.bf16.mxu1 %v2219_v14  ;;  %v2327_v26 = vunpack.c.h.s8.bf16 %v811_v11 }
 0x223   : > { %4386 = vmatpush2.bf16.msra.mxu0 %v2154_v17  ;;  %v2330_v17 = vunpack.c.l.s8.bf16 %v814_v61  ;;  %v2258_v61 = vunpack.c.l.s8.bf16 %v778_v28  ;;  %v770_v28 = vld [vmem:[%s7175_s16 + $0xe00] sm:$0xff] }
 0x224   : > { %4427 = vmatpush2.bf16.msra.mxu1 %v2218_v19  ;;  %4387 = vmatprep.subr.bf16.mxu0 %v2151_v23 }
 0x225   : > { %4428 = vmatprep.subr.bf16.mxu1 %v2215_v24  ;;  %v2263_v24 = vunpack.c.h.s8.bf16 %v779_v4 }
 0x227   : > { %4388 = vmatpush2.bf16.msra.mxu0 %v2150_v12  ;;  %v810_v12 = vld [vmem:[%s7175_s16 + $0xf40] sm:$0xff] }
 0x228   : > { %4429 = vmatpush2.bf16.msra.mxu1 %v2214_v34  ;;  %4389 = vmatprep.subr.bf16.mxu0 %v2147_v62  ;;  %v2326_v41 = vunpack.c.h.s8.bf16 %v810_v12 }
 0x229   : > { %4430 = vmatprep.subr.bf16.mxu1 %v2211_v36 }
 0x22b   : > { %4390 = vmatpush2.bf16.msra.mxu0 %v2146_v51 }
 0x22c   : > { %4431 = vmatpush2.bf16.msra.mxu1 %v2210_v52  ;;  %4441 = vmatprep.subr.bf16.mxu0 %v2271_v53  ;;  %v2323_v53 = vunpack.c.l.s8.bf16 %v811_v11 }
 0x22d   : > { %4482 = vmatprep.subr.bf16.mxu1 %v2335_v25  ;;  %v775_v25 = vld [vmem:[%s7175_s16 + $0xe28] sm:$0xff] }
 0x22e   : > { %v4147_v14 = vpop.f32.mrf.mxu0  ;;  %4392 = vmatmul.mubr.bf16.vlgmr.msra.gmra.mxu0 %v7633_v47  ;;  %v2251_v11 = vunpack.c.l.s8.bf16 %v775_v25 }
 0x22f   : > { %v4188_v22 = vpop.f32.mrf.mxu1  ;;  %4433 = vmatmul.mubr.bf16.vlgmr.msra.gmra.mxu1 %v7642_v0  ;;  %v4148_v16 = vadd.f32 %v4147_v14, %v7591_v7  ;;  %4442 = vmatpush1.bf16.msra.mxu0 %v2270_v10  ;;  %v2322_v10 = vunpack.c.l.s8.bf16 %v810_v12  ;;  %v806_v14 = vld [vmem:[%s7175_s16 + $0xf20] sm:$0xff] }
 0x230   : > { %4483 = vmatpush1.bf16.msra.mxu1 %v2334_v5  ;;  %v4149_v19 = vpop.f32.mrf.mxu0  ;;  %4443 = vmatprep.subr.bf16.mxu0 %v2267_v6  ;;  %v2255_v5 = vunpack.c.h.s8.bf16 %v775_v25  ;;  %v2319_v6 = vunpack.c.h.s8.bf16 %v807_v60  ;;  %v802_v12 = vld [vmem:[%s7175_s16 + $0xf00] sm:$0xff] }
 0x231   : > { %v4190_v23 = vpop.f32.mrf.mxu1  ;;  %4484 = vmatprep.subr.bf16.mxu1 %v2331_v9  ;;  %v7655_v34 = vadd.f32 %v4188_v22, %v4148_v16  ;;  %v4150_v62 = vadd.f32 %v4149_v19, %v7596_v13  ;;  %4473 = vmatprep.mubr.bf16.mxu0 %v7638_v63  ;;  %v2259_v13 = vunpack.c.l.s8.bf16 %v779_v4  ;;  %v774_v9 = vld [vmem:[%s7175_s16 + $0xe20] sm:$0xff]  ;;  %v2318_v4 = vunpack.c.h.s8.bf16 %v806_v14 }
 0x232   : > { %4514 = vmatprep.mubr.bf16.mxu1 %v7648_v15  ;;  %v4151_v7 = vpop.f32.mrf.mxu0  ;;  %v2254_v22 = vunpack.c.h.s8.bf16 %v774_v9  ;;  %v2315_v16 = vunpack.c.l.s8.bf16 %v807_v60  ;;  %v2250_v19 = vunpack.c.l.s8.bf16 %v774_v9  ;;  %v798_v60 = vld [vmem:[%s7175_s16 + $0xee0] sm:$0xff] }
 0x233   : > { %v4192_v36 = vpop.f32.mrf.mxu1  ;;  %v7660_v37 = vadd.f32 %v4190_v23, %v4150_v62  ;;  %4444 = vmatpush1.bf16.msra.mxu0 %v2266_v8  ;;  %v771_v8 = vld [vmem:[%s7175_s16 + $0xe08] sm:$0xff]  ;;  %v2314_v23 = vunpack.c.l.s8.bf16 %v806_v14  ;;  %v2246_v62 = vunpack.c.h.s8.bf16 %v770_v28  ;;  %v2310_v7 = vunpack.c.h.s8.bf16 %v802_v12 }
 0x234   : > { %4485 = vmatpush1.bf16.msra.mxu1 %v2330_v17  ;;  %v4152_v51 = vpop.f32.mrf.mxu0  ;;  %4445 = vmatprep.subr.bf16.mxu0 %v2263_v24  ;;  %v803_v17 = vld [vmem:[%s7175_s16 + $0xf08] sm:$0xff]  ;;  %v2247_v24 = vunpack.c.h.s8.bf16 %v771_v8  ;;  %v2243_v36 = vunpack.c.l.s8.bf16 %v771_v8 }
 0x235   : > { %v4193_v52 = vpop.f32.mrf.mxu1  ;;  %4486 = vmatprep.subr.bf16.mxu1 %v2327_v26  ;;  %v2311_v26 = vunpack.c.h.s8.bf16 %v803_v17  ;;  %v831_v51 = vld [vmem:[%s7175_s16 + $0xfe8] sm:$0xff] }
 0x236   : > { %v2242_v52 = vunpack.c.l.s8.bf16 %v770_v28  ;;  %v2367_v25 = vunpack.c.h.s8.bf16 %v831_v51  ;;  %v2363_v9 = vunpack.c.l.s8.bf16 %v831_v51  ;;  %v795_v14 = vld [vmem:[%s7175_s16 + $0xec8] sm:$0xff]  ;;  %v790_v51 = vld [vmem:[%s7175_s16 + $0xea0] sm:$0xff] }
 0x237   : > { %4446 = vmatpush1.bf16.msra.mxu0 %v2262_v39  ;;  %v2307_v39 = vunpack.c.l.s8.bf16 %v803_v17  ;;  %v794_v17 = vld [vmem:[%s7175_s16 + $0xec0] sm:$0xff] }
 0x238   : > { %4487 = vmatpush1.bf16.msra.mxu1 %v2326_v41  ;;  %4447 = vmatprep.subr.bf16.mxu0 %v2259_v13  ;;  %v799_v41 = vld [vmem:[%s7175_s16 + $0xee8] sm:$0xff]  ;;  %v2306_v13 = vunpack.c.l.s8.bf16 %v802_v12 }
 0x239   : > { %4488 = vmatprep.subr.bf16.mxu1 %v2323_v53  ;;  %v2303_v53 = vunpack.c.h.s8.bf16 %v799_v41  ;;  %v791_v12 = vld [vmem:[%s7175_s16 + $0xea8] sm:$0xff] }
 0x23b   : > { %4448 = vmatpush1.bf16.msra.mxu0 %v2258_v61  ;;  %v830_v61 = vld [vmem:[%s7175_s16 + $0xfe0] sm:$0xff] }
 0x23c   : > { %4489 = vmatpush1.bf16.msra.mxu1 %v2322_v10  ;;  %4449 = vmatprep.subr.bf16.mxu0 %v2255_v5  ;;  %v2302_v10 = vunpack.c.h.s8.bf16 %v798_v60  ;;  %v2366_v5 = vunpack.c.h.s8.bf16 %v830_v61 }
 0x23d   : > { %4490 = vmatprep.subr.bf16.mxu1 %v2319_v6  ;;  %v2299_v6 = vunpack.c.l.s8.bf16 %v799_v41 }
 0x23f   : > { %4450 = vmatpush1.bf16.msra.mxu0 %v2254_v22  ;;  %v827_v22 = vld [vmem:[%s7175_s16 + $0xfc8] sm:$0xff] }
 0x240   : > { %4491 = vmatpush1.bf16.msra.mxu1 %v2318_v4  ;;  %4451 = vmatprep.subr.bf16.mxu0 %v2251_v11  ;;  %v2298_v4 = vunpack.c.l.s8.bf16 %v798_v60  ;;  %v2362_v11 = vunpack.c.l.s8.bf16 %v830_v61  ;;  %v2359_v8 = vunpack.c.h.s8.bf16 %v827_v22  ;;  %v2355_v28 = vunpack.c.l.s8.bf16 %v827_v22  ;;  %v787_v61 = vld [vmem:[%s7175_s16 + $0xe88] sm:$0xff] }
 0x241   : > { %4492 = vmatprep.subr.bf16.mxu1 %v2315_v16  ;;  %v2295_v16 = vunpack.c.h.s8.bf16 %v795_v14 }
 0x243   : > { %4452 = vmatpush1.bf16.msra.mxu0 %v2250_v19  ;;  %v826_v19 = vld [vmem:[%s7175_s16 + $0xfc0] sm:$0xff] }
 0x244   : > { %4493 = vmatpush1.bf16.msra.mxu1 %v2314_v23  ;;  %4453 = vmatprep.subr.bf16.mxu0 %v2247_v24  ;;  %v2294_v23 = vunpack.c.h.s8.bf16 %v794_v17  ;;  %v2358_v24 = vunpack.c.h.s8.bf16 %v826_v19 }
 0x245   : > { %4494 = vmatprep.subr.bf16.mxu1 %v2311_v26  ;;  %v2291_v26 = vunpack.c.l.s8.bf16 %v795_v14  ;;  %v2279_v14 = vunpack.c.h.s8.bf16 %v787_v61 }
 0x247   : > { %4454 = vmatpush1.bf16.msra.mxu0 %v2246_v62  ;;  %v823_v62 = vld [vmem:[%s7175_s16 + $0xfa8] sm:$0xff] }
 0x248   : > { %4495 = vmatpush1.bf16.msra.mxu1 %v2310_v7  ;;  %4455 = vmatprep.subr.bf16.mxu0 %v2243_v36  ;;  %v2290_v7 = vunpack.c.l.s8.bf16 %v794_v17  ;;  %v2354_v36 = vunpack.c.l.s8.bf16 %v826_v19  ;;  %v2351_v41 = vunpack.c.h.s8.bf16 %v823_v62  ;;  %v2347_v60 = vunpack.c.l.s8.bf16 %v823_v62 }
 0x249   : > { %4496 = vmatprep.subr.bf16.mxu1 %v2307_v39  ;;  %v2287_v39 = vunpack.c.h.s8.bf16 %v791_v12  ;;  %v2275_v19 = vunpack.c.l.s8.bf16 %v787_v61  ;;  %v843_v61 = vld [vmem:[%s7175_s16 + $0x1048] sm:$0xff] }
 0x24b   : > { %4456 = vmatpush1.bf16.msra.mxu0 %v2242_v52  ;;  %v822_v52 = vld [vmem:[%s7175_s16 + $0xfa0] sm:$0xff] }
 0x24c   : > { %4497 = vmatpush1.bf16.msra.mxu1 %v2306_v13  ;;  %4457 = vmatprep.subr.bf16.mxu0 %v2303_v53  ;;  %v2286_v13 = vunpack.c.h.s8.bf16 %v790_v51  ;;  %v2350_v53 = vunpack.c.h.s8.bf16 %v822_v52 }
 0x24d   : > { %4498 = vmatprep.subr.bf16.mxu1 %v2367_v25  ;;  %v2283_v25 = vunpack.c.l.s8.bf16 %v791_v12  ;;  %v7699_v12 = vrot.slane %v7625_v20, %v7219_v49 }
 0x24f   : > { %4458 = vmatpush2.bf16.msra.mxu0 %v2302_v10  ;;  %v819_v10 = vld [vmem:[%s7175_s16 + $0xf88] sm:$0xff] }
 0x250   : > { %4499 = vmatpush2.bf16.msra.mxu1 %v2366_v5  ;;  %4459 = vmatprep.subr.bf16.mxu0 %v2299_v6  ;;  %v7685_v5 = vld [vmem:[%s7193_s27 + $0x20] sm:$0xff]  ;;  %v2282_v6 = vunpack.c.l.s8.bf16 %v790_v51  ;;  %v2343_v22 = vunpack.c.h.s8.bf16 %v819_v10  ;;  %v878_v51 = vld [vmem:[%s7175_s16 + $0x1160] sm:$0xff] }
 0x251   : > { %4500 = vmatprep.subr.bf16.mxu1 %v2363_v9  ;;  %v2346_v9 = vunpack.c.l.s8.bf16 %v822_v52 }
 0x253   : > { %4460 = vmatpush2.bf16.msra.mxu0 %v2298_v4  ;;  %v786_v4 = vld [vmem:[%s7175_s16 + $0xe80] sm:$0xff] }
 0x254   : > { %4501 = vmatpush2.bf16.msra.mxu1 %v2362_v11  ;;  %4461 = vmatprep.subr.bf16.mxu0 %v2295_v16  ;;  %v818_v11 = vld [vmem:[%s7175_s16 + $0xf80] sm:$0xff]  ;;  %v7691_v16 = vrot.slane %v7685_v5, %v7219_v49  ;;  %v2274_v62 = vunpack.c.l.s8.bf16 %v786_v4 }
 0x255   : > { %4502 = vmatprep.subr.bf16.mxu1 %v2359_v8  ;;  %v2278_v8 = vunpack.c.h.s8.bf16 %v786_v4  ;;  %v2342_v17 = vunpack.c.h.s8.bf16 %v818_v11 }
 0x257   : > { %4462 = vmatpush2.bf16.msra.mxu0 %v2294_v23  ;;  %v2339_v23 = vunpack.c.l.s8.bf16 %v819_v10  ;;  %v875_v10 = vld [vmem:[%s7175_s16 + $0x1148] sm:$0xff] }
 0x258   : > { %4503 = vmatpush2.bf16.msra.mxu1 %v2358_v24  ;;  %4463 = vmatprep.subr.bf16.mxu0 %v2291_v26  ;;  %v847_v24 = vld [vmem:[%s7175_s16 + $0x1068] sm:$0xff] }
 0x259   : > { %4504 = vmatprep.subr.bf16.mxu1 %v2355_v28  ;;  %v879_v26 = vld [vmem:[%s7175_s16 + $0x1168] sm:$0xff]  ;;  %v3622_v28 = vcombine.high %v7691_v16, %v7691_v16 }
 0x25b   : > { %4464 = vmatpush2.bf16.msra.mxu0 %v2290_v7  ;;  %v2338_v7 = vunpack.c.l.s8.bf16 %v818_v11  ;;  %v7704_v52 = vrot.slane %v3622_v28, %v7219_v49  ;;  %v2458_v11 = vunpack.c.l.s8.bf16 %v878_v51 }
 0x25c   : > { %4505 = vmatpush2.bf16.msra.mxu1 %v2354_v36  ;;  %4465 = vmatprep.subr.bf16.mxu0 %v2287_v39  ;;  %v2399_v36 = vunpack.c.h.s8.bf16 %v847_v24  ;;  %v2463_v39 = vunpack.c.h.s8.bf16 %v879_v26 }
 0x25d   : > { %4506 = vmatprep.subr.bf16.mxu1 %v2351_v41  ;;  %v846_v41 = vld [vmem:[%s7175_s16 + $0x1060] sm:$0xff] }
 0x25e   : > { %v2398_v20 = vunpack.c.h.s8.bf16 %v846_v41  ;;  %v2394_v4 = vunpack.c.l.s8.bf16 %v846_v41 }
 0x25f   : > { %4466 = vmatpush2.bf16.msra.mxu0 %v2286_v13  ;;  %v7708_v13 = vcombine.high %v7699_v12, %v7699_v12 }
 0x260   : > { %4507 = vmatpush2.bf16.msra.mxu1 %v2350_v53  ;;  %4467 = vmatprep.subr.bf16.mxu0 %v2283_v25  ;;  %v2462_v53 = vunpack.c.h.s8.bf16 %v878_v51  ;;  %v2395_v25 = vunpack.c.l.s8.bf16 %v847_v24  ;;  %v842_v24 = vld [vmem:[%s7175_s16 + $0x1040] sm:$0xff] }
 0x261   : > { %4508 = vmatprep.subr.bf16.mxu1 %v2347_v60  ;;  %v2459_v60 = vunpack.c.l.s8.bf16 %v879_v26  ;;  %v874_v26 = vld [vmem:[%s7175_s16 + $0x1140] sm:$0xff] }
 0x262   : > { %v2454_v41 = vunpack.c.h.s8.bf16 %v874_v26 }
 0x263   : > { %4468 = vmatpush2.bf16.msra.mxu0 %v2282_v6  ;;  %v7714_v6 = vcombine.high %v7704_v52, %v7704_v52 }
 0x264   : > { %4509 = vmatpush2.bf16.msra.mxu1 %v2346_v9  ;;  %4469 = vmatprep.subr.bf16.mxu0 %v2279_v14 }
 0x265   : > { %4510 = vmatprep.subr.bf16.mxu1 %v2343_v22 }
 0x267   : > { %4470 = vmatpush2.bf16.msra.mxu0 %v2278_v8 }
 0x268   : > { %4511 = vmatpush2.bf16.msra.mxu1 %v2342_v17  ;;  %4471 = vmatprep.subr.bf16.mxu0 %v2275_v19  ;;  %v2391_v19 = vunpack.c.h.s8.bf16 %v843_v61 }
 0x269   : > { %4512 = vmatprep.subr.bf16.mxu1 %v2339_v23  ;;  %v2455_v23 = vunpack.c.h.s8.bf16 %v875_v10 }
 0x26b   : > { %4472 = vmatpush2.bf16.msra.mxu0 %v2274_v62 }
 0x26c   : > { %4513 = vmatpush2.bf16.msra.mxu1 %v2338_v7  ;;  %4523 = vmatprep.subr.bf16.mxu0 %v2399_v36 }
 0x26d   : > { %4564 = vmatprep.subr.bf16.mxu1 %v2463_v39  ;;  %v2390_v39 = vunpack.c.h.s8.bf16 %v842_v24 }
 0x26e   : > { %v4229_v9 = vpop.f32.mrf.mxu0  ;;  %4474 = vmatmul.mubr.bf16.vlgmr.msra.gmra.mxu0 %v7699_v12 }
 0x26f   : > { %v4270_v14 = vpop.f32.mrf.mxu1  ;;  %4515 = vmatmul.mubr.bf16.vlgmr.msra.gmra.mxu1 %v7708_v13  ;;  %v4230_v22 = vadd.f32 %v4229_v9, %v7655_v34  ;;  %4524 = vmatpush1.bf16.msra.mxu0 %v2398_v20  ;;  %v2386_v9 = vunpack.c.l.s8.bf16 %v842_v24  ;;  %v867_v24 = vld [vmem:[%s7175_s16 + $0x1108] sm:$0xff] }
 0x270   : > { %4565 = vmatpush1.bf16.msra.mxu1 %v2462_v53  ;;  %v4231_v8 = vpop.f32.mrf.mxu0  ;;  %4525 = vmatprep.subr.bf16.mxu0 %v2395_v25  ;;  %v2451_v53 = vunpack.c.l.s8.bf16 %v875_v10  ;;  %v839_v25 = vld [vmem:[%s7175_s16 + $0x1028] sm:$0xff] }
 0x271   : > { %v4272_v17 = vpop.f32.mrf.mxu1  ;;  %4566 = vmatprep.subr.bf16.mxu1 %v2459_v60  ;;  %v7721_v28 = vadd.f32 %v4270_v14, %v4230_v22  ;;  %v4232_v62 = vadd.f32 %v4231_v8, %v7660_v37  ;;  %4555 = vmatprep.mubr.bf16.mxu0 %v7704_v52  ;;  %v2387_v37 = vunpack.c.l.s8.bf16 %v843_v61  ;;  %v871_v60 = vld [vmem:[%s7175_s16 + $0x1128] sm:$0xff]  ;;  %v2450_v14 = vunpack.c.l.s8.bf16 %v874_v26  ;;  %v870_v8 = vld [vmem:[%s7175_s16 + $0x1120] sm:$0xff] }
 0x272   : > { %4596 = vmatprep.mubr.bf16.mxu1 %v7714_v6  ;;  %v4233_v34 = vpop.f32.mrf.mxu0  ;;  %v2383_v22 = vunpack.c.h.s8.bf16 %v839_v25  ;;  %v2446_v61 = vunpack.c.h.s8.bf16 %v870_v8  ;;  %v2379_v10 = vunpack.c.l.s8.bf16 %v839_v25  ;;  %v863_v25 = vld [vmem:[%s7175_s16 + $0x10e8] sm:$0xff] }
 0x273   : > { %v4274_v7 = vpop.f32.mrf.mxu1  ;;  %v7726_v36 = vadd.f32 %v4272_v17, %v4232_v62  ;;  %4526 = vmatpush1.bf16.msra.mxu0 %v2394_v4  ;;  %v2447_v4 = vunpack.c.h.s8.bf16 %v871_v60  ;;  %v2442_v62 = vunpack.c.l.s8.bf16 %v870_v8  ;;  %v894_v8 = vld [vmem:[%s7175_s16 + $0x11e0] sm:$0xff] }
 0x274   : > { %4567 = vmatpush1.bf16.msra.mxu1 %v2458_v11  ;;  %v4234_v51 = vpop.f32.mrf.mxu0  ;;  %4527 = vmatprep.subr.bf16.mxu0 %v2391_v19  ;;  %v838_v11 = vld [vmem:[%s7175_s16 + $0x1020] sm:$0xff]  ;;  %v2443_v19 = vunpack.c.l.s8.bf16 %v871_v60  ;;  %v2439_v7 = vunpack.c.h.s8.bf16 %v867_v24  ;;  %v895_v60 = vld [vmem:[%s7175_s16 + $0x11e8] sm:$0xff] }
 0x275   : > { %v4275_v20 = vpop.f32.mrf.mxu1  ;;  %4568 = vmatprep.subr.bf16.mxu1 %v2455_v23  ;;  %v2382_v17 = vunpack.c.h.s8.bf16 %v838_v11  ;;  %v835_v23 = vld [vmem:[%s7175_s16 + $0x1008] sm:$0xff]  ;;  %v2378_v26 = vunpack.c.l.s8.bf16 %v838_v11  ;;  %v862_v11 = vld [vmem:[%s7175_s16 + $0x10e0] sm:$0xff] }
 0x276   : > { %v2375_v34 = vunpack.c.h.s8.bf16 %v835_v23 }
 0x277   : > { %4528 = vmatpush1.bf16.msra.mxu0 %v2390_v39  ;;  %v834_v39 = vld [vmem:[%s7175_s16 + $0x1000] sm:$0xff] }
 0x278   : > { %4569 = vmatpush1.bf16.msra.mxu1 %v2454_v41  ;;  %4529 = vmatprep.subr.bf16.mxu0 %v2387_v37  ;;  %v866_v41 = vld [vmem:[%s7175_s16 + $0x1100] sm:$0xff]  ;;  %v2374_v51 = vunpack.c.h.s8.bf16 %v834_v39  ;;  %v2371_v37 = vunpack.c.l.s8.bf16 %v835_v23  ;;  %v859_v23 = vld [vmem:[%s7175_s16 + $0x10c8] sm:$0xff] }
 0x279   : > { %4570 = vmatprep.subr.bf16.mxu1 %v2451_v53  ;;  %v2438_v20 = vunpack.c.h.s8.bf16 %v866_v41  ;;  %v2435_v53 = vunpack.c.l.s8.bf16 %v867_v24  ;;  %v891_v24 = vld [vmem:[%s7175_s16 + $0x11c8] sm:$0xff] }
 0x27b   : > { %4530 = vmatpush1.bf16.msra.mxu0 %v2386_v9  ;;  %v2370_v9 = vunpack.c.l.s8.bf16 %v834_v39  ;;  %v858_v39 = vld [vmem:[%s7175_s16 + $0x10c0] sm:$0xff] }
 0x27c   : > { %4571 = vmatpush1.bf16.msra.mxu1 %v2450_v14  ;;  %4531 = vmatprep.subr.bf16.mxu0 %v2383_v22  ;;  %v2434_v14 = vunpack.c.l.s8.bf16 %v866_v41  ;;  %v2431_v22 = vunpack.c.h.s8.bf16 %v863_v25  ;;  %v890_v41 = vld [vmem:[%s7175_s16 + $0x11c0] sm:$0xff] }
 0x27d   : > { %4572 = vmatprep.subr.bf16.mxu1 %v2447_v4  ;;  %v2495_v4 = vunpack.c.h.s8.bf16 %v895_v60 }
 0x27f   : > { %4532 = vmatpush1.bf16.msra.mxu0 %v2382_v17  ;;  %v2430_v17 = vunpack.c.h.s8.bf16 %v862_v11 }
 0x280   : > { %4573 = vmatpush1.bf16.msra.mxu1 %v2446_v61  ;;  %4533 = vmatprep.subr.bf16.mxu0 %v2379_v10  ;;  %v2494_v61 = vunpack.c.h.s8.bf16 %v894_v8  ;;  %v2427_v10 = vunpack.c.l.s8.bf16 %v863_v25  ;;  %v855_v25 = vld [vmem:[%s7175_s16 + $0x10a8] sm:$0xff] }
 0x281   : > { %4574 = vmatprep.subr.bf16.mxu1 %v2443_v19  ;;  %v2491_v19 = vunpack.c.l.s8.bf16 %v895_v60  ;;  %v887_v60 = vld [vmem:[%s7175_s16 + $0x11a8] sm:$0xff] }
 0x283   : > { %4534 = vmatpush1.bf16.msra.mxu0 %v2378_v26  ;;  %v2426_v26 = vunpack.c.l.s8.bf16 %v862_v11  ;;  %v854_v11 = vld [vmem:[%s7175_s16 + $0x10a0] sm:$0xff] }
 0x284   : > { %4575 = vmatpush1.bf16.msra.mxu1 %v2442_v62  ;;  %4535 = vmatprep.subr.bf16.mxu0 %v2375_v34  ;;  %v2490_v62 = vunpack.c.l.s8.bf16 %v894_v8  ;;  %v2423_v34 = vunpack.c.h.s8.bf16 %v859_v23  ;;  %v886_v8 = vld [vmem:[%s7175_s16 + $0x11a0] sm:$0xff] }
 0x285   : > { %4576 = vmatprep.subr.bf16.mxu1 %v2439_v7  ;;  %v2487_v7 = vunpack.c.h.s8.bf16 %v891_v24 }
 0x287   : > { %4536 = vmatpush1.bf16.msra.mxu0 %v2374_v51  ;;  %v2422_v51 = vunpack.c.h.s8.bf16 %v858_v39 }
 0x288   : > { %4577 = vmatpush1.bf16.msra.mxu1 %v2438_v20  ;;  %4537 = vmatprep.subr.bf16.mxu0 %v2371_v37  ;;  %v2486_v20 = vunpack.c.h.s8.bf16 %v890_v41  ;;  %v2419_v37 = vunpack.c.l.s8.bf16 %v859_v23  ;;  %v851_v23 = vld [vmem:[%s7175_s16 + $0x1088] sm:$0xff] }
 0x289   : > { %4578 = vmatprep.subr.bf16.mxu1 %v2435_v53  ;;  %v2483_v53 = vunpack.c.l.s8.bf16 %v891_v24  ;;  %v883_v24 = vld [vmem:[%s7175_s16 + $0x1188] sm:$0xff] }
 0x28b   : > { %4538 = vmatpush1.bf16.msra.mxu0 %v2370_v9  ;;  %v2418_v9 = vunpack.c.l.s8.bf16 %v858_v39  ;;  %v2471_v39 = vunpack.c.h.s8.bf16 %v883_v24 }
 0x28c   : > { %4579 = vmatpush1.bf16.msra.mxu1 %v2434_v14  ;;  %4539 = vmatprep.subr.bf16.mxu0 %v2431_v22  ;;  %v2482_v14 = vunpack.c.l.s8.bf16 %v890_v41  ;;  %v2415_v22 = vunpack.c.h.s8.bf16 %v855_v25  ;;  %v850_v41 = vld [vmem:[%s7175_s16 + $0x1080] sm:$0xff] }
 0x28d   : > { %4580 = vmatprep.subr.bf16.mxu1 %v2495_v4  ;;  %v2479_v4 = vunpack.c.h.s8.bf16 %v887_v60 }
 0x28f   : > { %4540 = vmatpush2.bf16.msra.mxu0 %v2430_v17  ;;  %v2414_v17 = vunpack.c.h.s8.bf16 %v854_v11 }
 0x290   : > { %4581 = vmatpush2.bf16.msra.mxu1 %v2494_v61  ;;  %4541 = vmatprep.subr.bf16.mxu0 %v2427_v10  ;;  %v2478_v61 = vunpack.c.h.s8.bf16 %v886_v8  ;;  %v2411_v10 = vunpack.c.l.s8.bf16 %v855_v25  ;;  %v2467_v25 = vunpack.c.l.s8.bf16 %v883_v24 }
 0x291   : > { %4582 = vmatprep.subr.bf16.mxu1 %v2491_v19  ;;  %v2475_v19 = vunpack.c.l.s8.bf16 %v887_v60  ;;  %v911_v60 = vld [vmem:[%s7175_s16 + $0x1268] sm:$0xff] }
 0x293   : > { %4542 = vmatpush2.bf16.msra.mxu0 %v2426_v26  ;;  %v3607_v26 = vcombine.high %v7685_v5, %v7685_v5  ;;  %v2403_v5 = vunpack.c.l.s8.bf16 %v851_v23 }
 0x294   : > { %4583 = vmatpush2.bf16.msra.mxu1 %v2490_v62  ;;  %4543 = vmatprep.subr.bf16.mxu0 %v2423_v34  ;;  %v2410_v62 = vunpack.c.l.s8.bf16 %v854_v11  ;;  %v2474_v34 = vunpack.c.l.s8.bf16 %v886_v8  ;;  %v2527_v8 = vunpack.c.h.s8.bf16 %v911_v60 }
 0x295   : > { %4584 = vmatprep.subr.bf16.mxu1 %v2487_v7  ;;  %v2407_v7 = vunpack.c.h.s8.bf16 %v851_v23 }
 0x297   : > { %4544 = vmatpush2.bf16.msra.mxu0 %v2422_v51  ;;  %v882_v51 = vld [vmem:[%s7175_s16 + $0x1180] sm:$0xff] }
 0x298   : > { %4585 = vmatpush2.bf16.msra.mxu1 %v2486_v20  ;;  %4545 = vmatprep.subr.bf16.mxu0 %v2419_v37  ;;  %v7755_v20 = vrot.slane %v3607_v26, %v7219_v49  ;;  %v2406_v37 = vunpack.c.h.s8.bf16 %v850_v41  ;;  %v2466_v11 = vunpack.c.l.s8.bf16 %v882_v51  ;;  %v2523_v26 = vunpack.c.l.s8.bf16 %v911_v60 }
 0x299   : > { %4586 = vmatprep.subr.bf16.mxu1 %v2483_v53  ;;  %v2470_v53 = vunpack.c.h.s8.bf16 %v882_v51 }
 0x29b   : > { %4546 = vmatpush2.bf16.msra.mxu0 %v2418_v9  ;;  %v943_v9 = vld [vmem:[%s7175_s16 + $0x1368] sm:$0xff] }
 0x29c   : > { %4587 = vmatpush2.bf16.msra.mxu1 %v2482_v14  ;;  %4547 = vmatprep.subr.bf16.mxu0 %v2415_v22  ;;  %v3623_v14 = vcombine.high %v7755_v20, %v7755_v20  ;;  %v7763_v22 = vrot.slane %v7691_v16, %v7219_v49 }
 0x29d   : > { %4588 = vmatprep.subr.bf16.mxu1 %v2479_v4  ;;  %v2402_v4 = vunpack.c.l.s8.bf16 %v850_v41 }
 0x29e   : > { %v7772_v23 = vcombine.high %v7763_v22, %v7763_v22 }
 0x29f   : > { %4548 = vmatpush2.bf16.msra.mxu0 %v2414_v17  ;;  %v2591_v17 = vunpack.c.h.s8.bf16 %v943_v9 }
 0x2a0   : > { %4589 = vmatpush2.bf16.msra.mxu1 %v2478_v61  ;;  %4549 = vmatprep.subr.bf16.mxu0 %v2411_v10  ;;  %v910_v61 = vld [vmem:[%s7175_s16 + $0x1260] sm:$0xff]  ;;  %8963 = vst [vmem:[#allocation16_spill] sm:$0xff] %v7772_v23 }
 0x2a1   : > { %4590 = vmatprep.subr.bf16.mxu1 %v2475_v19  ;;  %v942_v10 = vld [vmem:[%s7175_s16 + $0x1360] sm:$0xff]  ;;  %v7768_v19 = vrot.slane %v3623_v14, %v7219_v49  ;;  %v2526_v16 = vunpack.c.h.s8.bf16 %v910_v61 }
 0x2a2   : > { %v2590_v24 = vunpack.c.h.s8.bf16 %v942_v10 }
 0x2a3   : > { %4550 = vmatpush2.bf16.msra.mxu0 %v2410_v62  ;;  %8962 = vst [vmem:[#allocation15_spill] sm:$0xff] %v7768_v19  ;;  %v2587_v62 = vunpack.c.l.s8.bf16 %v943_v9 }
 0x2a4   : > { %4591 = vmatpush2.bf16.msra.mxu1 %v2474_v34  ;;  %4551 = vmatprep.subr.bf16.mxu0 %v2407_v7  ;;  %v907_v34 = vld [vmem:[%s7175_s16 + $0x1248] sm:$0xff] }
 0x2a5   : > { %4592 = vmatprep.subr.bf16.mxu1 %v2471_v39  ;;  %v939_v7 = vld [vmem:[%s7175_s16 + $0x1348] sm:$0xff]  ;;  %v7778_v39 = vcombine.high %v7768_v19, %v7768_v19  ;;  %v2519_v9 = vunpack.c.h.s8.bf16 %v907_v34 }
 0x2a6   : > { %v2583_v14 = vunpack.c.h.s8.bf16 %v939_v7 }
 0x2a7   : > { %4552 = vmatpush2.bf16.msra.mxu0 %v2406_v37  ;;  %8964 = vst [vmem:[#allocation17_spill] sm:$0xff] %v7778_v39 }
 0x2a8   : > { %4593 = vmatpush2.bf16.msra.mxu1 %v2470_v53  ;;  %4553 = vmatprep.subr.bf16.mxu0 %v2403_v5  ;;  %v2522_v53 = vunpack.c.l.s8.bf16 %v910_v61  ;;  %v2586_v5 = vunpack.c.l.s8.bf16 %v942_v10 }
 0x2a9   : > { %4594 = vmatprep.subr.bf16.mxu1 %v2467_v25 }
 0x2ab   : > { %4554 = vmatpush2.bf16.msra.mxu0 %v2402_v4  ;;  %v906_v4 = vld [vmem:[%s7175_s16 + $0x1240] sm:$0xff] }
 0x2ac   : > { %4595 = vmatpush2.bf16.msra.mxu1 %v2466_v11  ;;  %4605 = vmatprep.subr.bf16.mxu0 %v2527_v8  ;;  %v938_v11 = vld [vmem:[%s7175_s16 + $0x1340] sm:$0xff] }
 0x2ad   : > { %4646 = vmatprep.subr.bf16.mxu1 %v2591_v17 }
 0x2ae   : > { %v4311_v41 = vpop.f32.mrf.mxu0  ;;  %4556 = vmatmul.mubr.bf16.vlgmr.msra.gmra.mxu0 %v7763_v22 }
 0x2af   : > { %v4352_v51 = vpop.f32.mrf.mxu1  ;;  %4597 = vmatmul.mubr.bf16.vlgmr.msra.gmra.mxu1 %v7772_v23  ;;  %v4312_v37 = vadd.f32 %v4311_v41, %v7721_v28  ;;  %4606 = vmatpush1.bf16.msra.mxu0 %v2526_v16  ;;  %v2518_v16 = vunpack.c.h.s8.bf16 %v906_v4  ;;  %v2579_v41 = vunpack.c.l.s8.bf16 %v939_v7 }
 0x2b0   : > { %4647 = vmatpush1.bf16.msra.mxu1 %v2590_v24  ;;  %v4313_v25 = vpop.f32.mrf.mxu0  ;;  %4607 = vmatprep.subr.bf16.mxu0 %v2523_v26  ;;  %v2582_v24 = vunpack.c.h.s8.bf16 %v938_v11 }
 0x2b1   : > { %v4354_v60 = vpop.f32.mrf.mxu1  ;;  %4648 = vmatprep.subr.bf16.mxu1 %v2587_v62  ;;  %v7785_v8 = vadd.f32 %v4352_v51, %v4312_v37  ;;  %v4314_v17 = vadd.f32 %v4313_v25, %v7726_v36  ;;  %4637 = vmatprep.mubr.bf16.mxu0 %v7768_v19  ;;  %v2515_v36 = vunpack.c.l.s8.bf16 %v907_v34  ;;  %v903_v51 = vld [vmem:[%s7175_s16 + $0x1228] sm:$0xff]  ;;  %v2514_v25 = vunpack.c.l.s8.bf16 %v906_v4  ;;  %v1002_v19 = vld [vmem:[%s7175_s16 + $0x1540] sm:$0xff] }
 0x2b2   : > { %4678 = vmatprep.mubr.bf16.mxu1 %v7778_v39  ;;  %v4315_v28 = vpop.f32.mrf.mxu0  ;;  %v935_v37 = vld [vmem:[%s7175_s16 + $0x1328] sm:$0xff]  ;;  %v2507_v7 = vunpack.c.l.s8.bf16 %v903_v51  ;;  %v970_v39 = vld [vmem:[%s7175_s16 + $0x1440] sm:$0xff] }
 0x2b3   : > { %v4356_v61 = vpop.f32.mrf.mxu1  ;;  %v7790_v10 = vadd.f32 %v4354_v60, %v4314_v17  ;;  %4608 = vmatpush1.bf16.msra.mxu0 %v2522_v53  ;;  %v2578_v60 = vunpack.c.l.s8.bf16 %v938_v11  ;;  %v2511_v53 = vunpack.c.h.s8.bf16 %v903_v51  ;;  %v902_v17 = vld [vmem:[%s7175_s16 + $0x1220] sm:$0xff]  ;;  %v899_v4 = vld [vmem:[%s7175_s16 + $0x1208] sm:$0xff] }
 0x2b4   : > { %4649 = vmatpush1.bf16.msra.mxu1 %v2586_v5  ;;  %v4316_v26 = vpop.f32.mrf.mxu0  ;;  %4609 = vmatprep.subr.bf16.mxu0 %v2519_v9  ;;  %v2575_v5 = vunpack.c.h.s8.bf16 %v935_v37  ;;  %v934_v28 = vld [vmem:[%s7175_s16 + $0x1320] sm:$0xff]  ;;  %v2510_v9 = vunpack.c.h.s8.bf16 %v902_v17  ;;  %v931_v61 = vld [vmem:[%s7175_s16 + $0x1308] sm:$0xff]  ;;  %v2506_v11 = vunpack.c.l.s8.bf16 %v902_v17 }
 0x2b5   : > { %v4357_v62 = vpop.f32.mrf.mxu1  ;;  %4650 = vmatprep.subr.bf16.mxu1 %v2583_v14  ;;  %v2574_v34 = vunpack.c.h.s8.bf16 %v934_v28  ;;  %v2571_v14 = vunpack.c.l.s8.bf16 %v935_v37  ;;  %v2567_v26 = vunpack.c.h.s8.bf16 %v931_v61  ;;  %v2499_v37 = vunpack.c.l.s8.bf16 %v899_v4 }
 0x2b6   : > { %v898_v62 = vld [vmem:[%s7175_s16 + $0x1200] sm:$0xff] }
 0x2b7   : > { %4610 = vmatpush1.bf16.msra.mxu0 %v2518_v16  ;;  %v2570_v16 = vunpack.c.l.s8.bf16 %v934_v28 }
 0x2b8   : > { %4651 = vmatpush1.bf16.msra.mxu1 %v2582_v24  ;;  %4611 = vmatprep.subr.bf16.mxu0 %v2515_v36  ;;  %v2503_v24 = vunpack.c.h.s8.bf16 %v899_v4  ;;  %v930_v36 = vld [vmem:[%s7175_s16 + $0x1300] sm:$0xff] }
 0x2b9   : > { %4652 = vmatprep.subr.bf16.mxu1 %v2579_v41  ;;  %v2502_v41 = vunpack.c.h.s8.bf16 %v898_v62  ;;  %v2566_v51 = vunpack.c.h.s8.bf16 %v930_v36  ;;  %v2562_v17 = vunpack.c.l.s8.bf16 %v930_v36 }
 0x2bb   : > { %4612 = vmatpush1.bf16.msra.mxu0 %v2514_v25  ;;  %v2563_v25 = vunpack.c.l.s8.bf16 %v931_v61 }
 0x2bc   : > { %4653 = vmatpush1.bf16.msra.mxu1 %v2578_v60  ;;  %4613 = vmatprep.subr.bf16.mxu0 %v2511_v53  ;;  %v927_v60 = vld [vmem:[%s7175_s16 + $0x12e8] sm:$0xff] }
 0x2bd   : > { %4654 = vmatprep.subr.bf16.mxu1 %v2575_v5  ;;  %v959_v53 = vld [vmem:[%s7175_s16 + $0x13e8] sm:$0xff]  ;;  %v2498_v5 = vunpack.c.l.s8.bf16 %v898_v62  ;;  %v2559_v28 = vunpack.c.h.s8.bf16 %v927_v60  ;;  %v2555_v61 = vunpack.c.l.s8.bf16 %v927_v60 }
 0x2bf   : > { %4614 = vmatpush1.bf16.msra.mxu0 %v2510_v9  ;;  %v2623_v9 = vunpack.c.h.s8.bf16 %v959_v53 }
 0x2c0   : > { %4655 = vmatpush1.bf16.msra.mxu1 %v2574_v34  ;;  %4615 = vmatprep.subr.bf16.mxu0 %v2507_v7  ;;  %v926_v34 = vld [vmem:[%s7175_s16 + $0x12e0] sm:$0xff] }
 0x2c1   : > { %4656 = vmatprep.subr.bf16.mxu1 %v2571_v14  ;;  %v958_v7 = vld [vmem:[%s7175_s16 + $0x13e0] sm:$0xff]  ;;  %v2558_v14 = vunpack.c.h.s8.bf16 %v926_v34 }
 0x2c2   : > { %v2622_v4 = vunpack.c.h.s8.bf16 %v958_v7  ;;  %v2618_v62 = vunpack.c.l.s8.bf16 %v958_v7 }
 0x2c3   : > { %4616 = vmatpush1.bf16.msra.mxu0 %v2506_v11  ;;  %v2619_v11 = vunpack.c.l.s8.bf16 %v959_v53 }
 0x2c4   : > { %4657 = vmatpush1.bf16.msra.mxu1 %v2570_v16  ;;  %4617 = vmatprep.subr.bf16.mxu0 %v2503_v24  ;;  %v923_v16 = vld [vmem:[%s7175_s16 + $0x12c8] sm:$0xff] }
 0x2c5   : > { %4658 = vmatprep.subr.bf16.mxu1 %v2567_v26  ;;  %v955_v24 = vld [vmem:[%s7175_s16 + $0x13c8] sm:$0xff]  ;;  %v2554_v26 = vunpack.c.l.s8.bf16 %v926_v34  ;;  %v2551_v36 = vunpack.c.h.s8.bf16 %v923_v16  ;;  %v2547_v53 = vunpack.c.l.s8.bf16 %v923_v16 }
 0x2c7   : > { %4618 = vmatpush1.bf16.msra.mxu0 %v2502_v41  ;;  %v2615_v41 = vunpack.c.h.s8.bf16 %v955_v24 }
 0x2c8   : > { %4659 = vmatpush1.bf16.msra.mxu1 %v2566_v51  ;;  %4619 = vmatprep.subr.bf16.mxu0 %v2499_v37  ;;  %v922_v51 = vld [vmem:[%s7175_s16 + $0x12c0] sm:$0xff] }
 0x2c9   : > { %4660 = vmatprep.subr.bf16.mxu1 %v2563_v25  ;;  %v954_v37 = vld [vmem:[%s7175_s16 + $0x13c0] sm:$0xff]  ;;  %v2550_v25 = vunpack.c.h.s8.bf16 %v922_v51 }
 0x2ca   : > { %v2614_v60 = vunpack.c.h.s8.bf16 %v954_v37  ;;  %v2610_v34 = vunpack.c.l.s8.bf16 %v954_v37 }
 0x2cb   : > { %4620 = vmatpush1.bf16.msra.mxu0 %v2498_v5  ;;  %v2611_v5 = vunpack.c.l.s8.bf16 %v955_v24 }
 0x2cc   : > { %4661 = vmatpush1.bf16.msra.mxu1 %v2562_v17  ;;  %4621 = vmatprep.subr.bf16.mxu0 %v2559_v28  ;;  %v919_v17 = vld [vmem:[%s7175_s16 + $0x12a8] sm:$0xff] }
 0x2cd   : > { %4662 = vmatprep.subr.bf16.mxu1 %v2623_v9  ;;  %v951_v28 = vld [vmem:[%s7175_s16 + $0x13a8] sm:$0xff]  ;;  %v2546_v9 = vunpack.c.l.s8.bf16 %v922_v51  ;;  %v2543_v7 = vunpack.c.h.s8.bf16 %v919_v17  ;;  %v2539_v24 = vunpack.c.l.s8.bf16 %v919_v17 }
 0x2cf   : > { %4622 = vmatpush2.bf16.msra.mxu0 %v2558_v14  ;;  %v2607_v14 = vunpack.c.h.s8.bf16 %v951_v28 }
 0x2d0   : > { %4663 = vmatpush2.bf16.msra.mxu1 %v2622_v4  ;;  %4623 = vmatprep.subr.bf16.mxu0 %v2555_v61  ;;  %v918_v4 = vld [vmem:[%s7175_s16 + $0x12a0] sm:$0xff] }
 0x2d1   : > { %4664 = vmatprep.subr.bf16.mxu1 %v2619_v11  ;;  %v950_v61 = vld [vmem:[%s7175_s16 + $0x13a0] sm:$0xff]  ;;  %v2542_v11 = vunpack.c.h.s8.bf16 %v918_v4  ;;  %v2538_v51 = vunpack.c.l.s8.bf16 %v918_v4  ;;  %v1007_v4 = vld [vmem:[%s7175_s16 + $0x1568] sm:$0xff] }
 0x2d2   : > { %v2606_v16 = vunpack.c.h.s8.bf16 %v950_v61  ;;  %v2602_v37 = vunpack.c.l.s8.bf16 %v950_v61 }
 0x2d3   : > { %4624 = vmatpush2.bf16.msra.mxu0 %v2554_v26  ;;  %v2603_v26 = vunpack.c.l.s8.bf16 %v951_v28 }
 0x2d4   : > { %4665 = vmatpush2.bf16.msra.mxu1 %v2618_v62  ;;  %4625 = vmatprep.subr.bf16.mxu0 %v2551_v36  ;;  %v915_v62 = vld [vmem:[%s7175_s16 + $0x1288] sm:$0xff] }
 0x2d5   : > { %4666 = vmatprep.subr.bf16.mxu1 %v2615_v41  ;;  %v947_v36 = vld [vmem:[%s7175_s16 + $0x1388] sm:$0xff]  ;;  %v7815_v41 = vld [vmem:[%s7193_s27 + $0x28] sm:$0xff] }
 0x2d6   : > { %v7821_v17 = vrot.slane %v7815_v41, %v7219_v49 }
 0x2d7   : > { %4626 = vmatpush2.bf16.msra.mxu0 %v2550_v25  ;;  %v2535_v25 = vunpack.c.h.s8.bf16 %v915_v62 }
 0x2d8   : > { %4667 = vmatpush2.bf16.msra.mxu1 %v2614_v60  ;;  %4627 = vmatprep.subr.bf16.mxu0 %v2547_v53  ;;  %v2599_v60 = vunpack.c.h.s8.bf16 %v947_v36  ;;  %v914_v53 = vld [vmem:[%s7175_s16 + $0x1280] sm:$0xff]  ;;  %v3671_v61 = vcombine.high %v7821_v17, %v7821_v17 }
 0x2d9   : > { %4668 = vmatprep.subr.bf16.mxu1 %v2611_v5  ;;  %v946_v5 = vld [vmem:[%s7175_s16 + $0x1380] sm:$0xff]  ;;  %v2534_v28 = vunpack.c.h.s8.bf16 %v914_v53 }
 0x2db   : > { %4628 = vmatpush2.bf16.msra.mxu0 %v2546_v9  ;;  %v2598_v9 = vunpack.c.h.s8.bf16 %v946_v5 }
 0x2dc   : > { %4669 = vmatpush2.bf16.msra.mxu1 %v2610_v34  ;;  %4629 = vmatprep.subr.bf16.mxu0 %v2543_v7  ;;  %v2531_v34 = vunpack.c.l.s8.bf16 %v915_v62  ;;  %v2595_v7 = vunpack.c.l.s8.bf16 %v947_v36  ;;  %v2719_v62 = vunpack.c.h.s8.bf16 %v1007_v4  ;;  %v974_v36 = vld [vmem:[%s7175_s16 + $0x1460] sm:$0xff] }
 0x2dd   : > { %4670 = vmatprep.subr.bf16.mxu1 %v2607_v14  ;;  %v975_v14 = vld [vmem:[%s7175_s16 + $0x1468] sm:$0xff] }
 0x2df   : > { %4630 = vmatpush2.bf16.msra.mxu0 %v2542_v11  ;;  %v7829_v11 = vrot.slane %v7755_v20, %v7219_v49  ;;  %v2654_v20 = vunpack.c.h.s8.bf16 %v974_v36 }
 0x2e0   : > { %4671 = vmatpush2.bf16.msra.mxu1 %v2606_v16  ;;  %4631 = vmatprep.subr.bf16.mxu0 %v2539_v24  ;;  %v2530_v16 = vunpack.c.l.s8.bf16 %v914_v53  ;;  %v2594_v24 = vunpack.c.l.s8.bf16 %v946_v5  ;;  %v2651_v53 = vunpack.c.l.s8.bf16 %v975_v14  ;;  %v2715_v5 = vunpack.c.l.s8.bf16 %v1007_v4 }
 0x2e1   : > { %4672 = vmatprep.subr.bf16.mxu1 %v2603_v26  ;;  %8965 = vst [vmem:[#allocation18_spill] sm:$0xff] %v7829_v11  ;;  %v2655_v26 = vunpack.c.h.s8.bf16 %v975_v14  ;;  %v2650_v14 = vunpack.c.l.s8.bf16 %v974_v36 }
 0x2e3   : > { %4632 = vmatpush2.bf16.msra.mxu0 %v2538_v51  ;;  %v1006_v51 = vld [vmem:[%s7175_s16 + $0x1560] sm:$0xff] }
 0x2e4   : > { %4673 = vmatpush2.bf16.msra.mxu1 %v2602_v37  ;;  %4633 = vmatprep.subr.bf16.mxu0 %v2535_v25  ;;  %v7834_v37 = vrot.slane %v3671_v61, %v7219_v49  ;;  %v7838_v25 = vcombine.high %v7829_v11, %v7829_v11  ;;  %v2714_v4 = vunpack.c.l.s8.bf16 %v1006_v51 }
 0x2e5   : > { %4674 = vmatprep.subr.bf16.mxu1 %v2599_v60  ;;  %v2718_v60 = vunpack.c.h.s8.bf16 %v1006_v51 }
 0x2e6   : > { %8966 = vst [vmem:[#allocation19_spill] sm:$0xff] %v7834_v37  ;;  %8967 = vst [vmem:[#allocation20_spill] sm:$0xff] %v7838_v25 }
 0x2e7   : > { %4634 = vmatpush2.bf16.msra.mxu0 %v2534_v28  ;;  %v971_v28 = vld [vmem:[%s7175_s16 + $0x1448] sm:$0xff] }
 0x2e8   : > { %4675 = vmatpush2.bf16.msra.mxu1 %v2598_v9  ;;  %4635 = vmatprep.subr.bf16.mxu0 %v2531_v34  ;;  %v1003_v9 = vld [vmem:[%s7175_s16 + $0x1548] sm:$0xff]  ;;  %v7844_v34 = vcombine.high %v7834_v37, %v7834_v37 }
 0x2e9   : > { %4676 = vmatprep.subr.bf16.mxu1 %v2595_v7  ;;  %v2711_v38 = vunpack.c.h.s8.bf16 %v1003_v9 }
 0x2ea   : > { %8968 = vst [vmem:[#allocation21_spill] sm:$0xff] %v7844_v34 }
 0x2eb   : > { %4636 = vmatpush2.bf16.msra.mxu0 %v2530_v16 }
 0x2ec   : > { %4677 = vmatpush2.bf16.msra.mxu1 %v2594_v24  ;;  %4687 = vmatprep.subr.bf16.mxu0 %v2655_v26 }
 0x2ed   : > { %4728 = vmatprep.subr.bf16.mxu1 %v2719_v62  ;;  %v2647_v62 = vunpack.c.h.s8.bf16 %v971_v28 }
 0x2ee   : > { %v4393_v7 = vpop.f32.mrf.mxu0  ;;  %4638 = vmatmul.mubr.bf16.vlgmr.msra.gmra.mxu0 %v7829_v11 }
 0x2ef   : > { %v4434_v61 = vpop.f32.mrf.mxu1  ;;  %4679 = vmatmul.mubr.bf16.vlgmr.msra.gmra.mxu1 %v7838_v25  ;;  %v4394_v16 = vadd.f32 %v4393_v7, %v7785_v8  ;;  %4688 = vmatpush1.bf16.msra.mxu0 %v2654_v20  ;;  %v2646_v20 = vunpack.c.h.s8.bf16 %v970_v39  ;;  %v2707_v7 = vunpack.c.l.s8.bf16 %v1003_v9 }
 0x2f0   : > { %4729 = vmatpush1.bf16.msra.mxu1 %v2718_v60  ;;  %v4395_v24 = vpop.f32.mrf.mxu0  ;;  %4689 = vmatprep.subr.bf16.mxu0 %v2651_v53  ;;  %v2710_v60 = vunpack.c.h.s8.bf16 %v1002_v19 }
 0x2f1   : > { %v4436_v26 = vpop.f32.mrf.mxu1  ;;  %4730 = vmatprep.subr.bf16.mxu1 %v2715_v5  ;;  %v7851_v23 = vadd.f32 %v4434_v61, %v4394_v16  ;;  %v4396_v11 = vadd.f32 %v4395_v24, %v7790_v10  ;;  %4719 = vmatprep.mubr.bf16.mxu0 %v7834_v37  ;;  %v2643_v10 = vunpack.c.l.s8.bf16 %v971_v28  ;;  %v967_v61 = vld [vmem:[%s7175_s16 + $0x1428] sm:$0xff]  ;;  %v2642_v24 = vunpack.c.l.s8.bf16 %v970_v39 }
 0x2f2   : > { %4760 = vmatprep.mubr.bf16.mxu1 %v7844_v34  ;;  %v4397_v8 = vpop.f32.mrf.mxu0  ;;  %v999_v16 = vld [vmem:[%s7175_s16 + $0x1528] sm:$0xff]  ;;  %v2635_v28 = vunpack.c.l.s8.bf16 %v967_v61  ;;  %v1066_v34 = vld [vmem:[%s7175_s16 + $0x1740] sm:$0xff] }
 0x2f3   : > { %v4438_v36 = vpop.f32.mrf.mxu1  ;;  %v7856_v51 = vadd.f32 %v4436_v26, %v4396_v11  ;;  %4690 = vmatpush1.bf16.msra.mxu0 %v2650_v14  ;;  %v2706_v11 = vunpack.c.l.s8.bf16 %v1002_v19  ;;  %v2639_v14 = vunpack.c.h.s8.bf16 %v967_v61  ;;  %v966_v26 = vld [vmem:[%s7175_s16 + $0x1420] sm:$0xff]  ;;  %v2699_v9 = vunpack.c.l.s8.bf16 %v999_v16  ;;  %v963_v39 = vld [vmem:[%s7175_s16 + $0x1408] sm:$0xff] }
 0x2f4   : > { %4731 = vmatpush1.bf16.msra.mxu1 %v2714_v4  ;;  %v4398_v53 = vpop.f32.mrf.mxu0  ;;  %4691 = vmatprep.subr.bf16.mxu0 %v2647_v62  ;;  %v2703_v4 = vunpack.c.h.s8.bf16 %v999_v16  ;;  %v998_v8 = vld [vmem:[%s7175_s16 + $0x1520] sm:$0xff]  ;;  %v2638_v62 = vunpack.c.h.s8.bf16 %v966_v26  ;;  %v995_v36 = vld [vmem:[%s7175_s16 + $0x1508] sm:$0xff]  ;;  %v2634_v19 = vunpack.c.l.s8.bf16 %v966_v26  ;;  %v2627_v16 = vunpack.c.l.s8.bf16 %v963_v39 }
 0x2f5   : > { %v4439_v5 = vpop.f32.mrf.mxu1  ;;  %4732 = vmatprep.subr.bf16.mxu1 %v2711_v38  ;;  %v2702_v38 = vunpack.c.h.s8.bf16 %v998_v8  ;;  %v2695_v53 = vunpack.c.h.s8.bf16 %v995_v36 }
 0x2f6   : > { %v962_v5 = vld [vmem:[%s7175_s16 + $0x1400] sm:$0xff] }
 0x2f7   : > { %4692 = vmatpush1.bf16.msra.mxu0 %v2646_v20  ;;  %v2698_v20 = vunpack.c.l.s8.bf16 %v998_v8 }
 0x2f8   : > { %4733 = vmatpush1.bf16.msra.mxu1 %v2710_v60  ;;  %4693 = vmatprep.subr.bf16.mxu0 %v2643_v10  ;;  %v2631_v60 = vunpack.c.h.s8.bf16 %v963_v39  ;;  %v994_v10 = vld [vmem:[%s7175_s16 + $0x1500] sm:$0xff] }
 0x2f9   : > { %4734 = vmatprep.subr.bf16.mxu1 %v2707_v7  ;;  %v2630_v7 = vunpack.c.h.s8.bf16 %v962_v5  ;;  %v2694_v61 = vunpack.c.h.s8.bf16 %v994_v10  ;;  %v2690_v26 = vunpack.c.l.s8.bf16 %v994_v10 }
 0x2fb   : > { %4694 = vmatpush1.bf16.msra.mxu0 %v2642_v24  ;;  %v2691_v24 = vunpack.c.l.s8.bf16 %v995_v36 }
 0x2fc   : > { %4735 = vmatpush1.bf16.msra.mxu1 %v2706_v11  ;;  %4695 = vmatprep.subr.bf16.mxu0 %v2639_v14  ;;  %v991_v11 = vld [vmem:[%s7175_s16 + $0x14e8] sm:$0xff] }
 0x2fd   : > { %4736 = vmatprep.subr.bf16.mxu1 %v2703_v4  ;;  %v1023_v14 = vld [vmem:[%s7175_s16 + $0x15e8] sm:$0xff]  ;;  %v2626_v4 = vunpack.c.l.s8.bf16 %v962_v5  ;;  %v2687_v8 = vunpack.c.h.s8.bf16 %v991_v11  ;;  %v2683_v36 = vunpack.c.l.s8.bf16 %v991_v11 }
 0x2ff   : > { %4696 = vmatpush1.bf16.msra.mxu0 %v2638_v62  ;;  %v2751_v62 = vunpack.c.h.s8.bf16 %v1023_v14 }
 0x300   : > { %4737 = vmatpush1.bf16.msra.mxu1 %v2702_v38  ;;  %4697 = vmatprep.subr.bf16.mxu0 %v2635_v28  ;;  %v990_v38 = vld [vmem:[%s7175_s16 + $0x14e0] sm:$0xff] }
 0x301   : > { %4738 = vmatprep.subr.bf16.mxu1 %v2699_v9  ;;  %v1022_v28 = vld [vmem:[%s7175_s16 + $0x15e0] sm:$0xff]  ;;  %v2686_v9 = vunpack.c.h.s8.bf16 %v990_v38 }
 0x302   : > { %v2750_v39 = vunpack.c.h.s8.bf16 %v1022_v28  ;;  %v2746_v5 = vunpack.c.l.s8.bf16 %v1022_v28 }
 0x303   : > { %4698 = vmatpush1.bf16.msra.mxu0 %v2634_v19  ;;  %v2747_v19 = vunpack.c.l.s8.bf16 %v1023_v14 }
 0x304   : > { %4739 = vmatpush1.bf16.msra.mxu1 %v2698_v20  ;;  %4699 = vmatprep.subr.bf16.mxu0 %v2631_v60  ;;  %v987_v20 = vld [vmem:[%s7175_s16 + $0x14c8] sm:$0xff] }
 0x305   : > { %4740 = vmatprep.subr.bf16.mxu1 %v2695_v53  ;;  %v1019_v60 = vld [vmem:[%s7175_s16 + $0x15c8] sm:$0xff]  ;;  %v2682_v53 = vunpack.c.l.s8.bf16 %v990_v38  ;;  %v2679_v10 = vunpack.c.h.s8.bf16 %v987_v20  ;;  %v2675_v14 = vunpack.c.l.s8.bf16 %v987_v20 }
 0x307   : > { %4700 = vmatpush1.bf16.msra.mxu0 %v2630_v7  ;;  %v2743_v7 = vunpack.c.h.s8.bf16 %v1019_v60 }
 0x308   : > { %4741 = vmatpush1.bf16.msra.mxu1 %v2694_v61  ;;  %4701 = vmatprep.subr.bf16.mxu0 %v2627_v16  ;;  %v986_v61 = vld [vmem:[%s7175_s16 + $0x14c0] sm:$0xff] }
 0x309   : > { %4742 = vmatprep.subr.bf16.mxu1 %v2691_v24  ;;  %v1018_v16 = vld [vmem:[%s7175_s16 + $0x15c0] sm:$0xff]  ;;  %v2678_v24 = vunpack.c.h.s8.bf16 %v986_v61 }
 0x30a   : > { %v2742_v11 = vunpack.c.h.s8.bf16 %v1018_v16  ;;  %v2738_v38 = vunpack.c.l.s8.bf16 %v1018_v16 }
 0x30b   : > { %4702 = vmatpush1.bf16.msra.mxu0 %v2626_v4  ;;  %v2739_v4 = vunpack.c.l.s8.bf16 %v1019_v60 }
 0x30c   : > { %4743 = vmatpush1.bf16.msra.mxu1 %v2690_v26  ;;  %4703 = vmatprep.subr.bf16.mxu0 %v2687_v8  ;;  %v983_v26 = vld [vmem:[%s7175_s16 + $0x14a8] sm:$0xff] }
 0x30d   : > { %4744 = vmatprep.subr.bf16.mxu1 %v2751_v62  ;;  %v1015_v8 = vld [vmem:[%s7175_s16 + $0x15a8] sm:$0xff]  ;;  %v2674_v62 = vunpack.c.l.s8.bf16 %v986_v61  ;;  %v2671_v28 = vunpack.c.h.s8.bf16 %v983_v26  ;;  %v2667_v20 = vunpack.c.l.s8.bf16 %v983_v26 }
 0x30e   : > { %v2731_v60 = vunpack.c.l.s8.bf16 %v1015_v8 }
 0x30f   : > { %4704 = vmatpush2.bf16.msra.mxu0 %v2686_v9  ;;  %v2735_v9 = vunpack.c.h.s8.bf16 %v1015_v8 }
 0x310   : > { %4745 = vmatpush2.bf16.msra.mxu1 %v2750_v39  ;;  %4705 = vmatprep.subr.bf16.mxu0 %v2683_v36  ;;  %v982_v39 = vld [vmem:[%s7175_s16 + $0x14a0] sm:$0xff] }
 0x311   : > { %4746 = vmatprep.subr.bf16.mxu1 %v2747_v19  ;;  %v1014_v36 = vld [vmem:[%s7175_s16 + $0x15a0] sm:$0xff]  ;;  %v2670_v19 = vunpack.c.h.s8.bf16 %v982_v39  ;;  %v2666_v61 = vunpack.c.l.s8.bf16 %v982_v39 }
 0x312   : > { %v2730_v16 = vunpack.c.l.s8.bf16 %v1014_v36 }
 0x313   : > { %4706 = vmatpush2.bf16.msra.mxu0 %v2682_v53  ;;  %v2734_v53 = vunpack.c.h.s8.bf16 %v1014_v36  ;;  %v7893_v36 = vrot.slane %v7821_v17, %v7219_v49 }
 0x314   : > { %4747 = vmatpush2.bf16.msra.mxu1 %v2746_v5  ;;  %4707 = vmatprep.subr.bf16.mxu0 %v2679_v10  ;;  %v979_v5 = vld [vmem:[%s7175_s16 + $0x1488] sm:$0xff] }
 0x315   : > { %4748 = vmatprep.subr.bf16.mxu1 %v2743_v7  ;;  %v1011_v10 = vld [vmem:[%s7175_s16 + $0x1588] sm:$0xff]  ;;  %v3656_v7 = vcombine.high %v7815_v41, %v7815_v41  ;;  %v2659_v41 = vunpack.c.l.s8.bf16 %v979_v5  ;;  %8969 = vst [vmem:[#allocation22_spill] sm:$0xff] %v7893_v36 }
 0x317   : > { %4708 = vmatpush2.bf16.msra.mxu0 %v2678_v24  ;;  %v2663_v24 = vunpack.c.h.s8.bf16 %v979_v5  ;;  %v7885_v26 = vrot.slane %v3656_v7, %v7219_v49  ;;  %v1038_v5 = vld [vmem:[%s7175_s16 + $0x1660] sm:$0xff] }
 0x318   : > { %4749 = vmatpush2.bf16.msra.mxu1 %v2742_v11  ;;  %4709 = vmatprep.subr.bf16.mxu0 %v2675_v14  ;;  %v2727_v11 = vunpack.c.h.s8.bf16 %v1011_v10  ;;  %v978_v14 = vld [vmem:[%s7175_s16 + $0x1480] sm:$0xff]  ;;  %v2782_v17 = vunpack.c.h.s8.bf16 %v1038_v5 }
 0x319   : > { %4750 = vmatprep.subr.bf16.mxu1 %v2739_v4  ;;  %v1010_v4 = vld [vmem:[%s7175_s16 + $0x1580] sm:$0xff]  ;;  %v2662_v8 = vunpack.c.h.s8.bf16 %v978_v14  ;;  %v3672_v39 = vcombine.high %v7885_v26, %v7885_v26 }
 0x31b   : > { %4710 = vmatpush2.bf16.msra.mxu0 %v2674_v62  ;;  %v2726_v62 = vunpack.c.h.s8.bf16 %v1010_v4  ;;  %v7898_v7 = vrot.slane %v3672_v39, %v7219_v49 }
 0x31c   : > { %4751 = vmatpush2.bf16.msra.mxu1 %v2738_v38  ;;  %4711 = vmatprep.subr.bf16.mxu0 %v2671_v28  ;;  %v2723_v38 = vunpack.c.l.s8.bf16 %v1011_v10  ;;  %v1039_v28 = vld [vmem:[%s7175_s16 + $0x1668] sm:$0xff]  ;;  %v1070_v10 = vld [vmem:[%s7175_s16 + $0x1760] sm:$0xff] }
 0x31d   : > { %4752 = vmatprep.subr.bf16.mxu1 %v2735_v9  ;;  %v1071_v9 = vld [vmem:[%s7175_s16 + $0x1768] sm:$0xff]  ;;  %8970 = vst [vmem:[#allocation23_spill] sm:$0xff] %v7898_v7 }
 0x31f   : > { %4712 = vmatpush2.bf16.msra.mxu0 %v2670_v19  ;;  %v2658_v19 = vunpack.c.l.s8.bf16 %v978_v14  ;;  %v1035_v14 = vld [vmem:[%s7175_s16 + $0x1648] sm:$0xff] }
 0x320   : > { %4753 = vmatpush2.bf16.msra.mxu1 %v2734_v53  ;;  %4713 = vmatprep.subr.bf16.mxu0 %v2667_v20  ;;  %v2722_v53 = vunpack.c.l.s8.bf16 %v1010_v4  ;;  %v2783_v20 = vunpack.c.h.s8.bf16 %v1039_v28  ;;  %v1067_v4 = vld [vmem:[%s7175_s16 + $0x1748] sm:$0xff] }
 0x321   : > { %4754 = vmatprep.subr.bf16.mxu1 %v2731_v60  ;;  %v2847_v60 = vunpack.c.h.s8.bf16 %v1071_v9 }
 0x323   : > { %4714 = vmatpush2.bf16.msra.mxu0 %v2666_v61  ;;  %v7902_v61 = vcombine.high %v7893_v36, %v7893_v36 }
 0x324   : > { %4755 = vmatpush2.bf16.msra.mxu1 %v2730_v16  ;;  %4715 = vmatprep.subr.bf16.mxu0 %v2663_v24  ;;  %v2846_v16 = vunpack.c.h.s8.bf16 %v1070_v10  ;;  %v2779_v24 = vunpack.c.l.s8.bf16 %v1039_v28  ;;  %v2778_v28 = vunpack.c.l.s8.bf16 %v1038_v5 }
 0x325   : > { %4756 = vmatprep.subr.bf16.mxu1 %v2727_v11  ;;  %8971 = vst [vmem:[#allocation24_spill] sm:$0xff] %v7902_v61  ;;  %v2843_v11 = vunpack.c.l.s8.bf16 %v1071_v9  ;;  %v2842_v9 = vunpack.c.l.s8.bf16 %v1070_v10 }
 0x327   : > { %4716 = vmatpush2.bf16.msra.mxu0 %v2662_v8  ;;  %v7908_v8 = vcombine.high %v7898_v7, %v7898_v7 }
 0x328   : > { %4757 = vmatpush2.bf16.msra.mxu1 %v2726_v62  ;;  %4717 = vmatprep.subr.bf16.mxu0 %v2659_v41 }
 0x329   : > { %4758 = vmatprep.subr.bf16.mxu1 %v2723_v38  ;;  %8972 = vst [vmem:[#allocation25_spill] sm:$0xff] %v7908_v8 }
 0x32b   : > { %4718 = vmatpush2.bf16.msra.mxu0 %v2658_v19 }
 0x32c   : > { %4759 = vmatpush2.bf16.msra.mxu1 %v2722_v53  ;;  %4769 = vmatprep.subr.bf16.mxu0 %v2783_v20  ;;  %v2775_v53 = vunpack.c.h.s8.bf16 %v1035_v14  ;;  %v2839_v20 = vunpack.c.h.s8.bf16 %v1067_v4 }
 0x32d   : > { %4810 = vmatprep.subr.bf16.mxu1 %v2847_v60  ;;  %v1034_v60 = vld [vmem:[%s7175_s16 + $0x1640] sm:$0xff] }
 0x32e   : > { %v4475_v62 = vpop.f32.mrf.mxu0  ;;  %4720 = vmatmul.mubr.bf16.vlgmr.msra.gmra.mxu0 %v7893_v36 }
 0x32f   : > { %v4516_v41 = vpop.f32.mrf.mxu1  ;;  %4761 = vmatmul.mubr.bf16.vlgmr.msra.gmra.mxu1 %v7902_v61  ;;  %v4476_v38 = vadd.f32 %v4475_v62, %v7851_v23  ;;  %4770 = vmatpush1.bf16.msra.mxu0 %v2782_v17  ;;  %v2774_v17 = vunpack.c.h.s8.bf16 %v1034_v60  ;;  %v2835_v62 = vunpack.c.l.s8.bf16 %v1067_v4  ;;  %v1130_v61 = vld [vmem:[%s7175_s16 + $0x1940] sm:$0xff] }
 0x330   : > { %4811 = vmatpush1.bf16.msra.mxu1 %v2846_v16  ;;  %v4477_v39 = vpop.f32.mrf.mxu0  ;;  %4771 = vmatprep.subr.bf16.mxu0 %v2779_v24  ;;  %v2838_v16 = vunpack.c.h.s8.bf16 %v1066_v34 }
 0x331   : > { %v4518_v19 = vpop.f32.mrf.mxu1  ;;  %4812 = vmatprep.subr.bf16.mxu1 %v2843_v11  ;;  %v7915_v37 = vadd.f32 %v4516_v41, %v4476_v38  ;;  %v4478_v36 = vadd.f32 %v4477_v39, %v7856_v51  ;;  %4801 = vmatprep.mubr.bf16.mxu0 %v7898_v7  ;;  %v2771_v51 = vunpack.c.l.s8.bf16 %v1035_v14  ;;  %v1031_v41 = vld [vmem:[%s7175_s16 + $0x1628] sm:$0xff]  ;;  %v2770_v39 = vunpack.c.l.s8.bf16 %v1034_v60  ;;  %v1098_v7 = vld [vmem:[%s7175_s16 + $0x1840] sm:$0xff] }
 0x332   : > { %4842 = vmatprep.mubr.bf16.mxu1 %v7908_v8  ;;  %v4479_v23 = vpop.f32.mrf.mxu0  ;;  %v1063_v38 = vld [vmem:[%s7175_s16 + $0x1728] sm:$0xff]  ;;  %v2763_v4 = vunpack.c.l.s8.bf16 %v1031_v41 }
 0x333   : > { %v4520_v5 = vpop.f32.mrf.mxu1  ;;  %v7920_v10 = vadd.f32 %v4518_v19, %v4478_v36  ;;  %4772 = vmatpush1.bf16.msra.mxu0 %v2778_v28  ;;  %v2834_v36 = vunpack.c.l.s8.bf16 %v1066_v34  ;;  %v2767_v28 = vunpack.c.h.s8.bf16 %v1031_v41  ;;  %v1030_v19 = vld [vmem:[%s7175_s16 + $0x1620] sm:$0xff]  ;;  %v1027_v60 = vld [vmem:[%s7175_s16 + $0x1608] sm:$0xff] }
 0x334   : > { %4813 = vmatpush1.bf16.msra.mxu1 %v2842_v9  ;;  %v4480_v24 = vpop.f32.mrf.mxu0  ;;  %4773 = vmatprep.subr.bf16.mxu0 %v2775_v53  ;;  %v2831_v9 = vunpack.c.h.s8.bf16 %v1063_v38  ;;  %v1062_v23 = vld [vmem:[%s7175_s16 + $0x1720] sm:$0xff]  ;;  %v2766_v53 = vunpack.c.h.s8.bf16 %v1030_v19  ;;  %v1059_v5 = vld [vmem:[%s7175_s16 + $0x1708] sm:$0xff]  ;;  %v2762_v34 = vunpack.c.l.s8.bf16 %v1030_v19 }
 0x335   : > { %v4521_v11 = vpop.f32.mrf.mxu1  ;;  %4814 = vmatprep.subr.bf16.mxu1 %v2839_v20  ;;  %v2830_v14 = vunpack.c.h.s8.bf16 %v1062_v23  ;;  %v2827_v20 = vunpack.c.l.s8.bf16 %v1063_v38  ;;  %v2823_v24 = vunpack.c.h.s8.bf16 %v1059_v5  ;;  %v2755_v38 = vunpack.c.l.s8.bf16 %v1027_v60 }
 0x336   : > { %v1026_v11 = vld [vmem:[%s7175_s16 + $0x1600] sm:$0xff] }
 0x337   : > { %4774 = vmatpush1.bf16.msra.mxu0 %v2774_v17  ;;  %v2826_v17 = vunpack.c.l.s8.bf16 %v1062_v23 }
 0x338   : > { %4815 = vmatpush1.bf16.msra.mxu1 %v2838_v16  ;;  %4775 = vmatprep.subr.bf16.mxu0 %v2771_v51  ;;  %v2759_v16 = vunpack.c.h.s8.bf16 %v1027_v60  ;;  %v1058_v51 = vld [vmem:[%s7175_s16 + $0x1700] sm:$0xff] }
 0x339   : > { %4816 = vmatprep.subr.bf16.mxu1 %v2835_v62  ;;  %v2758_v62 = vunpack.c.h.s8.bf16 %v1026_v11  ;;  %v2822_v41 = vunpack.c.h.s8.bf16 %v1058_v51  ;;  %v2818_v19 = vunpack.c.l.s8.bf16 %v1058_v51 }
 0x33b   : > { %4776 = vmatpush1.bf16.msra.mxu0 %v2770_v39  ;;  %v2819_v39 = vunpack.c.l.s8.bf16 %v1059_v5 }
 0x33c   : > { %4817 = vmatpush1.bf16.msra.mxu1 %v2834_v36  ;;  %4777 = vmatprep.subr.bf16.mxu0 %v2767_v28  ;;  %v1055_v36 = vld [vmem:[%s7175_s16 + $0x16e8] sm:$0xff] }
 0x33d   : > { %4818 = vmatprep.subr.bf16.mxu1 %v2831_v9  ;;  %v1087_v28 = vld [vmem:[%s7175_s16 + $0x17e8] sm:$0xff]  ;;  %v2754_v9 = vunpack.c.l.s8.bf16 %v1026_v11  ;;  %v2815_v23 = vunpack.c.h.s8.bf16 %v1055_v36  ;;  %v2811_v5 = vunpack.c.l.s8.bf16 %v1055_v36 }
 0x33f   : > { %4778 = vmatpush1.bf16.msra.mxu0 %v2766_v53  ;;  %v2879_v53 = vunpack.c.h.s8.bf16 %v1087_v28 }
 0x340   : > { %4819 = vmatpush1.bf16.msra.mxu1 %v2830_v14  ;;  %4779 = vmatprep.subr.bf16.mxu0 %v2763_v4  ;;  %v1054_v14 = vld [vmem:[%s7175_s16 + $0x16e0] sm:$0xff] }
 0x341   : > { %4820 = vmatprep.subr.bf16.mxu1 %v2827_v20  ;;  %v1086_v4 = vld [vmem:[%s7175_s16 + $0x17e0] sm:$0xff]  ;;  %v2814_v20 = vunpack.c.h.s8.bf16 %v1054_v14 }
 0x342   : > { %v2878_v60 = vunpack.c.h.s8.bf16 %v1086_v4  ;;  %v2874_v11 = vunpack.c.l.s8.bf16 %v1086_v4 }
 0x343   : > { %4780 = vmatpush1.bf16.msra.mxu0 %v2762_v34  ;;  %v2875_v34 = vunpack.c.l.s8.bf16 %v1087_v28 }
 0x344   : > { %4821 = vmatpush1.bf16.msra.mxu1 %v2826_v17  ;;  %4781 = vmatprep.subr.bf16.mxu0 %v2759_v16  ;;  %v1051_v17 = vld [vmem:[%s7175_s16 + $0x16c8] sm:$0xff] }
 0x345   : > { %4822 = vmatprep.subr.bf16.mxu1 %v2823_v24  ;;  %v1083_v16 = vld [vmem:[%s7175_s16 + $0x17c8] sm:$0xff]  ;;  %v2810_v24 = vunpack.c.l.s8.bf16 %v1054_v14  ;;  %v2807_v51 = vunpack.c.h.s8.bf16 %v1051_v17  ;;  %v2803_v28 = vunpack.c.l.s8.bf16 %v1051_v17 }
 0x347   : > { %4782 = vmatpush1.bf16.msra.mxu0 %v2758_v62  ;;  %v2871_v62 = vunpack.c.h.s8.bf16 %v1083_v16 }
 0x348   : > { %4823 = vmatpush1.bf16.msra.mxu1 %v2822_v41  ;;  %4783 = vmatprep.subr.bf16.mxu0 %v2755_v38  ;;  %v1050_v41 = vld [vmem:[%s7175_s16 + $0x16c0] sm:$0xff] }
 0x349   : > { %4824 = vmatprep.subr.bf16.mxu1 %v2819_v39  ;;  %v1082_v38 = vld [vmem:[%s7175_s16 + $0x17c0] sm:$0xff]  ;;  %v2806_v39 = vunpack.c.h.s8.bf16 %v1050_v41 }
 0x34a   : > { %v2870_v36 = vunpack.c.h.s8.bf16 %v1082_v38  ;;  %v2866_v14 = vunpack.c.l.s8.bf16 %v1082_v38 }
 0x34b   : > { %4784 = vmatpush1.bf16.msra.mxu0 %v2754_v9  ;;  %v2867_v9 = vunpack.c.l.s8.bf16 %v1083_v16 }
 0x34c   : > { %4825 = vmatpush1.bf16.msra.mxu1 %v2818_v19  ;;  %4785 = vmatprep.subr.bf16.mxu0 %v2815_v23  ;;  %v1047_v19 = vld [vmem:[%s7175_s16 + $0x16a8] sm:$0xff] }
 0x34d   : > { %4826 = vmatprep.subr.bf16.mxu1 %v2879_v53  ;;  %v1079_v23 = vld [vmem:[%s7175_s16 + $0x17a8] sm:$0xff]  ;;  %v2802_v53 = vunpack.c.l.s8.bf16 %v1050_v41  ;;  %v2799_v4 = vunpack.c.h.s8.bf16 %v1047_v19  ;;  %v2795_v16 = vunpack.c.l.s8.bf16 %v1047_v19 }
 0x34f   : > { %4786 = vmatpush2.bf16.msra.mxu0 %v2814_v20  ;;  %v2863_v20 = vunpack.c.h.s8.bf16 %v1079_v23 }
 0x350   : > { %4827 = vmatpush2.bf16.msra.mxu1 %v2878_v60  ;;  %4787 = vmatprep.subr.bf16.mxu0 %v2811_v5  ;;  %v1046_v60 = vld [vmem:[%s7175_s16 + $0x16a0] sm:$0xff] }
 0x351   : > { %4828 = vmatprep.subr.bf16.mxu1 %v2875_v34  ;;  %v1078_v5 = vld [vmem:[%s7175_s16 + $0x17a0] sm:$0xff]  ;;  %v2798_v34 = vunpack.c.h.s8.bf16 %v1046_v60  ;;  %v2794_v41 = vunpack.c.l.s8.bf16 %v1046_v60  ;;  %v1135_v60 = vld [vmem:[%s7175_s16 + $0x1968] sm:$0xff] }
 0x352   : > { %v2862_v17 = vunpack.c.h.s8.bf16 %v1078_v5  ;;  %v2858_v38 = vunpack.c.l.s8.bf16 %v1078_v5 }
 0x353   : > { %4788 = vmatpush2.bf16.msra.mxu0 %v2810_v24  ;;  %v2859_v24 = vunpack.c.l.s8.bf16 %v1079_v23 }
 0x354   : > { %4829 = vmatpush2.bf16.msra.mxu1 %v2874_v11  ;;  %4789 = vmatprep.subr.bf16.mxu0 %v2807_v51  ;;  %v1043_v11 = vld [vmem:[%s7175_s16 + $0x1688] sm:$0xff] }
 0x355   : > { %4830 = vmatprep.subr.bf16.mxu1 %v2871_v62  ;;  %v1075_v51 = vld [vmem:[%s7175_s16 + $0x1788] sm:$0xff] }
 0x356   : > { %v7945_v62 = vld [vmem:[%s7193_s27 + $0x30] sm:$0xff] }
 0x357   : > { %4790 = vmatpush2.bf16.msra.mxu0 %v2806_v39  ;;  %v2791_v39 = vunpack.c.h.s8.bf16 %v1043_v11  ;;  %v7951_v19 = vrot.slane %v7945_v62, %v7219_v49 }
 0x358   : > { %4831 = vmatpush2.bf16.msra.mxu1 %v2870_v36  ;;  %4791 = vmatprep.subr.bf16.mxu0 %v2803_v28  ;;  %v2855_v36 = vunpack.c.h.s8.bf16 %v1075_v51  ;;  %v1042_v28 = vld [vmem:[%s7175_s16 + $0x1680] sm:$0xff] }
 0x359   : > { %4832 = vmatprep.subr.bf16.mxu1 %v2867_v9  ;;  %v1074_v9 = vld [vmem:[%s7175_s16 + $0x1780] sm:$0xff]  ;;  %v2790_v23 = vunpack.c.h.s8.bf16 %v1042_v28  ;;  %v3720_v5 = vcombine.high %v7951_v19, %v7951_v19 }
 0x35b   : > { %4792 = vmatpush2.bf16.msra.mxu0 %v2802_v53  ;;  %v2854_v53 = vunpack.c.h.s8.bf16 %v1074_v9 }
 0x35c   : > { %4833 = vmatpush2.bf16.msra.mxu1 %v2866_v14  ;;  %4793 = vmatprep.subr.bf16.mxu0 %v2799_v4  ;;  %v2787_v14 = vunpack.c.l.s8.bf16 %v1043_v11  ;;  %v2851_v4 = vunpack.c.l.s8.bf16 %v1075_v51  ;;  %v2975_v11 = vunpack.c.h.s8.bf16 %v1135_v60  ;;  %v1102_v51 = vld [vmem:[%s7175_s16 + $0x1860] sm:$0xff] }
 0x35d   : > { %4834 = vmatprep.subr.bf16.mxu1 %v2863_v20  ;;  %v1103_v20 = vld [vmem:[%s7175_s16 + $0x1868] sm:$0xff] }
 0x35f   : > { %4794 = vmatpush2.bf16.msra.mxu0 %v2798_v34  ;;  %v7959_v34 = vrot.slane %v7885_v26, %v7219_v49  ;;  %v2910_v26 = vunpack.c.h.s8.bf16 %v1102_v51 }
 0x360   : > { %4835 = vmatpush2.bf16.msra.mxu1 %v2862_v17  ;;  %4795 = vmatprep.subr.bf16.mxu0 %v2795_v16  ;;  %v2786_v17 = vunpack.c.l.s8.bf16 %v1042_v28  ;;  %v2850_v16 = vunpack.c.l.s8.bf16 %v1074_v9  ;;  %v2907_v28 = vunpack.c.l.s8.bf16 %v1103_v20  ;;  %v2971_v9 = vunpack.c.l.s8.bf16 %v1135_v60 }
 0x361   : > { %4836 = vmatprep.subr.bf16.mxu1 %v2859_v24  ;;  %8973 = vst [vmem:[#allocation26_spill] sm:$0xff] %v7959_v34  ;;  %v2911_v24 = vunpack.c.h.s8.bf16 %v1103_v20  ;;  %v2906_v20 = vunpack.c.l.s8.bf16 %v1102_v51 }
 0x363   : > { %4796 = vmatpush2.bf16.msra.mxu0 %v2794_v41  ;;  %v1134_v41 = vld [vmem:[%s7175_s16 + $0x1960] sm:$0xff] }
 0x364   : > { %4837 = vmatpush2.bf16.msra.mxu1 %v2858_v38  ;;  %4797 = vmatprep.subr.bf16.mxu0 %v2791_v39  ;;  %v7964_v38 = vrot.slane %v3720_v5, %v7219_v49  ;;  %v7968_v39 = vcombine.high %v7959_v34, %v7959_v34  ;;  %v2970_v60 = vunpack.c.l.s8.bf16 %v1134_v41 }
 0x365   : > { %4838 = vmatprep.subr.bf16.mxu1 %v2855_v36  ;;  %v2974_v36 = vunpack.c.h.s8.bf16 %v1134_v41 }
 0x366   : > { %8974 = vst [vmem:[#allocation27_spill] sm:$0xff] %v7964_v38  ;;  %8975 = vst [vmem:[#allocation28_spill] sm:$0xff] %v7968_v39 }
 0x367   : > { %4798 = vmatpush2.bf16.msra.mxu0 %v2790_v23  ;;  %v1099_v23 = vld [vmem:[%s7175_s16 + $0x1848] sm:$0xff] }
 0x368   : > { %4839 = vmatpush2.bf16.msra.mxu1 %v2854_v53  ;;  %4799 = vmatprep.subr.bf16.mxu0 %v2787_v14  ;;  %v1131_v53 = vld [vmem:[%s7175_s16 + $0x1948] sm:$0xff]  ;;  %v7974_v14 = vcombine.high %v7964_v38, %v7964_v38 }
 0x369   : > { %4840 = vmatprep.subr.bf16.mxu1 %v2851_v4  ;;  %v2967_v8 = vunpack.c.h.s8.bf16 %v1131_v53 }
 0x36a   : > { %8976 = vst [vmem:[#allocation29_spill] sm:$0xff] %v7974_v14 }
 0x36b   : > { %4800 = vmatpush2.bf16.msra.mxu0 %v2786_v17 }
 0x36c   : > { %4841 = vmatpush2.bf16.msra.mxu1 %v2850_v16  ;;  %4851 = vmatprep.subr.bf16.mxu0 %v2911_v24 }
 0x36d   : > { %4892 = vmatprep.subr.bf16.mxu1 %v2975_v11  ;;  %v2903_v11 = vunpack.c.h.s8.bf16 %v1099_v23 }
 0x36e   : > { %v4557_v4 = vpop.f32.mrf.mxu0  ;;  %4802 = vmatmul.mubr.bf16.vlgmr.msra.gmra.mxu0 %v7959_v34 }
 0x36f   : > { %v4598_v5 = vpop.f32.mrf.mxu1  ;;  %4843 = vmatmul.mubr.bf16.vlgmr.msra.gmra.mxu1 %v7968_v39  ;;  %v4558_v17 = vadd.f32 %v4557_v4, %v7915_v37  ;;  %4852 = vmatpush1.bf16.msra.mxu0 %v2910_v26  ;;  %v2902_v26 = vunpack.c.h.s8.bf16 %v1098_v7  ;;  %v2963_v4 = vunpack.c.l.s8.bf16 %v1131_v53 }
 0x370   : > { %4893 = vmatpush1.bf16.msra.mxu1 %v2974_v36  ;;  %v4559_v16 = vpop.f32.mrf.mxu0  ;;  %4853 = vmatprep.subr.bf16.mxu0 %v2907_v28  ;;  %v2966_v36 = vunpack.c.h.s8.bf16 %v1130_v61 }
 0x371   : > { %v4600_v24 = vpop.f32.mrf.mxu1  ;;  %4894 = vmatprep.subr.bf16.mxu1 %v2971_v9  ;;  %v7981_v25 = vadd.f32 %v4598_v5, %v4558_v17  ;;  %v4560_v34 = vadd.f32 %v4559_v16, %v7920_v10  ;;  %4883 = vmatprep.mubr.bf16.mxu0 %v7964_v38  ;;  %v2899_v10 = vunpack.c.l.s8.bf16 %v1099_v23  ;;  %v1095_v5 = vld [vmem:[%s7175_s16 + $0x1828] sm:$0xff]  ;;  %v2898_v16 = vunpack.c.l.s8.bf16 %v1098_v7 }
 0x372   : > { %4924 = vmatprep.mubr.bf16.mxu1 %v7974_v14  ;;  %v4561_v37 = vpop.f32.mrf.mxu0  ;;  %v1127_v17 = vld [vmem:[%s7175_s16 + $0x1928] sm:$0xff]  ;;  %v2891_v23 = vunpack.c.l.s8.bf16 %v1095_v5  ;;  %v1194_v14 = vld [vmem:[%s7175_s16 + $0x1b40] sm:$0xff] }
 0x373   : > { %v4602_v51 = vpop.f32.mrf.mxu1  ;;  %v7986_v41 = vadd.f32 %v4600_v24, %v4560_v34  ;;  %4854 = vmatpush1.bf16.msra.mxu0 %v2906_v20  ;;  %v2962_v34 = vunpack.c.l.s8.bf16 %v1130_v61  ;;  %v2895_v20 = vunpack.c.h.s8.bf16 %v1095_v5  ;;  %v1094_v24 = vld [vmem:[%s7175_s16 + $0x1820] sm:$0xff]  ;;  %v2955_v53 = vunpack.c.l.s8.bf16 %v1127_v17  ;;  %v1091_v7 = vld [vmem:[%s7175_s16 + $0x1808] sm:$0xff] }
 0x374   : > { %4895 = vmatpush1.bf16.msra.mxu1 %v2970_v60  ;;  %v4562_v28 = vpop.f32.mrf.mxu0  ;;  %4855 = vmatprep.subr.bf16.mxu0 %v2903_v11  ;;  %v2959_v60 = vunpack.c.h.s8.bf16 %v1127_v17  ;;  %v1126_v37 = vld [vmem:[%s7175_s16 + $0x1920] sm:$0xff]  ;;  %v2894_v11 = vunpack.c.h.s8.bf16 %v1094_v24  ;;  %v1123_v51 = vld [vmem:[%s7175_s16 + $0x1908] sm:$0xff]  ;;  %v2890_v61 = vunpack.c.l.s8.bf16 %v1094_v24  ;;  %v2883_v17 = vunpack.c.l.s8.bf16 %v1091_v7 }
 0x375   : > { %v4603_v9 = vpop.f32.mrf.mxu1  ;;  %4896 = vmatprep.subr.bf16.mxu1 %v2967_v8  ;;  %v2958_v8 = vunpack.c.h.s8.bf16 %v1126_v37  ;;  %v2951_v28 = vunpack.c.h.s8.bf16 %v1123_v51 }
 0x376   : > { %v1090_v9 = vld [vmem:[%s7175_s16 + $0x1800] sm:$0xff] }
 0x377   : > { %4856 = vmatpush1.bf16.msra.mxu0 %v2902_v26  ;;  %v2954_v26 = vunpack.c.l.s8.bf16 %v1126_v37 }
 0x378   : > { %4897 = vmatpush1.bf16.msra.mxu1 %v2966_v36  ;;  %4857 = vmatprep.subr.bf16.mxu0 %v2899_v10  ;;  %v2887_v36 = vunpack.c.h.s8.bf16 %v1091_v7  ;;  %v1122_v10 = vld [vmem:[%s7175_s16 + $0x1900] sm:$0xff] }
 0x379   : > { %4898 = vmatprep.subr.bf16.mxu1 %v2963_v4  ;;  %v2886_v4 = vunpack.c.h.s8.bf16 %v1090_v9  ;;  %v2950_v5 = vunpack.c.h.s8.bf16 %v1122_v10  ;;  %v2946_v24 = vunpack.c.l.s8.bf16 %v1122_v10 }
 0x37b   : > { %4858 = vmatpush1.bf16.msra.mxu0 %v2898_v16  ;;  %v2947_v16 = vunpack.c.l.s8.bf16 %v1123_v51 }
 0x37c   : > { %4899 = vmatpush1.bf16.msra.mxu1 %v2962_v34  ;;  %4859 = vmatprep.subr.bf16.mxu0 %v2895_v20  ;;  %v1119_v34 = vld [vmem:[%s7175_s16 + $0x18e8] sm:$0xff] }
 0x37d   : > { %4900 = vmatprep.subr.bf16.mxu1 %v2959_v60  ;;  %v1151_v20 = vld [vmem:[%s7175_s16 + $0x19e8] sm:$0xff]  ;;  %v2882_v60 = vunpack.c.l.s8.bf16 %v1090_v9  ;;  %v2943_v37 = vunpack.c.h.s8.bf16 %v1119_v34  ;;  %v2939_v51 = vunpack.c.l.s8.bf16 %v1119_v34 }
 0x37f   : > { %4860 = vmatpush1.bf16.msra.mxu0 %v2894_v11  ;;  %v3007_v11 = vunpack.c.h.s8.bf16 %v1151_v20 }
 0x380   : > { %4901 = vmatpush1.bf16.msra.mxu1 %v2958_v8  ;;  %4861 = vmatprep.subr.bf16.mxu0 %v2891_v23  ;;  %v1118_v8 = vld [vmem:[%s7175_s16 + $0x18e0] sm:$0xff] }
 0x381   : > { %4902 = vmatprep.subr.bf16.mxu1 %v2955_v53  ;;  %v1150_v23 = vld [vmem:[%s7175_s16 + $0x19e0] sm:$0xff]  ;;  %v2942_v53 = vunpack.c.h.s8.bf16 %v1118_v8 }
 0x382   : > { %v3006_v7 = vunpack.c.h.s8.bf16 %v1150_v23  ;;  %v3002_v9 = vunpack.c.l.s8.bf16 %v1150_v23 }
 0x383   : > { %4862 = vmatpush1.bf16.msra.mxu0 %v2890_v61  ;;  %v3003_v61 = vunpack.c.l.s8.bf16 %v1151_v20 }
 0x384   : > { %4903 = vmatpush1.bf16.msra.mxu1 %v2954_v26  ;;  %4863 = vmatprep.subr.bf16.mxu0 %v2887_v36  ;;  %v1115_v26 = vld [vmem:[%s7175_s16 + $0x18c8] sm:$0xff] }
 0x385   : > { %4904 = vmatprep.subr.bf16.mxu1 %v2951_v28  ;;  %v1147_v36 = vld [vmem:[%s7175_s16 + $0x19c8] sm:$0xff]  ;;  %v2938_v28 = vunpack.c.l.s8.bf16 %v1118_v8  ;;  %v2935_v10 = vunpack.c.h.s8.bf16 %v1115_v26  ;;  %v2931_v20 = vunpack.c.l.s8.bf16 %v1115_v26 }
 0x387   : > { %4864 = vmatpush1.bf16.msra.mxu0 %v2886_v4  ;;  %v2999_v4 = vunpack.c.h.s8.bf16 %v1147_v36 }
 0x388   : > { %4905 = vmatpush1.bf16.msra.mxu1 %v2950_v5  ;;  %4865 = vmatprep.subr.bf16.mxu0 %v2883_v17  ;;  %v1114_v5 = vld [vmem:[%s7175_s16 + $0x18c0] sm:$0xff] }
 0x389   : > { %4906 = vmatprep.subr.bf16.mxu1 %v2947_v16  ;;  %v1146_v17 = vld [vmem:[%s7175_s16 + $0x19c0] sm:$0xff]  ;;  %v2934_v16 = vunpack.c.h.s8.bf16 %v1114_v5 }
 0x38a   : > { %v2998_v34 = vunpack.c.h.s8.bf16 %v1146_v17  ;;  %v2994_v8 = vunpack.c.l.s8.bf16 %v1146_v17 }
 0x38b   : > { %4866 = vmatpush1.bf16.msra.mxu0 %v2882_v60  ;;  %v2995_v60 = vunpack.c.l.s8.bf16 %v1147_v36 }
 0x38c   : > { %4907 = vmatpush1.bf16.msra.mxu1 %v2946_v24  ;;  %4867 = vmatprep.subr.bf16.mxu0 %v2943_v37  ;;  %v1111_v24 = vld [vmem:[%s7175_s16 + $0x18a8] sm:$0xff] }
 0x38d   : > { %4908 = vmatprep.subr.bf16.mxu1 %v3007_v11  ;;  %v1143_v37 = vld [vmem:[%s7175_s16 + $0x19a8] sm:$0xff]  ;;  %v2930_v11 = vunpack.c.l.s8.bf16 %v1114_v5  ;;  %v2927_v23 = vunpack.c.h.s8.bf16 %v1111_v24  ;;  %v2923_v26 = vunpack.c.l.s8.bf16 %v1111_v24 }
 0x38e   : > { %v2987_v36 = vunpack.c.l.s8.bf16 %v1143_v37 }
 0x38f   : > { %4868 = vmatpush2.bf16.msra.mxu0 %v2942_v53  ;;  %v2991_v53 = vunpack.c.h.s8.bf16 %v1143_v37 }
 0x390   : > { %4909 = vmatpush2.bf16.msra.mxu1 %v3006_v7  ;;  %4869 = vmatprep.subr.bf16.mxu0 %v2939_v51  ;;  %v1110_v7 = vld [vmem:[%s7175_s16 + $0x18a0] sm:$0xff] }
 0x391   : > { %4910 = vmatprep.subr.bf16.mxu1 %v3003_v61  ;;  %v1142_v51 = vld [vmem:[%s7175_s16 + $0x19a0] sm:$0xff]  ;;  %v2926_v61 = vunpack.c.h.s8.bf16 %v1110_v7  ;;  %v2922_v5 = vunpack.c.l.s8.bf16 %v1110_v7 }
 0x392   : > { %v2986_v17 = vunpack.c.l.s8.bf16 %v1142_v51 }
 0x393   : > { %4870 = vmatpush2.bf16.msra.mxu0 %v2938_v28  ;;  %v2990_v28 = vunpack.c.h.s8.bf16 %v1142_v51  ;;  %v8023_v51 = vrot.slane %v7951_v19, %v7219_v49 }
 0x394   : > { %4911 = vmatpush2.bf16.msra.mxu1 %v3002_v9  ;;  %4871 = vmatprep.subr.bf16.mxu0 %v2935_v10  ;;  %v1107_v9 = vld [vmem:[%s7175_s16 + $0x1888] sm:$0xff] }
 0x395   : > { %4912 = vmatprep.subr.bf16.mxu1 %v2999_v4  ;;  %v1139_v10 = vld [vmem:[%s7175_s16 + $0x1988] sm:$0xff]  ;;  %v3705_v4 = vcombine.high %v7945_v62, %v7945_v62  ;;  %v2915_v62 = vunpack.c.l.s8.bf16 %v1107_v9  ;;  %8977 = vst [vmem:[#allocation30_spill] sm:$0xff] %v8023_v51 }
 0x397   : > { %4872 = vmatpush2.bf16.msra.mxu0 %v2934_v16  ;;  %v2919_v16 = vunpack.c.h.s8.bf16 %v1107_v9  ;;  %v8015_v24 = vrot.slane %v3705_v4, %v7219_v49  ;;  %v1166_v9 = vld [vmem:[%s7175_s16 + $0x1a60] sm:$0xff] }
 0x398   : > { %4913 = vmatpush2.bf16.msra.mxu1 %v2998_v34  ;;  %4873 = vmatprep.subr.bf16.mxu0 %v2931_v20  ;;  %v2983_v34 = vunpack.c.h.s8.bf16 %v1139_v10  ;;  %v1106_v20 = vld [vmem:[%s7175_s16 + $0x1880] sm:$0xff]  ;;  %v3038_v19 = vunpack.c.h.s8.bf16 %v1166_v9 }
 0x399   : > { %4914 = vmatprep.subr.bf16.mxu1 %v2995_v60  ;;  %v1138_v60 = vld [vmem:[%s7175_s16 + $0x1980] sm:$0xff]  ;;  %v2918_v37 = vunpack.c.h.s8.bf16 %v1106_v20  ;;  %v3721_v7 = vcombine.high %v8015_v24, %v8015_v24 }
 0x39b   : > { %4874 = vmatpush2.bf16.msra.mxu0 %v2930_v11  ;;  %v2982_v11 = vunpack.c.h.s8.bf16 %v1138_v60  ;;  %v8028_v4 = vrot.slane %v3721_v7, %v7219_v49 }
 0x39c   : > { %4915 = vmatpush2.bf16.msra.mxu1 %v2994_v8  ;;  %4875 = vmatprep.subr.bf16.mxu0 %v2927_v23  ;;  %v2979_v8 = vunpack.c.l.s8.bf16 %v1139_v10  ;;  %v1167_v23 = vld [vmem:[%s7175_s16 + $0x1a68] sm:$0xff]  ;;  %v1198_v10 = vld [vmem:[%s7175_s16 + $0x1b60] sm:$0xff] }
 0x39d   : > { %4916 = vmatprep.subr.bf16.mxu1 %v2991_v53  ;;  %v1199_v53 = vld [vmem:[%s7175_s16 + $0x1b68] sm:$0xff]  ;;  %8978 = vst [vmem:[#allocation31_spill] sm:$0xff] %v8028_v4 }
 0x39f   : > { %4876 = vmatpush2.bf16.msra.mxu0 %v2926_v61  ;;  %v2914_v61 = vunpack.c.l.s8.bf16 %v1106_v20  ;;  %v1163_v20 = vld [vmem:[%s7175_s16 + $0x1a48] sm:$0xff] }
 0x3a0   : > { %4917 = vmatpush2.bf16.msra.mxu1 %v2990_v28  ;;  %4877 = vmatprep.subr.bf16.mxu0 %v2923_v26  ;;  %v2978_v28 = vunpack.c.l.s8.bf16 %v1138_v60  ;;  %v3039_v26 = vunpack.c.h.s8.bf16 %v1167_v23  ;;  %v1195_v60 = vld [vmem:[%s7175_s16 + $0x1b48] sm:$0xff] }
 0x3a1   : > { %4918 = vmatprep.subr.bf16.mxu1 %v2987_v36  ;;  %v3103_v36 = vunpack.c.h.s8.bf16 %v1199_v53 }
 0x3a3   : > { %4878 = vmatpush2.bf16.msra.mxu0 %v2922_v5  ;;  %v8032_v5 = vcombine.high %v8023_v51, %v8023_v51 }
 0x3a4   : > { %4919 = vmatpush2.bf16.msra.mxu1 %v2986_v17  ;;  %4879 = vmatprep.subr.bf16.mxu0 %v2919_v16  ;;  %v3102_v17 = vunpack.c.h.s8.bf16 %v1198_v10  ;;  %v3035_v16 = vunpack.c.l.s8.bf16 %v1167_v23  ;;  %v3034_v23 = vunpack.c.l.s8.bf16 %v1166_v9 }
 0x3a5   : > { %4920 = vmatprep.subr.bf16.mxu1 %v2983_v34  ;;  %8979 = vst [vmem:[#allocation32_spill] sm:$0xff] %v8032_v5  ;;  %v3099_v34 = vunpack.c.l.s8.bf16 %v1199_v53  ;;  %v3098_v53 = vunpack.c.l.s8.bf16 %v1198_v10 }
 0x3a7   : > { %4880 = vmatpush2.bf16.msra.mxu0 %v2918_v37  ;;  %v8038_v37 = vcombine.high %v8028_v4, %v8028_v4 }
 0x3a8   : > { %4921 = vmatpush2.bf16.msra.mxu1 %v2982_v11  ;;  %4881 = vmatprep.subr.bf16.mxu0 %v2915_v62 }
 0x3a9   : > { %4922 = vmatprep.subr.bf16.mxu1 %v2979_v8  ;;  %8980 = vst [vmem:[#allocation33_spill] sm:$0xff] %v8038_v37 }
 0x3ab   : > { %4882 = vmatpush2.bf16.msra.mxu0 %v2914_v61 }
 0x3ac   : > { %4923 = vmatpush2.bf16.msra.mxu1 %v2978_v28  ;;  %4933 = vmatprep.subr.bf16.mxu0 %v3039_v26  ;;  %v3031_v28 = vunpack.c.h.s8.bf16 %v1163_v20  ;;  %v3095_v26 = vunpack.c.h.s8.bf16 %v1195_v60 }
 0x3ad   : > { %4974 = vmatprep.subr.bf16.mxu1 %v3103_v36  ;;  %v1162_v36 = vld [vmem:[%s7175_s16 + $0x1a40] sm:$0xff] }
 0x3ae   : > { %v4639_v11 = vpop.f32.mrf.mxu0  ;;  %4884 = vmatmul.mubr.bf16.vlgmr.msra.gmra.mxu0 %v8023_v51 }
 0x3af   : > { %v4680_v62 = vpop.f32.mrf.mxu1  ;;  %4925 = vmatmul.mubr.bf16.vlgmr.msra.gmra.mxu1 %v8032_v5  ;;  %v4640_v8 = vadd.f32 %v4639_v11, %v7981_v25  ;;  %4934 = vmatpush1.bf16.msra.mxu0 %v3038_v19  ;;  %v3030_v19 = vunpack.c.h.s8.bf16 %v1162_v36  ;;  %v3091_v11 = vunpack.c.l.s8.bf16 %v1195_v60  ;;  %v1258_v5 = vld [vmem:[%s7175_s16 + $0x1d40] sm:$0xff] }
 0x3b0   : > { %4975 = vmatpush1.bf16.msra.mxu1 %v3102_v17  ;;  %v4641_v7 = vpop.f32.mrf.mxu0  ;;  %4935 = vmatprep.subr.bf16.mxu0 %v3035_v16  ;;  %v3094_v17 = vunpack.c.h.s8.bf16 %v1194_v14 }
 0x3b1   : > { %v4682_v61 = vpop.f32.mrf.mxu1  ;;  %4976 = vmatprep.subr.bf16.mxu1 %v3099_v34  ;;  %v8045_v38 = vadd.f32 %v4680_v62, %v4640_v8  ;;  %v4642_v51 = vadd.f32 %v4641_v7, %v7986_v41  ;;  %4965 = vmatprep.mubr.bf16.mxu0 %v8028_v4  ;;  %v3027_v41 = vunpack.c.l.s8.bf16 %v1163_v20  ;;  %v1159_v62 = vld [vmem:[%s7175_s16 + $0x1a28] sm:$0xff]  ;;  %v3026_v7 = vunpack.c.l.s8.bf16 %v1162_v36  ;;  %v1226_v4 = vld [vmem:[%s7175_s16 + $0x1c40] sm:$0xff] }
 0x3b2   : > { %5006 = vmatprep.mubr.bf16.mxu1 %v8038_v37  ;;  %v4643_v25 = vpop.f32.mrf.mxu0  ;;  %v1191_v8 = vld [vmem:[%s7175_s16 + $0x1b28] sm:$0xff]  ;;  %v3019_v60 = vunpack.c.l.s8.bf16 %v1159_v62 }
 0x3b3   : > { %v4684_v9 = vpop.f32.mrf.mxu1  ;;  %v8050_v10 = vadd.f32 %v4682_v61, %v4642_v51  ;;  %4936 = vmatpush1.bf16.msra.mxu0 %v3034_v23  ;;  %v3090_v51 = vunpack.c.l.s8.bf16 %v1194_v14  ;;  %v3023_v23 = vunpack.c.h.s8.bf16 %v1159_v62  ;;  %v1158_v61 = vld [vmem:[%s7175_s16 + $0x1a20] sm:$0xff]  ;;  %v1155_v36 = vld [vmem:[%s7175_s16 + $0x1a08] sm:$0xff] }
 0x3b4   : > { %4977 = vmatpush1.bf16.msra.mxu1 %v3098_v53  ;;  %v4644_v16 = vpop.f32.mrf.mxu0  ;;  %4937 = vmatprep.subr.bf16.mxu0 %v3031_v28  ;;  %v3087_v53 = vunpack.c.h.s8.bf16 %v1191_v8  ;;  %v1190_v25 = vld [vmem:[%s7175_s16 + $0x1b20] sm:$0xff]  ;;  %v3022_v28 = vunpack.c.h.s8.bf16 %v1158_v61  ;;  %v1187_v9 = vld [vmem:[%s7175_s16 + $0x1b08] sm:$0xff]  ;;  %v3018_v14 = vunpack.c.l.s8.bf16 %v1158_v61 }
 0x3b5   : > { %v4685_v34 = vpop.f32.mrf.mxu1  ;;  %4978 = vmatprep.subr.bf16.mxu1 %v3095_v26  ;;  %v3086_v20 = vunpack.c.h.s8.bf16 %v1190_v25  ;;  %v3083_v26 = vunpack.c.l.s8.bf16 %v1191_v8  ;;  %v3079_v16 = vunpack.c.h.s8.bf16 %v1187_v9  ;;  %v3011_v8 = vunpack.c.l.s8.bf16 %v1155_v36 }
 0x3b6   : > { %v1154_v34 = vld [vmem:[%s7175_s16 + $0x1a00] sm:$0xff] }
 0x3b7   : > { %4938 = vmatpush1.bf16.msra.mxu0 %v3030_v19  ;;  %v3082_v19 = vunpack.c.l.s8.bf16 %v1190_v25 }
 0x3b8   : > { %4979 = vmatpush1.bf16.msra.mxu1 %v3094_v17  ;;  %4939 = vmatprep.subr.bf16.mxu0 %v3027_v41  ;;  %v3015_v17 = vunpack.c.h.s8.bf16 %v1155_v36  ;;  %v1186_v41 = vld [vmem:[%s7175_s16 + $0x1b00] sm:$0xff] }
 0x3b9   : > { %4980 = vmatprep.subr.bf16.mxu1 %v3091_v11  ;;  %v3014_v11 = vunpack.c.h.s8.bf16 %v1154_v34  ;;  %v3078_v62 = vunpack.c.h.s8.bf16 %v1186_v41  ;;  %v3074_v61 = vunpack.c.l.s8.bf16 %v1186_v41 }
 0x3bb   : > { %4940 = vmatpush1.bf16.msra.mxu0 %v3026_v7  ;;  %v3075_v7 = vunpack.c.l.s8.bf16 %v1187_v9 }
 0x3bc   : > { %4981 = vmatpush1.bf16.msra.mxu1 %v3090_v51  ;;  %4941 = vmatprep.subr.bf16.mxu0 %v3023_v23  ;;  %v1183_v51 = vld [vmem:[%s7175_s16 + $0x1ae8] sm:$0xff] }
 0x3bd   : > { %4982 = vmatprep.subr.bf16.mxu1 %v3087_v53  ;;  %v1215_v23 = vld [vmem:[%s7175_s16 + $0x1be8] sm:$0xff]  ;;  %v3010_v53 = vunpack.c.l.s8.bf16 %v1154_v34  ;;  %v3071_v25 = vunpack.c.h.s8.bf16 %v1183_v51  ;;  %v3067_v9 = vunpack.c.l.s8.bf16 %v1183_v51 }
 0x3bf   : > { %4942 = vmatpush1.bf16.msra.mxu0 %v3022_v28  ;;  %v3135_v28 = vunpack.c.h.s8.bf16 %v1215_v23 }
 0x3c0   : > { %4983 = vmatpush1.bf16.msra.mxu1 %v3086_v20  ;;  %4943 = vmatprep.subr.bf16.mxu0 %v3019_v60  ;;  %v1182_v20 = vld [vmem:[%s7175_s16 + $0x1ae0] sm:$0xff] }
 0x3c1   : > { %4984 = vmatprep.subr.bf16.mxu1 %v3083_v26  ;;  %v1214_v60 = vld [vmem:[%s7175_s16 + $0x1be0] sm:$0xff]  ;;  %v3070_v26 = vunpack.c.h.s8.bf16 %v1182_v20 }
 0x3c2   : > { %v3134_v36 = vunpack.c.h.s8.bf16 %v1214_v60  ;;  %v3130_v34 = vunpack.c.l.s8.bf16 %v1214_v60 }
 0x3c3   : > { %4944 = vmatpush1.bf16.msra.mxu0 %v3018_v14  ;;  %v3131_v14 = vunpack.c.l.s8.bf16 %v1215_v23 }
 0x3c4   : > { %4985 = vmatpush1.bf16.msra.mxu1 %v3082_v19  ;;  %4945 = vmatprep.subr.bf16.mxu0 %v3015_v17  ;;  %v1179_v19 = vld [vmem:[%s7175_s16 + $0x1ac8] sm:$0xff] }
 0x3c5   : > { %4986 = vmatprep.subr.bf16.mxu1 %v3079_v16  ;;  %v1211_v17 = vld [vmem:[%s7175_s16 + $0x1bc8] sm:$0xff]  ;;  %v3066_v16 = vunpack.c.l.s8.bf16 %v1182_v20  ;;  %v3063_v41 = vunpack.c.h.s8.bf16 %v1179_v19  ;;  %v3059_v23 = vunpack.c.l.s8.bf16 %v1179_v19 }
 0x3c7   : > { %4946 = vmatpush1.bf16.msra.mxu0 %v3014_v11  ;;  %v3127_v11 = vunpack.c.h.s8.bf16 %v1211_v17 }
 0x3c8   : > { %4987 = vmatpush1.bf16.msra.mxu1 %v3078_v62  ;;  %4947 = vmatprep.subr.bf16.mxu0 %v3011_v8  ;;  %v1178_v62 = vld [vmem:[%s7175_s16 + $0x1ac0] sm:$0xff] }
 0x3c9   : > { %4988 = vmatprep.subr.bf16.mxu1 %v3075_v7  ;;  %v1210_v8 = vld [vmem:[%s7175_s16 + $0x1bc0] sm:$0xff]  ;;  %v3062_v7 = vunpack.c.h.s8.bf16 %v1178_v62 }
 0x3ca   : > { %v3126_v51 = vunpack.c.h.s8.bf16 %v1210_v8  ;;  %v3122_v20 = vunpack.c.l.s8.bf16 %v1210_v8 }
 0x3cb   : > { %4948 = vmatpush1.bf16.msra.mxu0 %v3010_v53  ;;  %v3123_v53 = vunpack.c.l.s8.bf16 %v1211_v17 }
 0x3cc   : > { %4989 = vmatpush1.bf16.msra.mxu1 %v3074_v61  ;;  %4949 = vmatprep.subr.bf16.mxu0 %v3071_v25  ;;  %v1175_v61 = vld [vmem:[%s7175_s16 + $0x1aa8] sm:$0xff] }
 0x3cd   : > { %4990 = vmatprep.subr.bf16.mxu1 %v3135_v28  ;;  %v1207_v25 = vld [vmem:[%s7175_s16 + $0x1ba8] sm:$0xff]  ;;  %v3058_v28 = vunpack.c.l.s8.bf16 %v1178_v62  ;;  %v3055_v60 = vunpack.c.h.s8.bf16 %v1175_v61  ;;  %v3051_v17 = vunpack.c.l.s8.bf16 %v1175_v61 }
 0x3cf   : > { %4950 = vmatpush2.bf16.msra.mxu0 %v3070_v26  ;;  %v3119_v26 = vunpack.c.h.s8.bf16 %v1207_v25 }
 0x3d0   : > { %4991 = vmatpush2.bf16.msra.mxu1 %v3134_v36  ;;  %4951 = vmatprep.subr.bf16.mxu0 %v3067_v9  ;;  %v1174_v36 = vld [vmem:[%s7175_s16 + $0x1aa0] sm:$0xff] }
 0x3d1   : > { %4992 = vmatprep.subr.bf16.mxu1 %v3131_v14  ;;  %v1206_v9 = vld [vmem:[%s7175_s16 + $0x1ba0] sm:$0xff]  ;;  %v3054_v14 = vunpack.c.h.s8.bf16 %v1174_v36  ;;  %v3050_v62 = vunpack.c.l.s8.bf16 %v1174_v36  ;;  %v1263_v36 = vld [vmem:[%s7175_s16 + $0x1d68] sm:$0xff] }
 0x3d2   : > { %v3118_v19 = vunpack.c.h.s8.bf16 %v1206_v9  ;;  %v3114_v8 = vunpack.c.l.s8.bf16 %v1206_v9 }
 0x3d3   : > { %4952 = vmatpush2.bf16.msra.mxu0 %v3066_v16  ;;  %v3115_v16 = vunpack.c.l.s8.bf16 %v1207_v25 }
 0x3d4   : > { %4993 = vmatpush2.bf16.msra.mxu1 %v3130_v34  ;;  %4953 = vmatprep.subr.bf16.mxu0 %v3063_v41  ;;  %v1171_v34 = vld [vmem:[%s7175_s16 + $0x1a88] sm:$0xff] }
 0x3d5   : > { %4994 = vmatprep.subr.bf16.mxu1 %v3127_v11  ;;  %v1203_v41 = vld [vmem:[%s7175_s16 + $0x1b88] sm:$0xff]  ;;  %v8075_v11 = vld [vmem:[%s7193_s27 + $0x38] sm:$0xff] }
 0x3d6   : > { %v8081_v61 = vrot.slane %v8075_v11, %v7219_v49 }
 0x3d7   : > { %4954 = vmatpush2.bf16.msra.mxu0 %v3062_v7  ;;  %v3047_v7 = vunpack.c.h.s8.bf16 %v1171_v34 }
 0x3d8   : > { %4995 = vmatpush2.bf16.msra.mxu1 %v3126_v51  ;;  %4955 = vmatprep.subr.bf16.mxu0 %v3059_v23  ;;  %v3111_v51 = vunpack.c.h.s8.bf16 %v1203_v41  ;;  %v1170_v23 = vld [vmem:[%s7175_s16 + $0x1a80] sm:$0xff]  ;;  %v3769_v9 = vcombine.high %v8081_v61, %v8081_v61 }
 0x3d9   : > { %4996 = vmatprep.subr.bf16.mxu1 %v3123_v53  ;;  %v1202_v53 = vld [vmem:[%s7175_s16 + $0x1b80] sm:$0xff]  ;;  %v3046_v25 = vunpack.c.h.s8.bf16 %v1170_v23 }
 0x3db   : > { %4956 = vmatpush2.bf16.msra.mxu0 %v3058_v28  ;;  %v3110_v28 = vunpack.c.h.s8.bf16 %v1202_v53 }
 0x3dc   : > { %4997 = vmatpush2.bf16.msra.mxu1 %v3122_v20  ;;  %4957 = vmatprep.subr.bf16.mxu0 %v3055_v60  ;;  %v3043_v20 = vunpack.c.l.s8.bf16 %v1171_v34  ;;  %v3107_v60 = vunpack.c.l.s8.bf16 %v1203_v41  ;;  %v3231_v34 = vunpack.c.h.s8.bf16 %v1263_v36  ;;  %v1230_v41 = vld [vmem:[%s7175_s16 + $0x1c60] sm:$0xff] }
 0x3dd   : > { %4998 = vmatprep.subr.bf16.mxu1 %v3119_v26  ;;  %v1231_v26 = vld [vmem:[%s7175_s16 + $0x1c68] sm:$0xff] }
 0x3df   : > { %4958 = vmatpush2.bf16.msra.mxu0 %v3054_v14  ;;  %v8089_v14 = vrot.slane %v8015_v24, %v7219_v49  ;;  %v3166_v24 = vunpack.c.h.s8.bf16 %v1230_v41 }
 0x3e0   : > { %4999 = vmatpush2.bf16.msra.mxu1 %v3118_v19  ;;  %4959 = vmatprep.subr.bf16.mxu0 %v3051_v17  ;;  %v3042_v19 = vunpack.c.l.s8.bf16 %v1170_v23  ;;  %v3106_v17 = vunpack.c.l.s8.bf16 %v1202_v53  ;;  %v3163_v23 = vunpack.c.l.s8.bf16 %v1231_v26  ;;  %v3227_v53 = vunpack.c.l.s8.bf16 %v1263_v36 }
 0x3e1   : > { %5000 = vmatprep.subr.bf16.mxu1 %v3115_v16  ;;  %8981 = vst [vmem:[#allocation34_spill] sm:$0xff] %v8089_v14  ;;  %v3167_v16 = vunpack.c.h.s8.bf16 %v1231_v26  ;;  %v3162_v26 = vunpack.c.l.s8.bf16 %v1230_v41 }
 0x3e3   : > { %4960 = vmatpush2.bf16.msra.mxu0 %v3050_v62  ;;  %v1262_v62 = vld [vmem:[%s7175_s16 + $0x1d60] sm:$0xff] }
 0x3e4   : > { %5001 = vmatpush2.bf16.msra.mxu1 %v3114_v8  ;;  %4961 = vmatprep.subr.bf16.mxu0 %v3047_v7  ;;  %v8094_v8 = vrot.slane %v3769_v9, %v7219_v49  ;;  %v8098_v7 = vcombine.high %v8089_v14, %v8089_v14  ;;  %v3226_v36 = vunpack.c.l.s8.bf16 %v1262_v62 }
 0x3e5   : > { %5002 = vmatprep.subr.bf16.mxu1 %v3111_v51  ;;  %v3230_v51 = vunpack.c.h.s8.bf16 %v1262_v62 }
 0x3e6   : > { %8982 = vst [vmem:[#allocation35_spill] sm:$0xff] %v8094_v8 }
 0x3e7   : > { %4962 = vmatpush2.bf16.msra.mxu0 %v3046_v25  ;;  %v1227_v25 = vld [vmem:[%s7175_s16 + $0x1c48] sm:$0xff] }
 0x3e8   : > { %5003 = vmatpush2.bf16.msra.mxu1 %v3110_v28  ;;  %4963 = vmatprep.subr.bf16.mxu0 %v3043_v20  ;;  %v1259_v28 = vld [vmem:[%s7175_s16 + $0x1d48] sm:$0xff]  ;;  %v8104_v20 = vcombine.high %v8094_v8, %v8094_v8 }
 0x3e9   : > { %5004 = vmatprep.subr.bf16.mxu1 %v3107_v60  ;;  %v3223_v37 = vunpack.c.h.s8.bf16 %v1259_v28 }
 0x3ea   : > { %8983 = vst [vmem:[#allocation36_spill] sm:$0xff] %v8104_v20 }
 0x3eb   : > { %4964 = vmatpush2.bf16.msra.mxu0 %v3042_v19 }
 0x3ec   : > { %5005 = vmatpush2.bf16.msra.mxu1 %v3106_v17  ;;  %5015 = vmatprep.subr.bf16.mxu0 %v3167_v16 }
 0x3ed   : > { %5056 = vmatprep.subr.bf16.mxu1 %v3231_v34  ;;  %v3159_v34 = vunpack.c.h.s8.bf16 %v1227_v25 }
 0x3ee   : > { %v4721_v60 = vpop.f32.mrf.mxu0  ;;  %4966 = vmatmul.mubr.bf16.vlgmr.msra.gmra.mxu0 %v8089_v14 }
 0x3ef   : > { %v4762_v9 = vpop.f32.mrf.mxu1  ;;  %5007 = vmatmul.mubr.bf16.vlgmr.msra.gmra.mxu1 %v8098_v7  ;;  %v4722_v19 = vadd.f32 %v4721_v60, %v8045_v38  ;;  %5016 = vmatpush1.bf16.msra.mxu0 %v3166_v24  ;;  %v3158_v24 = vunpack.c.h.s8.bf16 %v1226_v4  ;;  %v3219_v60 = vunpack.c.l.s8.bf16 %v1259_v28 }
 0x3f0   : > { %5057 = vmatpush1.bf16.msra.mxu1 %v3230_v51  ;;  %v4723_v17 = vpop.f32.mrf.mxu0  ;;  %5017 = vmatprep.subr.bf16.mxu0 %v3163_v23  ;;  %v3222_v51 = vunpack.c.h.s8.bf16 %v1258_v5 }
 0x3f1   : > { %v4764_v16 = vpop.f32.mrf.mxu1  ;;  %5058 = vmatprep.subr.bf16.mxu1 %v3227_v53  ;;  %v8111_v39 = vadd.f32 %v4762_v9, %v4722_v19  ;;  %v4724_v14 = vadd.f32 %v4723_v17, %v8050_v10  ;;  %5047 = vmatprep.mubr.bf16.mxu0 %v8094_v8  ;;  %v3155_v10 = vunpack.c.l.s8.bf16 %v1227_v25  ;;  %v1223_v9 = vld [vmem:[%s7175_s16 + $0x1c28] sm:$0xff]  ;;  %v3154_v17 = vunpack.c.l.s8.bf16 %v1226_v4 }
 0x3f2   : > { %5088 = vmatprep.mubr.bf16.mxu1 %v8104_v20  ;;  %v4725_v38 = vpop.f32.mrf.mxu0  ;;  %v1255_v19 = vld [vmem:[%s7175_s16 + $0x1d28] sm:$0xff]  ;;  %v3147_v25 = vunpack.c.l.s8.bf16 %v1223_v9  ;;  %v1322_v20 = vld [vmem:[%s7175_s16 + $0x1f40] sm:$0xff] }
 0x3f3   : > { %v4766_v41 = vpop.f32.mrf.mxu1  ;;  %v8116_v62 = vadd.f32 %v4764_v16, %v4724_v14  ;;  %5018 = vmatpush1.bf16.msra.mxu0 %v3162_v26  ;;  %v3218_v14 = vunpack.c.l.s8.bf16 %v1258_v5  ;;  %v3151_v26 = vunpack.c.h.s8.bf16 %v1223_v9  ;;  %v1222_v16 = vld [vmem:[%s7175_s16 + $0x1c20] sm:$0xff]  ;;  %v3211_v28 = vunpack.c.l.s8.bf16 %v1255_v19  ;;  %v1219_v4 = vld [vmem:[%s7175_s16 + $0x1c08] sm:$0xff] }
 0x3f4   : > { %5059 = vmatpush1.bf16.msra.mxu1 %v3226_v36  ;;  %v4726_v23 = vpop.f32.mrf.mxu0  ;;  %5019 = vmatprep.subr.bf16.mxu0 %v3159_v34  ;;  %v3215_v36 = vunpack.c.h.s8.bf16 %v1255_v19  ;;  %v1254_v38 = vld [vmem:[%s7175_s16 + $0x1d20] sm:$0xff]  ;;  %v3150_v34 = vunpack.c.h.s8.bf16 %v1222_v16  ;;  %v1251_v41 = vld [vmem:[%s7175_s16 + $0x1d08] sm:$0xff]  ;;  %v3146_v5 = vunpack.c.l.s8.bf16 %v1222_v16  ;;  %v3139_v19 = vunpack.c.l.s8.bf16 %v1219_v4 }
 0x3f5   : > { %v4767_v53 = vpop.f32.mrf.mxu1  ;;  %5060 = vmatprep.subr.bf16.mxu1 %v3223_v37  ;;  %v3214_v37 = vunpack.c.h.s8.bf16 %v1254_v38  ;;  %v3207_v23 = vunpack.c.h.s8.bf16 %v1251_v41 }
 0x3f6   : > { %v1218_v53 = vld [vmem:[%s7175_s16 + $0x1c00] sm:$0xff] }
 0x3f7   : > { %5020 = vmatpush1.bf16.msra.mxu0 %v3158_v24  ;;  %v3210_v24 = vunpack.c.l.s8.bf16 %v1254_v38 }
 0x3f8   : > { %5061 = vmatpush1.bf16.msra.mxu1 %v3222_v51  ;;  %5021 = vmatprep.subr.bf16.mxu0 %v3155_v10  ;;  %v3143_v51 = vunpack.c.h.s8.bf16 %v1219_v4  ;;  %v1250_v10 = vld [vmem:[%s7175_s16 + $0x1d00] sm:$0xff] }
 0x3f9   : > { %5062 = vmatprep.subr.bf16.mxu1 %v3219_v60  ;;  %v3142_v60 = vunpack.c.h.s8.bf16 %v1218_v53  ;;  %v3206_v9 = vunpack.c.h.s8.bf16 %v1250_v10  ;;  %v3202_v16 = vunpack.c.l.s8.bf16 %v1250_v10 }
 0x3fb   : > { %5022 = vmatpush1.bf16.msra.mxu0 %v3154_v17  ;;  %v3203_v17 = vunpack.c.l.s8.bf16 %v1251_v41 }
 0x3fc   : > { %5063 = vmatpush1.bf16.msra.mxu1 %v3218_v14  ;;  %5023 = vmatprep.subr.bf16.mxu0 %v3151_v26  ;;  %v1247_v14 = vld [vmem:[%s7175_s16 + $0x1ce8] sm:$0xff] }
 0x3fd   : > { %5064 = vmatprep.subr.bf16.mxu1 %v3215_v36  ;;  %v1279_v26 = vld [vmem:[%s7175_s16 + $0x1de8] sm:$0xff]  ;;  %v3138_v36 = vunpack.c.l.s8.bf16 %v1218_v53  ;;  %v3199_v38 = vunpack.c.h.s8.bf16 %v1247_v14  ;;  %v3195_v41 = vunpack.c.l.s8.bf16 %v1247_v14 }
 0x3ff   : > { %5024 = vmatpush1.bf16.msra.mxu0 %v3150_v34  ;;  %v3263_v34 = vunpack.c.h.s8.bf16 %v1279_v26 }
 0x400   : > { %5065 = vmatpush1.bf16.msra.mxu1 %v3214_v37  ;;  %5025 = vmatprep.subr.bf16.mxu0 %v3147_v25  ;;  %v1246_v37 = vld [vmem:[%s7175_s16 + $0x1ce0] sm:$0xff] }
 0x401   : > { %5066 = vmatprep.subr.bf16.mxu1 %v3211_v28  ;;  %v1278_v25 = vld [vmem:[%s7175_s16 + $0x1de0] sm:$0xff]  ;;  %v3198_v28 = vunpack.c.h.s8.bf16 %v1246_v37 }
 0x402   : > { %v3262_v4 = vunpack.c.h.s8.bf16 %v1278_v25  ;;  %v3258_v53 = vunpack.c.l.s8.bf16 %v1278_v25 }
 0x403   : > { %5026 = vmatpush1.bf16.msra.mxu0 %v3146_v5  ;;  %v3259_v5 = vunpack.c.l.s8.bf16 %v1279_v26 }
 0x404   : > { %5067 = vmatpush1.bf16.msra.mxu1 %v3210_v24  ;;  %5027 = vmatprep.subr.bf16.mxu0 %v3143_v51  ;;  %v1243_v24 = vld [vmem:[%s7175_s16 + $0x1cc8] sm:$0xff] }
 0x405   : > { %5068 = vmatprep.subr.bf16.mxu1 %v3207_v23  ;;  %v1275_v51 = vld [vmem:[%s7175_s16 + $0x1dc8] sm:$0xff]  ;;  %v3194_v23 = vunpack.c.l.s8.bf16 %v1246_v37  ;;  %v3191_v10 = vunpack.c.h.s8.bf16 %v1243_v24  ;;  %v3187_v26 = vunpack.c.l.s8.bf16 %v1243_v24 }
 0x407   : > { %5028 = vmatpush1.bf16.msra.mxu0 %v3142_v60  ;;  %v3255_v60 = vunpack.c.h.s8.bf16 %v1275_v51 }
 0x408   : > { %5069 = vmatpush1.bf16.msra.mxu1 %v3206_v9  ;;  %5029 = vmatprep.subr.bf16.mxu0 %v3139_v19  ;;  %v1242_v9 = vld [vmem:[%s7175_s16 + $0x1cc0] sm:$0xff] }
 0x409   : > { %5070 = vmatprep.subr.bf16.mxu1 %v3203_v17  ;;  %v1274_v19 = vld [vmem:[%s7175_s16 + $0x1dc0] sm:$0xff]  ;;  %v3190_v17 = vunpack.c.h.s8.bf16 %v1242_v9 }
 0x40a   : > { %v3254_v14 = vunpack.c.h.s8.bf16 %v1274_v19  ;;  %v3250_v37 = vunpack.c.l.s8.bf16 %v1274_v19 }
 0x40b   : > { %5030 = vmatpush1.bf16.msra.mxu0 %v3138_v36  ;;  %v3251_v36 = vunpack.c.l.s8.bf16 %v1275_v51 }
 0x40c   : > { %5071 = vmatpush1.bf16.msra.mxu1 %v3202_v16  ;;  %5031 = vmatprep.subr.bf16.mxu0 %v3199_v38  ;;  %v1239_v16 = vld [vmem:[%s7175_s16 + $0x1ca8] sm:$0xff] }
 0x40d   : > { %5072 = vmatprep.subr.bf16.mxu1 %v3263_v34  ;;  %v1271_v38 = vld [vmem:[%s7175_s16 + $0x1da8] sm:$0xff]  ;;  %v3186_v34 = vunpack.c.l.s8.bf16 %v1242_v9  ;;  %v3183_v25 = vunpack.c.h.s8.bf16 %v1239_v16  ;;  %v3179_v24 = vunpack.c.l.s8.bf16 %v1239_v16 }
 0x40e   : > { %v3243_v51 = vunpack.c.l.s8.bf16 %v1271_v38 }
 0x40f   : > { %5032 = vmatpush2.bf16.msra.mxu0 %v3198_v28  ;;  %v3247_v28 = vunpack.c.h.s8.bf16 %v1271_v38 }
 0x410   : > { %5073 = vmatpush2.bf16.msra.mxu1 %v3262_v4  ;;  %5033 = vmatprep.subr.bf16.mxu0 %v3195_v41  ;;  %v1238_v4 = vld [vmem:[%s7175_s16 + $0x1ca0] sm:$0xff] }
 0x411   : > { %5074 = vmatprep.subr.bf16.mxu1 %v3259_v5  ;;  %v1270_v41 = vld [vmem:[%s7175_s16 + $0x1da0] sm:$0xff]  ;;  %v3182_v5 = vunpack.c.h.s8.bf16 %v1238_v4  ;;  %v3178_v9 = vunpack.c.l.s8.bf16 %v1238_v4 }
 0x412   : > { %v3242_v19 = vunpack.c.l.s8.bf16 %v1270_v41 }
 0x413   : > { %5034 = vmatpush2.bf16.msra.mxu0 %v3194_v23  ;;  %v3246_v23 = vunpack.c.h.s8.bf16 %v1270_v41  ;;  %v8153_v41 = vrot.slane %v8081_v61, %v7219_v49 }
 0x414   : > { %5075 = vmatpush2.bf16.msra.mxu1 %v3258_v53  ;;  %5035 = vmatprep.subr.bf16.mxu0 %v3191_v10  ;;  %v1235_v53 = vld [vmem:[%s7175_s16 + $0x1c88] sm:$0xff] }
 0x415   : > { %5076 = vmatprep.subr.bf16.mxu1 %v3255_v60  ;;  %v1267_v10 = vld [vmem:[%s7175_s16 + $0x1d88] sm:$0xff]  ;;  %v3754_v60 = vcombine.high %v8075_v11, %v8075_v11  ;;  %v3171_v11 = vunpack.c.l.s8.bf16 %v1235_v53  ;;  %8984 = vst [vmem:[#allocation37_spill] sm:$0xff] %v8153_v41 }
 0x417   : > { %5036 = vmatpush2.bf16.msra.mxu0 %v3190_v17  ;;  %v3175_v17 = vunpack.c.h.s8.bf16 %v1235_v53  ;;  %v8145_v16 = vrot.slane %v3754_v60, %v7219_v49  ;;  %v1294_v53 = vld [vmem:[%s7175_s16 + $0x1e60] sm:$0xff] }
 0x418   : > { %5077 = vmatpush2.bf16.msra.mxu1 %v3254_v14  ;;  %5037 = vmatprep.subr.bf16.mxu0 %v3187_v26  ;;  %v3239_v14 = vunpack.c.h.s8.bf16 %v1267_v10  ;;  %v1234_v26 = vld [vmem:[%s7175_s16 + $0x1c80] sm:$0xff]  ;;  %v3294_v61 = vunpack.c.h.s8.bf16 %v1294_v53 }
 0x419   : > { %5078 = vmatprep.subr.bf16.mxu1 %v3251_v36  ;;  %v1266_v36 = vld [vmem:[%s7175_s16 + $0x1d80] sm:$0xff]  ;;  %v3174_v38 = vunpack.c.h.s8.bf16 %v1234_v26  ;;  %v3770_v4 = vcombine.high %v8145_v16, %v8145_v16 }
 0x41b   : > { %5038 = vmatpush2.bf16.msra.mxu0 %v3186_v34  ;;  %v3238_v34 = vunpack.c.h.s8.bf16 %v1266_v36  ;;  %v8158_v60 = vrot.slane %v3770_v4, %v7219_v49 }
 0x41c   : > { %5079 = vmatpush2.bf16.msra.mxu1 %v3250_v37  ;;  %5039 = vmatprep.subr.bf16.mxu0 %v3183_v25  ;;  %v3235_v37 = vunpack.c.l.s8.bf16 %v1267_v10  ;;  %v1295_v25 = vld [vmem:[%s7175_s16 + $0x1e68] sm:$0xff]  ;;  %v1326_v10 = vld [vmem:[%s7175_s16 + $0x1f60] sm:$0xff] }
 0x41d   : > { %5080 = vmatprep.subr.bf16.mxu1 %v3247_v28  ;;  %v1327_v28 = vld [vmem:[%s7175_s16 + $0x1f68] sm:$0xff] }
 0x41f   : > { %5040 = vmatpush2.bf16.msra.mxu0 %v3182_v5  ;;  %v3170_v5 = vunpack.c.l.s8.bf16 %v1234_v26  ;;  %v1291_v26 = vld [vmem:[%s7175_s16 + $0x1e48] sm:$0xff] }
 0x420   : > { %5081 = vmatpush2.bf16.msra.mxu1 %v3246_v23  ;;  %5041 = vmatprep.subr.bf16.mxu0 %v3179_v24  ;;  %v3234_v23 = vunpack.c.l.s8.bf16 %v1266_v36  ;;  %v3295_v24 = vunpack.c.h.s8.bf16 %v1295_v25  ;;  %v1323_v36 = vld [vmem:[%s7175_s16 + $0x1f48] sm:$0xff] }
 0x421   : > { %5082 = vmatprep.subr.bf16.mxu1 %v3243_v51  ;;  %v3359_v51 = vunpack.c.h.s8.bf16 %v1327_v28 }
 0x423   : > { %5042 = vmatpush2.bf16.msra.mxu0 %v3178_v9  ;;  %v8162_v9 = vcombine.high %v8153_v41, %v8153_v41 }
 0x424   : > { %5083 = vmatpush2.bf16.msra.mxu1 %v3242_v19  ;;  %5043 = vmatprep.subr.bf16.mxu0 %v3175_v17  ;;  %v3358_v19 = vunpack.c.h.s8.bf16 %v1326_v10  ;;  %v3291_v17 = vunpack.c.l.s8.bf16 %v1295_v25  ;;  %v3290_v25 = vunpack.c.l.s8.bf16 %v1294_v53 }
 0x425   : > { %5084 = vmatprep.subr.bf16.mxu1 %v3239_v14  ;;  %v3355_v14 = vunpack.c.l.s8.bf16 %v1327_v28  ;;  %v3354_v28 = vunpack.c.l.s8.bf16 %v1326_v10 }
 0x427   : > { %5044 = vmatpush2.bf16.msra.mxu0 %v3174_v38  ;;  %v8168_v38 = vcombine.high %v8158_v60, %v8158_v60 }
 0x428   : > { %5085 = vmatpush2.bf16.msra.mxu1 %v3238_v34  ;;  %5045 = vmatprep.subr.bf16.mxu0 %v3171_v11 }
 0x429   : > { %5086 = vmatprep.subr.bf16.mxu1 %v3235_v37 }
 0x42b   : > { %5046 = vmatpush2.bf16.msra.mxu0 %v3170_v5 }
 0x42c   : > { %5087 = vmatpush2.bf16.msra.mxu1 %v3234_v23  ;;  %5097 = vmatprep.subr.bf16.mxu0 %v3295_v24  ;;  %v3287_v23 = vunpack.c.h.s8.bf16 %v1291_v26  ;;  %v3351_v24 = vunpack.c.h.s8.bf16 %v1323_v36 }
 0x42d   : > { %5138 = vmatprep.subr.bf16.mxu1 %v3359_v51  ;;  %v1290_v51 = vld [vmem:[%s7175_s16 + $0x1e40] sm:$0xff] }
 0x42e   : > { %v4803_v34 = vpop.f32.mrf.mxu0  ;;  %5048 = vmatmul.mubr.bf16.vlgmr.msra.gmra.mxu0 %v8153_v41 }
 0x42f   : > { %v4844_v11 = vpop.f32.mrf.mxu1  ;;  %5089 = vmatmul.mubr.bf16.vlgmr.msra.gmra.mxu1 %v8162_v9  ;;  %v4804_v37 = vadd.f32 %v4803_v34, %v8111_v39  ;;  %5098 = vmatpush1.bf16.msra.mxu0 %v3294_v61  ;;  %v3286_v61 = vunpack.c.h.s8.bf16 %v1290_v51  ;;  %v3347_v34 = vunpack.c.l.s8.bf16 %v1323_v36 }
 0x430   : > { %5139 = vmatpush1.bf16.msra.mxu1 %v3358_v19  ;;  %v4805_v4 = vpop.f32.mrf.mxu0  ;;  %5099 = vmatprep.subr.bf16.mxu0 %v3291_v17  ;;  %v3350_v19 = vunpack.c.h.s8.bf16 %v1322_v20 }
 0x431   : > { %v4846_v5 = vpop.f32.mrf.mxu1  ;;  %5140 = vmatprep.subr.bf16.mxu1 %v3355_v14  ;;  %v8175_v8 = vadd.f32 %v4844_v11, %v4804_v37  ;;  %v4806_v41 = vadd.f32 %v4805_v4, %v8116_v62  ;;  %5129 = vmatprep.mubr.bf16.mxu0 %v8158_v60  ;;  %v3283_v62 = vunpack.c.l.s8.bf16 %v1291_v26  ;;  %v1287_v11 = vld [vmem:[%s7175_s16 + $0x1e28] sm:$0xff]  ;;  %v3282_v4 = vunpack.c.l.s8.bf16 %v1290_v51 }
 0x432   : > { %5170 = vmatprep.mubr.bf16.mxu1 %v8168_v38  ;;  %v4807_v39 = vpop.f32.mrf.mxu0  ;;  %v1319_v37 = vld [vmem:[%s7175_s16 + $0x1f28] sm:$0xff]  ;;  %v3275_v36 = vunpack.c.l.s8.bf16 %v1287_v11 }
 0x433   : > { %v4848_v53 = vpop.f32.mrf.mxu1  ;;  %v8180_v10 = vadd.f32 %v4846_v5, %v4806_v41  ;;  %5100 = vmatpush1.bf16.msra.mxu0 %v3290_v25  ;;  %v3346_v41 = vunpack.c.l.s8.bf16 %v1322_v20  ;;  %v3279_v25 = vunpack.c.h.s8.bf16 %v1287_v11  ;;  %v1286_v5 = vld [vmem:[%s7175_s16 + $0x1e20] sm:$0xff]  ;;  %v1283_v51 = vld [vmem:[%s7175_s16 + $0x1e08] sm:$0xff] }
 0x434   : > { %5141 = vmatpush1.bf16.msra.mxu1 %v3354_v28  ;;  %v4808_v17 = vpop.f32.mrf.mxu0  ;;  %5101 = vmatprep.subr.bf16.mxu0 %v3287_v23  ;;  %v3343_v28 = vunpack.c.h.s8.bf16 %v1319_v37  ;;  %v1318_v39 = vld [vmem:[%s7175_s16 + $0x1f20] sm:$0xff]  ;;  %v3278_v23 = vunpack.c.h.s8.bf16 %v1286_v5  ;;  %v1315_v53 = vld [vmem:[%s7175_s16 + $0x1f08] sm:$0xff]  ;;  %v3274_v20 = vunpack.c.l.s8.bf16 %v1286_v5 }
 0x435   : > { %v4849_v14 = vpop.f32.mrf.mxu1  ;;  %5142 = vmatprep.subr.bf16.mxu1 %v3351_v24  ;;  %v3342_v26 = vunpack.c.h.s8.bf16 %v1318_v39  ;;  %v3339_v24 = vunpack.c.l.s8.bf16 %v1319_v37  ;;  %v3335_v17 = vunpack.c.h.s8.bf16 %v1315_v53  ;;  %v3267_v37 = vunpack.c.l.s8.bf16 %v1283_v51 }
 0x436   : > { %v1282_v14 = vld [vmem:[%s7175_s16 + $0x1e00] sm:$0xff] }
 0x437   : > { %5102 = vmatpush1.bf16.msra.mxu0 %v3286_v61  ;;  %v3338_v61 = vunpack.c.l.s8.bf16 %v1318_v39 }
 0x438   : > { %5143 = vmatpush1.bf16.msra.mxu1 %v3350_v19  ;;  %5103 = vmatprep.subr.bf16.mxu0 %v3283_v62  ;;  %v3271_v19 = vunpack.c.h.s8.bf16 %v1283_v51  ;;  %v1314_v62 = vld [vmem:[%s7175_s16 + $0x1f00] sm:$0xff] }
 0x439   : > { %5144 = vmatprep.subr.bf16.mxu1 %v3347_v34  ;;  %v3270_v34 = vunpack.c.h.s8.bf16 %v1282_v14  ;;  %v3334_v11 = vunpack.c.h.s8.bf16 %v1314_v62  ;;  %v3330_v5 = vunpack.c.l.s8.bf16 %v1314_v62 }
 0x43b   : > { %5104 = vmatpush1.bf16.msra.mxu0 %v3282_v4  ;;  %v3331_v4 = vunpack.c.l.s8.bf16 %v1315_v53 }
 0x43c   : > { %5145 = vmatpush1.bf16.msra.mxu1 %v3346_v41  ;;  %5105 = vmatprep.subr.bf16.mxu0 %v3279_v25  ;;  %v1311_v41 = vld [vmem:[%s7175_s16 + $0x1ee8] sm:$0xff] }
 0x43d   : > { %5146 = vmatprep.subr.bf16.mxu1 %v3343_v28  ;;  %v1343_v25 = vld [vmem:[%s7175_s16 + $0x1fe8] sm:$0xff]  ;;  %v3266_v28 = vunpack.c.l.s8.bf16 %v1282_v14  ;;  %v3327_v39 = vunpack.c.h.s8.bf16 %v1311_v41  ;;  %v3323_v53 = vunpack.c.l.s8.bf16 %v1311_v41 }
 0x43f   : > { %5106 = vmatpush1.bf16.msra.mxu0 %v3278_v23  ;;  %v3391_v23 = vunpack.c.h.s8.bf16 %v1343_v25 }
 0x440   : > { %5147 = vmatpush1.bf16.msra.mxu1 %v3342_v26  ;;  %5107 = vmatprep.subr.bf16.mxu0 %v3275_v36  ;;  %v1310_v26 = vld [vmem:[%s7175_s16 + $0x1ee0] sm:$0xff] }
 0x441   : > { %5148 = vmatprep.subr.bf16.mxu1 %v3339_v24  ;;  %v1342_v36 = vld [vmem:[%s7175_s16 + $0x1fe0] sm:$0xff]  ;;  %v3326_v24 = vunpack.c.h.s8.bf16 %v1310_v26 }
 0x442   : > { %v3390_v51 = vunpack.c.h.s8.bf16 %v1342_v36  ;;  %v3386_v14 = vunpack.c.l.s8.bf16 %v1342_v36 }
 0x443   : > { %5108 = vmatpush1.bf16.msra.mxu0 %v3274_v20  ;;  %v3387_v20 = vunpack.c.l.s8.bf16 %v1343_v25 }
 0x444   : > { %5149 = vmatpush1.bf16.msra.mxu1 %v3338_v61  ;;  %5109 = vmatprep.subr.bf16.mxu0 %v3271_v19  ;;  %v1307_v61 = vld [vmem:[%s7175_s16 + $0x1ec8] sm:$0xff] }
 0x445   : > { %5150 = vmatprep.subr.bf16.mxu1 %v3335_v17  ;;  %v1339_v19 = vld [vmem:[%s7175_s16 + $0x1fc8] sm:$0xff]  ;;  %v3322_v17 = vunpack.c.l.s8.bf16 %v1310_v26  ;;  %v3319_v62 = vunpack.c.h.s8.bf16 %v1307_v61  ;;  %v3315_v25 = vunpack.c.l.s8.bf16 %v1307_v61 }
 0x447   : > { %5110 = vmatpush1.bf16.msra.mxu0 %v3270_v34  ;;  %v3383_v34 = vunpack.c.h.s8.bf16 %v1339_v19 }
 0x448   : > { %5151 = vmatpush1.bf16.msra.mxu1 %v3334_v11  ;;  %5111 = vmatprep.subr.bf16.mxu0 %v3267_v37  ;;  %v1306_v11 = vld [vmem:[%s7175_s16 + $0x1ec0] sm:$0xff] }
 0x449   : > { %5152 = vmatprep.subr.bf16.mxu1 %v3331_v4  ;;  %v1338_v37 = vld [vmem:[%s7175_s16 + $0x1fc0] sm:$0xff]  ;;  %v3318_v4 = vunpack.c.h.s8.bf16 %v1306_v11 }
 0x44a   : > { %v3382_v41 = vunpack.c.h.s8.bf16 %v1338_v37  ;;  %v3378_v26 = vunpack.c.l.s8.bf16 %v1338_v37 }
 0x44b   : > { %5112 = vmatpush1.bf16.msra.mxu0 %v3266_v28  ;;  %v3379_v28 = vunpack.c.l.s8.bf16 %v1339_v19 }
 0x44c   : > { %5153 = vmatpush1.bf16.msra.mxu1 %v3330_v5  ;;  %5113 = vmatprep.subr.bf16.mxu0 %v3327_v39  ;;  %v1303_v5 = vld [vmem:[%s7175_s16 + $0x1ea8] sm:$0xff] }
 0x44d   : > { %5154 = vmatprep.subr.bf16.mxu1 %v3391_v23  ;;  %v1335_v39 = vld [vmem:[%s7175_s16 + $0x1fa8] sm:$0xff]  ;;  %v3314_v23 = vunpack.c.l.s8.bf16 %v1306_v11  ;;  %v3311_v36 = vunpack.c.h.s8.bf16 %v1303_v5  ;;  %v3307_v19 = vunpack.c.l.s8.bf16 %v1303_v5 }
 0x44f   : > { %5114 = vmatpush2.bf16.msra.mxu0 %v3326_v24  ;;  %v3375_v24 = vunpack.c.h.s8.bf16 %v1335_v39 }
 0x450   : > { %5155 = vmatpush2.bf16.msra.mxu1 %v3390_v51  ;;  %5115 = vmatprep.subr.bf16.mxu0 %v3323_v53  ;;  %v1302_v51 = vld [vmem:[%s7175_s16 + $0x1ea0] sm:$0xff] }
 0x451   : > { %5156 = vmatprep.subr.bf16.mxu1 %v3387_v20  ;;  %v1334_v53 = vld [vmem:[%s7175_s16 + $0x1fa0] sm:$0xff]  ;;  %v3310_v20 = vunpack.c.h.s8.bf16 %v1302_v51 }
 0x452   : > { %v3374_v61 = vunpack.c.h.s8.bf16 %v1334_v53  ;;  %v3370_v11 = vunpack.c.l.s8.bf16 %v1334_v53 }
 0x453   : > { %5116 = vmatpush2.bf16.msra.mxu0 %v3322_v17  ;;  %v3371_v17 = vunpack.c.l.s8.bf16 %v1335_v39 }
 0x454   : > { %5157 = vmatpush2.bf16.msra.mxu1 %v3386_v14  ;;  %5117 = vmatprep.subr.bf16.mxu0 %v3319_v62  ;;  %v1299_v14 = vld [vmem:[%s7175_s16 + $0x1e88] sm:$0xff] }
 0x455   : > { %5158 = vmatprep.subr.bf16.mxu1 %v3383_v34  ;;  %v1331_v62 = vld [vmem:[%s7175_s16 + $0x1f88] sm:$0xff]  ;;  %v3306_v34 = vunpack.c.l.s8.bf16 %v1302_v51  ;;  %v3303_v37 = vunpack.c.h.s8.bf16 %v1299_v14  ;;  %v3299_v5 = vunpack.c.l.s8.bf16 %v1299_v14 }
 0x456   : > { %v3363_v39 = vunpack.c.l.s8.bf16 %v1331_v62 }
 0x457   : > { %5118 = vmatpush2.bf16.msra.mxu0 %v3318_v4  ;;  %v3367_v4 = vunpack.c.h.s8.bf16 %v1331_v62 }
 0x458   : > { %5159 = vmatpush2.bf16.msra.mxu1 %v3382_v41  ;;  %5119 = vmatprep.subr.bf16.mxu0 %v3315_v25  ;;  %v1298_v41 = vld [vmem:[%s7175_s16 + $0x1e80] sm:$0xff] }
 0x459   : > { %5160 = vmatprep.subr.bf16.mxu1 %v3379_v28  ;;  %v1330_v25 = vld [vmem:[%s7175_s16 + $0x1f80] sm:$0xff]  ;;  %v3302_v28 = vunpack.c.h.s8.bf16 %v1298_v41  ;;  %v3298_v51 = vunpack.c.l.s8.bf16 %v1298_v41 }
 0x45a   : > { %v3362_v53 = vunpack.c.l.s8.bf16 %v1330_v25 }
 0x45b   : > { %5120 = vmatpush2.bf16.msra.mxu0 %v3314_v23  ;;  %v3366_v23 = vunpack.c.h.s8.bf16 %v1330_v25 }
 0x45c   : > { %5161 = vmatpush2.bf16.msra.mxu1 %v3378_v26  ;;  %5121 = vmatprep.subr.bf16.mxu0 %v3311_v36  ;;  %v337_v26 = vld [vmem:[%s7175_s16 + $0x78] sm:$0xff] }
 0x45d   : > { %5162 = vmatprep.subr.bf16.mxu1 %v3375_v24  ;;  %v369_v36 = vld [vmem:[%s7175_s16 + $0x178] sm:$0xff]  ;;  %v8210_v24 = vrot.slane %v8145_v16, %v7219_v49  ;;  %v1373_v62 = vunpack.c.l.s8.bf16 %v337_v26 }
 0x45f   : > { %5122 = vmatpush2.bf16.msra.mxu0 %v3310_v20  ;;  %v1377_v20 = vunpack.c.h.s8.bf16 %v337_v26  ;;  %v8216_v14 = vcombine.high %v8210_v24, %v8210_v24 }
 0x460   : > { %5163 = vmatpush2.bf16.msra.mxu1 %v3374_v61  ;;  %5123 = vmatprep.subr.bf16.mxu0 %v3307_v19  ;;  %v1441_v61 = vunpack.c.h.s8.bf16 %v369_v36  ;;  %v336_v19 = vld [vmem:[%s7175_s16 + $0x70] sm:$0xff] }
 0x461   : > { %5164 = vmatprep.subr.bf16.mxu1 %v3371_v17  ;;  %v368_v17 = vld [vmem:[%s7175_s16 + $0x170] sm:$0xff]  ;;  %v1376_v49 = vunpack.c.h.s8.bf16 %v336_v19 }
 0x462   : > { %v1440_v16 = vunpack.c.h.s8.bf16 %v368_v17 }
 0x463   : > { %5124 = vmatpush2.bf16.msra.mxu0 %v3306_v34  ;;  %v1437_v34 = vunpack.c.l.s8.bf16 %v369_v36 }
 0x464   : > { %5165 = vmatpush2.bf16.msra.mxu1 %v3370_v11  ;;  %5125 = vmatprep.subr.bf16.mxu0 %v3303_v37  ;;  %v333_v11 = vld [vmem:[%s7175_s16 + $0x58] sm:$0xff] }
 0x465   : > { %5166 = vmatprep.subr.bf16.mxu1 %v3367_v4  ;;  %v365_v37 = vld [vmem:[%s7175_s16 + $0x158] sm:$0xff]  ;;  %v1369_v26 = vunpack.c.h.s8.bf16 %v333_v11 }
 0x466   : > { %v1433_v36 = vunpack.c.h.s8.bf16 %v365_v37 }
 0x467   : > { %5126 = vmatpush2.bf16.msra.mxu0 %v3302_v28  ;;  %v1372_v28 = vunpack.c.l.s8.bf16 %v336_v19 }
 0x468   : > { %5167 = vmatpush2.bf16.msra.mxu1 %v3366_v23  ;;  %5127 = vmatprep.subr.bf16.mxu0 %v3299_v5  ;;  %v1436_v23 = vunpack.c.l.s8.bf16 %v368_v17 }
 0x469   : > { %5168 = vmatprep.subr.bf16.mxu1 %v3363_v39 }
 0x46b   : > { %5128 = vmatpush2.bf16.msra.mxu0 %v3298_v51  ;;  %v332_v51 = vld [vmem:[%s7175_s16 + $0x50] sm:$0xff] }
 0x46c   : > { %5169 = vmatpush2.bf16.msra.mxu1 %v3362_v53  ;;  %5179 = vmatprep.subr.bf16.mxu0 %v1377_v20  ;;  %v364_v53 = vld [vmem:[%s7175_s16 + $0x150] sm:$0xff] }
 0x46d   : > { %5220 = vmatprep.subr.bf16.mxu1 %v1441_v61 }
 0x46e   : > { %v4885_v4 = vpop.f32.mrf.mxu0  ;;  %5130 = vmatmul.mubr.bf16.vlgmr.msra.gmra.mxu0 %v8210_v24 }
 0x46f   : > { %v4926_v41 = vpop.f32.mrf.mxu1  ;;  %5171 = vmatmul.mubr.bf16.vlgmr.msra.gmra.mxu1 %v8216_v14  ;;  %v4886_v25 = vadd.f32 %v4885_v4, %v8175_v8  ;;  %5180 = vmatpush1.bf16.msra.mxu0 %v1376_v49  ;;  %v1368_v49 = vunpack.c.h.s8.bf16 %v332_v51  ;;  %v1429_v4 = vunpack.c.l.s8.bf16 %v365_v37 }
 0x470   : > { %5221 = vmatpush1.bf16.msra.mxu1 %v1440_v16  ;;  %v4887_v5 = vpop.f32.mrf.mxu0  ;;  %5181 = vmatprep.subr.bf16.mxu0 %v1373_v62  ;;  %v1432_v16 = vunpack.c.h.s8.bf16 %v364_v53 }
 0x471   : > { %v4928_v39 = vpop.f32.mrf.mxu1  ;;  %5222 = vmatprep.subr.bf16.mxu1 %v1437_v34  ;;  %v8225_v20 = vadd.f32 %v4926_v41, %v4886_v25  ;;  %v4888_v61 = vadd.f32 %v4887_v5, %v8180_v10  ;;  %5211 = vmatprep.mubr.bf16.mxu0 %v7230_v58  ;;  %v1365_v10 = vunpack.c.l.s8.bf16 %v333_v11  ;;  %v329_v58 = vld [vmem:[%s7175_s16 + $0x38] sm:$0xff]  ;;  %v1428_v25 = vunpack.c.l.s8.bf16 %v364_v53  ;;  %v328_v5 = vld [vmem:[%s7175_s16 + $0x30] sm:$0xff] }
 0x472   : > { %5252 = vmatprep.mubr.bf16.mxu1 %v7236_v1  ;;  %v4889_v8 = vpop.f32.mrf.mxu0  ;;  %v361_v41 = vld [vmem:[%s7175_s16 + $0x138] sm:$0xff]  ;;  %v1364_v1 = vunpack.c.l.s8.bf16 %v332_v51  ;;  %v1357_v37 = vunpack.c.l.s8.bf16 %v329_v58  ;;  %v1356_v53 = vunpack.c.l.s8.bf16 %v328_v5 }
 0x473   : > { %v4930_v19 = vpop.f32.mrf.mxu1  ;;  %v8230_v17 = vadd.f32 %v4928_v39, %v4888_v61  ;;  %5182 = vmatpush1.bf16.msra.mxu0 %v1372_v28  ;;  %v1361_v28 = vunpack.c.h.s8.bf16 %v329_v58  ;;  %v360_v39 = vld [vmem:[%s7175_s16 + $0x130] sm:$0xff]  ;;  %v325_v51 = vld [vmem:[%s7175_s16 + $0x18] sm:$0xff] }
 0x474   : > { %5223 = vmatpush1.bf16.msra.mxu1 %v1436_v23  ;;  %v4890_v62 = vpop.f32.mrf.mxu0  ;;  %5183 = vmatprep.subr.bf16.mxu0 %v1369_v26  ;;  %v1425_v23 = vunpack.c.h.s8.bf16 %v361_v41  ;;  %v1360_v26 = vunpack.c.h.s8.bf16 %v328_v5  ;;  %v1424_v11 = vunpack.c.h.s8.bf16 %v360_v39  ;;  %v357_v61 = vld [vmem:[%s7175_s16 + $0x118] sm:$0xff]  ;;  %v1420_v8 = vunpack.c.l.s8.bf16 %v360_v39  ;;  %v352_v39 = vld [vmem:[%s7175_s16 + $0xf0] sm:$0xff] }
 0x475   : > { %v4931_v34 = vpop.f32.mrf.mxu1  ;;  %5224 = vmatprep.subr.bf16.mxu1 %v1433_v36  ;;  %v1421_v36 = vunpack.c.l.s8.bf16 %v361_v41  ;;  %v1353_v19 = vunpack.c.h.s8.bf16 %v325_v51  ;;  %v356_v62 = vld [vmem:[%s7175_s16 + $0x110] sm:$0xff]  ;;  %v1413_v58 = vunpack.c.l.s8.bf16 %v357_v61  ;;  %v353_v41 = vld [vmem:[%s7175_s16 + $0xf8] sm:$0xff] }
 0x477   : > { %5184 = vmatpush1.bf16.msra.mxu0 %v1368_v49  ;;  %v1417_v49 = vunpack.c.h.s8.bf16 %v357_v61  ;;  %v349_v61 = vld [vmem:[%s7175_s16 + $0xd8] sm:$0xff] }
 0x478   : > { %5225 = vmatpush1.bf16.msra.mxu1 %v1432_v16  ;;  %5185 = vmatprep.subr.bf16.mxu0 %v1365_v10  ;;  %v324_v16 = vld [vmem:[%s7175_s16 + $0x10] sm:$0xff]  ;;  %v1416_v10 = vunpack.c.h.s8.bf16 %v356_v62 }
 0x479   : > { %5226 = vmatprep.subr.bf16.mxu1 %v1429_v4  ;;  %v1352_v34 = vunpack.c.h.s8.bf16 %v324_v16  ;;  %v1349_v4 = vunpack.c.l.s8.bf16 %v325_v51 }
 0x47b   : > { %5186 = vmatpush1.bf16.msra.mxu0 %v1364_v1  ;;  %v385_v1 = vld [vmem:[%s7175_s16 + $0x1f8] sm:$0xff] }
 0x47c   : > { %5227 = vmatpush1.bf16.msra.mxu1 %v1428_v25  ;;  %5187 = vmatprep.subr.bf16.mxu0 %v1361_v28  ;;  %v1348_v25 = vunpack.c.l.s8.bf16 %v324_v16  ;;  %v1412_v28 = vunpack.c.l.s8.bf16 %v356_v62  ;;  %v1473_v5 = vunpack.c.h.s8.bf16 %v385_v1  ;;  %v1469_v51 = vunpack.c.l.s8.bf16 %v385_v1  ;;  %v348_v62 = vld [vmem:[%s7175_s16 + $0xd0] sm:$0xff]  ;;  %v345_v1 = vld [vmem:[%s7175_s16 + $0xb8] sm:$0xff] }
 0x47d   : > { %5228 = vmatprep.subr.bf16.mxu1 %v1425_v23  ;;  %v1409_v23 = vunpack.c.h.s8.bf16 %v353_v41 }
 0x47f   : > { %5188 = vmatpush1.bf16.msra.mxu0 %v1360_v26  ;;  %v384_v26 = vld [vmem:[%s7175_s16 + $0x1f0] sm:$0xff] }
 0x480   : > { %5229 = vmatpush1.bf16.msra.mxu1 %v1424_v11  ;;  %5189 = vmatprep.subr.bf16.mxu0 %v1357_v37  ;;  %v1408_v11 = vunpack.c.h.s8.bf16 %v352_v39  ;;  %v1472_v37 = vunpack.c.h.s8.bf16 %v384_v26 }
 0x481   : > { %5230 = vmatprep.subr.bf16.mxu1 %v1421_v36  ;;  %v1405_v36 = vunpack.c.l.s8.bf16 %v353_v41 }
 0x483   : > { %5190 = vmatpush1.bf16.msra.mxu0 %v1356_v53  ;;  %v381_v53 = vld [vmem:[%s7175_s16 + $0x1d8] sm:$0xff] }
 0x484   : > { %5231 = vmatpush1.bf16.msra.mxu1 %v1420_v8  ;;  %5191 = vmatprep.subr.bf16.mxu0 %v1353_v19  ;;  %v1404_v8 = vunpack.c.l.s8.bf16 %v352_v39  ;;  %v1468_v19 = vunpack.c.l.s8.bf16 %v384_v26  ;;  %v1465_v16 = vunpack.c.h.s8.bf16 %v381_v53  ;;  %v1461_v41 = vunpack.c.l.s8.bf16 %v381_v53  ;;  %v344_v26 = vld [vmem:[%s7175_s16 + $0xb0] sm:$0xff]  ;;  %v341_v53 = vld [vmem:[%s7175_s16 + $0x98] sm:$0xff] }
 0x485   : > { %5232 = vmatprep.subr.bf16.mxu1 %v1417_v49  ;;  %v1401_v49 = vunpack.c.h.s8.bf16 %v349_v61 }
 0x487   : > { %5192 = vmatpush1.bf16.msra.mxu0 %v1352_v34  ;;  %v380_v34 = vld [vmem:[%s7175_s16 + $0x1d0] sm:$0xff] }
 0x488   : > { %5233 = vmatpush1.bf16.msra.mxu1 %v1416_v10  ;;  %5193 = vmatprep.subr.bf16.mxu0 %v1349_v4  ;;  %v1400_v10 = vunpack.c.h.s8.bf16 %v348_v62  ;;  %v1464_v4 = vunpack.c.h.s8.bf16 %v380_v34 }
 0x489   : > { %5234 = vmatprep.subr.bf16.mxu1 %v1413_v58  ;;  %v1397_v58 = vunpack.c.l.s8.bf16 %v349_v61 }
 0x48b   : > { %5194 = vmatpush1.bf16.msra.mxu0 %v1348_v25  ;;  %v377_v25 = vld [vmem:[%s7175_s16 + $0x1b8] sm:$0xff] }
 0x48c   : > { %5235 = vmatpush1.bf16.msra.mxu1 %v1412_v28  ;;  %5195 = vmatprep.subr.bf16.mxu0 %v1409_v23  ;;  %v1396_v28 = vunpack.c.l.s8.bf16 %v348_v62  ;;  %v1460_v23 = vunpack.c.l.s8.bf16 %v380_v34  ;;  %v1457_v39 = vunpack.c.h.s8.bf16 %v377_v25  ;;  %v1453_v61 = vunpack.c.l.s8.bf16 %v377_v25  ;;  %v340_v34 = vld [vmem:[%s7175_s16 + $0x90] sm:$0xff]  ;;  %v401_v25 = vld [vmem:[%s7175_s16 + $0x278] sm:$0xff] }
 0x48d   : > { %5236 = vmatprep.subr.bf16.mxu1 %v1473_v5  ;;  %v1393_v5 = vunpack.c.h.s8.bf16 %v345_v1 }
 0x48f   : > { %5196 = vmatpush2.bf16.msra.mxu0 %v1408_v11  ;;  %v376_v11 = vld [vmem:[%s7175_s16 + $0x1b0] sm:$0xff] }
 0x490   : > { %5237 = vmatpush2.bf16.msra.mxu1 %v1472_v37  ;;  %5197 = vmatprep.subr.bf16.mxu0 %v1405_v36  ;;  %v1392_v37 = vunpack.c.h.s8.bf16 %v344_v26  ;;  %v1456_v36 = vunpack.c.h.s8.bf16 %v376_v11 }
 0x491   : > { %5238 = vmatprep.subr.bf16.mxu1 %v1469_v51  ;;  %v1389_v51 = vunpack.c.l.s8.bf16 %v345_v1 }
 0x493   : > { %5198 = vmatpush2.bf16.msra.mxu0 %v1404_v8  ;;  %v373_v8 = vld [vmem:[%s7175_s16 + $0x198] sm:$0xff] }
 0x494   : > { %5239 = vmatpush2.bf16.msra.mxu1 %v1468_v19  ;;  %5199 = vmatprep.subr.bf16.mxu0 %v1401_v49  ;;  %v1388_v19 = vunpack.c.l.s8.bf16 %v344_v26  ;;  %v1452_v49 = vunpack.c.l.s8.bf16 %v376_v11  ;;  %v1449_v62 = vunpack.c.h.s8.bf16 %v373_v8  ;;  %v1445_v1 = vunpack.c.l.s8.bf16 %v373_v8  ;;  %v400_v11 = vld [vmem:[%s7175_s16 + $0x270] sm:$0xff]  ;;  %v397_v8 = vld [vmem:[%s7175_s16 + $0x258] sm:$0xff] }
 0x495   : > { %5240 = vmatprep.subr.bf16.mxu1 %v1465_v16  ;;  %v1385_v16 = vunpack.c.h.s8.bf16 %v341_v53 }
 0x497   : > { %5200 = vmatpush2.bf16.msra.mxu0 %v1400_v10  ;;  %v372_v10 = vld [vmem:[%s7175_s16 + $0x190] sm:$0xff] }
 0x498   : > { %5241 = vmatpush2.bf16.msra.mxu1 %v1464_v4  ;;  %5201 = vmatprep.subr.bf16.mxu0 %v1397_v58  ;;  %v1384_v4 = vunpack.c.h.s8.bf16 %v340_v34  ;;  %v1448_v58 = vunpack.c.h.s8.bf16 %v372_v10 }
 0x499   : > { %5242 = vmatprep.subr.bf16.mxu1 %v1461_v41  ;;  %v1381_v41 = vunpack.c.l.s8.bf16 %v341_v53 }
 0x49b   : > { %5202 = vmatpush2.bf16.msra.mxu0 %v1396_v28  ;;  %v433_v28 = vld [vmem:[%s7175_s16 + $0x378] sm:$0xff] }
 0x49c   : > { %5243 = vmatpush2.bf16.msra.mxu1 %v1460_v23  ;;  %5203 = vmatprep.subr.bf16.mxu0 %v1393_v5  ;;  %v1380_v23 = vunpack.c.l.s8.bf16 %v340_v34  ;;  %v1444_v5 = vunpack.c.l.s8.bf16 %v372_v10  ;;  %v1569_v26 = vunpack.c.h.s8.bf16 %v433_v28  ;;  %v1565_v53 = vunpack.c.l.s8.bf16 %v433_v28  ;;  %v428_v28 = vld [vmem:[%s7175_s16 + $0x350] sm:$0xff] }
 0x49d   : > { %5244 = vmatprep.subr.bf16.mxu1 %v1457_v39  ;;  %v1505_v39 = vunpack.c.h.s8.bf16 %v401_v25  ;;  %v1500_v34 = vunpack.c.l.s8.bf16 %v400_v11 }
 0x49f   : > { %5204 = vmatpush2.bf16.msra.mxu0 %v1392_v37  ;;  %v432_v37 = vld [vmem:[%s7175_s16 + $0x370] sm:$0xff] }
 0x4a0   : > { %5245 = vmatpush2.bf16.msra.mxu1 %v1456_v36  ;;  %5205 = vmatprep.subr.bf16.mxu0 %v1389_v51  ;;  %v1504_v36 = vunpack.c.h.s8.bf16 %v400_v11  ;;  %v1568_v51 = vunpack.c.h.s8.bf16 %v432_v37  ;;  %v1564_v10 = vunpack.c.l.s8.bf16 %v432_v37 }
 0x4a1   : > { %5246 = vmatprep.subr.bf16.mxu1 %v1453_v61  ;;  %v1501_v61 = vunpack.c.l.s8.bf16 %v401_v25  ;;  %v396_v25 = vld [vmem:[%s7175_s16 + $0x250] sm:$0xff] }
 0x4a3   : > { %5206 = vmatpush2.bf16.msra.mxu0 %v1388_v19  ;;  %v429_v19 = vld [vmem:[%s7175_s16 + $0x358] sm:$0xff] }
 0x4a4   : > { %5247 = vmatpush2.bf16.msra.mxu1 %v1452_v49  ;;  %5207 = vmatprep.subr.bf16.mxu0 %v1385_v16 }
 0x4a5   : > { %5248 = vmatprep.subr.bf16.mxu1 %v1449_v62 }
 0x4a7   : > { %5208 = vmatpush2.bf16.msra.mxu0 %v1384_v4 }
 0x4a8   : > { %5249 = vmatpush2.bf16.msra.mxu1 %v1448_v58  ;;  %5209 = vmatprep.subr.bf16.mxu0 %v1381_v41  ;;  %v1497_v41 = vunpack.c.h.s8.bf16 %v397_v8 }
 0x4a9   : > { %5250 = vmatprep.subr.bf16.mxu1 %v1445_v1  ;;  %v1561_v1 = vunpack.c.h.s8.bf16 %v429_v19 }
 0x4ab   : > { %5210 = vmatpush2.bf16.msra.mxu0 %v1380_v23 }
 0x4ac   : > { %5251 = vmatpush2.bf16.msra.mxu1 %v1444_v5  ;;  %5261 = vmatprep.subr.bf16.mxu0 %v1505_v39  ;;  %v1496_v39 = vunpack.c.h.s8.bf16 %v396_v25 }
 0x4ad   : > { %5302 = vmatprep.subr.bf16.mxu1 %v1569_v26  ;;  %v1560_v26 = vunpack.c.h.s8.bf16 %v428_v28 }
 0x4ae   : > { %v4967_v49 = vpop.f32.mrf.mxu0  ;;  %5212 = vmatmul.mubr.bf16.vlgmr.msra.gmra.mxu0 %v7263_v48 }
 0x4af   : > { %v5008_v16 = vpop.f32.mrf.mxu1  ;;  %5253 = vmatmul.mubr.bf16.vlgmr.msra.gmra.mxu1 %v7272_v59  ;;  %v4968_v62 = vadd.f32 %v4967_v49, %v8225_v20  ;;  %5262 = vmatpush1.bf16.msra.mxu0 %v1504_v36  ;;  %v1557_v36 = vunpack.c.l.s8.bf16 %v429_v19 }
 0x4b0   : > { %5303 = vmatpush1.bf16.msra.mxu1 %v1568_v51  ;;  %v4969_v4 = vpop.f32.mrf.mxu0  ;;  %5263 = vmatprep.subr.bf16.mxu0 %v1501_v61  ;;  %v425_v51 = vld [vmem:[%s7175_s16 + $0x338] sm:$0xff]  ;;  %v1556_v61 = vunpack.c.l.s8.bf16 %v428_v28 }
 0x4b1   : > { %v5010_v58 = vpop.f32.mrf.mxu1  ;;  %5304 = vmatprep.subr.bf16.mxu1 %v1565_v53  ;;  %v8267_v23 = vadd.f32 %v5008_v16, %v4968_v62  ;;  %v4970_v48 = vadd.f32 %v4969_v4, %v8230_v17  ;;  %5293 = vmatprep.mubr.bf16.mxu0 %v7268_v57  ;;  %v1493_v17 = vunpack.c.l.s8.bf16 %v397_v8  ;;  %v393_v57 = vld [vmem:[%s7175_s16 + $0x238] sm:$0xff]  ;;  %v1553_v49 = vunpack.c.h.s8.bf16 %v425_v51  ;;  %v392_v16 = vld [vmem:[%s7175_s16 + $0x230] sm:$0xff] }
 0x4b2   : > { %5334 = vmatprep.mubr.bf16.mxu1 %v7278_v2  ;;  %v4971_v59 = vpop.f32.mrf.mxu0  ;;  %v1492_v2 = vunpack.c.l.s8.bf16 %v396_v25  ;;  %v1489_v53 = vunpack.c.h.s8.bf16 %v393_v57  ;;  %v424_v62 = vld [vmem:[%s7175_s16 + $0x330] sm:$0xff]  ;;  %v1485_v19 = vunpack.c.l.s8.bf16 %v393_v57  ;;  %v389_v4 = vld [vmem:[%s7175_s16 + $0x218] sm:$0xff] }
 0x4b3   : > { %v5012_v20 = vpop.f32.mrf.mxu1  ;;  %v8272_v5 = vadd.f32 %v5010_v58, %v4970_v48  ;;  %5264 = vmatpush1.bf16.msra.mxu0 %v1500_v34  ;;  %v1488_v34 = vunpack.c.h.s8.bf16 %v392_v16  ;;  %v1552_v8 = vunpack.c.h.s8.bf16 %v424_v62  ;;  %v421_v58 = vld [vmem:[%s7175_s16 + $0x318] sm:$0xff]  ;;  %v1481_v25 = vunpack.c.h.s8.bf16 %v389_v4  ;;  %v388_v48 = vld [vmem:[%s7175_s16 + $0x210] sm:$0xff] }
 0x4b4   : > { %5305 = vmatpush1.bf16.msra.mxu1 %v1564_v10  ;;  %v4972_v11 = vpop.f32.mrf.mxu0  ;;  %5265 = vmatprep.subr.bf16.mxu0 %v1497_v41  ;;  %v1549_v10 = vunpack.c.l.s8.bf16 %v425_v51  ;;  %v1484_v41 = vunpack.c.l.s8.bf16 %v392_v16  ;;  %v1545_v28 = vunpack.c.h.s8.bf16 %v421_v58  ;;  %v420_v59 = vld [vmem:[%s7175_s16 + $0x310] sm:$0xff]  ;;  %v1480_v20 = vunpack.c.h.s8.bf16 %v388_v48 }
 0x4b5   : > { %v5013_v37 = vpop.f32.mrf.mxu1  ;;  %5306 = vmatprep.subr.bf16.mxu1 %v1561_v1  ;;  %v1548_v1 = vunpack.c.l.s8.bf16 %v424_v62  ;;  %v1541_v11 = vunpack.c.l.s8.bf16 %v421_v58  ;;  %v1540_v57 = vunpack.c.l.s8.bf16 %v420_v59 }
 0x4b6   : > { %v417_v37 = vld [vmem:[%s7175_s16 + $0x2f8] sm:$0xff] }
 0x4b7   : > { %5266 = vmatpush1.bf16.msra.mxu0 %v1496_v39  ;;  %v1544_v39 = vunpack.c.h.s8.bf16 %v420_v59  ;;  %v1537_v51 = vunpack.c.h.s8.bf16 %v417_v37  ;;  %v1533_v62 = vunpack.c.l.s8.bf16 %v417_v37 }
 0x4b8   : > { %5307 = vmatpush1.bf16.msra.mxu1 %v1560_v26  ;;  %5267 = vmatprep.subr.bf16.mxu0 %v1493_v17  ;;  %v1477_v26 = vunpack.c.l.s8.bf16 %v389_v4  ;;  %v449_v17 = vld [vmem:[%s7175_s16 + $0x3f8] sm:$0xff] }
 0x4b9   : > { %5308 = vmatprep.subr.bf16.mxu1 %v1557_v36  ;;  %v1476_v36 = vunpack.c.l.s8.bf16 %v388_v48 }
 0x4bb   : > { %5268 = vmatpush1.bf16.msra.mxu0 %v1492_v2  ;;  %v1601_v2 = vunpack.c.h.s8.bf16 %v449_v17 }
 0x4bc   : > { %5309 = vmatpush1.bf16.msra.mxu1 %v1556_v61  ;;  %5269 = vmatprep.subr.bf16.mxu0 %v1489_v53  ;;  %v416_v61 = vld [vmem:[%s7175_s16 + $0x2f0] sm:$0xff] }
 0x4bd   : > { %5310 = vmatprep.subr.bf16.mxu1 %v1553_v49  ;;  %v448_v53 = vld [vmem:[%s7175_s16 + $0x3f0] sm:$0xff]  ;;  %v1536_v49 = vunpack.c.h.s8.bf16 %v416_v61 }
 0x4be   : > { %v1600_v16 = vunpack.c.h.s8.bf16 %v448_v53  ;;  %v1596_v4 = vunpack.c.l.s8.bf16 %v448_v53 }
 0x4bf   : > { %5270 = vmatpush1.bf16.msra.mxu0 %v1488_v34  ;;  %v1597_v34 = vunpack.c.l.s8.bf16 %v449_v17 }
 0x4c0   : > { %5311 = vmatpush1.bf16.msra.mxu1 %v1552_v8  ;;  %5271 = vmatprep.subr.bf16.mxu0 %v1485_v19  ;;  %v413_v8 = vld [vmem:[%s7175_s16 + $0x2d8] sm:$0xff] }
 0x4c1   : > { %5312 = vmatprep.subr.bf16.mxu1 %v1549_v10  ;;  %v445_v19 = vld [vmem:[%s7175_s16 + $0x3d8] sm:$0xff]  ;;  %v1532_v10 = vunpack.c.l.s8.bf16 %v416_v61  ;;  %v1529_v58 = vunpack.c.h.s8.bf16 %v413_v8  ;;  %v1525_v59 = vunpack.c.l.s8.bf16 %v413_v8 }
 0x4c3   : > { %5272 = vmatpush1.bf16.msra.mxu0 %v1484_v41  ;;  %v1593_v41 = vunpack.c.h.s8.bf16 %v445_v19 }
 0x4c4   : > { %5313 = vmatpush1.bf16.msra.mxu1 %v1548_v1  ;;  %5273 = vmatprep.subr.bf16.mxu0 %v1481_v25  ;;  %v412_v1 = vld [vmem:[%s7175_s16 + $0x2d0] sm:$0xff] }
 0x4c5   : > { %5314 = vmatprep.subr.bf16.mxu1 %v1545_v28  ;;  %v444_v25 = vld [vmem:[%s7175_s16 + $0x3d0] sm:$0xff]  ;;  %v1528_v28 = vunpack.c.h.s8.bf16 %v412_v1 }
 0x4c6   : > { %v1592_v48 = vunpack.c.h.s8.bf16 %v444_v25  ;;  %v1588_v37 = vunpack.c.l.s8.bf16 %v444_v25 }
 0x4c7   : > { %5274 = vmatpush1.bf16.msra.mxu0 %v1480_v20  ;;  %v1589_v20 = vunpack.c.l.s8.bf16 %v445_v19 }
 0x4c8   : > { %5315 = vmatpush1.bf16.msra.mxu1 %v1544_v39  ;;  %5275 = vmatprep.subr.bf16.mxu0 %v1477_v26  ;;  %v409_v39 = vld [vmem:[%s7175_s16 + $0x2b8] sm:$0xff] }
 0x4c9   : > { %5316 = vmatprep.subr.bf16.mxu1 %v1541_v11  ;;  %v441_v26 = vld [vmem:[%s7175_s16 + $0x3b8] sm:$0xff]  ;;  %v1524_v11 = vunpack.c.l.s8.bf16 %v412_v1  ;;  %v1521_v17 = vunpack.c.h.s8.bf16 %v409_v39  ;;  %v1517_v53 = vunpack.c.l.s8.bf16 %v409_v39 }
 0x4cb   : > { %5276 = vmatpush1.bf16.msra.mxu0 %v1476_v36  ;;  %v1585_v36 = vunpack.c.h.s8.bf16 %v441_v26 }
 0x4cc   : > { %5317 = vmatpush1.bf16.msra.mxu1 %v1540_v57  ;;  %5277 = vmatprep.subr.bf16.mxu0 %v1537_v51  ;;  %v408_v57 = vld [vmem:[%s7175_s16 + $0x2b0] sm:$0xff] }
 0x4cd   : > { %5318 = vmatprep.subr.bf16.mxu1 %v1601_v2  ;;  %v440_v51 = vld [vmem:[%s7175_s16 + $0x3b0] sm:$0xff]  ;;  %v1520_v2 = vunpack.c.h.s8.bf16 %v408_v57 }
 0x4ce   : > { %v1584_v61 = vunpack.c.h.s8.bf16 %v440_v51  ;;  %v1580_v8 = vunpack.c.l.s8.bf16 %v440_v51 }
 0x4cf   : > { %5278 = vmatpush2.bf16.msra.mxu0 %v1536_v49  ;;  %v1581_v49 = vunpack.c.l.s8.bf16 %v441_v26 }
 0x4d0   : > { %5319 = vmatpush2.bf16.msra.mxu1 %v1600_v16  ;;  %5279 = vmatprep.subr.bf16.mxu0 %v1533_v62  ;;  %v405_v16 = vld [vmem:[%s7175_s16 + $0x298] sm:$0xff] }
 0x4d1   : > { %5320 = vmatprep.subr.bf16.mxu1 %v1597_v34  ;;  %v437_v62 = vld [vmem:[%s7175_s16 + $0x398] sm:$0xff]  ;;  %v1516_v34 = vunpack.c.l.s8.bf16 %v408_v57  ;;  %v1513_v19 = vunpack.c.h.s8.bf16 %v405_v16  ;;  %v1509_v25 = vunpack.c.l.s8.bf16 %v405_v16 }
 0x4d3   : > { %5280 = vmatpush2.bf16.msra.mxu0 %v1532_v10  ;;  %v1577_v10 = vunpack.c.h.s8.bf16 %v437_v62 }
 0x4d4   : > { %5321 = vmatpush2.bf16.msra.mxu1 %v1596_v4  ;;  %5281 = vmatprep.subr.bf16.mxu0 %v1529_v58  ;;  %v404_v4 = vld [vmem:[%s7175_s16 + $0x290] sm:$0xff] }
 0x4d5   : > { %5322 = vmatprep.subr.bf16.mxu1 %v1593_v41  ;;  %v436_v58 = vld [vmem:[%s7175_s16 + $0x390] sm:$0xff]  ;;  %v1512_v41 = vunpack.c.h.s8.bf16 %v404_v4 }
 0x4d6   : > { %v1576_v1 = vunpack.c.h.s8.bf16 %v436_v58  ;;  %v1572_v39 = vunpack.c.l.s8.bf16 %v436_v58 }
 0x4d7   : > { %5282 = vmatpush2.bf16.msra.mxu0 %v1528_v28  ;;  %v1573_v28 = vunpack.c.l.s8.bf16 %v437_v62 }
 0x4d8   : > { %5323 = vmatpush2.bf16.msra.mxu1 %v1592_v48  ;;  %5283 = vmatprep.subr.bf16.mxu0 %v1525_v59  ;;  %v465_v48 = vld [vmem:[%s7175_s16 + $0x478] sm:$0xff] }
 0x4d9   : > { %5324 = vmatprep.subr.bf16.mxu1 %v1589_v20  ;;  %v497_v59 = vld [vmem:[%s7175_s16 + $0x578] sm:$0xff]  ;;  %v1508_v20 = vunpack.c.l.s8.bf16 %v404_v4  ;;  %v1633_v26 = vunpack.c.h.s8.bf16 %v465_v48  ;;  %v1629_v51 = vunpack.c.l.s8.bf16 %v465_v48 }
 0x4db   : > { %5284 = vmatpush2.bf16.msra.mxu0 %v1524_v11  ;;  %v1697_v11 = vunpack.c.h.s8.bf16 %v497_v59 }
 0x4dc   : > { %5325 = vmatpush2.bf16.msra.mxu1 %v1588_v37  ;;  %5285 = vmatprep.subr.bf16.mxu0 %v1521_v17  ;;  %v464_v37 = vld [vmem:[%s7175_s16 + $0x470] sm:$0xff] }
 0x4dd   : > { %5326 = vmatprep.subr.bf16.mxu1 %v1585_v36  ;;  %v496_v17 = vld [vmem:[%s7175_s16 + $0x570] sm:$0xff]  ;;  %v1632_v36 = vunpack.c.h.s8.bf16 %v464_v37 }
 0x4de   : > { %v1696_v57 = vunpack.c.h.s8.bf16 %v496_v17 }
 0x4df   : > { %5286 = vmatpush2.bf16.msra.mxu0 %v1520_v2  ;;  %v1693_v2 = vunpack.c.l.s8.bf16 %v497_v59 }
 0x4e0   : > { %5327 = vmatpush2.bf16.msra.mxu1 %v1584_v61  ;;  %5287 = vmatprep.subr.bf16.mxu0 %v1517_v53  ;;  %v461_v61 = vld [vmem:[%s7175_s16 + $0x458] sm:$0xff] }
 0x4e1   : > { %5328 = vmatprep.subr.bf16.mxu1 %v1581_v49  ;;  %v493_v53 = vld [vmem:[%s7175_s16 + $0x558] sm:$0xff]  ;;  %v1625_v4 = vunpack.c.h.s8.bf16 %v461_v61 }
 0x4e2   : > { %v1689_v58 = vunpack.c.h.s8.bf16 %v493_v53 }
 0x4e3   : > { %5288 = vmatpush2.bf16.msra.mxu0 %v1516_v34  ;;  %v1628_v34 = vunpack.c.l.s8.bf16 %v464_v37 }
 0x4e4   : > { %5329 = vmatpush2.bf16.msra.mxu1 %v1580_v8  ;;  %5289 = vmatprep.subr.bf16.mxu0 %v1513_v19  ;;  %v1692_v8 = vunpack.c.l.s8.bf16 %v496_v17 }
 0x4e5   : > { %5330 = vmatprep.subr.bf16.mxu1 %v1577_v10 }
 0x4e7   : > { %5290 = vmatpush2.bf16.msra.mxu0 %v1512_v41  ;;  %v460_v41 = vld [vmem:[%s7175_s16 + $0x450] sm:$0xff] }
 0x4e8   : > { %5331 = vmatpush2.bf16.msra.mxu1 %v1576_v1  ;;  %5291 = vmatprep.subr.bf16.mxu0 %v1509_v25  ;;  %v492_v1 = vld [vmem:[%s7175_s16 + $0x550] sm:$0xff]  ;;  %v1624_v48 = vunpack.c.h.s8.bf16 %v460_v41 }
 0x4e9   : > { %5332 = vmatprep.subr.bf16.mxu1 %v1573_v28  ;;  %v1688_v59 = vunpack.c.h.s8.bf16 %v492_v1  ;;  %v1684_v37 = vunpack.c.l.s8.bf16 %v492_v1 }
 0x4eb   : > { %5292 = vmatpush2.bf16.msra.mxu0 %v1508_v20 }
 0x4ec   : > { %5333 = vmatpush2.bf16.msra.mxu1 %v1572_v39  ;;  %5343 = vmatprep.subr.bf16.mxu0 %v1633_v26  ;;  %v1685_v26 = vunpack.c.l.s8.bf16 %v493_v53 }
 0x4ed   : > { %5384 = vmatprep.subr.bf16.mxu1 %v1697_v11  ;;  %v489_v11 = vld [vmem:[%s7175_s16 + $0x538] sm:$0xff] }
 0x4ee   : > { %v5049_v49 = vpop.f32.mrf.mxu0  ;;  %5294 = vmatmul.mubr.bf16.vlgmr.msra.gmra.mxu0 %v7323_v35 }
 0x4ef   : > { %v5090_v16 = vpop.f32.mrf.mxu1  ;;  %5335 = vmatmul.mubr.bf16.vlgmr.msra.gmra.mxu1 %v7332_v45  ;;  %v5050_v62 = vadd.f32 %v5049_v49, %v8267_v23  ;;  %5344 = vmatpush1.bf16.msra.mxu0 %v1632_v36  ;;  %v1681_v36 = vunpack.c.h.s8.bf16 %v489_v11  ;;  %v1677_v49 = vunpack.c.l.s8.bf16 %v489_v11 }
 0x4f0   : > { %5385 = vmatpush1.bf16.msra.mxu1 %v1696_v57  ;;  %v5051_v19 = vpop.f32.mrf.mxu0  ;;  %5345 = vmatprep.subr.bf16.mxu0 %v1629_v51  ;;  %v456_v57 = vld [vmem:[%s7175_s16 + $0x430] sm:$0xff] }
 0x4f1   : > { %v5092_v10 = vpop.f32.mrf.mxu1  ;;  %5386 = vmatprep.subr.bf16.mxu1 %v1693_v2  ;;  %v8309_v25 = vadd.f32 %v5090_v16, %v5050_v62  ;;  %v5052_v35 = vadd.f32 %v5051_v19, %v8272_v5  ;;  %5375 = vmatprep.mubr.bf16.mxu0 %v7328_v44  ;;  %v1621_v5 = vunpack.c.l.s8.bf16 %v461_v61  ;;  %v457_v44 = vld [vmem:[%s7175_s16 + $0x438] sm:$0xff]  ;;  %v488_v51 = vld [vmem:[%s7175_s16 + $0x530] sm:$0xff]  ;;  %v1616_v2 = vunpack.c.h.s8.bf16 %v456_v57 }
 0x4f2   : > { %5416 = vmatprep.mubr.bf16.mxu1 %v7338_v54  ;;  %v5053_v45 = vpop.f32.mrf.mxu0  ;;  %v1620_v54 = vunpack.c.l.s8.bf16 %v460_v41  ;;  %v1617_v17 = vunpack.c.h.s8.bf16 %v457_v44  ;;  %v1680_v61 = vunpack.c.h.s8.bf16 %v488_v51  ;;  %v1613_v53 = vunpack.c.l.s8.bf16 %v457_v44  ;;  %v453_v16 = vld [vmem:[%s7175_s16 + $0x418] sm:$0xff]  ;;  %v512_v44 = vld [vmem:[%s7175_s16 + $0x5f0] sm:$0xff] }
 0x4f3   : > { %v5094_v23 = vpop.f32.mrf.mxu1  ;;  %v8314_v28 = vadd.f32 %v5092_v10, %v5052_v35  ;;  %5346 = vmatpush1.bf16.msra.mxu0 %v1628_v34  ;;  %v485_v62 = vld [vmem:[%s7175_s16 + $0x518] sm:$0xff]  ;;  %v1612_v34 = vunpack.c.l.s8.bf16 %v456_v57  ;;  %v1609_v19 = vunpack.c.h.s8.bf16 %v453_v16  ;;  %v1605_v35 = vunpack.c.l.s8.bf16 %v453_v16  ;;  %v508_v16 = vld [vmem:[%s7175_s16 + $0x5d0] sm:$0xff] }
 0x4f4   : > { %5387 = vmatpush1.bf16.msra.mxu1 %v1692_v8  ;;  %v5054_v20 = vpop.f32.mrf.mxu0  ;;  %5347 = vmatprep.subr.bf16.mxu0 %v1625_v4  ;;  %v1676_v8 = vunpack.c.l.s8.bf16 %v488_v51  ;;  %v1673_v10 = vunpack.c.h.s8.bf16 %v485_v62  ;;  %v452_v4 = vld [vmem:[%s7175_s16 + $0x410] sm:$0xff]  ;;  %v1669_v45 = vunpack.c.l.s8.bf16 %v485_v62  ;;  %v481_v23 = vld [vmem:[%s7175_s16 + $0x4f8] sm:$0xff] }
 0x4f5   : > { %v5095_v39 = vpop.f32.mrf.mxu1  ;;  %5388 = vmatprep.subr.bf16.mxu1 %v1689_v58  ;;  %v484_v58 = vld [vmem:[%s7175_s16 + $0x510] sm:$0xff]  ;;  %v1608_v41 = vunpack.c.h.s8.bf16 %v452_v4  ;;  %v509_v57 = vld [vmem:[%s7175_s16 + $0x5d8] sm:$0xff] }
 0x4f6   : > { %v1672_v1 = vunpack.c.h.s8.bf16 %v484_v58  ;;  %v1668_v20 = vunpack.c.l.s8.bf16 %v484_v58  ;;  %v1665_v39 = vunpack.c.h.s8.bf16 %v481_v23 }
 0x4f7   : > { %5348 = vmatpush1.bf16.msra.mxu0 %v1624_v48  ;;  %v513_v48 = vld [vmem:[%s7175_s16 + $0x5f8] sm:$0xff] }
 0x4f8   : > { %5389 = vmatpush1.bf16.msra.mxu1 %v1688_v59  ;;  %5349 = vmatprep.subr.bf16.mxu0 %v1621_v5  ;;  %v1604_v59 = vunpack.c.l.s8.bf16 %v452_v4  ;;  %v1729_v5 = vunpack.c.h.s8.bf16 %v513_v48  ;;  %v505_v4 = vld [vmem:[%s7175_s16 + $0x5b8] sm:$0xff] }
 0x4f9   : > { %5390 = vmatprep.subr.bf16.mxu1 %v1685_v26  ;;  %v480_v26 = vld [vmem:[%s7175_s16 + $0x4f0] sm:$0xff] }
 0x4fa   : > { %v1664_v11 = vunpack.c.h.s8.bf16 %v480_v26  ;;  %v1660_v51 = vunpack.c.l.s8.bf16 %v480_v26  ;;  %v501_v26 = vld [vmem:[%s7175_s16 + $0x598] sm:$0xff] }
 0x4fb   : > { %5350 = vmatpush1.bf16.msra.mxu0 %v1620_v54  ;;  %v1728_v54 = vunpack.c.h.s8.bf16 %v512_v44 }
 0x4fc   : > { %5391 = vmatpush1.bf16.msra.mxu1 %v1684_v37  ;;  %5351 = vmatprep.subr.bf16.mxu0 %v1617_v17  ;;  %v1661_v37 = vunpack.c.l.s8.bf16 %v481_v23  ;;  %v1725_v17 = vunpack.c.l.s8.bf16 %v513_v48  ;;  %v504_v23 = vld [vmem:[%s7175_s16 + $0x5b0] sm:$0xff] }
 0x4fd   : > { %5392 = vmatprep.subr.bf16.mxu1 %v1681_v36  ;;  %v477_v36 = vld [vmem:[%s7175_s16 + $0x4d8] sm:$0xff] }
 0x4ff   : > { %5352 = vmatpush1.bf16.msra.mxu0 %v1616_v2  ;;  %v1724_v2 = vunpack.c.l.s8.bf16 %v512_v44 }
 0x500   : > { %5393 = vmatpush1.bf16.msra.mxu1 %v1680_v61  ;;  %5353 = vmatprep.subr.bf16.mxu0 %v1613_v53  ;;  %v1657_v61 = vunpack.c.h.s8.bf16 %v477_v36  ;;  %v1721_v53 = vunpack.c.h.s8.bf16 %v509_v57 }
 0x501   : > { %5394 = vmatprep.subr.bf16.mxu1 %v1677_v49  ;;  %v476_v49 = vld [vmem:[%s7175_s16 + $0x4d0] sm:$0xff] }
 0x502   : > { %v1656_v62 = vunpack.c.h.s8.bf16 %v476_v49  ;;  %v1652_v58 = vunpack.c.l.s8.bf16 %v476_v49  ;;  %v561_v49 = vld [vmem:[%s7175_s16 + $0x778] sm:$0xff] }
 0x503   : > { %5354 = vmatpush1.bf16.msra.mxu0 %v1612_v34  ;;  %v1720_v34 = vunpack.c.h.s8.bf16 %v508_v16 }
 0x504   : > { %5395 = vmatpush1.bf16.msra.mxu1 %v1676_v8  ;;  %5355 = vmatprep.subr.bf16.mxu0 %v1609_v19  ;;  %v1653_v8 = vunpack.c.l.s8.bf16 %v477_v36  ;;  %v1717_v19 = vunpack.c.l.s8.bf16 %v509_v57  ;;  %v500_v36 = vld [vmem:[%s7175_s16 + $0x590] sm:$0xff] }
 0x505   : > { %5396 = vmatprep.subr.bf16.mxu1 %v1673_v10  ;;  %v473_v10 = vld [vmem:[%s7175_s16 + $0x4b8] sm:$0xff] }
 0x507   : > { %5356 = vmatpush1.bf16.msra.mxu0 %v1608_v41  ;;  %v1716_v41 = vunpack.c.l.s8.bf16 %v508_v16 }
 0x508   : > { %5397 = vmatpush1.bf16.msra.mxu1 %v1672_v1  ;;  %5357 = vmatprep.subr.bf16.mxu0 %v1605_v35  ;;  %v1649_v1 = vunpack.c.h.s8.bf16 %v473_v10  ;;  %v1713_v35 = vunpack.c.h.s8.bf16 %v505_v4 }
 0x509   : > { %5398 = vmatprep.subr.bf16.mxu1 %v1669_v45  ;;  %v472_v45 = vld [vmem:[%s7175_s16 + $0x4b0] sm:$0xff] }
 0x50a   : > { %v1648_v48 = vunpack.c.h.s8.bf16 %v472_v45  ;;  %v1644_v44 = vunpack.c.l.s8.bf16 %v472_v45  ;;  %v557_v45 = vld [vmem:[%s7175_s16 + $0x758] sm:$0xff] }
 0x50b   : > { %5358 = vmatpush1.bf16.msra.mxu0 %v1604_v59  ;;  %v1712_v59 = vunpack.c.h.s8.bf16 %v504_v23 }
 0x50c   : > { %5399 = vmatpush1.bf16.msra.mxu1 %v1668_v20  ;;  %5359 = vmatprep.subr.bf16.mxu0 %v1665_v39  ;;  %v1645_v20 = vunpack.c.l.s8.bf16 %v473_v10  ;;  %v1709_v39 = vunpack.c.l.s8.bf16 %v505_v4  ;;  %v560_v10 = vld [vmem:[%s7175_s16 + $0x770] sm:$0xff] }
 0x50d   : > { %5400 = vmatprep.subr.bf16.mxu1 %v1729_v5  ;;  %v469_v5 = vld [vmem:[%s7175_s16 + $0x498] sm:$0xff] }
 0x50f   : > { %5360 = vmatpush2.bf16.msra.mxu0 %v1664_v11  ;;  %v1708_v11 = vunpack.c.l.s8.bf16 %v504_v23 }
 0x510   : > { %5401 = vmatpush2.bf16.msra.mxu1 %v1728_v54  ;;  %5361 = vmatprep.subr.bf16.mxu0 %v1661_v37  ;;  %v1641_v54 = vunpack.c.h.s8.bf16 %v469_v5  ;;  %v1705_v37 = vunpack.c.h.s8.bf16 %v501_v26 }
 0x511   : > { %5402 = vmatprep.subr.bf16.mxu1 %v1725_v17  ;;  %v468_v17 = vld [vmem:[%s7175_s16 + $0x490] sm:$0xff] }
 0x512   : > { %v1640_v57 = vunpack.c.h.s8.bf16 %v468_v17  ;;  %v1636_v16 = vunpack.c.l.s8.bf16 %v468_v17 }
 0x513   : > { %5362 = vmatpush2.bf16.msra.mxu0 %v1660_v51  ;;  %v1704_v51 = vunpack.c.h.s8.bf16 %v500_v36 }
 0x514   : > { %5403 = vmatpush2.bf16.msra.mxu1 %v1724_v2  ;;  %5363 = vmatprep.subr.bf16.mxu0 %v1657_v61  ;;  %v1637_v2 = vunpack.c.l.s8.bf16 %v469_v5  ;;  %v1701_v61 = vunpack.c.l.s8.bf16 %v501_v26 }
 0x515   : > { %5404 = vmatprep.subr.bf16.mxu1 %v1721_v53  ;;  %v529_v53 = vld [vmem:[%s7175_s16 + $0x678] sm:$0xff] }
 0x517   : > { %5364 = vmatpush2.bf16.msra.mxu0 %v1656_v62  ;;  %v1700_v62 = vunpack.c.l.s8.bf16 %v500_v36 }
 0x518   : > { %5405 = vmatpush2.bf16.msra.mxu1 %v1720_v34  ;;  %5365 = vmatprep.subr.bf16.mxu0 %v1653_v8  ;;  %v1761_v34 = vunpack.c.h.s8.bf16 %v529_v53  ;;  %v1825_v8 = vunpack.c.h.s8.bf16 %v561_v49 }
 0x519   : > { %5406 = vmatprep.subr.bf16.mxu1 %v1717_v19  ;;  %v528_v19 = vld [vmem:[%s7175_s16 + $0x670] sm:$0xff] }
 0x51a   : > { %v1760_v4 = vunpack.c.h.s8.bf16 %v528_v19 }
 0x51b   : > { %5366 = vmatpush2.bf16.msra.mxu0 %v1652_v58  ;;  %v1824_v58 = vunpack.c.h.s8.bf16 %v560_v10 }
 0x51c   : > { %5407 = vmatpush2.bf16.msra.mxu1 %v1716_v41  ;;  %5367 = vmatprep.subr.bf16.mxu0 %v1649_v1  ;;  %v1757_v41 = vunpack.c.l.s8.bf16 %v529_v53  ;;  %v1821_v1 = vunpack.c.l.s8.bf16 %v561_v49  ;;  %v521_v53 = vld [vmem:[%s7175_s16 + $0x638] sm:$0xff] }
 0x51d   : > { %5408 = vmatprep.subr.bf16.mxu1 %v1713_v35  ;;  %v525_v35 = vld [vmem:[%s7175_s16 + $0x658] sm:$0xff] }
 0x51e   : > { %v553_v49 = vld [vmem:[%s7175_s16 + $0x738] sm:$0xff] }
 0x51f   : > { %5368 = vmatpush2.bf16.msra.mxu0 %v1648_v48 }
 0x520   : > { %5409 = vmatpush2.bf16.msra.mxu1 %v1712_v59  ;;  %5369 = vmatprep.subr.bf16.mxu0 %v1645_v20  ;;  %v1756_v20 = vunpack.c.l.s8.bf16 %v528_v19  ;;  %v520_v19 = vld [vmem:[%s7175_s16 + $0x630] sm:$0xff] }
 0x521   : > { %5410 = vmatprep.subr.bf16.mxu1 %v1709_v39  ;;  %v1820_v39 = vunpack.c.l.s8.bf16 %v560_v10  ;;  %v552_v10 = vld [vmem:[%s7175_s16 + $0x730] sm:$0xff] }
 0x523   : > { %5370 = vmatpush2.bf16.msra.mxu0 %v1644_v44  ;;  %v1753_v44 = vunpack.c.h.s8.bf16 %v525_v35 }
 0x524   : > { %5411 = vmatpush2.bf16.msra.mxu1 %v1708_v11  ;;  %5371 = vmatprep.subr.bf16.mxu0 %v1641_v54  ;;  %v1817_v11 = vunpack.c.h.s8.bf16 %v557_v45  ;;  %v524_v54 = vld [vmem:[%s7175_s16 + $0x650] sm:$0xff] }
 0x525   : > { %5412 = vmatprep.subr.bf16.mxu1 %v1705_v37  ;;  %v556_v37 = vld [vmem:[%s7175_s16 + $0x750] sm:$0xff] }
 0x527   : > { %5372 = vmatpush2.bf16.msra.mxu0 %v1640_v57  ;;  %v1752_v57 = vunpack.c.h.s8.bf16 %v524_v54 }
 0x528   : > { %5413 = vmatpush2.bf16.msra.mxu1 %v1704_v51  ;;  %5373 = vmatprep.subr.bf16.mxu0 %v1637_v2  ;;  %v1816_v51 = vunpack.c.h.s8.bf16 %v556_v37 }
 0x529   : > { %5414 = vmatprep.subr.bf16.mxu1 %v1701_v61 }
 0x52b   : > { %5374 = vmatpush2.bf16.msra.mxu0 %v1636_v16  ;;  %v1748_v16 = vunpack.c.l.s8.bf16 %v524_v54 }
 0x52c   : > { %5415 = vmatpush2.bf16.msra.mxu1 %v1700_v62  ;;  %5425 = vmatprep.subr.bf16.mxu0 %v1761_v34  ;;  %v1812_v62 = vunpack.c.l.s8.bf16 %v556_v37  ;;  %v1745_v34 = vunpack.c.h.s8.bf16 %v521_v53  ;;  %v545_v37 = vld [vmem:[%s7175_s16 + $0x6f8] sm:$0xff] }
 0x52d   : > { %5466 = vmatprep.subr.bf16.mxu1 %v1825_v8  ;;  %v1809_v8 = vunpack.c.h.s8.bf16 %v553_v49 }
 0x52e   : > { %v5131_v23 = vpop.f32.mrf.mxu0  ;;  %5376 = vmatmul.mubr.bf16.vlgmr.msra.gmra.mxu0 %v7381_v33 }
 0x52f   : > { %v5172_v48 = vpop.f32.mrf.mxu1  ;;  %5417 = vmatmul.mubr.bf16.vlgmr.msra.gmra.mxu1 %v7390_v40  ;;  %v5132_v59 = vadd.f32 %v5131_v23, %v8309_v25  ;;  %5426 = vmatpush1.bf16.msra.mxu0 %v1760_v4  ;;  %v1744_v4 = vunpack.c.h.s8.bf16 %v520_v19  ;;  %v1740_v23 = vunpack.c.l.s8.bf16 %v520_v19 }
 0x530   : > { %5467 = vmatpush1.bf16.msra.mxu1 %v1824_v58  ;;  %v5133_v5 = vpop.f32.mrf.mxu0  ;;  %5427 = vmatprep.subr.bf16.mxu0 %v1757_v41  ;;  %v1808_v58 = vunpack.c.h.s8.bf16 %v552_v10  ;;  %v1741_v41 = vunpack.c.l.s8.bf16 %v521_v53  ;;  %v1789_v53 = vunpack.c.l.s8.bf16 %v545_v37 }
 0x531   : > { %v5174_v26 = vpop.f32.mrf.mxu1  ;;  %5468 = vmatprep.subr.bf16.mxu1 %v1821_v1  ;;  %v8351_v17 = vadd.f32 %v5172_v48, %v5132_v59  ;;  %v5134_v33 = vadd.f32 %v5133_v5, %v8314_v28  ;;  %5457 = vmatprep.mubr.bf16.mxu0 %v7386_v43  ;;  %v1749_v28 = vunpack.c.l.s8.bf16 %v525_v35  ;;  %v1813_v43 = vunpack.c.l.s8.bf16 %v557_v45  ;;  %v517_v35 = vld [vmem:[%s7175_s16 + $0x618] sm:$0xff]  ;;  %v548_v5 = vld [vmem:[%s7175_s16 + $0x710] sm:$0xff] }
 0x532   : > { %5498 = vmatprep.mubr.bf16.mxu1 %v7396_v55  ;;  %v5135_v40 = vpop.f32.mrf.mxu0  ;;  %v1805_v1 = vunpack.c.l.s8.bf16 %v553_v49  ;;  %v549_v45 = vld [vmem:[%s7175_s16 + $0x718] sm:$0xff]  ;;  %v1804_v48 = vunpack.c.l.s8.bf16 %v552_v10  ;;  %v1737_v59 = vunpack.c.h.s8.bf16 %v517_v35 }
 0x533   : > { %v5176_v25 = vpop.f32.mrf.mxu1  ;;  %v8356_v36 = vadd.f32 %v5174_v26, %v5134_v33  ;;  %5428 = vmatpush1.bf16.msra.mxu0 %v1756_v20  ;;  %v1801_v20 = vunpack.c.h.s8.bf16 %v549_v45  ;;  %v1797_v54 = vunpack.c.l.s8.bf16 %v549_v45  ;;  %v577_v33 = vld [vmem:[%s7175_s16 + $0x7f8] sm:$0xff] }
 0x534   : > { %5469 = vmatpush1.bf16.msra.mxu1 %v1820_v39  ;;  %v5136_v2 = vpop.f32.mrf.mxu0  ;;  %5429 = vmatprep.subr.bf16.mxu0 %v1753_v44  ;;  %v516_v39 = vld [vmem:[%s7175_s16 + $0x610] sm:$0xff]  ;;  %v1800_v44 = vunpack.c.h.s8.bf16 %v548_v5  ;;  %v1796_v25 = vunpack.c.l.s8.bf16 %v548_v5  ;;  %v1853_v49 = vunpack.c.l.s8.bf16 %v577_v33 }
 0x535   : > { %v5177_v61 = vpop.f32.mrf.mxu1  ;;  %5470 = vmatprep.subr.bf16.mxu1 %v1817_v11  ;;  %v6495_v55 = vcombine.low %v8351_v17, %v8356_v36  ;;  %v1736_v26 = vunpack.c.h.s8.bf16 %v516_v39  ;;  %v1733_v11 = vunpack.c.l.s8.bf16 %v517_v35  ;;  %v1732_v40 = vunpack.c.l.s8.bf16 %v516_v39  ;;  %v544_v2 = vld [vmem:[%s7175_s16 + $0x6f0] sm:$0xff] }
 0x536   : > { %v576_v61 = vld [vmem:[%s7175_s16 + $0x7f0] sm:$0xff] }
 0x537   : > { %5430 = vmatpush1.bf16.msra.mxu0 %v1752_v57  ;;  %v1793_v57 = vunpack.c.h.s8.bf16 %v545_v37 }
 0x538   : > { %5471 = vmatpush1.bf16.msra.mxu1 %v1816_v51  ;;  %5431 = vmatprep.subr.bf16.mxu0 %v1749_v28  ;;  %v1857_v51 = vunpack.c.h.s8.bf16 %v577_v33  ;;  %v1792_v28 = vunpack.c.h.s8.bf16 %v544_v2 }
 0x539   : > { %5472 = vmatprep.subr.bf16.mxu1 %v1813_v43  ;;  %v1856_v43 = vunpack.c.h.s8.bf16 %v576_v61 }
 0x53b   : > { %5432 = vmatpush1.bf16.msra.mxu0 %v1748_v16  ;;  %v541_v16 = vld [vmem:[%s7175_s16 + $0x6d8] sm:$0xff] }
 0x53c   : > { %5473 = vmatpush1.bf16.msra.mxu1 %v1812_v62  ;;  %5433 = vmatprep.subr.bf16.mxu0 %v1745_v34  ;;  %v573_v62 = vld [vmem:[%s7175_s16 + $0x7d8] sm:$0xff]  ;;  %v1788_v34 = vunpack.c.l.s8.bf16 %v544_v2  ;;  %v1785_v19 = vunpack.c.h.s8.bf16 %v541_v16  ;;  %v1781_v35 = vunpack.c.l.s8.bf16 %v541_v16 }
 0x53d   : > { %5474 = vmatprep.subr.bf16.mxu1 %v1809_v8  ;;  %v1852_v8 = vunpack.c.l.s8.bf16 %v576_v61  ;;  %v1849_v10 = vunpack.c.h.s8.bf16 %v573_v62  ;;  %v1845_v45 = vunpack.c.l.s8.bf16 %v573_v62 }
 0x53f   : > { %5434 = vmatpush1.bf16.msra.mxu0 %v1744_v4  ;;  %v540_v4 = vld [vmem:[%s7175_s16 + $0x6d0] sm:$0xff] }
 0x540   : > { %5475 = vmatpush1.bf16.msra.mxu1 %v1808_v58  ;;  %5435 = vmatprep.subr.bf16.mxu0 %v1741_v41  ;;  %v572_v58 = vld [vmem:[%s7175_s16 + $0x7d0] sm:$0xff]  ;;  %v1784_v41 = vunpack.c.h.s8.bf16 %v540_v4 }
 0x541   : > { %5476 = vmatprep.subr.bf16.mxu1 %v1805_v1  ;;  %v1848_v1 = vunpack.c.h.s8.bf16 %v572_v58 }
 0x543   : > { %5436 = vmatpush1.bf16.msra.mxu0 %v1740_v23  ;;  %v537_v23 = vld [vmem:[%s7175_s16 + $0x6b8] sm:$0xff] }
 0x544   : > { %5477 = vmatpush1.bf16.msra.mxu1 %v1804_v48  ;;  %5437 = vmatprep.subr.bf16.mxu0 %v1737_v59  ;;  %v569_v48 = vld [vmem:[%s7175_s16 + $0x7b8] sm:$0xff]  ;;  %v1780_v59 = vunpack.c.l.s8.bf16 %v540_v4  ;;  %v1777_v39 = vunpack.c.h.s8.bf16 %v537_v23  ;;  %v1773_v37 = vunpack.c.l.s8.bf16 %v537_v23 }
 0x545   : > { %5478 = vmatprep.subr.bf16.mxu1 %v1801_v20  ;;  %v1844_v20 = vunpack.c.l.s8.bf16 %v572_v58  ;;  %v1841_v5 = vunpack.c.h.s8.bf16 %v569_v48  ;;  %v1837_v33 = vunpack.c.l.s8.bf16 %v569_v48 }
 0x547   : > { %5438 = vmatpush1.bf16.msra.mxu0 %v1736_v26  ;;  %v536_v26 = vld [vmem:[%s7175_s16 + $0x6b0] sm:$0xff] }
 0x548   : > { %5479 = vmatpush1.bf16.msra.mxu1 %v1800_v44  ;;  %5439 = vmatprep.subr.bf16.mxu0 %v1733_v11  ;;  %v568_v44 = vld [vmem:[%s7175_s16 + $0x7b0] sm:$0xff]  ;;  %v1776_v11 = vunpack.c.h.s8.bf16 %v536_v26 }
 0x549   : > { %5480 = vmatprep.subr.bf16.mxu1 %v1797_v54  ;;  %v1840_v54 = vunpack.c.h.s8.bf16 %v568_v44 }
 0x54b   : > { %5440 = vmatpush1.bf16.msra.mxu0 %v1732_v40  ;;  %v533_v40 = vld [vmem:[%s7175_s16 + $0x698] sm:$0xff] }
 0x54c   : > { %5481 = vmatpush1.bf16.msra.mxu1 %v1796_v25  ;;  %5441 = vmatprep.subr.bf16.mxu0 %v1793_v57  ;;  %v565_v25 = vld [vmem:[%s7175_s16 + $0x798] sm:$0xff]  ;;  %v1772_v57 = vunpack.c.l.s8.bf16 %v536_v26  ;;  %v1769_v2 = vunpack.c.h.s8.bf16 %v533_v40  ;;  %v1765_v16 = vunpack.c.l.s8.bf16 %v533_v40 }
 0x54d   : > { %5482 = vmatprep.subr.bf16.mxu1 %v1857_v51  ;;  %v1836_v51 = vunpack.c.l.s8.bf16 %v568_v44  ;;  %v1833_v61 = vunpack.c.h.s8.bf16 %v565_v25  ;;  %v1829_v62 = vunpack.c.l.s8.bf16 %v565_v25  ;;  %v588_v25 = vld [vmem:[%s7175_s16 + $0x850] sm:$0xff] }
 0x54f   : > { %5442 = vmatpush2.bf16.msra.mxu0 %v1792_v28  ;;  %v532_v28 = vld [vmem:[%s7175_s16 + $0x690] sm:$0xff] }
 0x550   : > { %5483 = vmatpush2.bf16.msra.mxu1 %v1856_v43  ;;  %5443 = vmatprep.subr.bf16.mxu0 %v1789_v53  ;;  %v564_v43 = vld [vmem:[%s7175_s16 + $0x790] sm:$0xff]  ;;  %v1768_v53 = vunpack.c.h.s8.bf16 %v532_v28 }
 0x551   : > { %5484 = vmatprep.subr.bf16.mxu1 %v1853_v49  ;;  %v1832_v49 = vunpack.c.h.s8.bf16 %v564_v43 }
 0x553   : > { %5444 = vmatpush2.bf16.msra.mxu0 %v1788_v34  ;;  %v593_v34 = vld [vmem:[%s7175_s16 + $0x878] sm:$0xff] }
 0x554   : > { %5485 = vmatpush2.bf16.msra.mxu1 %v1852_v8  ;;  %5445 = vmatprep.subr.bf16.mxu0 %v1785_v19  ;;  %v625_v8 = vld [vmem:[%s7175_s16 + $0x978] sm:$0xff]  ;;  %v1764_v19 = vunpack.c.l.s8.bf16 %v532_v28  ;;  %v1889_v4 = vunpack.c.h.s8.bf16 %v593_v34  ;;  %v1885_v23 = vunpack.c.l.s8.bf16 %v593_v34 }
 0x555   : > { %5486 = vmatprep.subr.bf16.mxu1 %v1849_v10  ;;  %v1828_v10 = vunpack.c.l.s8.bf16 %v564_v43  ;;  %v1953_v58 = vunpack.c.h.s8.bf16 %v625_v8  ;;  %v1949_v48 = vunpack.c.l.s8.bf16 %v625_v8 }
 0x557   : > { %5446 = vmatpush2.bf16.msra.mxu0 %v1784_v41  ;;  %v592_v41 = vld [vmem:[%s7175_s16 + $0x870] sm:$0xff] }
 0x558   : > { %5487 = vmatpush2.bf16.msra.mxu1 %v1848_v1  ;;  %5447 = vmatprep.subr.bf16.mxu0 %v1781_v35  ;;  %v624_v1 = vld [vmem:[%s7175_s16 + $0x970] sm:$0xff]  ;;  %v1888_v35 = vunpack.c.h.s8.bf16 %v592_v41  ;;  %v1884_v44 = vunpack.c.l.s8.bf16 %v592_v41 }
 0x559   : > { %5488 = vmatprep.subr.bf16.mxu1 %v1845_v45  ;;  %v1952_v45 = vunpack.c.h.s8.bf16 %v624_v1 }
 0x55b   : > { %5448 = vmatpush2.bf16.msra.mxu0 %v1780_v59  ;;  %v589_v59 = vld [vmem:[%s7175_s16 + $0x858] sm:$0xff] }
 0x55c   : > { %5489 = vmatpush2.bf16.msra.mxu1 %v1844_v20  ;;  %5449 = vmatprep.subr.bf16.mxu0 %v1777_v39  ;;  %v621_v20 = vld [vmem:[%s7175_s16 + $0x958] sm:$0xff] }
 0x55d   : > { %5490 = vmatprep.subr.bf16.mxu1 %v1841_v5  ;;  %v1945_v40 = vunpack.c.h.s8.bf16 %v621_v20 }
 0x55f   : > { %5450 = vmatpush2.bf16.msra.mxu0 %v1776_v11  ;;  %v1948_v11 = vunpack.c.l.s8.bf16 %v624_v1 }
 0x560   : > { %5491 = vmatpush2.bf16.msra.mxu1 %v1840_v54  ;;  %5451 = vmatprep.subr.bf16.mxu0 %v1773_v37 }
 0x561   : > { %5492 = vmatprep.subr.bf16.mxu1 %v1837_v33  ;;  %v1881_v33 = vunpack.c.h.s8.bf16 %v589_v59 }
 0x563   : > { %5452 = vmatpush2.bf16.msra.mxu0 %v1772_v57  ;;  %v620_v57 = vld [vmem:[%s7175_s16 + $0x950] sm:$0xff] }
 0x564   : > { %5493 = vmatpush2.bf16.msra.mxu1 %v1836_v51  ;;  %5453 = vmatprep.subr.bf16.mxu0 %v1769_v2  ;;  %v1880_v2 = vunpack.c.h.s8.bf16 %v588_v25 }
 0x565   : > { %5494 = vmatprep.subr.bf16.mxu1 %v1833_v61  ;;  %v1944_v61 = vunpack.c.h.s8.bf16 %v620_v57 }
 0x567   : > { %5454 = vmatpush2.bf16.msra.mxu0 %v1768_v53  ;;  %v1877_v53 = vunpack.c.l.s8.bf16 %v589_v59 }
 0x568   : > { %5495 = vmatpush2.bf16.msra.mxu1 %v1832_v49  ;;  %5455 = vmatprep.subr.bf16.mxu0 %v1765_v16  ;;  %v1941_v49 = vunpack.c.l.s8.bf16 %v621_v20  ;;  %v585_v16 = vld [vmem:[%s7175_s16 + $0x838] sm:$0xff] }
 0x569   : > { %5496 = vmatprep.subr.bf16.mxu1 %v1829_v62  ;;  %v617_v62 = vld [vmem:[%s7175_s16 + $0x938] sm:$0xff]  ;;  %v1873_v34 = vunpack.c.h.s8.bf16 %v585_v16  ;;  %v1869_v41 = vunpack.c.l.s8.bf16 %v585_v16 }
 0x56a   : > { %v1937_v8 = vunpack.c.h.s8.bf16 %v617_v62  ;;  %v1933_v1 = vunpack.c.l.s8.bf16 %v617_v62  ;;  %v605_v16 = vld [vmem:[%s7175_s16 + $0x8d8] sm:$0xff] }
 0x56b   : > { %5456 = vmatpush2.bf16.msra.mxu0 %v1764_v19  ;;  %v584_v19 = vld [vmem:[%s7175_s16 + $0x830] sm:$0xff]  ;;  %v637_v62 = vld [vmem:[%s7175_s16 + $0x9d8] sm:$0xff] }
 0x56c   : > { %5497 = vmatpush2.bf16.msra.mxu1 %v1828_v10  ;;  %5507 = vmatprep.subr.bf16.mxu0 %v1889_v4  ;;  %v616_v10 = vld [vmem:[%s7175_s16 + $0x930] sm:$0xff]  ;;  %v1872_v4 = vunpack.c.h.s8.bf16 %v584_v19 }
 0x56d   : > { %5548 = vmatprep.subr.bf16.mxu1 %v1953_v58  ;;  %v1936_v58 = vunpack.c.h.s8.bf16 %v616_v10 }
 0x56e   : > { %v5213_v39 = vpop.f32.mrf.mxu0  ;;  %5458 = vmatmul.mubr.bf16.vlgmr.msra.gmra.mxu0 %v7441_v42 }
 0x56f   : > { %v5254_v5 = vpop.f32.mrf.mxu1  ;;  %5499 = vmatmul.mubr.bf16.vlgmr.msra.gmra.mxu1 %v7450_v50  ;;  %5508 = vmatpush1.bf16.msra.mxu0 %v1888_v35  ;;  %v581_v35 = vld [vmem:[%s7175_s16 + $0x818] sm:$0xff] }
 0x570   : > { %v8392_v26 = vadd.f32 %v5254_v5, %v5213_v39  ;;  %5549 = vmatpush1.bf16.msra.mxu1 %v1952_v45  ;;  %v5215_v54 = vpop.f32.mrf.mxu0  ;;  %5509 = vmatprep.subr.bf16.mxu0 %v1885_v23  ;;  %v613_v45 = vld [vmem:[%s7175_s16 + $0x918] sm:$0xff]  ;;  %v1868_v23 = vunpack.c.l.s8.bf16 %v584_v19  ;;  %v1865_v59 = vunpack.c.h.s8.bf16 %v581_v35  ;;  %v580_v39 = vld [vmem:[%s7175_s16 + $0x810] sm:$0xff] }
 0x571   : > { %v5256_v37 = vpop.f32.mrf.mxu1  ;;  %5550 = vmatprep.subr.bf16.mxu1 %v1949_v48  ;;  %5539 = vmatprep.mubr.bf16.mxu0 %v7446_v56  ;;  %v1876_v56 = vunpack.c.l.s8.bf16 %v588_v25  ;;  %v1932_v48 = vunpack.c.l.s8.bf16 %v616_v10  ;;  %v1929_v20 = vunpack.c.h.s8.bf16 %v613_v45  ;;  %v612_v5 = vld [vmem:[%s7175_s16 + $0x910] sm:$0xff]  ;;  %v1860_v25 = vunpack.c.l.s8.bf16 %v580_v39 }
 0x572   : > { %v8396_v51 = vadd.f32 %v5256_v37, %v5215_v54  ;;  %5580 = vmatprep.mubr.bf16.mxu1 %v7456_v3  ;;  %v5217_v42 = vpop.f32.mrf.mxu0  ;;  %v1940_v3 = vunpack.c.l.s8.bf16 %v620_v57  ;;  %v1861_v54 = vunpack.c.l.s8.bf16 %v581_v35  ;;  %v1925_v37 = vunpack.c.l.s8.bf16 %v613_v45  ;;  %v604_v19 = vld [vmem:[%s7175_s16 + $0x8d0] sm:$0xff]  ;;  %v601_v35 = vld [vmem:[%s7175_s16 + $0x8b8] sm:$0xff] }
 0x573   : > { %v5258_v50 = vpop.f32.mrf.mxu1  ;;  %5510 = vmatpush1.bf16.msra.mxu0 %v1884_v44  ;;  %v1864_v44 = vunpack.c.h.s8.bf16 %v580_v39  ;;  %v1924_v57 = vunpack.c.l.s8.bf16 %v612_v5  ;;  %v636_v10 = vld [vmem:[%s7175_s16 + $0x9d0] sm:$0xff]  ;;  %v633_v45 = vld [vmem:[%s7175_s16 + $0x9b8] sm:$0xff] }
 0x574   : > { %5551 = vmatpush1.bf16.msra.mxu1 %v1948_v11  ;;  %v5218_v28 = vpop.f32.mrf.mxu0  ;;  %5511 = vmatprep.subr.bf16.mxu0 %v1881_v33  ;;  %v1928_v11 = vunpack.c.h.s8.bf16 %v612_v5  ;;  %v609_v33 = vld [vmem:[%s7175_s16 + $0x8f8] sm:$0xff]  ;;  %v600_v39 = vld [vmem:[%s7175_s16 + $0x8b0] sm:$0xff] }
 0x575   : > { %v5259_v43 = vpop.f32.mrf.mxu1  ;;  %5552 = vmatprep.subr.bf16.mxu1 %v1945_v40  ;;  %v641_v40 = vld [vmem:[%s7175_s16 + $0x9f8] sm:$0xff]  ;;  %v1921_v42 = vunpack.c.h.s8.bf16 %v609_v33  ;;  %v632_v5 = vld [vmem:[%s7175_s16 + $0x9b0] sm:$0xff] }
 0x576   : > { %v1985_v50 = vunpack.c.h.s8.bf16 %v641_v40 }
 0x577   : > { %5512 = vmatpush1.bf16.msra.mxu0 %v1880_v2  ;;  %v608_v2 = vld [vmem:[%s7175_s16 + $0x8f0] sm:$0xff] }
 0x578   : > { %5553 = vmatpush1.bf16.msra.mxu1 %v1944_v61  ;;  %5513 = vmatprep.subr.bf16.mxu0 %v1877_v53  ;;  %v640_v61 = vld [vmem:[%s7175_s16 + $0x9f0] sm:$0xff]  ;;  %v1920_v28 = vunpack.c.h.s8.bf16 %v608_v2  ;;  %v1917_v53 = vunpack.c.l.s8.bf16 %v609_v33  ;;  %v597_v33 = vld [vmem:[%s7175_s16 + $0x898] sm:$0xff] }
 0x579   : > { %5554 = vmatprep.subr.bf16.mxu1 %v1941_v49  ;;  %v1984_v43 = vunpack.c.h.s8.bf16 %v640_v61  ;;  %v1981_v49 = vunpack.c.l.s8.bf16 %v641_v40  ;;  %v629_v40 = vld [vmem:[%s7175_s16 + $0x998] sm:$0xff] }
 0x57b   : > { %5514 = vmatpush1.bf16.msra.mxu0 %v1876_v56  ;;  %v1916_v56 = vunpack.c.l.s8.bf16 %v608_v2  ;;  %v596_v2 = vld [vmem:[%s7175_s16 + $0x890] sm:$0xff] }
 0x57c   : > { %5555 = vmatpush1.bf16.msra.mxu1 %v1940_v3  ;;  %5515 = vmatprep.subr.bf16.mxu0 %v1873_v34  ;;  %v1980_v3 = vunpack.c.l.s8.bf16 %v640_v61  ;;  %v1913_v34 = vunpack.c.h.s8.bf16 %v605_v16  ;;  %v628_v61 = vld [vmem:[%s7175_s16 + $0x990] sm:$0xff] }
 0x57d   : > { %5556 = vmatprep.subr.bf16.mxu1 %v1937_v8  ;;  %v1977_v8 = vunpack.c.h.s8.bf16 %v637_v62 }
 0x57f   : > { %5516 = vmatpush1.bf16.msra.mxu0 %v1872_v4  ;;  %v1912_v4 = vunpack.c.h.s8.bf16 %v604_v19 }
 0x580   : > { %5557 = vmatpush1.bf16.msra.mxu1 %v1936_v58  ;;  %5517 = vmatprep.subr.bf16.mxu0 %v1869_v41  ;;  %v1976_v58 = vunpack.c.h.s8.bf16 %v636_v10  ;;  %v1909_v41 = vunpack.c.l.s8.bf16 %v605_v16  ;;  %v657_v16 = vld [vmem:[%s7175_s16 + $0xa78] sm:$0xff] }
 0x581   : > { %5558 = vmatprep.subr.bf16.mxu1 %v1933_v1  ;;  %v1973_v1 = vunpack.c.l.s8.bf16 %v637_v62  ;;  %v689_v62 = vld [vmem:[%s7175_s16 + $0xb78] sm:$0xff] }
 0x583   : > { %5518 = vmatpush1.bf16.msra.mxu0 %v1868_v23  ;;  %v1908_v23 = vunpack.c.l.s8.bf16 %v604_v19  ;;  %v656_v19 = vld [vmem:[%s7175_s16 + $0xa70] sm:$0xff] }
 0x584   : > { %5559 = vmatpush1.bf16.msra.mxu1 %v1932_v48  ;;  %5519 = vmatprep.subr.bf16.mxu0 %v1865_v59  ;;  %v1972_v48 = vunpack.c.l.s8.bf16 %v636_v10  ;;  %v1905_v59 = vunpack.c.h.s8.bf16 %v601_v35  ;;  %v688_v10 = vld [vmem:[%s7175_s16 + $0xb70] sm:$0xff] }
 0x585   : > { %5560 = vmatprep.subr.bf16.mxu1 %v1929_v20  ;;  %v1969_v20 = vunpack.c.h.s8.bf16 %v633_v45 }
 0x587   : > { %5520 = vmatpush1.bf16.msra.mxu0 %v1864_v44  ;;  %v1904_v44 = vunpack.c.h.s8.bf16 %v600_v39 }
 0x588   : > { %5561 = vmatpush1.bf16.msra.mxu1 %v1928_v11  ;;  %5521 = vmatprep.subr.bf16.mxu0 %v1861_v54  ;;  %v1968_v11 = vunpack.c.h.s8.bf16 %v632_v5  ;;  %v1901_v54 = vunpack.c.l.s8.bf16 %v601_v35  ;;  %v653_v35 = vld [vmem:[%s7175_s16 + $0xa58] sm:$0xff] }
 0x589   : > { %5562 = vmatprep.subr.bf16.mxu1 %v1925_v37  ;;  %v1965_v37 = vunpack.c.l.s8.bf16 %v633_v45  ;;  %v685_v45 = vld [vmem:[%s7175_s16 + $0xb58] sm:$0xff] }
 0x58b   : > { %5522 = vmatpush1.bf16.msra.mxu0 %v1860_v25  ;;  %v1900_v25 = vunpack.c.l.s8.bf16 %v600_v39  ;;  %v2076_v39 = vunpack.c.l.s8.bf16 %v688_v10 }
 0x58c   : > { %5563 = vmatpush1.bf16.msra.mxu1 %v1924_v57  ;;  %5523 = vmatprep.subr.bf16.mxu0 %v1921_v42  ;;  %v1964_v57 = vunpack.c.l.s8.bf16 %v632_v5  ;;  %v1897_v42 = vunpack.c.h.s8.bf16 %v597_v33 }
 0x58d   : > { %5564 = vmatprep.subr.bf16.mxu1 %v1985_v50  ;;  %v1961_v50 = vunpack.c.h.s8.bf16 %v629_v40 }
 0x58f   : > { %5524 = vmatpush2.bf16.msra.mxu0 %v1920_v28  ;;  %v1896_v28 = vunpack.c.h.s8.bf16 %v596_v2 }
 0x590   : > { %5565 = vmatpush2.bf16.msra.mxu1 %v1984_v43  ;;  %5525 = vmatprep.subr.bf16.mxu0 %v1917_v53  ;;  %v1960_v43 = vunpack.c.h.s8.bf16 %v628_v61  ;;  %v1893_v53 = vunpack.c.l.s8.bf16 %v597_v33  ;;  %v684_v33 = vld [vmem:[%s7175_s16 + $0xb50] sm:$0xff] }
 0x591   : > { %5566 = vmatprep.subr.bf16.mxu1 %v1981_v49  ;;  %v1957_v49 = vunpack.c.l.s8.bf16 %v629_v40 }
 0x593   : > { %5526 = vmatpush2.bf16.msra.mxu0 %v1916_v56  ;;  %v1892_v56 = vunpack.c.l.s8.bf16 %v596_v2 }
 0x594   : > { %5567 = vmatpush2.bf16.msra.mxu1 %v1980_v3  ;;  %5527 = vmatprep.subr.bf16.mxu0 %v1913_v34  ;;  %v1956_v3 = vunpack.c.l.s8.bf16 %v628_v61  ;;  %v2017_v34 = vunpack.c.h.s8.bf16 %v657_v16  ;;  %v2069_v61 = vunpack.c.l.s8.bf16 %v685_v45 }
 0x595   : > { %5568 = vmatprep.subr.bf16.mxu1 %v1977_v8  ;;  %v2081_v8 = vunpack.c.h.s8.bf16 %v689_v62 }
 0x597   : > { %5528 = vmatpush2.bf16.msra.mxu0 %v1912_v4  ;;  %v2016_v4 = vunpack.c.h.s8.bf16 %v656_v19 }
 0x598   : > { %5569 = vmatpush2.bf16.msra.mxu1 %v1976_v58  ;;  %5529 = vmatprep.subr.bf16.mxu0 %v1909_v41  ;;  %v2080_v58 = vunpack.c.h.s8.bf16 %v688_v10  ;;  %v2013_v41 = vunpack.c.l.s8.bf16 %v657_v16  ;;  %v648_v16 = vld [vmem:[%s7175_s16 + $0xa30] sm:$0xff]  ;;  %v677_v10 = vld [vmem:[%s7175_s16 + $0xb18] sm:$0xff] }
 0x599   : > { %5570 = vmatprep.subr.bf16.mxu1 %v1973_v1  ;;  %v2077_v1 = vunpack.c.l.s8.bf16 %v689_v62  ;;  %v680_v62 = vld [vmem:[%s7175_s16 + $0xb30] sm:$0xff] }
 0x59b   : > { %5530 = vmatpush2.bf16.msra.mxu0 %v1908_v23 }
 0x59c   : > { %5571 = vmatpush2.bf16.msra.mxu1 %v1972_v48  ;;  %5531 = vmatprep.subr.bf16.mxu0 %v1905_v59 }
 0x59d   : > { %5572 = vmatprep.subr.bf16.mxu1 %v1969_v20  ;;  %v2012_v20 = vunpack.c.l.s8.bf16 %v656_v19  ;;  %v645_v19 = vld [vmem:[%s7175_s16 + $0xa18] sm:$0xff] }
 0x59f   : > { %5532 = vmatpush2.bf16.msra.mxu0 %v1904_v44 }
 0x5a0   : > { %5573 = vmatpush2.bf16.msra.mxu1 %v1968_v11  ;;  %5533 = vmatprep.subr.bf16.mxu0 %v1901_v54  ;;  %v2009_v11 = vunpack.c.h.s8.bf16 %v653_v35  ;;  %v2073_v54 = vunpack.c.h.s8.bf16 %v685_v45  ;;  %v676_v45 = vld [vmem:[%s7175_s16 + $0xb10] sm:$0xff] }
 0x5a1   : > { %5574 = vmatprep.subr.bf16.mxu1 %v1965_v37  ;;  %v652_v37 = vld [vmem:[%s7175_s16 + $0xa50] sm:$0xff] }
 0x5a3   : > { %5534 = vmatpush2.bf16.msra.mxu0 %v1900_v25 }
 0x5a4   : > { %5575 = vmatpush2.bf16.msra.mxu1 %v1964_v57  ;;  %5535 = vmatprep.subr.bf16.mxu0 %v1897_v42  ;;  %v2008_v57 = vunpack.c.h.s8.bf16 %v652_v37  ;;  %v2072_v42 = vunpack.c.h.s8.bf16 %v684_v33 }
 0x5a5   : > { %5576 = vmatprep.subr.bf16.mxu1 %v1961_v50 }
 0x5a7   : > { %5536 = vmatpush2.bf16.msra.mxu0 %v1896_v28  ;;  %v681_v28 = vld [vmem:[%s7175_s16 + $0xb38] sm:$0xff] }
 0x5a8   : > { %5577 = vmatpush2.bf16.msra.mxu1 %v1960_v43  ;;  %5537 = vmatprep.subr.bf16.mxu0 %v1893_v53  ;;  %v2068_v43 = vunpack.c.l.s8.bf16 %v684_v33  ;;  %v672_v33 = vld [vmem:[%s7175_s16 + $0xaf0] sm:$0xff] }
 0x5a9   : > { %5578 = vmatprep.subr.bf16.mxu1 %v1957_v49  ;;  %v2065_v49 = vunpack.c.h.s8.bf16 %v681_v28 }
 0x5ab   : > { %5538 = vmatpush2.bf16.msra.mxu0 %v1892_v56  ;;  %v2000_v56 = vunpack.c.h.s8.bf16 %v648_v16 }
 0x5ac   : > { %5579 = vmatpush2.bf16.msra.mxu1 %v1956_v3  ;;  %5589 = vmatprep.subr.bf16.mxu0 %v2017_v34  ;;  %v2064_v3 = vunpack.c.h.s8.bf16 %v680_v62 }
 0x5ad   : > { %5630 = vmatprep.subr.bf16.mxu1 %v2081_v8  ;;  %v2061_v8 = vunpack.c.l.s8.bf16 %v681_v28 }
 0x5ae   : > { %v5295_v23 = vpop.f32.mrf.mxu0  ;;  %5540 = vmatmul.mubr.bf16.vlgmr.msra.gmra.mxu0 %v7503_v21 }
 0x5af   : > { %v5336_v48 = vpop.f32.mrf.mxu1  ;;  %5581 = vmatmul.mubr.bf16.vlgmr.msra.gmra.mxu1 %v7512_v32  ;;  %v5296_v59 = vadd.f32 %v5295_v23, %v8392_v26  ;;  %5590 = vmatpush1.bf16.msra.mxu0 %v2016_v4  ;;  %v1996_v4 = vunpack.c.l.s8.bf16 %v648_v16 }
 0x5b0   : > { %5631 = vmatpush1.bf16.msra.mxu1 %v2080_v58  ;;  %v5297_v5 = vpop.f32.mrf.mxu0  ;;  %5591 = vmatprep.subr.bf16.mxu0 %v2013_v41  ;;  %v2060_v58 = vunpack.c.l.s8.bf16 %v680_v62  ;;  %v1993_v41 = vunpack.c.h.s8.bf16 %v645_v19 }
 0x5b1   : > { %v5338_v44 = vpop.f32.mrf.mxu1  ;;  %5632 = vmatprep.subr.bf16.mxu1 %v2077_v1  ;;  %v8435_v40 = vadd.f32 %v5336_v48, %v5296_v59  ;;  %v5298_v21 = vadd.f32 %v5297_v5, %v8396_v51  ;;  %5621 = vmatprep.mubr.bf16.mxu0 %v7508_v31  ;;  %v2005_v51 = vunpack.c.l.s8.bf16 %v653_v35  ;;  %v649_v31 = vld [vmem:[%s7175_s16 + $0xa38] sm:$0xff]  ;;  %v2057_v1 = vunpack.c.h.s8.bf16 %v677_v10  ;;  %v644_v35 = vld [vmem:[%s7175_s16 + $0xa10] sm:$0xff] }
 0x5b2   : > { %5662 = vmatprep.mubr.bf16.mxu1 %v7518_v27  ;;  %v5299_v32 = vpop.f32.mrf.mxu0  ;;  %v2004_v27 = vunpack.c.l.s8.bf16 %v652_v37  ;;  %v2001_v53 = vunpack.c.h.s8.bf16 %v649_v31  ;;  %v1997_v34 = vunpack.c.l.s8.bf16 %v649_v31  ;;  %v1992_v23 = vunpack.c.h.s8.bf16 %v644_v35  ;;  %v705_v5 = vld [vmem:[%s7175_s16 + $0xbf8] sm:$0xff] }
 0x5b3   : > { %v5340_v26 = vpop.f32.mrf.mxu1  ;;  %v8440_v25 = vadd.f32 %v5338_v44, %v5298_v21  ;;  %5592 = vmatpush1.bf16.msra.mxu0 %v2012_v20  ;;  %v2056_v48 = vunpack.c.h.s8.bf16 %v676_v45  ;;  %v1989_v59 = vunpack.c.l.s8.bf16 %v645_v19  ;;  %v2053_v20 = vunpack.c.l.s8.bf16 %v677_v10  ;;  %v704_v21 = vld [vmem:[%s7175_s16 + $0xbf0] sm:$0xff] }
 0x5b4   : > { %5633 = vmatpush1.bf16.msra.mxu1 %v2076_v39  ;;  %v5300_v50 = vpop.f32.mrf.mxu0  ;;  %5593 = vmatprep.subr.bf16.mxu0 %v2009_v11  ;;  %v673_v39 = vld [vmem:[%s7175_s16 + $0xaf8] sm:$0xff]  ;;  %v1988_v44 = vunpack.c.l.s8.bf16 %v644_v35  ;;  %v2052_v11 = vunpack.c.l.s8.bf16 %v676_v45  ;;  %v2113_v37 = vunpack.c.h.s8.bf16 %v705_v5  ;;  %v2048_v32 = vunpack.c.h.s8.bf16 %v672_v33 }
 0x5b5   : > { %v5341_v2 = vpop.f32.mrf.mxu1  ;;  %5634 = vmatprep.subr.bf16.mxu1 %v2073_v54  ;;  %v2049_v54 = vunpack.c.h.s8.bf16 %v673_v39  ;;  %v2112_v26 = vunpack.c.h.s8.bf16 %v704_v21  ;;  %v669_v50 = vld [vmem:[%s7175_s16 + $0xad8] sm:$0xff] }
 0x5b6   : > { %v701_v2 = vld [vmem:[%s7175_s16 + $0xbd8] sm:$0xff]  ;;  %v2041_v31 = vunpack.c.h.s8.bf16 %v669_v50  ;;  %v2037_v16 = vunpack.c.l.s8.bf16 %v669_v50 }
 0x5b7   : > { %5594 = vmatpush1.bf16.msra.mxu0 %v2008_v57  ;;  %v2045_v57 = vunpack.c.l.s8.bf16 %v673_v39  ;;  %v2105_v28 = vunpack.c.h.s8.bf16 %v701_v2  ;;  %v2101_v62 = vunpack.c.l.s8.bf16 %v701_v2 }
 0x5b8   : > { %5635 = vmatpush1.bf16.msra.mxu1 %v2072_v42  ;;  %5595 = vmatprep.subr.bf16.mxu0 %v2005_v51  ;;  %v2109_v42 = vunpack.c.l.s8.bf16 %v705_v5  ;;  %v2044_v51 = vunpack.c.l.s8.bf16 %v672_v33 }
 0x5b9   : > { %5636 = vmatprep.subr.bf16.mxu1 %v2069_v61  ;;  %v2108_v61 = vunpack.c.l.s8.bf16 %v704_v21 }
 0x5bb   : > { %5596 = vmatpush1.bf16.msra.mxu0 %v2004_v27  ;;  %v668_v27 = vld [vmem:[%s7175_s16 + $0xad0] sm:$0xff] }
 0x5bc   : > { %5637 = vmatpush1.bf16.msra.mxu1 %v2068_v43  ;;  %5597 = vmatprep.subr.bf16.mxu0 %v2001_v53  ;;  %v700_v43 = vld [vmem:[%s7175_s16 + $0xbd0] sm:$0xff]  ;;  %v2040_v53 = vunpack.c.h.s8.bf16 %v668_v27 }
 0x5bd   : > { %5638 = vmatprep.subr.bf16.mxu1 %v2065_v49  ;;  %v2104_v49 = vunpack.c.h.s8.bf16 %v700_v43 }
 0x5bf   : > { %5598 = vmatpush1.bf16.msra.mxu0 %v2000_v56  ;;  %v665_v56 = vld [vmem:[%s7175_s16 + $0xab8] sm:$0xff] }
 0x5c0   : > { %5639 = vmatpush1.bf16.msra.mxu1 %v2064_v3  ;;  %5599 = vmatprep.subr.bf16.mxu0 %v1997_v34  ;;  %v697_v3 = vld [vmem:[%s7175_s16 + $0xbb8] sm:$0xff]  ;;  %v2036_v34 = vunpack.c.l.s8.bf16 %v668_v27  ;;  %v2033_v19 = vunpack.c.h.s8.bf16 %v665_v56  ;;  %v2029_v35 = vunpack.c.l.s8.bf16 %v665_v56 }
 0x5c1   : > { %5640 = vmatprep.subr.bf16.mxu1 %v2061_v8  ;;  %v2100_v8 = vunpack.c.l.s8.bf16 %v700_v43  ;;  %v2097_v10 = vunpack.c.h.s8.bf16 %v697_v3  ;;  %v2093_v45 = vunpack.c.l.s8.bf16 %v697_v3 }
 0x5c3   : > { %5600 = vmatpush1.bf16.msra.mxu0 %v1996_v4  ;;  %v664_v4 = vld [vmem:[%s7175_s16 + $0xab0] sm:$0xff] }
 0x5c4   : > { %5641 = vmatpush1.bf16.msra.mxu1 %v2060_v58  ;;  %5601 = vmatprep.subr.bf16.mxu0 %v1993_v41  ;;  %v696_v58 = vld [vmem:[%s7175_s16 + $0xbb0] sm:$0xff]  ;;  %v2032_v41 = vunpack.c.h.s8.bf16 %v664_v4 }
 0x5c5   : > { %5642 = vmatprep.subr.bf16.mxu1 %v2057_v1  ;;  %v2096_v1 = vunpack.c.h.s8.bf16 %v696_v58 }
 0x5c7   : > { %5602 = vmatpush1.bf16.msra.mxu0 %v1992_v23  ;;  %v661_v23 = vld [vmem:[%s7175_s16 + $0xa98] sm:$0xff] }
 0x5c8   : > { %5643 = vmatpush1.bf16.msra.mxu1 %v2056_v48  ;;  %5603 = vmatprep.subr.bf16.mxu0 %v1989_v59  ;;  %v693_v48 = vld [vmem:[%s7175_s16 + $0xb98] sm:$0xff]  ;;  %v2028_v59 = vunpack.c.l.s8.bf16 %v664_v4  ;;  %v2025_v39 = vunpack.c.h.s8.bf16 %v661_v23  ;;  %v2021_v33 = vunpack.c.l.s8.bf16 %v661_v23 }
 0x5c9   : > { %5644 = vmatprep.subr.bf16.mxu1 %v2053_v20  ;;  %v2092_v20 = vunpack.c.l.s8.bf16 %v696_v58  ;;  %v2089_v5 = vunpack.c.h.s8.bf16 %v693_v48  ;;  %v2085_v21 = vunpack.c.l.s8.bf16 %v693_v48  ;;  %v716_v58 = vld [vmem:[%s7175_s16 + $0xc50] sm:$0xff] }
 0x5cb   : > { %5604 = vmatpush1.bf16.msra.mxu0 %v1988_v44  ;;  %v660_v44 = vld [vmem:[%s7175_s16 + $0xa90] sm:$0xff] }
 0x5cc   : > { %5645 = vmatpush1.bf16.msra.mxu1 %v2052_v11  ;;  %5605 = vmatprep.subr.bf16.mxu0 %v2049_v54  ;;  %v692_v11 = vld [vmem:[%s7175_s16 + $0xb90] sm:$0xff]  ;;  %v2024_v54 = vunpack.c.h.s8.bf16 %v660_v44 }
 0x5cd   : > { %5646 = vmatprep.subr.bf16.mxu1 %v2113_v37  ;;  %v2088_v37 = vunpack.c.h.s8.bf16 %v692_v11 }
 0x5cf   : > { %5606 = vmatpush2.bf16.msra.mxu0 %v2048_v32  ;;  %v721_v32 = vld [vmem:[%s7175_s16 + $0xc78] sm:$0xff] }
 0x5d0   : > { %5647 = vmatpush2.bf16.msra.mxu1 %v2112_v26  ;;  %5607 = vmatprep.subr.bf16.mxu0 %v2045_v57  ;;  %v753_v26 = vld [vmem:[%s7175_s16 + $0xd78] sm:$0xff]  ;;  %v2020_v57 = vunpack.c.l.s8.bf16 %v660_v44  ;;  %v2145_v50 = vunpack.c.h.s8.bf16 %v721_v32  ;;  %v2141_v27 = vunpack.c.l.s8.bf16 %v721_v32 }
 0x5d1   : > { %5648 = vmatprep.subr.bf16.mxu1 %v2109_v42  ;;  %v2084_v42 = vunpack.c.l.s8.bf16 %v692_v11  ;;  %v2209_v2 = vunpack.c.h.s8.bf16 %v753_v26  ;;  %v2205_v43 = vunpack.c.l.s8.bf16 %v753_v26 }
 0x5d3   : > { %5608 = vmatpush2.bf16.msra.mxu0 %v2044_v51  ;;  %v720_v51 = vld [vmem:[%s7175_s16 + $0xc70] sm:$0xff] }
 0x5d4   : > { %5649 = vmatpush2.bf16.msra.mxu1 %v2108_v61  ;;  %5609 = vmatprep.subr.bf16.mxu0 %v2041_v31  ;;  %v752_v61 = vld [vmem:[%s7175_s16 + $0xd70] sm:$0xff]  ;;  %v2144_v31 = vunpack.c.h.s8.bf16 %v720_v51  ;;  %v2140_v3 = vunpack.c.l.s8.bf16 %v720_v51 }
 0x5d5   : > { %5650 = vmatprep.subr.bf16.mxu1 %v2105_v28  ;;  %v2208_v28 = vunpack.c.h.s8.bf16 %v752_v61 }
 0x5d7   : > { %5610 = vmatpush2.bf16.msra.mxu0 %v2040_v53  ;;  %v717_v53 = vld [vmem:[%s7175_s16 + $0xc58] sm:$0xff] }
 0x5d8   : > { %5651 = vmatpush2.bf16.msra.mxu1 %v2104_v49  ;;  %5611 = vmatprep.subr.bf16.mxu0 %v2037_v16  ;;  %v749_v49 = vld [vmem:[%s7175_s16 + $0xd58] sm:$0xff] }
 0x5d9   : > { %5652 = vmatprep.subr.bf16.mxu1 %v2101_v62  ;;  %v2201_v4 = vunpack.c.h.s8.bf16 %v749_v49 }
 0x5db   : > { %5612 = vmatpush2.bf16.msra.mxu0 %v2036_v34  ;;  %v2204_v34 = vunpack.c.l.s8.bf16 %v752_v61 }
 0x5dc   : > { %5653 = vmatpush2.bf16.msra.mxu1 %v2100_v8  ;;  %5613 = vmatprep.subr.bf16.mxu0 %v2033_v19 }
 0x5dd   : > { %5654 = vmatprep.subr.bf16.mxu1 %v2097_v10  ;;  %v2137_v10 = vunpack.c.h.s8.bf16 %v717_v53 }
 0x5df   : > { %5614 = vmatpush2.bf16.msra.mxu0 %v2032_v41  ;;  %v748_v41 = vld [vmem:[%s7175_s16 + $0xd50] sm:$0xff] }
 0x5e0   : > { %5655 = vmatpush2.bf16.msra.mxu1 %v2096_v1  ;;  %5615 = vmatprep.subr.bf16.mxu0 %v2029_v35  ;;  %v2200_v23 = vunpack.c.h.s8.bf16 %v748_v41 }
 0x5e1   : > { %5656 = vmatprep.subr.bf16.mxu1 %v2093_v45  ;;  %v2136_v45 = vunpack.c.h.s8.bf16 %v716_v58 }
 0x5e3   : > { %5616 = vmatpush2.bf16.msra.mxu0 %v2028_v59 }
 0x5e4   : > { %5657 = vmatpush2.bf16.msra.mxu1 %v2092_v20  ;;  %5617 = vmatprep.subr.bf16.mxu0 %v2025_v39  ;;  %v2197_v20 = vunpack.c.l.s8.bf16 %v749_v49  ;;  %v745_v39 = vld [vmem:[%s7175_s16 + $0xd38] sm:$0xff] }
 0x5e5   : > { %5658 = vmatprep.subr.bf16.mxu1 %v2089_v5  ;;  %v2196_v5 = vunpack.c.l.s8.bf16 %v748_v41  ;;  %v2193_v11 = vunpack.c.h.s8.bf16 %v745_v39  ;;  %v2189_v26 = vunpack.c.l.s8.bf16 %v745_v39 }
 0x5e7   : > { %5618 = vmatpush2.bf16.msra.mxu0 %v2024_v54  ;;  %v712_v54 = vld [vmem:[%s7175_s16 + $0xc30] sm:$0xff] }
 0x5e8   : > { %5659 = vmatpush2.bf16.msra.mxu1 %v2088_v37  ;;  %5619 = vmatprep.subr.bf16.mxu0 %v2021_v33  ;;  %v744_v37 = vld [vmem:[%s7175_s16 + $0xd30] sm:$0xff]  ;;  %v2128_v33 = vunpack.c.h.s8.bf16 %v712_v54 }
 0x5e9   : > { %5660 = vmatprep.subr.bf16.mxu1 %v2085_v21  ;;  %v2192_v21 = vunpack.c.h.s8.bf16 %v744_v37 }
 0x5eb   : > { %5620 = vmatpush2.bf16.msra.mxu0 %v2020_v57  ;;  %v709_v57 = vld [vmem:[%s7175_s16 + $0xc18] sm:$0xff] }
 0x5ec   : > { %5661 = vmatpush2.bf16.msra.mxu1 %v2084_v42  ;;  %5671 = vmatprep.subr.bf16.mxu0 %v2145_v50  ;;  %v741_v42 = vld [vmem:[%s7175_s16 + $0xd18] sm:$0xff]  ;;  %v2124_v50 = vunpack.c.l.s8.bf16 %v712_v54  ;;  %v2121_v51 = vunpack.c.h.s8.bf16 %v709_v57 }
 0x5ed   : > { %5712 = vmatprep.subr.bf16.mxu1 %v2209_v2  ;;  %v2188_v2 = vunpack.c.l.s8.bf16 %v744_v37  ;;  %v2185_v61 = vunpack.c.h.s8.bf16 %v741_v42  ;;  %v2181_v49 = vunpack.c.l.s8.bf16 %v741_v42 }
 0x5ee   : > { %v5377_v16 = vpop.f32.mrf.mxu0  ;;  %5622 = vmatmul.mubr.bf16.vlgmr.msra.gmra.mxu0 %v7569_v18 }
 0x5ef   : > { %v5418_v62 = vpop.f32.mrf.mxu1  ;;  %5663 = vmatmul.mubr.bf16.vlgmr.msra.gmra.mxu1 %v7578_v30  ;;  %v5378_v56 = vadd.f32 %v5377_v16, %v8435_v40  ;;  %5672 = vmatpush1.bf16.msra.mxu0 %v2144_v31  ;;  %v708_v31 = vld [vmem:[%s7175_s16 + $0xc10] sm:$0xff]  ;;  %v737_v16 = vld [vmem:[%s7175_s16 + $0xcf8] sm:$0xff] }
 0x5f0   : > { %5713 = vmatpush1.bf16.msra.mxu1 %v2208_v28  ;;  %v5379_v8 = vpop.f32.mrf.mxu0  ;;  %5673 = vmatprep.subr.bf16.mxu0 %v2141_v27  ;;  %v740_v28 = vld [vmem:[%s7175_s16 + $0xd10] sm:$0xff]  ;;  %v2120_v27 = vunpack.c.h.s8.bf16 %v708_v31  ;;  %v2173_v41 = vunpack.c.l.s8.bf16 %v737_v16 }
 0x5f1   : > { %v5420_v19 = vpop.f32.mrf.mxu1  ;;  %5714 = vmatprep.subr.bf16.mxu1 %v2205_v43  ;;  %v8477_v1 = vadd.f32 %v5418_v62, %v5378_v56  ;;  %v5380_v18 = vadd.f32 %v5379_v8, %v8440_v25  ;;  %5703 = vmatprep.mubr.bf16.mxu0 %v7574_v29  ;;  %v2133_v25 = vunpack.c.l.s8.bf16 %v717_v53  ;;  %v713_v29 = vld [vmem:[%s7175_s16 + $0xc38] sm:$0xff]  ;;  %v2184_v43 = vunpack.c.h.s8.bf16 %v740_v28 }
 0x5f2   : > { %5744 = vmatprep.mubr.bf16.mxu1 %v7584_v46  ;;  %v5381_v30 = vpop.f32.mrf.mxu0  ;;  %v2132_v46 = vunpack.c.l.s8.bf16 %v716_v58  ;;  %v2129_v44 = vunpack.c.h.s8.bf16 %v713_v29  ;;  %v2125_v32 = vunpack.c.l.s8.bf16 %v713_v29  ;;  %v2117_v53 = vunpack.c.l.s8.bf16 %v709_v57  ;;  %v769_v62 = vld [vmem:[%s7175_s16 + $0xdf8] sm:$0xff] }
 0x5f3   : > { %v5422_v40 = vpop.f32.mrf.mxu1  ;;  %v8482_v35 = vadd.f32 %v5420_v19, %v5380_v18  ;;  %5674 = vmatpush1.bf16.msra.mxu0 %v2140_v3  ;;  %v2116_v56 = vunpack.c.l.s8.bf16 %v708_v31  ;;  %v2180_v3 = vunpack.c.l.s8.bf16 %v740_v28  ;;  %v2241_v8 = vunpack.c.h.s8.bf16 %v769_v62  ;;  %v736_v19 = vld [vmem:[%s7175_s16 + $0xcf0] sm:$0xff]  ;;  %v733_v30 = vld [vmem:[%s7175_s16 + $0xcd8] sm:$0xff] }
 0x5f4   : > { %5715 = vmatpush1.bf16.msra.mxu1 %v2204_v34  ;;  %v5382_v48 = vpop.f32.mrf.mxu0  ;;  %5675 = vmatprep.subr.bf16.mxu0 %v2137_v10  ;;  %v2177_v34 = vunpack.c.h.s8.bf16 %v737_v16  ;;  %v768_v10 = vld [vmem:[%s7175_s16 + $0xdf0] sm:$0xff]  ;;  %v2237_v18 = vunpack.c.l.s8.bf16 %v769_v62  ;;  %v765_v40 = vld [vmem:[%s7175_s16 + $0xdd8] sm:$0xff] }
 0x5f5   : > { %v5423_v59 = vpop.f32.mrf.mxu1  ;;  %5716 = vmatprep.subr.bf16.mxu1 %v2201_v4  ;;  %v2176_v4 = vunpack.c.h.s8.bf16 %v736_v19  ;;  %v2240_v58 = vunpack.c.h.s8.bf16 %v768_v10  ;;  %v2169_v48 = vunpack.c.h.s8.bf16 %v733_v30 }
 0x5f6   : > { %v2233_v59 = vunpack.c.h.s8.bf16 %v765_v40 }
 0x5f7   : > { %5676 = vmatpush1.bf16.msra.mxu0 %v2136_v45  ;;  %v2172_v45 = vunpack.c.l.s8.bf16 %v736_v19 }
 0x5f8   : > { %5717 = vmatpush1.bf16.msra.mxu1 %v2200_v23  ;;  %5677 = vmatprep.subr.bf16.mxu0 %v2133_v25  ;;  %v2236_v23 = vunpack.c.l.s8.bf16 %v768_v10  ;;  %v732_v25 = vld [vmem:[%s7175_s16 + $0xcd0] sm:$0xff] }
 0x5f9   : > { %5718 = vmatprep.subr.bf16.mxu1 %v2197_v20  ;;  %v764_v20 = vld [vmem:[%s7175_s16 + $0xdd0] sm:$0xff]  ;;  %v2168_v29 = vunpack.c.h.s8.bf16 %v732_v25  ;;  %v2164_v54 = vunpack.c.l.s8.bf16 %v732_v25 }
 0x5fa   : > { %v2232_v39 = vunpack.c.h.s8.bf16 %v764_v20  ;;  %v2228_v37 = vunpack.c.l.s8.bf16 %v764_v20 }
 0x5fb   : > { %5678 = vmatpush1.bf16.msra.mxu0 %v2132_v46  ;;  %v2165_v46 = vunpack.c.l.s8.bf16 %v733_v30 }
 0x5fc   : > { %5719 = vmatpush1.bf16.msra.mxu1 %v2196_v5  ;;  %5679 = vmatprep.subr.bf16.mxu0 %v2129_v44  ;;  %v2229_v5 = vunpack.c.l.s8.bf16 %v765_v40  ;;  %v729_v44 = vld [vmem:[%s7175_s16 + $0xcb8] sm:$0xff] }
 0x5fd   : > { %5720 = vmatprep.subr.bf16.mxu1 %v2193_v11  ;;  %v761_v11 = vld [vmem:[%s7175_s16 + $0xdb8] sm:$0xff] }
 0x5ff   : > { %5680 = vmatpush1.bf16.msra.mxu0 %v2128_v33  ;;  %v2161_v33 = vunpack.c.h.s8.bf16 %v729_v44 }
 0x600   : > { %5721 = vmatpush1.bf16.msra.mxu1 %v2192_v21  ;;  %5681 = vmatprep.subr.bf16.mxu0 %v2125_v32  ;;  %v2225_v21 = vunpack.c.h.s8.bf16 %v761_v11  ;;  %v728_v32 = vld [vmem:[%s7175_s16 + $0xcb0] sm:$0xff] }
 0x601   : > { %5722 = vmatprep.subr.bf16.mxu1 %v2189_v26  ;;  %v760_v26 = vld [vmem:[%s7175_s16 + $0xdb0] sm:$0xff]  ;;  %v2160_v57 = vunpack.c.h.s8.bf16 %v728_v32  ;;  %v2156_v31 = vunpack.c.l.s8.bf16 %v728_v32 }
 0x602   : > { %v2224_v42 = vunpack.c.h.s8.bf16 %v760_v26  ;;  %v2220_v28 = vunpack.c.l.s8.bf16 %v760_v26 }
 0x603   : > { %5682 = vmatpush1.bf16.msra.mxu0 %v2124_v50  ;;  %v2157_v50 = vunpack.c.l.s8.bf16 %v729_v44 }
 0x604   : > { %5723 = vmatpush1.bf16.msra.mxu1 %v2188_v2  ;;  %5683 = vmatprep.subr.bf16.mxu0 %v2121_v51  ;;  %v2221_v2 = vunpack.c.l.s8.bf16 %v761_v11  ;;  %v725_v51 = vld [vmem:[%s7175_s16 + $0xc98] sm:$0xff] }
 0x605   : > { %5724 = vmatprep.subr.bf16.mxu1 %v2185_v61  ;;  %v757_v61 = vld [vmem:[%s7175_s16 + $0xd98] sm:$0xff] }
 0x607   : > { %5684 = vmatpush1.bf16.msra.mxu0 %v2120_v27  ;;  %v2153_v27 = vunpack.c.h.s8.bf16 %v725_v51 }
 0x608   : > { %5725 = vmatpush1.bf16.msra.mxu1 %v2184_v43  ;;  %5685 = vmatprep.subr.bf16.mxu0 %v2117_v53  ;;  %v2217_v43 = vunpack.c.h.s8.bf16 %v757_v61  ;;  %v724_v53 = vld [vmem:[%s7175_s16 + $0xc90] sm:$0xff] }
 0x609   : > { %5726 = vmatprep.subr.bf16.mxu1 %v2181_v49  ;;  %v756_v49 = vld [vmem:[%s7175_s16 + $0xd90] sm:$0xff]  ;;  %v2152_v16 = vunpack.c.h.s8.bf16 %v724_v53  ;;  %v2148_v19 = vunpack.c.l.s8.bf16 %v724_v53 }
 0x60a   : > { %v2216_v62 = vunpack.c.h.s8.bf16 %v756_v49  ;;  %v2212_v10 = vunpack.c.l.s8.bf16 %v756_v49 }
 0x60b   : > { %5686 = vmatpush1.bf16.msra.mxu0 %v2116_v56  ;;  %v2149_v56 = vunpack.c.l.s8.bf16 %v725_v51  ;;  %v809_v51 = vld [vmem:[%s7175_s16 + $0xf38] sm:$0xff] }
 0x60c   : > { %5727 = vmatpush1.bf16.msra.mxu1 %v2180_v3  ;;  %5687 = vmatprep.subr.bf16.mxu0 %v2177_v34  ;;  %v2213_v3 = vunpack.c.l.s8.bf16 %v757_v61  ;;  %v785_v34 = vld [vmem:[%s7175_s16 + $0xe78] sm:$0xff] }
 0x60d   : > { %5728 = vmatprep.subr.bf16.mxu1 %v2241_v8  ;;  %v817_v8 = vld [vmem:[%s7175_s16 + $0xf78] sm:$0xff] }
 0x60f   : > { %5688 = vmatpush2.bf16.msra.mxu0 %v2176_v4  ;;  %v2273_v4 = vunpack.c.h.s8.bf16 %v785_v34 }
 0x610   : > { %5729 = vmatpush2.bf16.msra.mxu1 %v2240_v58  ;;  %5689 = vmatprep.subr.bf16.mxu0 %v2173_v41  ;;  %v2337_v58 = vunpack.c.h.s8.bf16 %v817_v8  ;;  %v784_v41 = vld [vmem:[%s7175_s16 + $0xe70] sm:$0xff] }
 0x611   : > { %5730 = vmatprep.subr.bf16.mxu1 %v2237_v18  ;;  %v816_v18 = vld [vmem:[%s7175_s16 + $0xf70] sm:$0xff]  ;;  %v2272_v30 = vunpack.c.h.s8.bf16 %v784_v41 }
 0x612   : > { %v2336_v40 = vunpack.c.h.s8.bf16 %v816_v18 }
 0x613   : > { %5690 = vmatpush2.bf16.msra.mxu0 %v2172_v45  ;;  %v2269_v45 = vunpack.c.l.s8.bf16 %v785_v34 }
 0x614   : > { %5731 = vmatpush2.bf16.msra.mxu1 %v2236_v23  ;;  %5691 = vmatprep.subr.bf16.mxu0 %v2169_v48  ;;  %v2333_v23 = vunpack.c.l.s8.bf16 %v817_v8  ;;  %v781_v48 = vld [vmem:[%s7175_s16 + $0xe58] sm:$0xff] }
 0x615   : > { %5732 = vmatprep.subr.bf16.mxu1 %v2233_v59  ;;  %v813_v59 = vld [vmem:[%s7175_s16 + $0xf58] sm:$0xff]  ;;  %v2265_v11 = vunpack.c.h.s8.bf16 %v781_v48 }
 0x617   : > { %5692 = vmatpush2.bf16.msra.mxu0 %v2168_v29 }
 0x618   : > { %5733 = vmatpush2.bf16.msra.mxu1 %v2232_v39  ;;  %5693 = vmatprep.subr.bf16.mxu0 %v2165_v46  ;;  %v2268_v39 = vunpack.c.l.s8.bf16 %v784_v41  ;;  %v2332_v46 = vunpack.c.l.s8.bf16 %v816_v18 }
 0x619   : > { %5734 = vmatprep.subr.bf16.mxu1 %v2229_v5 }
 0x61b   : > { %5694 = vmatpush2.bf16.msra.mxu0 %v2164_v54  ;;  %v2329_v54 = vunpack.c.h.s8.bf16 %v813_v59 }
 0x61c   : > { %5735 = vmatpush2.bf16.msra.mxu1 %v2228_v37  ;;  %5695 = vmatprep.subr.bf16.mxu0 %v2161_v33  ;;  %v780_v37 = vld [vmem:[%s7175_s16 + $0xe50] sm:$0xff] }
 0x61d   : > { %5736 = vmatprep.subr.bf16.mxu1 %v2225_v21  ;;  %v812_v33 = vld [vmem:[%s7175_s16 + $0xf50] sm:$0xff]  ;;  %v2264_v26 = vunpack.c.h.s8.bf16 %v780_v37 }
 0x61e   : > { %v2324_v61 = vunpack.c.l.s8.bf16 %v812_v33 }
 0x61f   : > { %5696 = vmatpush2.bf16.msra.mxu0 %v2160_v57  ;;  %v2328_v57 = vunpack.c.h.s8.bf16 %v812_v33 }
 0x620   : > { %5737 = vmatpush2.bf16.msra.mxu1 %v2224_v42  ;;  %5697 = vmatprep.subr.bf16.mxu0 %v2157_v50 }
 0x621   : > { %5738 = vmatprep.subr.bf16.mxu1 %v2221_v2  ;;  %v2325_v2 = vunpack.c.l.s8.bf16 %v813_v59 }
 0x623   : > { %5698 = vmatpush2.bf16.msra.mxu0 %v2156_v31 }
 0x624   : > { %5739 = vmatpush2.bf16.msra.mxu1 %v2220_v28  ;;  %5699 = vmatprep.subr.bf16.mxu0 %v2153_v27  ;;  %v2321_v28 = vunpack.c.h.s8.bf16 %v809_v51  ;;  %v776_v27 = vld [vmem:[%s7175_s16 + $0xe30] sm:$0xff] }
 0x625   : > { %5740 = vmatprep.subr.bf16.mxu1 %v2217_v43  ;;  %v808_v43 = vld [vmem:[%s7175_s16 + $0xf30] sm:$0xff]  ;;  %v2256_v53 = vunpack.c.h.s8.bf16 %v776_v27  ;;  %v2252_v34 = vunpack.c.l.s8.bf16 %v776_v27 }
 0x626   : > { %v2320_v49 = vunpack.c.h.s8.bf16 %v808_v43  ;;  %v2316_v8 = vunpack.c.l.s8.bf16 %v808_v43  ;;  %v792_v27 = vld [vmem:[%s7175_s16 + $0xeb0] sm:$0xff] }
 0x627   : > { %5700 = vmatpush2.bf16.msra.mxu0 %v2152_v16  ;;  %v824_v43 = vld [vmem:[%s7175_s16 + $0xfb0] sm:$0xff] }
 0x628   : > { %5741 = vmatpush2.bf16.msra.mxu1 %v2216_v62  ;;  %5701 = vmatprep.subr.bf16.mxu0 %v2149_v56  ;;  %v2317_v62 = vunpack.c.l.s8.bf16 %v809_v51  ;;  %v773_v56 = vld [vmem:[%s7175_s16 + $0xe18] sm:$0xff] }
 0x629   : > { %5742 = vmatprep.subr.bf16.mxu1 %v2213_v3  ;;  %v805_v3 = vld [vmem:[%s7175_s16 + $0xf18] sm:$0xff] }
 0x62a   : > { %v825_v51 = vld [vmem:[%s7175_s16 + $0xfb8] sm:$0xff] }
 0x62b   : > { %5702 = vmatpush2.bf16.msra.mxu0 %v2148_v19  ;;  %v2249_v19 = vunpack.c.h.s8.bf16 %v773_v56 }
 0x62c   : > { %5743 = vmatpush2.bf16.msra.mxu1 %v2212_v10  ;;  %5753 = vmatprep.subr.bf16.mxu0 %v2273_v4  ;;  %v2313_v10 = vunpack.c.h.s8.bf16 %v805_v3  ;;  %v772_v4 = vld [vmem:[%s7175_s16 + $0xe10] sm:$0xff] }
 0x62d   : > { %5794 = vmatprep.subr.bf16.mxu1 %v2337_v58  ;;  %v804_v58 = vld [vmem:[%s7175_s16 + $0xf10] sm:$0xff]  ;;  %v2248_v41 = vunpack.c.h.s8.bf16 %v772_v4 }
 0x62e   : > { %v5459_v25 = vpop.f32.mrf.mxu0  ;;  %5704 = vmatmul.mubr.bf16.vlgmr.msra.gmra.mxu0 %v7633_v47  ;;  %v2312_v18 = vunpack.c.h.s8.bf16 %v804_v58  ;;  %v2308_v59 = vunpack.c.l.s8.bf16 %v804_v58  ;;  %v820_v58 = vld [vmem:[%s7175_s16 + $0xf90] sm:$0xff] }
 0x62f   : > { %v5500_v20 = vpop.f32.mrf.mxu1  ;;  %5745 = vmatmul.mubr.bf16.vlgmr.msra.gmra.mxu1 %v7642_v0  ;;  %v5460_v29 = vadd.f32 %v5459_v25, %v8477_v1  ;;  %5754 = vmatpush1.bf16.msra.mxu0 %v2272_v30  ;;  %v2245_v30 = vunpack.c.l.s8.bf16 %v773_v56  ;;  %v789_v56 = vld [vmem:[%s7175_s16 + $0xe98] sm:$0xff] }
 0x630   : > { %5795 = vmatpush1.bf16.msra.mxu1 %v2336_v40  ;;  %v5461_v5 = vpop.f32.mrf.mxu0  ;;  %5755 = vmatprep.subr.bf16.mxu0 %v2269_v45  ;;  %v2309_v40 = vunpack.c.l.s8.bf16 %v805_v3  ;;  %v801_v45 = vld [vmem:[%s7175_s16 + $0xef8] sm:$0xff] }
 0x631   : > { %v5502_v44 = vpop.f32.mrf.mxu1  ;;  %5796 = vmatprep.subr.bf16.mxu1 %v2333_v23  ;;  %v8519_v21 = vadd.f32 %v5500_v20, %v5460_v29  ;;  %v5462_v47 = vadd.f32 %v5461_v5, %v8482_v35  ;;  %5785 = vmatprep.mubr.bf16.mxu0 %v7638_v63  ;;  %v2261_v35 = vunpack.c.l.s8.bf16 %v781_v48  ;;  %v777_v63 = vld [vmem:[%s7175_s16 + $0xe38] sm:$0xff]  ;;  %v2244_v48 = vunpack.c.l.s8.bf16 %v772_v4  ;;  %v800_v29 = vld [vmem:[%s7175_s16 + $0xef0] sm:$0xff] }
 0x632   : > { %5826 = vmatprep.mubr.bf16.mxu1 %v7648_v15  ;;  %v5463_v0 = vpop.f32.mrf.mxu0  ;;  %v2260_v15 = vunpack.c.l.s8.bf16 %v780_v37  ;;  %v2257_v31 = vunpack.c.h.s8.bf16 %v777_v63  ;;  %v2253_v16 = vunpack.c.l.s8.bf16 %v777_v63  ;;  %v833_v23 = vld [vmem:[%s7175_s16 + $0xff8] sm:$0xff]  ;;  %v2305_v25 = vunpack.c.h.s8.bf16 %v801_v45  ;;  %v788_v4 = vld [vmem:[%s7175_s16 + $0xe90] sm:$0xff] }
 0x633   : > { %v5504_v1 = vpop.f32.mrf.mxu1  ;;  %v8524_v32 = vadd.f32 %v5502_v44, %v5462_v47  ;;  %5756 = vmatpush1.bf16.msra.mxu0 %v2268_v39  ;;  %v2369_v20 = vunpack.c.h.s8.bf16 %v833_v23  ;;  %v832_v39 = vld [vmem:[%s7175_s16 + $0xff0] sm:$0xff]  ;;  %v2301_v44 = vunpack.c.l.s8.bf16 %v801_v45  ;;  %v829_v37 = vld [vmem:[%s7175_s16 + $0xfd8] sm:$0xff]  ;;  %v2300_v33 = vunpack.c.l.s8.bf16 %v800_v29 }
 0x634   : > { %5797 = vmatpush1.bf16.msra.mxu1 %v2332_v46  ;;  %v5464_v42 = vpop.f32.mrf.mxu0  ;;  %5757 = vmatprep.subr.bf16.mxu0 %v2265_v11  ;;  %v2304_v46 = vunpack.c.h.s8.bf16 %v800_v29  ;;  %v2368_v5 = vunpack.c.h.s8.bf16 %v832_v39  ;;  %v2365_v11 = vunpack.c.l.s8.bf16 %v833_v23  ;;  %v2364_v47 = vunpack.c.l.s8.bf16 %v832_v39  ;;  %v793_v63 = vld [vmem:[%s7175_s16 + $0xeb8] sm:$0xff]  ;;  %v848_v29 = vld [vmem:[%s7175_s16 + $0x1070] sm:$0xff] }
 0x635   : > { %v5505_v50 = vpop.f32.mrf.mxu1  ;;  %5798 = vmatprep.subr.bf16.mxu1 %v2329_v54  ;;  %v797_v54 = vld [vmem:[%s7175_s16 + $0xed8] sm:$0xff]  ;;  %v2361_v1 = vunpack.c.h.s8.bf16 %v829_v37  ;;  %v880_v39 = vld [vmem:[%s7175_s16 + $0x1170] sm:$0xff] }
 0x636   : > { %v2297_v0 = vunpack.c.h.s8.bf16 %v797_v54  ;;  %v821_v3 = vld [vmem:[%s7175_s16 + $0xf98] sm:$0xff] }
 0x637   : > { %5758 = vmatpush1.bf16.msra.mxu0 %v2264_v26  ;;  %v796_v26 = vld [vmem:[%s7175_s16 + $0xed0] sm:$0xff]  ;;  %v849_v45 = vld [vmem:[%s7175_s16 + $0x1078] sm:$0xff] }
 0x638   : > { %5799 = vmatpush1.bf16.msra.mxu1 %v2328_v57  ;;  %5759 = vmatprep.subr.bf16.mxu0 %v2261_v35  ;;  %v828_v57 = vld [vmem:[%s7175_s16 + $0xfd0] sm:$0xff]  ;;  %v2296_v42 = vunpack.c.h.s8.bf16 %v796_v26  ;;  %v2293_v35 = vunpack.c.l.s8.bf16 %v797_v54  ;;  %v881_v23 = vld [vmem:[%s7175_s16 + $0x1178] sm:$0xff] }
 0x639   : > { %5800 = vmatprep.subr.bf16.mxu1 %v2325_v2  ;;  %v2360_v50 = vunpack.c.h.s8.bf16 %v828_v57  ;;  %v2357_v2 = vunpack.c.l.s8.bf16 %v829_v37  ;;  %v845_v54 = vld [vmem:[%s7175_s16 + $0x1058] sm:$0xff] }
 0x63a   : > { %v877_v37 = vld [vmem:[%s7175_s16 + $0x1158] sm:$0xff] }
 0x63b   : > { %5760 = vmatpush1.bf16.msra.mxu0 %v2260_v15  ;;  %v2292_v15 = vunpack.c.l.s8.bf16 %v796_v26  ;;  %v2460_v26 = vunpack.c.l.s8.bf16 %v880_v39 }
 0x63c   : > { %5801 = vmatpush1.bf16.msra.mxu1 %v2324_v61  ;;  %5761 = vmatprep.subr.bf16.mxu0 %v2257_v31  ;;  %v2356_v61 = vunpack.c.l.s8.bf16 %v828_v57  ;;  %v2289_v31 = vunpack.c.h.s8.bf16 %v793_v63 }
 0x63d   : > { %5802 = vmatprep.subr.bf16.mxu1 %v2321_v28  ;;  %v2353_v28 = vunpack.c.h.s8.bf16 %v825_v51 }
 0x63f   : > { %5762 = vmatpush1.bf16.msra.mxu0 %v2256_v53  ;;  %v2288_v53 = vunpack.c.h.s8.bf16 %v792_v27 }
 0x640   : > { %5803 = vmatpush1.bf16.msra.mxu1 %v2320_v49  ;;  %5763 = vmatprep.subr.bf16.mxu0 %v2253_v16  ;;  %v2352_v49 = vunpack.c.h.s8.bf16 %v824_v43  ;;  %v2285_v16 = vunpack.c.l.s8.bf16 %v793_v63  ;;  %v876_v63 = vld [vmem:[%s7175_s16 + $0x1150] sm:$0xff] }
 0x641   : > { %5804 = vmatprep.subr.bf16.mxu1 %v2317_v62  ;;  %v2349_v62 = vunpack.c.l.s8.bf16 %v825_v51 }
 0x643   : > { %5764 = vmatpush1.bf16.msra.mxu0 %v2252_v34  ;;  %v2284_v34 = vunpack.c.l.s8.bf16 %v792_v27 }
 0x644   : > { %5805 = vmatpush1.bf16.msra.mxu1 %v2316_v8  ;;  %5765 = vmatprep.subr.bf16.mxu0 %v2249_v19  ;;  %v2348_v8 = vunpack.c.l.s8.bf16 %v824_v43  ;;  %v2281_v19 = vunpack.c.h.s8.bf16 %v789_v56  ;;  %v2453_v43 = vunpack.c.l.s8.bf16 %v877_v37 }
 0x645   : > { %5806 = vmatprep.subr.bf16.mxu1 %v2313_v10  ;;  %v2345_v10 = vunpack.c.h.s8.bf16 %v821_v3 }
 0x647   : > { %5766 = vmatpush1.bf16.msra.mxu0 %v2248_v41  ;;  %v2280_v41 = vunpack.c.h.s8.bf16 %v788_v4 }
 0x648   : > { %5807 = vmatpush1.bf16.msra.mxu1 %v2312_v18  ;;  %5767 = vmatprep.subr.bf16.mxu0 %v2245_v30  ;;  %v2344_v18 = vunpack.c.h.s8.bf16 %v820_v58  ;;  %v2277_v30 = vunpack.c.l.s8.bf16 %v789_v56  ;;  %v840_v56 = vld [vmem:[%s7175_s16 + $0x1030] sm:$0xff] }
 0x649   : > { %5808 = vmatprep.subr.bf16.mxu1 %v2309_v40  ;;  %v2341_v40 = vunpack.c.l.s8.bf16 %v821_v3  ;;  %v872_v3 = vld [vmem:[%s7175_s16 + $0x1130] sm:$0xff] }
 0x64b   : > { %5768 = vmatpush1.bf16.msra.mxu0 %v2244_v48  ;;  %v2276_v48 = vunpack.c.l.s8.bf16 %v788_v4  ;;  %v837_v4 = vld [vmem:[%s7175_s16 + $0x1018] sm:$0xff] }
 0x64c   : > { %5809 = vmatpush1.bf16.msra.mxu1 %v2308_v59  ;;  %5769 = vmatprep.subr.bf16.mxu0 %v2305_v25  ;;  %v2340_v59 = vunpack.c.l.s8.bf16 %v820_v58  ;;  %v2401_v25 = vunpack.c.h.s8.bf16 %v849_v45  ;;  %v869_v58 = vld [vmem:[%s7175_s16 + $0x1118] sm:$0xff] }
 0x64d   : > { %5810 = vmatprep.subr.bf16.mxu1 %v2369_v20  ;;  %v2465_v20 = vunpack.c.h.s8.bf16 %v881_v23 }
 0x64f   : > { %5770 = vmatpush2.bf16.msra.mxu0 %v2304_v46  ;;  %v2400_v46 = vunpack.c.h.s8.bf16 %v848_v29 }
 0x650   : > { %5811 = vmatpush2.bf16.msra.mxu1 %v2368_v5  ;;  %5771 = vmatprep.subr.bf16.mxu0 %v2301_v44  ;;  %v2464_v5 = vunpack.c.h.s8.bf16 %v880_v39  ;;  %v2397_v44 = vunpack.c.l.s8.bf16 %v849_v45  ;;  %v836_v45 = vld [vmem:[%s7175_s16 + $0x1010] sm:$0xff]  ;;  %v897_v39 = vld [vmem:[%s7175_s16 + $0x11f8] sm:$0xff] }
 0x651   : > { %5812 = vmatprep.subr.bf16.mxu1 %v2365_v11  ;;  %v2461_v11 = vunpack.c.l.s8.bf16 %v881_v23  ;;  %v868_v23 = vld [vmem:[%s7175_s16 + $0x1110] sm:$0xff] }
 0x653   : > { %5772 = vmatpush2.bf16.msra.mxu0 %v2300_v33 }
 0x654   : > { %5813 = vmatpush2.bf16.msra.mxu1 %v2364_v47  ;;  %5773 = vmatprep.subr.bf16.mxu0 %v2297_v0 }
 0x655   : > { %5814 = vmatprep.subr.bf16.mxu1 %v2361_v1  ;;  %v2396_v1 = vunpack.c.l.s8.bf16 %v848_v29  ;;  %v865_v29 = vld [vmem:[%s7175_s16 + $0x10f8] sm:$0xff] }
 0x657   : > { %5774 = vmatpush2.bf16.msra.mxu0 %v2296_v42 }
 0x658   : > { %5815 = vmatpush2.bf16.msra.mxu1 %v2360_v50  ;;  %5775 = vmatprep.subr.bf16.mxu0 %v2293_v35  ;;  %v2393_v50 = vunpack.c.h.s8.bf16 %v845_v54  ;;  %v2457_v35 = vunpack.c.h.s8.bf16 %v877_v37  ;;  %v896_v37 = vld [vmem:[%s7175_s16 + $0x11f0] sm:$0xff] }
 0x659   : > { %5816 = vmatprep.subr.bf16.mxu1 %v2357_v2  ;;  %v844_v2 = vld [vmem:[%s7175_s16 + $0x1050] sm:$0xff] }
 0x65b   : > { %5776 = vmatpush2.bf16.msra.mxu0 %v2292_v15 }
 0x65c   : > { %5817 = vmatpush2.bf16.msra.mxu1 %v2356_v61  ;;  %5777 = vmatprep.subr.bf16.mxu0 %v2289_v31  ;;  %v2392_v61 = vunpack.c.h.s8.bf16 %v844_v2  ;;  %v2456_v31 = vunpack.c.h.s8.bf16 %v876_v63 }
 0x65d   : > { %5818 = vmatprep.subr.bf16.mxu1 %v2353_v28 }
 0x65f   : > { %5778 = vmatpush2.bf16.msra.mxu0 %v2288_v53  ;;  %v873_v53 = vld [vmem:[%s7175_s16 + $0x1138] sm:$0xff] }
 0x660   : > { %5819 = vmatpush2.bf16.msra.mxu1 %v2352_v49  ;;  %5779 = vmatprep.subr.bf16.mxu0 %v2285_v16  ;;  %v2452_v49 = vunpack.c.l.s8.bf16 %v876_v63  ;;  %v860_v63 = vld [vmem:[%s7175_s16 + $0x10d0] sm:$0xff] }
 0x661   : > { %5820 = vmatprep.subr.bf16.mxu1 %v2349_v62  ;;  %v2449_v62 = vunpack.c.h.s8.bf16 %v873_v53 }
 0x663   : > { %5780 = vmatpush2.bf16.msra.mxu0 %v2284_v34  ;;  %v2384_v34 = vunpack.c.h.s8.bf16 %v840_v56 }
 0x664   : > { %5821 = vmatpush2.bf16.msra.mxu1 %v2348_v8  ;;  %5781 = vmatprep.subr.bf16.mxu0 %v2281_v19  ;;  %v2448_v8 = vunpack.c.h.s8.bf16 %v872_v3 }
 0x665   : > { %5822 = vmatprep.subr.bf16.mxu1 %v2345_v10  ;;  %v2445_v10 = vunpack.c.l.s8.bf16 %v873_v53 }
 0x667   : > { %5782 = vmatpush2.bf16.msra.mxu0 %v2280_v41  ;;  %v2380_v41 = vunpack.c.l.s8.bf16 %v840_v56 }
 0x668   : > { %5823 = vmatpush2.bf16.msra.mxu1 %v2344_v18  ;;  %5783 = vmatprep.subr.bf16.mxu0 %v2277_v30  ;;  %v2444_v18 = vunpack.c.l.s8.bf16 %v872_v3  ;;  %v2377_v30 = vunpack.c.h.s8.bf16 %v837_v4 }
 0x669   : > { %5824 = vmatprep.subr.bf16.mxu1 %v2341_v40  ;;  %v2441_v40 = vunpack.c.h.s8.bf16 %v869_v58 }
 0x66b   : > { %5784 = vmatpush2.bf16.msra.mxu0 %v2276_v48  ;;  %v2376_v48 = vunpack.c.h.s8.bf16 %v836_v45 }
 0x66c   : > { %5825 = vmatpush2.bf16.msra.mxu1 %v2340_v59  ;;  %5835 = vmatprep.subr.bf16.mxu0 %v2401_v25  ;;  %v2440_v59 = vunpack.c.h.s8.bf16 %v868_v23  ;;  %v2373_v25 = vunpack.c.l.s8.bf16 %v837_v4 }
 0x66d   : > { %5876 = vmatprep.subr.bf16.mxu1 %v2465_v20  ;;  %v2437_v20 = vunpack.c.l.s8.bf16 %v869_v58 }
 0x66e   : > { %v5541_v33 = vpop.f32.mrf.mxu0  ;;  %5786 = vmatmul.mubr.bf16.vlgmr.msra.gmra.mxu0 %v7699_v12 }
 0x66f   : > { %v5582_v47 = vpop.f32.mrf.mxu1  ;;  %5827 = vmatmul.mubr.bf16.vlgmr.msra.gmra.mxu1 %v7708_v13  ;;  %v5542_v0 = vadd.f32 %v5541_v33, %v8519_v21  ;;  %5836 = vmatpush1.bf16.msra.mxu0 %v2400_v46  ;;  %v2372_v46 = vunpack.c.l.s8.bf16 %v836_v45 }
 0x670   : > { %5877 = vmatpush1.bf16.msra.mxu1 %v2464_v5  ;;  %v5543_v57 = vpop.f32.mrf.mxu0  ;;  %5837 = vmatprep.subr.bf16.mxu0 %v2397_v44  ;;  %v2436_v5 = vunpack.c.l.s8.bf16 %v868_v23  ;;  %v2433_v44 = vunpack.c.h.s8.bf16 %v865_v29 }
 0x671   : > { %v5584_v42 = vpop.f32.mrf.mxu1  ;;  %5878 = vmatprep.subr.bf16.mxu1 %v2461_v11  ;;  %v8561_v51 = vadd.f32 %v5582_v47, %v5542_v0  ;;  %v5544_v12 = vadd.f32 %v5543_v57, %v8524_v32  ;;  %5867 = vmatprep.mubr.bf16.mxu0 %v7704_v52  ;;  %v2389_v32 = vunpack.c.l.s8.bf16 %v845_v54  ;;  %v841_v52 = vld [vmem:[%s7175_s16 + $0x1038] sm:$0xff]  ;;  %v2497_v11 = vunpack.c.h.s8.bf16 %v897_v39  ;;  %v864_v54 = vld [vmem:[%s7175_s16 + $0x10f0] sm:$0xff] }
 0x672   : > { %5908 = vmatprep.mubr.bf16.mxu1 %v7714_v6  ;;  %v5545_v13 = vpop.f32.mrf.mxu0  ;;  %v2388_v6 = vunpack.c.l.s8.bf16 %v844_v2  ;;  %v2385_v16 = vunpack.c.h.s8.bf16 %v841_v52  ;;  %v2381_v19 = vunpack.c.l.s8.bf16 %v841_v52  ;;  %v2432_v33 = vunpack.c.h.s8.bf16 %v864_v54  ;;  %v893_v57 = vld [vmem:[%s7175_s16 + $0x11d8] sm:$0xff] }
 0x673   : > { %v5586_v21 = vpop.f32.mrf.mxu1  ;;  %v8566_v15 = vadd.f32 %v5584_v42, %v5544_v12  ;;  %5838 = vmatpush1.bf16.msra.mxu0 %v2396_v1  ;;  %v2496_v47 = vunpack.c.h.s8.bf16 %v896_v37  ;;  %v2429_v0 = vunpack.c.l.s8.bf16 %v865_v29  ;;  %v2493_v1 = vunpack.c.l.s8.bf16 %v897_v39  ;;  %v892_v12 = vld [vmem:[%s7175_s16 + $0x11d0] sm:$0xff] }
 0x674   : > { %5879 = vmatpush1.bf16.msra.mxu1 %v2460_v26  ;;  %v5546_v28 = vpop.f32.mrf.mxu0  ;;  %5839 = vmatprep.subr.bf16.mxu0 %v2393_v50  ;;  %v861_v26 = vld [vmem:[%s7175_s16 + $0x10d8] sm:$0xff]  ;;  %v2428_v42 = vunpack.c.l.s8.bf16 %v864_v54  ;;  %v2492_v50 = vunpack.c.l.s8.bf16 %v896_v37  ;;  %v2489_v2 = vunpack.c.h.s8.bf16 %v893_v57  ;;  %v2424_v13 = vunpack.c.h.s8.bf16 %v860_v63 }
 0x675   : > { %v5587_v27 = vpop.f32.mrf.mxu1  ;;  %5880 = vmatprep.subr.bf16.mxu1 %v2457_v35  ;;  %v2425_v35 = vunpack.c.h.s8.bf16 %v861_v26  ;;  %v2488_v21 = vunpack.c.h.s8.bf16 %v892_v12  ;;  %v857_v28 = vld [vmem:[%s7175_s16 + $0x10b8] sm:$0xff] }
 0x676   : > { %v889_v27 = vld [vmem:[%s7175_s16 + $0x11b8] sm:$0xff]  ;;  %v2417_v52 = vunpack.c.h.s8.bf16 %v857_v28  ;;  %v2413_v56 = vunpack.c.l.s8.bf16 %v857_v28 }
 0x677   : > { %5840 = vmatpush1.bf16.msra.mxu0 %v2392_v61  ;;  %v2421_v61 = vunpack.c.l.s8.bf16 %v861_v26  ;;  %v2481_v53 = vunpack.c.h.s8.bf16 %v889_v27  ;;  %v2477_v3 = vunpack.c.l.s8.bf16 %v889_v27  ;;  %v8985_v26 = vld [vmem:[#allocation16_spill] sm:$0xff] }
 0x678   : > { %5881 = vmatpush1.bf16.msra.mxu1 %v2456_v31  ;;  %5841 = vmatprep.subr.bf16.mxu0 %v2389_v32  ;;  %v2485_v31 = vunpack.c.l.s8.bf16 %v893_v57  ;;  %v2420_v32 = vunpack.c.l.s8.bf16 %v860_v63 }
 0x679   : > { %5882 = vmatprep.subr.bf16.mxu1 %v2453_v43  ;;  %v2484_v43 = vunpack.c.l.s8.bf16 %v892_v12 }
 0x67b   : > { %5842 = vmatpush1.bf16.msra.mxu0 %v2388_v6  ;;  %v856_v6 = vld [vmem:[%s7175_s16 + $0x10b0] sm:$0xff] }
 0x67c   : > { %5883 = vmatpush1.bf16.msra.mxu1 %v2452_v49  ;;  %5843 = vmatprep.subr.bf16.mxu0 %v2385_v16  ;;  %v888_v49 = vld [vmem:[%s7175_s16 + $0x11b0] sm:$0xff]  ;;  %v2416_v16 = vunpack.c.h.s8.bf16 %v856_v6 }
 0x67d   : > { %5884 = vmatprep.subr.bf16.mxu1 %v2449_v62  ;;  %v2480_v62 = vunpack.c.h.s8.bf16 %v888_v49 }
 0x67f   : > { %5844 = vmatpush1.bf16.msra.mxu0 %v2384_v34  ;;  %v853_v34 = vld [vmem:[%s7175_s16 + $0x1098] sm:$0xff] }
 0x680   : > { %5885 = vmatpush1.bf16.msra.mxu1 %v2448_v8  ;;  %5845 = vmatprep.subr.bf16.mxu0 %v2381_v19  ;;  %v885_v8 = vld [vmem:[%s7175_s16 + $0x1198] sm:$0xff]  ;;  %v2412_v19 = vunpack.c.l.s8.bf16 %v856_v6  ;;  %v2409_v4 = vunpack.c.h.s8.bf16 %v853_v34  ;;  %v2405_v45 = vunpack.c.l.s8.bf16 %v853_v34 }
 0x681   : > { %5886 = vmatprep.subr.bf16.mxu1 %v2445_v10  ;;  %v2476_v10 = vunpack.c.l.s8.bf16 %v888_v49  ;;  %v2473_v58 = vunpack.c.h.s8.bf16 %v885_v8  ;;  %v2469_v23 = vunpack.c.l.s8.bf16 %v885_v8 }
 0x683   : > { %5846 = vmatpush1.bf16.msra.mxu0 %v2380_v41  ;;  %v852_v41 = vld [vmem:[%s7175_s16 + $0x1090] sm:$0xff] }
 0x684   : > { %5887 = vmatpush1.bf16.msra.mxu1 %v2444_v18  ;;  %5847 = vmatprep.subr.bf16.mxu0 %v2377_v30  ;;  %v884_v18 = vld [vmem:[%s7175_s16 + $0x1190] sm:$0xff]  ;;  %v2408_v30 = vunpack.c.h.s8.bf16 %v852_v41 }
 0x685   : > { %5888 = vmatprep.subr.bf16.mxu1 %v2441_v40  ;;  %v2472_v40 = vunpack.c.h.s8.bf16 %v884_v18 }
 0x687   : > { %5848 = vmatpush1.bf16.msra.mxu0 %v2376_v48  ;;  %v913_v48 = vld [vmem:[%s7175_s16 + $0x1278] sm:$0xff] }
 0x688   : > { %5889 = vmatpush1.bf16.msra.mxu1 %v2440_v59  ;;  %5849 = vmatprep.subr.bf16.mxu0 %v2373_v25  ;;  %v945_v59 = vld [vmem:[%s7175_s16 + $0x1378] sm:$0xff]  ;;  %v2404_v25 = vunpack.c.l.s8.bf16 %v852_v41  ;;  %v2529_v29 = vunpack.c.h.s8.bf16 %v913_v48  ;;  %v2525_v54 = vunpack.c.l.s8.bf16 %v913_v48 }
 0x689   : > { %5890 = vmatprep.subr.bf16.mxu1 %v2437_v20  ;;  %v2468_v20 = vunpack.c.l.s8.bf16 %v884_v18  ;;  %v2593_v39 = vunpack.c.h.s8.bf16 %v945_v59  ;;  %v2589_v37 = vunpack.c.l.s8.bf16 %v945_v59 }
 0x68b   : > { %5850 = vmatpush1.bf16.msra.mxu0 %v2372_v46  ;;  %v912_v46 = vld [vmem:[%s7175_s16 + $0x1270] sm:$0xff] }
 0x68c   : > { %5891 = vmatpush1.bf16.msra.mxu1 %v2436_v5  ;;  %5851 = vmatprep.subr.bf16.mxu0 %v2433_v44  ;;  %v944_v5 = vld [vmem:[%s7175_s16 + $0x1370] sm:$0xff]  ;;  %v2528_v44 = vunpack.c.h.s8.bf16 %v912_v46 }
 0x68d   : > { %5892 = vmatprep.subr.bf16.mxu1 %v2497_v11  ;;  %v2592_v11 = vunpack.c.h.s8.bf16 %v944_v5 }
 0x68f   : > { %5852 = vmatpush2.bf16.msra.mxu0 %v2432_v33  ;;  %v909_v33 = vld [vmem:[%s7175_s16 + $0x1258] sm:$0xff] }
 0x690   : > { %5893 = vmatpush2.bf16.msra.mxu1 %v2496_v47  ;;  %5853 = vmatprep.subr.bf16.mxu0 %v2429_v0  ;;  %v941_v47 = vld [vmem:[%s7175_s16 + $0x1358] sm:$0xff]  ;;  %v2521_v63 = vunpack.c.h.s8.bf16 %v909_v33 }
 0x691   : > { %5894 = vmatprep.subr.bf16.mxu1 %v2493_v1  ;;  %v2585_v12 = vunpack.c.h.s8.bf16 %v941_v47  ;;  %v2581_v49 = vunpack.c.l.s8.bf16 %v941_v47 }
 0x693   : > { %5854 = vmatpush2.bf16.msra.mxu0 %v2428_v42  ;;  %v2524_v42 = vunpack.c.l.s8.bf16 %v912_v46 }
 0x694   : > { %5895 = vmatpush2.bf16.msra.mxu1 %v2492_v50  ;;  %5855 = vmatprep.subr.bf16.mxu0 %v2425_v35  ;;  %v2588_v50 = vunpack.c.l.s8.bf16 %v944_v5 }
 0x695   : > { %5896 = vmatprep.subr.bf16.mxu1 %v2489_v2 }
 0x697   : > { %5856 = vmatpush2.bf16.msra.mxu0 %v2424_v13  ;;  %v908_v13 = vld [vmem:[%s7175_s16 + $0x1250] sm:$0xff] }
 0x698   : > { %5897 = vmatpush2.bf16.msra.mxu1 %v2488_v21  ;;  %5857 = vmatprep.subr.bf16.mxu0 %v2421_v61  ;;  %v940_v21 = vld [vmem:[%s7175_s16 + $0x1350] sm:$0xff] }
 0x699   : > { %5898 = vmatprep.subr.bf16.mxu1 %v2485_v31  ;;  %v8986_v31 = vld [vmem:[#allocation15_spill] sm:$0xff] }
 0x69b   : > { %5858 = vmatpush2.bf16.msra.mxu0 %v2420_v32 }
 0x69c   : > { %5899 = vmatpush2.bf16.msra.mxu1 %v2484_v43  ;;  %5859 = vmatprep.subr.bf16.mxu0 %v2417_v52  ;;  %v2520_v43 = vunpack.c.h.s8.bf16 %v908_v13  ;;  %v2584_v52 = vunpack.c.h.s8.bf16 %v940_v21 }
 0x69d   : > { %5900 = vmatprep.subr.bf16.mxu1 %v2481_v53 }
 0x69f   : > { %5860 = vmatpush2.bf16.msra.mxu0 %v2416_v16  ;;  %v905_v16 = vld [vmem:[%s7175_s16 + $0x1238] sm:$0xff] }
 0x6a0   : > { %5901 = vmatpush2.bf16.msra.mxu1 %v2480_v62  ;;  %5861 = vmatprep.subr.bf16.mxu0 %v2413_v56  ;;  %v937_v62 = vld [vmem:[%s7175_s16 + $0x1338] sm:$0xff]  ;;  %v2516_v56 = vunpack.c.l.s8.bf16 %v908_v13  ;;  %v2513_v34 = vunpack.c.h.s8.bf16 %v905_v16  ;;  %v2509_v41 = vunpack.c.l.s8.bf16 %v905_v16 }
 0x6a1   : > { %5902 = vmatprep.subr.bf16.mxu1 %v2477_v3  ;;  %v2580_v3 = vunpack.c.l.s8.bf16 %v940_v21  ;;  %v2577_v8 = vunpack.c.h.s8.bf16 %v937_v62  ;;  %v2573_v18 = vunpack.c.l.s8.bf16 %v937_v62  ;;  %v920_v62 = vld [vmem:[%s7175_s16 + $0x12b0] sm:$0xff] }
 0x6a3   : > { %5862 = vmatpush2.bf16.msra.mxu0 %v2412_v19  ;;  %v904_v19 = vld [vmem:[%s7175_s16 + $0x1230] sm:$0xff] }
 0x6a4   : > { %5903 = vmatpush2.bf16.msra.mxu1 %v2476_v10  ;;  %5863 = vmatprep.subr.bf16.mxu0 %v2409_v4  ;;  %v936_v10 = vld [vmem:[%s7175_s16 + $0x1330] sm:$0xff]  ;;  %v2512_v4 = vunpack.c.h.s8.bf16 %v904_v19 }
 0x6a5   : > { %5904 = vmatprep.subr.bf16.mxu1 %v2473_v58  ;;  %v2576_v58 = vunpack.c.h.s8.bf16 %v936_v10 }
 0x6a7   : > { %5864 = vmatpush2.bf16.msra.mxu0 %v2408_v30  ;;  %v901_v30 = vld [vmem:[%s7175_s16 + $0x1218] sm:$0xff] }
 0x6a8   : > { %5905 = vmatpush2.bf16.msra.mxu1 %v2472_v40  ;;  %5865 = vmatprep.subr.bf16.mxu0 %v2405_v45  ;;  %v933_v40 = vld [vmem:[%s7175_s16 + $0x1318] sm:$0xff]  ;;  %v2508_v45 = vunpack.c.l.s8.bf16 %v904_v19  ;;  %v2505_v48 = vunpack.c.h.s8.bf16 %v901_v30  ;;  %v2501_v46 = vunpack.c.l.s8.bf16 %v901_v30 }
 0x6a9   : > { %5906 = vmatprep.subr.bf16.mxu1 %v2469_v23  ;;  %v2572_v23 = vunpack.c.l.s8.bf16 %v936_v10  ;;  %v2569_v59 = vunpack.c.h.s8.bf16 %v933_v40  ;;  %v2565_v5 = vunpack.c.l.s8.bf16 %v933_v40  ;;  %v917_v10 = vld [vmem:[%s7175_s16 + $0x1298] sm:$0xff]  ;;  %v916_v40 = vld [vmem:[%s7175_s16 + $0x1290] sm:$0xff] }
 0x6ab   : > { %5866 = vmatpush2.bf16.msra.mxu0 %v2404_v25  ;;  %v900_v25 = vld [vmem:[%s7175_s16 + $0x1210] sm:$0xff] }
 0x6ac   : > { %5907 = vmatpush2.bf16.msra.mxu1 %v2468_v20  ;;  %5917 = vmatprep.subr.bf16.mxu0 %v2529_v29  ;;  %v932_v20 = vld [vmem:[%s7175_s16 + $0x1310] sm:$0xff]  ;;  %v2504_v29 = vunpack.c.h.s8.bf16 %v900_v25 }
 0x6ad   : > { %5958 = vmatprep.subr.bf16.mxu1 %v2593_v39  ;;  %v2568_v39 = vunpack.c.h.s8.bf16 %v932_v20 }
 0x6ae   : > { %v5623_v0 = vpop.f32.mrf.mxu0  ;;  %5868 = vmatmul.mubr.bf16.vlgmr.msra.gmra.mxu0 %v7763_v22 }
 0x6af   : > { %v5664_v1 = vpop.f32.mrf.mxu1  ;;  %5909 = vmatmul.mubr.bf16.vlgmr.msra.gmra.mxu1 %v8985_v26  ;;  %v5624_v57 = vadd.f32 %v5623_v0, %v8561_v51  ;;  %5918 = vmatpush1.bf16.msra.mxu0 %v2528_v44  ;;  %v8987_v51 = vld [vmem:[#allocation17_spill] sm:$0xff]  ;;  %v929_v44 = vld [vmem:[%s7175_s16 + $0x12f8] sm:$0xff]  ;;  %v928_v0 = vld [vmem:[%s7175_s16 + $0x12f0] sm:$0xff] }
 0x6b0   : > { %5959 = vmatpush1.bf16.msra.mxu1 %v2592_v11  ;;  %v5625_v35 = vpop.f32.mrf.mxu0  ;;  %5919 = vmatprep.subr.bf16.mxu0 %v2525_v54  ;;  %v961_v11 = vld [vmem:[%s7175_s16 + $0x13f8] sm:$0xff]  ;;  %v2500_v54 = vunpack.c.l.s8.bf16 %v900_v25  ;;  %v2560_v26 = vunpack.c.h.s8.bf16 %v928_v0 }
 0x6b1   : > { %v5666_v2 = vpop.f32.mrf.mxu1  ;;  %5960 = vmatprep.subr.bf16.mxu1 %v2589_v37  ;;  %v8603_v61 = vadd.f32 %v5664_v1, %v5624_v57  ;;  %v5626_v22 = vadd.f32 %v5625_v35, %v8566_v15  ;;  %5949 = vmatprep.mubr.bf16.mxu0 %v8986_v31  ;;  %v2517_v15 = vunpack.c.l.s8.bf16 %v909_v33  ;;  %v2564_v37 = vunpack.c.l.s8.bf16 %v932_v20  ;;  %v960_v1 = vld [vmem:[%s7175_s16 + $0x13f0] sm:$0xff]  ;;  %v925_v35 = vld [vmem:[%s7175_s16 + $0x12d8] sm:$0xff] }
 0x6b2   : > { %5990 = vmatprep.mubr.bf16.mxu1 %v8987_v51  ;;  %v5627_v28 = vpop.f32.mrf.mxu0  ;;  %v2561_v33 = vunpack.c.h.s8.bf16 %v929_v44  ;;  %v2625_v47 = vunpack.c.h.s8.bf16 %v961_v11  ;;  %v2624_v57 = vunpack.c.h.s8.bf16 %v960_v1  ;;  %v2553_v13 = vunpack.c.h.s8.bf16 %v925_v35  ;;  %v956_v31 = vld [vmem:[%s7175_s16 + $0x13d0] sm:$0xff]  ;;  %v977_v20 = vld [vmem:[%s7175_s16 + $0x1478] sm:$0xff] }
 0x6b3   : > { %v5668_v27 = vpop.f32.mrf.mxu1  ;;  %v8608_v32 = vadd.f32 %v5666_v2, %v5626_v22  ;;  %5920 = vmatpush1.bf16.msra.mxu0 %v2524_v42  ;;  %v2557_v42 = vunpack.c.l.s8.bf16 %v929_v44  ;;  %v957_v2 = vld [vmem:[%s7175_s16 + $0x13d8] sm:$0xff]  ;;  %v924_v22 = vld [vmem:[%s7175_s16 + $0x12d0] sm:$0xff]  ;;  %v2616_v28 = vunpack.c.h.s8.bf16 %v956_v31 }
 0x6b4   : > { %5961 = vmatpush1.bf16.msra.mxu1 %v2588_v50  ;;  %v5628_v53 = vpop.f32.mrf.mxu0  ;;  %5921 = vmatprep.subr.bf16.mxu0 %v2521_v63  ;;  %v2621_v50 = vunpack.c.l.s8.bf16 %v961_v11  ;;  %v2556_v63 = vunpack.c.l.s8.bf16 %v928_v0  ;;  %v2617_v21 = vunpack.c.h.s8.bf16 %v957_v2  ;;  %v2552_v51 = vunpack.c.h.s8.bf16 %v924_v22  ;;  %v976_v11 = vld [vmem:[%s7175_s16 + $0x1470] sm:$0xff] }
 0x6b5   : > { %v5669_v6 = vpop.f32.mrf.mxu1  ;;  %5962 = vmatprep.subr.bf16.mxu1 %v2585_v12  ;;  %v2620_v12 = vunpack.c.l.s8.bf16 %v960_v1  ;;  %v2549_v27 = vunpack.c.l.s8.bf16 %v925_v35  ;;  %v953_v53 = vld [vmem:[%s7175_s16 + $0x13b8] sm:$0xff] }
 0x6b6   : > { %v2548_v6 = vunpack.c.l.s8.bf16 %v924_v22  ;;  %v2609_v16 = vunpack.c.h.s8.bf16 %v953_v53  ;;  %v2605_v19 = vunpack.c.l.s8.bf16 %v953_v53  ;;  %v973_v1 = vld [vmem:[%s7175_s16 + $0x1458] sm:$0xff] }
 0x6b7   : > { %5922 = vmatpush1.bf16.msra.mxu0 %v2520_v43  ;;  %v2613_v43 = vunpack.c.l.s8.bf16 %v957_v2  ;;  %v8989_v35 = vld [vmem:[#allocation20_spill] sm:$0xff]  ;;  %v2649_v22 = vunpack.c.h.s8.bf16 %v973_v1 }
 0x6b8   : > { %5963 = vmatpush1.bf16.msra.mxu1 %v2584_v52  ;;  %5923 = vmatprep.subr.bf16.mxu0 %v2517_v15  ;;  %v921_v52 = vld [vmem:[%s7175_s16 + $0x12b8] sm:$0xff]  ;;  %v2612_v15 = vunpack.c.l.s8.bf16 %v956_v31 }
 0x6b9   : > { %5964 = vmatprep.subr.bf16.mxu1 %v2581_v49  ;;  %v2545_v49 = vunpack.c.h.s8.bf16 %v921_v52 }
 0x6bb   : > { %5924 = vmatpush1.bf16.msra.mxu0 %v2516_v56  ;;  %v952_v56 = vld [vmem:[%s7175_s16 + $0x13b0] sm:$0xff] }
 0x6bc   : > { %5965 = vmatpush1.bf16.msra.mxu1 %v2580_v3  ;;  %5925 = vmatprep.subr.bf16.mxu0 %v2513_v34  ;;  %v2544_v3 = vunpack.c.h.s8.bf16 %v920_v62  ;;  %v2608_v34 = vunpack.c.h.s8.bf16 %v952_v56 }
 0x6bd   : > { %5966 = vmatprep.subr.bf16.mxu1 %v2577_v8  ;;  %v2541_v8 = vunpack.c.l.s8.bf16 %v921_v52  ;;  %v8990_v52 = vld [vmem:[#allocation19_spill] sm:$0xff] }
 0x6bf   : > { %5926 = vmatpush1.bf16.msra.mxu0 %v2512_v4  ;;  %v949_v4 = vld [vmem:[%s7175_s16 + $0x1398] sm:$0xff] }
 0x6c0   : > { %5967 = vmatpush1.bf16.msra.mxu1 %v2576_v58  ;;  %5927 = vmatprep.subr.bf16.mxu0 %v2509_v41  ;;  %v2540_v58 = vunpack.c.l.s8.bf16 %v920_v62  ;;  %v2604_v41 = vunpack.c.l.s8.bf16 %v952_v56  ;;  %v2601_v30 = vunpack.c.h.s8.bf16 %v949_v4  ;;  %v2597_v25 = vunpack.c.l.s8.bf16 %v949_v4 }
 0x6c1   : > { %5968 = vmatprep.subr.bf16.mxu1 %v2573_v18  ;;  %v2537_v18 = vunpack.c.h.s8.bf16 %v917_v10 }
 0x6c3   : > { %5928 = vmatpush1.bf16.msra.mxu0 %v2508_v45  ;;  %v948_v45 = vld [vmem:[%s7175_s16 + $0x1390] sm:$0xff] }
 0x6c4   : > { %5969 = vmatpush1.bf16.msra.mxu1 %v2572_v23  ;;  %5929 = vmatprep.subr.bf16.mxu0 %v2505_v48  ;;  %v2536_v23 = vunpack.c.h.s8.bf16 %v916_v40  ;;  %v2600_v48 = vunpack.c.h.s8.bf16 %v948_v45 }
 0x6c5   : > { %5970 = vmatprep.subr.bf16.mxu1 %v2569_v59  ;;  %v2533_v59 = vunpack.c.l.s8.bf16 %v917_v10 }
 0x6c7   : > { %5930 = vmatpush1.bf16.msra.mxu0 %v2504_v29  ;;  %v1009_v29 = vld [vmem:[%s7175_s16 + $0x1578] sm:$0xff] }
 0x6c8   : > { %5971 = vmatpush1.bf16.msra.mxu1 %v2568_v39  ;;  %5931 = vmatprep.subr.bf16.mxu0 %v2501_v46  ;;  %v2532_v39 = vunpack.c.l.s8.bf16 %v916_v40  ;;  %v2596_v46 = vunpack.c.l.s8.bf16 %v948_v45  ;;  %v2721_v44 = vunpack.c.h.s8.bf16 %v1009_v29  ;;  %v2717_v0 = vunpack.c.l.s8.bf16 %v1009_v29 }
 0x6c9   : > { %5972 = vmatprep.subr.bf16.mxu1 %v2565_v5  ;;  %v2657_v5 = vunpack.c.h.s8.bf16 %v977_v20 }
 0x6cb   : > { %5932 = vmatpush1.bf16.msra.mxu0 %v2500_v54  ;;  %v1008_v54 = vld [vmem:[%s7175_s16 + $0x1570] sm:$0xff] }
 0x6cc   : > { %5973 = vmatpush1.bf16.msra.mxu1 %v2564_v37  ;;  %5933 = vmatprep.subr.bf16.mxu0 %v2561_v33  ;;  %v2656_v37 = vunpack.c.h.s8.bf16 %v976_v11  ;;  %v2720_v33 = vunpack.c.h.s8.bf16 %v1008_v54 }
 0x6cd   : > { %5974 = vmatprep.subr.bf16.mxu1 %v2625_v47  ;;  %v2653_v47 = vunpack.c.l.s8.bf16 %v977_v20 }
 0x6cf   : > { %5934 = vmatpush2.bf16.msra.mxu0 %v2560_v26  ;;  %v1005_v26 = vld [vmem:[%s7175_s16 + $0x1558] sm:$0xff] }
 0x6d0   : > { %5975 = vmatpush2.bf16.msra.mxu1 %v2624_v57  ;;  %5935 = vmatprep.subr.bf16.mxu0 %v2557_v42  ;;  %v2713_v31 = vunpack.c.h.s8.bf16 %v1005_v26 }
 0x6d1   : > { %5976 = vmatprep.subr.bf16.mxu1 %v2621_v50  ;;  %v8988_v50 = vld [vmem:[#allocation18_spill] sm:$0xff] }
 0x6d3   : > { %5936 = vmatpush2.bf16.msra.mxu0 %v2556_v63  ;;  %v2652_v63 = vunpack.c.l.s8.bf16 %v976_v11 }
 0x6d4   : > { %5977 = vmatpush2.bf16.msra.mxu1 %v2620_v12  ;;  %5937 = vmatprep.subr.bf16.mxu0 %v2553_v13  ;;  %v2716_v12 = vunpack.c.l.s8.bf16 %v1008_v54 }
 0x6d5   : > { %5978 = vmatprep.subr.bf16.mxu1 %v2617_v21 }
 0x6d7   : > { %5938 = vmatpush2.bf16.msra.mxu0 %v2552_v51  ;;  %v972_v51 = vld [vmem:[%s7175_s16 + $0x1450] sm:$0xff] }
 0x6d8   : > { %5979 = vmatpush2.bf16.msra.mxu1 %v2616_v28  ;;  %5939 = vmatprep.subr.bf16.mxu0 %v2549_v27  ;;  %v1004_v28 = vld [vmem:[%s7175_s16 + $0x1550] sm:$0xff] }
 0x6d9   : > { %5980 = vmatprep.subr.bf16.mxu1 %v2613_v43  ;;  %v2708_v10 = vunpack.c.l.s8.bf16 %v1004_v28 }
 0x6db   : > { %5940 = vmatpush2.bf16.msra.mxu0 %v2548_v6 }
 0x6dc   : > { %5981 = vmatpush2.bf16.msra.mxu1 %v2612_v15  ;;  %5941 = vmatprep.subr.bf16.mxu0 %v2545_v49  ;;  %v2648_v49 = vunpack.c.h.s8.bf16 %v972_v51 }
 0x6dd   : > { %5982 = vmatprep.subr.bf16.mxu1 %v2609_v16  ;;  %v2712_v16 = vunpack.c.h.s8.bf16 %v1004_v28 }
 0x6df   : > { %5942 = vmatpush2.bf16.msra.mxu0 %v2544_v3  ;;  %v2709_v3 = vunpack.c.l.s8.bf16 %v1005_v26 }
 0x6e0   : > { %5983 = vmatpush2.bf16.msra.mxu1 %v2608_v34  ;;  %5943 = vmatprep.subr.bf16.mxu0 %v2541_v8  ;;  %v969_v34 = vld [vmem:[%s7175_s16 + $0x1438] sm:$0xff] }
 0x6e1   : > { %5984 = vmatprep.subr.bf16.mxu1 %v2605_v19  ;;  %v1001_v8 = vld [vmem:[%s7175_s16 + $0x1538] sm:$0xff]  ;;  %v2644_v19 = vunpack.c.l.s8.bf16 %v972_v51  ;;  %v2641_v4 = vunpack.c.h.s8.bf16 %v969_v34  ;;  %v2637_v45 = vunpack.c.l.s8.bf16 %v969_v34 }
 0x6e3   : > { %5944 = vmatpush2.bf16.msra.mxu0 %v2540_v58  ;;  %v2705_v58 = vunpack.c.h.s8.bf16 %v1001_v8 }
 0x6e4   : > { %5985 = vmatpush2.bf16.msra.mxu1 %v2604_v41  ;;  %5945 = vmatprep.subr.bf16.mxu0 %v2537_v18  ;;  %v968_v41 = vld [vmem:[%s7175_s16 + $0x1430] sm:$0xff] }
 0x6e5   : > { %5986 = vmatprep.subr.bf16.mxu1 %v2601_v30  ;;  %v1000_v18 = vld [vmem:[%s7175_s16 + $0x1530] sm:$0xff]  ;;  %v2640_v30 = vunpack.c.h.s8.bf16 %v968_v41 }
 0x6e6   : > { %v2704_v40 = vunpack.c.h.s8.bf16 %v1000_v18  ;;  %v2700_v20 = vunpack.c.l.s8.bf16 %v1000_v18  ;;  %v981_v18 = vld [vmem:[%s7175_s16 + $0x1498] sm:$0xff] }
 0x6e7   : > { %5946 = vmatpush2.bf16.msra.mxu0 %v2536_v23  ;;  %v2701_v23 = vunpack.c.l.s8.bf16 %v1001_v8  ;;  %v984_v8 = vld [vmem:[%s7175_s16 + $0x14b0] sm:$0xff] }
 0x6e8   : > { %5987 = vmatpush2.bf16.msra.mxu1 %v2600_v48  ;;  %5947 = vmatprep.subr.bf16.mxu0 %v2533_v59  ;;  %v965_v48 = vld [vmem:[%s7175_s16 + $0x1418] sm:$0xff] }
 0x6e9   : > { %5988 = vmatprep.subr.bf16.mxu1 %v2597_v25  ;;  %v997_v59 = vld [vmem:[%s7175_s16 + $0x1518] sm:$0xff]  ;;  %v2636_v25 = vunpack.c.l.s8.bf16 %v968_v41  ;;  %v2633_v29 = vunpack.c.h.s8.bf16 %v965_v48  ;;  %v2629_v54 = vunpack.c.l.s8.bf16 %v965_v48 }
 0x6eb   : > { %5948 = vmatpush2.bf16.msra.mxu0 %v2532_v39  ;;  %v2697_v39 = vunpack.c.h.s8.bf16 %v997_v59 }
 0x6ec   : > { %5989 = vmatpush2.bf16.msra.mxu1 %v2596_v46  ;;  %5999 = vmatprep.subr.bf16.mxu0 %v2657_v5  ;;  %v964_v46 = vld [vmem:[%s7175_s16 + $0x1410] sm:$0xff] }
 0x6ed   : > { %6040 = vmatprep.subr.bf16.mxu1 %v2721_v44  ;;  %v996_v5 = vld [vmem:[%s7175_s16 + $0x1510] sm:$0xff]  ;;  %v2632_v44 = vunpack.c.h.s8.bf16 %v964_v46 }
 0x6ee   : > { %v5705_v57 = vpop.f32.mrf.mxu0  ;;  %5950 = vmatmul.mubr.bf16.vlgmr.msra.gmra.mxu0 %v8988_v50  ;;  %v2696_v11 = vunpack.c.h.s8.bf16 %v996_v5  ;;  %v1024_v50 = vld [vmem:[%s7175_s16 + $0x15f0] sm:$0xff] }
 0x6ef   : > { %v5746_v42 = vpop.f32.mrf.mxu1  ;;  %5991 = vmatmul.mubr.bf16.vlgmr.msra.gmra.mxu1 %v8989_v35  ;;  %v5706_v2 = vadd.f32 %v5705_v57, %v8603_v61  ;;  %6000 = vmatpush1.bf16.msra.mxu0 %v2656_v37  ;;  %v8991_v61 = vld [vmem:[#allocation21_spill] sm:$0xff]  ;;  %v2693_v37 = vunpack.c.l.s8.bf16 %v997_v59  ;;  %v980_v59 = vld [vmem:[%s7175_s16 + $0x1490] sm:$0xff] }
 0x6f0   : > { %6041 = vmatpush1.bf16.msra.mxu1 %v2720_v33  ;;  %v5707_v13 = vpop.f32.mrf.mxu0  ;;  %6001 = vmatprep.subr.bf16.mxu0 %v2653_v47  ;;  %v993_v33 = vld [vmem:[%s7175_s16 + $0x14f8] sm:$0xff] }
 0x6f1   : > { %v5748_v21 = vpop.f32.mrf.mxu1  ;;  %6042 = vmatprep.subr.bf16.mxu1 %v2717_v0  ;;  %v8645_v27 = vadd.f32 %v5746_v42, %v5706_v2  ;;  %v5708_v43 = vadd.f32 %v5707_v13, %v8608_v32  ;;  %6031 = vmatprep.mubr.bf16.mxu0 %v8990_v52  ;;  %v2645_v32 = vunpack.c.l.s8.bf16 %v973_v1  ;;  %v1025_v47 = vld [vmem:[%s7175_s16 + $0x15f8] sm:$0xff]  ;;  %v2628_v0 = vunpack.c.l.s8.bf16 %v964_v46  ;;  %v992_v42 = vld [vmem:[%s7175_s16 + $0x14f0] sm:$0xff] }
 0x6f2   : > { %6072 = vmatprep.mubr.bf16.mxu1 %v8991_v61  ;;  %v5709_v53 = vpop.f32.mrf.mxu0  ;;  %v2692_v1 = vunpack.c.l.s8.bf16 %v996_v5  ;;  %v2689_v26 = vunpack.c.h.s8.bf16 %v993_v33  ;;  %v2753_v57 = vunpack.c.h.s8.bf16 %v1025_v47  ;;  %v2688_v35 = vunpack.c.h.s8.bf16 %v992_v42  ;;  %v989_v13 = vld [vmem:[%s7175_s16 + $0x14d8] sm:$0xff]  ;;  %v1020_v52 = vld [vmem:[%s7175_s16 + $0x15d0] sm:$0xff] }
 0x6f3   : > { %v5750_v6 = vpop.f32.mrf.mxu1  ;;  %v8650_v15 = vadd.f32 %v5748_v21, %v5708_v43  ;;  %6002 = vmatpush1.bf16.msra.mxu0 %v2652_v63  ;;  %v2752_v2 = vunpack.c.h.s8.bf16 %v1024_v50  ;;  %v2685_v63 = vunpack.c.l.s8.bf16 %v993_v33  ;;  %v1021_v21 = vld [vmem:[%s7175_s16 + $0x15d8] sm:$0xff]  ;;  %v2681_v51 = vunpack.c.h.s8.bf16 %v989_v13  ;;  %v988_v43 = vld [vmem:[%s7175_s16 + $0x14d0] sm:$0xff] }
 0x6f4   : > { %6043 = vmatpush1.bf16.msra.mxu1 %v2716_v12  ;;  %v5710_v62 = vpop.f32.mrf.mxu0  ;;  %6003 = vmatprep.subr.bf16.mxu0 %v2649_v22  ;;  %v2749_v12 = vunpack.c.l.s8.bf16 %v1025_v47  ;;  %v2684_v22 = vunpack.c.l.s8.bf16 %v992_v42  ;;  %v2745_v28 = vunpack.c.h.s8.bf16 %v1021_v21  ;;  %v2680_v61 = vunpack.c.h.s8.bf16 %v988_v43  ;;  %v1041_v5 = vld [vmem:[%s7175_s16 + $0x1678] sm:$0xff]  ;;  %v1040_v47 = vld [vmem:[%s7175_s16 + $0x1670] sm:$0xff] }
 0x6f5   : > { %v5751_v56 = vpop.f32.mrf.mxu1  ;;  %6044 = vmatprep.subr.bf16.mxu1 %v2713_v31  ;;  %v2748_v31 = vunpack.c.l.s8.bf16 %v1024_v50  ;;  %v2744_v53 = vunpack.c.h.s8.bf16 %v1020_v52  ;;  %v2677_v6 = vunpack.c.l.s8.bf16 %v989_v13  ;;  %v1017_v62 = vld [vmem:[%s7175_s16 + $0x15b8] sm:$0xff] }
 0x6f6   : > { %v2676_v56 = vunpack.c.l.s8.bf16 %v988_v43  ;;  %v2737_v34 = vunpack.c.h.s8.bf16 %v1017_v62  ;;  %v2733_v41 = vunpack.c.l.s8.bf16 %v1017_v62  ;;  %v1037_v50 = vld [vmem:[%s7175_s16 + $0x1658] sm:$0xff] }
 0x6f7   : > { %6004 = vmatpush1.bf16.msra.mxu0 %v2648_v49  ;;  %v2741_v49 = vunpack.c.l.s8.bf16 %v1021_v21  ;;  %v8993_v13 = vld [vmem:[#allocation24_spill] sm:$0xff]  ;;  %v2777_v43 = vunpack.c.h.s8.bf16 %v1037_v50 }
 0x6f8   : > { %6045 = vmatpush1.bf16.msra.mxu1 %v2712_v16  ;;  %6005 = vmatprep.subr.bf16.mxu0 %v2645_v32  ;;  %v985_v16 = vld [vmem:[%s7175_s16 + $0x14b8] sm:$0xff]  ;;  %v2740_v32 = vunpack.c.l.s8.bf16 %v1020_v52 }
 0x6f9   : > { %6046 = vmatprep.subr.bf16.mxu1 %v2709_v3  ;;  %v2673_v3 = vunpack.c.h.s8.bf16 %v985_v16 }
 0x6fb   : > { %6006 = vmatpush1.bf16.msra.mxu0 %v2644_v19  ;;  %v1016_v19 = vld [vmem:[%s7175_s16 + $0x15b0] sm:$0xff] }
 0x6fc   : > { %6047 = vmatpush1.bf16.msra.mxu1 %v2708_v10  ;;  %6007 = vmatprep.subr.bf16.mxu0 %v2641_v4  ;;  %v2672_v10 = vunpack.c.h.s8.bf16 %v984_v8  ;;  %v2736_v4 = vunpack.c.h.s8.bf16 %v1016_v19 }
 0x6fd   : > { %6048 = vmatprep.subr.bf16.mxu1 %v2705_v58  ;;  %v2669_v58 = vunpack.c.l.s8.bf16 %v985_v16  ;;  %v8994_v16 = vld [vmem:[#allocation23_spill] sm:$0xff] }
 0x6ff   : > { %6008 = vmatpush1.bf16.msra.mxu0 %v2640_v30  ;;  %v1013_v30 = vld [vmem:[%s7175_s16 + $0x1598] sm:$0xff] }
 0x700   : > { %6049 = vmatpush1.bf16.msra.mxu1 %v2704_v40  ;;  %6009 = vmatprep.subr.bf16.mxu0 %v2637_v45  ;;  %v2668_v40 = vunpack.c.l.s8.bf16 %v984_v8  ;;  %v2732_v45 = vunpack.c.l.s8.bf16 %v1016_v19  ;;  %v2729_v48 = vunpack.c.h.s8.bf16 %v1013_v30  ;;  %v2725_v46 = vunpack.c.l.s8.bf16 %v1013_v30 }
 0x701   : > { %6050 = vmatprep.subr.bf16.mxu1 %v2701_v23  ;;  %v2665_v23 = vunpack.c.h.s8.bf16 %v981_v18 }
 0x703   : > { %6010 = vmatpush1.bf16.msra.mxu0 %v2636_v25  ;;  %v1012_v25 = vld [vmem:[%s7175_s16 + $0x1590] sm:$0xff] }
 0x704   : > { %6051 = vmatpush1.bf16.msra.mxu1 %v2700_v20  ;;  %6011 = vmatprep.subr.bf16.mxu0 %v2633_v29  ;;  %v2664_v20 = vunpack.c.h.s8.bf16 %v980_v59  ;;  %v2728_v29 = vunpack.c.h.s8.bf16 %v1012_v25 }
 0x705   : > { %6052 = vmatprep.subr.bf16.mxu1 %v2697_v39  ;;  %v2661_v39 = vunpack.c.l.s8.bf16 %v981_v18 }
 0x707   : > { %6012 = vmatpush1.bf16.msra.mxu0 %v2632_v44  ;;  %v1073_v44 = vld [vmem:[%s7175_s16 + $0x1778] sm:$0xff] }
 0x708   : > { %6053 = vmatpush1.bf16.msra.mxu1 %v2696_v11  ;;  %6013 = vmatprep.subr.bf16.mxu0 %v2629_v54  ;;  %v2660_v11 = vunpack.c.l.s8.bf16 %v980_v59  ;;  %v2724_v54 = vunpack.c.l.s8.bf16 %v1012_v25  ;;  %v2849_v33 = vunpack.c.h.s8.bf16 %v1073_v44  ;;  %v2845_v42 = vunpack.c.l.s8.bf16 %v1073_v44 }
 0x709   : > { %6054 = vmatprep.subr.bf16.mxu1 %v2693_v37  ;;  %v2785_v37 = vunpack.c.h.s8.bf16 %v1041_v5 }
 0x70b   : > { %6014 = vmatpush1.bf16.msra.mxu0 %v2628_v0  ;;  %v1072_v0 = vld [vmem:[%s7175_s16 + $0x1770] sm:$0xff] }
 0x70c   : > { %6055 = vmatpush1.bf16.msra.mxu1 %v2692_v1  ;;  %6015 = vmatprep.subr.bf16.mxu0 %v2689_v26  ;;  %v2784_v1 = vunpack.c.h.s8.bf16 %v1040_v47  ;;  %v2848_v26 = vunpack.c.h.s8.bf16 %v1072_v0 }
 0x70d   : > { %6056 = vmatprep.subr.bf16.mxu1 %v2753_v57  ;;  %v2781_v57 = vunpack.c.l.s8.bf16 %v1041_v5 }
 0x70f   : > { %6016 = vmatpush2.bf16.msra.mxu0 %v2688_v35  ;;  %v1069_v35 = vld [vmem:[%s7175_s16 + $0x1758] sm:$0xff] }
 0x710   : > { %6057 = vmatpush2.bf16.msra.mxu1 %v2752_v2  ;;  %6017 = vmatprep.subr.bf16.mxu0 %v2685_v63  ;;  %v2841_v52 = vunpack.c.h.s8.bf16 %v1069_v35 }
 0x711   : > { %6058 = vmatprep.subr.bf16.mxu1 %v2749_v12  ;;  %v8992_v12 = vld [vmem:[#allocation22_spill] sm:$0xff] }
 0x713   : > { %6018 = vmatpush2.bf16.msra.mxu0 %v2684_v22  ;;  %v2780_v22 = vunpack.c.l.s8.bf16 %v1040_v47 }
 0x714   : > { %6059 = vmatpush2.bf16.msra.mxu1 %v2748_v31  ;;  %6019 = vmatprep.subr.bf16.mxu0 %v2681_v51  ;;  %v2844_v31 = vunpack.c.l.s8.bf16 %v1072_v0 }
 0x715   : > { %6060 = vmatprep.subr.bf16.mxu1 %v2745_v28 }
 0x717   : > { %6020 = vmatpush2.bf16.msra.mxu0 %v2680_v61  ;;  %v1036_v61 = vld [vmem:[%s7175_s16 + $0x1650] sm:$0xff] }
 0x718   : > { %6061 = vmatpush2.bf16.msra.mxu1 %v2744_v53  ;;  %6021 = vmatprep.subr.bf16.mxu0 %v2677_v6  ;;  %v1068_v53 = vld [vmem:[%s7175_s16 + $0x1750] sm:$0xff] }
 0x719   : > { %6062 = vmatprep.subr.bf16.mxu1 %v2741_v49  ;;  %v2836_v18 = vunpack.c.l.s8.bf16 %v1068_v53 }
 0x71b   : > { %6022 = vmatpush2.bf16.msra.mxu0 %v2676_v56 }
 0x71c   : > { %6063 = vmatpush2.bf16.msra.mxu1 %v2740_v32  ;;  %6023 = vmatprep.subr.bf16.mxu0 %v2673_v3  ;;  %v2776_v3 = vunpack.c.h.s8.bf16 %v1036_v61 }
 0x71d   : > { %6064 = vmatprep.subr.bf16.mxu1 %v2737_v34  ;;  %v2840_v34 = vunpack.c.h.s8.bf16 %v1068_v53 }
 0x71f   : > { %6024 = vmatpush2.bf16.msra.mxu0 %v2672_v10  ;;  %v2837_v10 = vunpack.c.l.s8.bf16 %v1069_v35 }
 0x720   : > { %6065 = vmatpush2.bf16.msra.mxu1 %v2736_v4  ;;  %6025 = vmatprep.subr.bf16.mxu0 %v2669_v58  ;;  %v1033_v4 = vld [vmem:[%s7175_s16 + $0x1638] sm:$0xff] }
 0x721   : > { %6066 = vmatprep.subr.bf16.mxu1 %v2733_v41  ;;  %v1065_v58 = vld [vmem:[%s7175_s16 + $0x1738] sm:$0xff]  ;;  %v2772_v41 = vunpack.c.l.s8.bf16 %v1036_v61  ;;  %v2769_v30 = vunpack.c.h.s8.bf16 %v1033_v4  ;;  %v2765_v25 = vunpack.c.l.s8.bf16 %v1033_v4 }
 0x723   : > { %6026 = vmatpush2.bf16.msra.mxu0 %v2668_v40  ;;  %v2833_v40 = vunpack.c.h.s8.bf16 %v1065_v58 }
 0x724   : > { %6067 = vmatpush2.bf16.msra.mxu1 %v2732_v45  ;;  %6027 = vmatprep.subr.bf16.mxu0 %v2665_v23  ;;  %v1032_v45 = vld [vmem:[%s7175_s16 + $0x1630] sm:$0xff] }
 0x725   : > { %6068 = vmatprep.subr.bf16.mxu1 %v2729_v48  ;;  %v1064_v23 = vld [vmem:[%s7175_s16 + $0x1730] sm:$0xff]  ;;  %v2768_v48 = vunpack.c.h.s8.bf16 %v1032_v45 }
 0x726   : > { %v2832_v59 = vunpack.c.h.s8.bf16 %v1064_v23  ;;  %v2828_v5 = vunpack.c.l.s8.bf16 %v1064_v23  ;;  %v1045_v23 = vld [vmem:[%s7175_s16 + $0x1698] sm:$0xff] }
 0x727   : > { %6028 = vmatpush2.bf16.msra.mxu0 %v2664_v20  ;;  %v2829_v20 = vunpack.c.l.s8.bf16 %v1065_v58  ;;  %v1048_v58 = vld [vmem:[%s7175_s16 + $0x16b0] sm:$0xff] }
 0x728   : > { %6069 = vmatpush2.bf16.msra.mxu1 %v2728_v29  ;;  %6029 = vmatprep.subr.bf16.mxu0 %v2661_v39  ;;  %v1029_v29 = vld [vmem:[%s7175_s16 + $0x1618] sm:$0xff] }
 0x729   : > { %6070 = vmatprep.subr.bf16.mxu1 %v2725_v46  ;;  %v1061_v39 = vld [vmem:[%s7175_s16 + $0x1718] sm:$0xff]  ;;  %v2764_v46 = vunpack.c.l.s8.bf16 %v1032_v45  ;;  %v2761_v44 = vunpack.c.h.s8.bf16 %v1029_v29  ;;  %v2757_v0 = vunpack.c.l.s8.bf16 %v1029_v29 }
 0x72b   : > { %6030 = vmatpush2.bf16.msra.mxu0 %v2660_v11  ;;  %v2825_v11 = vunpack.c.h.s8.bf16 %v1061_v39 }
 0x72c   : > { %6071 = vmatpush2.bf16.msra.mxu1 %v2724_v54  ;;  %6081 = vmatprep.subr.bf16.mxu0 %v2785_v37  ;;  %v1028_v54 = vld [vmem:[%s7175_s16 + $0x1610] sm:$0xff] }
 0x72d   : > { %6122 = vmatprep.subr.bf16.mxu1 %v2849_v33  ;;  %v1060_v37 = vld [vmem:[%s7175_s16 + $0x1710] sm:$0xff]  ;;  %v2760_v33 = vunpack.c.h.s8.bf16 %v1028_v54 }
 0x72e   : > { %v5787_v2 = vpop.f32.mrf.mxu0  ;;  %6032 = vmatmul.mubr.bf16.vlgmr.msra.gmra.mxu0 %v8992_v12  ;;  %v2824_v47 = vunpack.c.h.s8.bf16 %v1060_v37  ;;  %v1088_v12 = vld [vmem:[%s7175_s16 + $0x17f0] sm:$0xff] }
 0x72f   : > { %v5828_v63 = vpop.f32.mrf.mxu1  ;;  %6073 = vmatmul.mubr.bf16.vlgmr.msra.gmra.mxu1 %v8993_v13  ;;  %v5788_v21 = vadd.f32 %v5787_v2, %v8645_v27  ;;  %6082 = vmatpush1.bf16.msra.mxu0 %v2784_v1  ;;  %v8995_v27 = vld [vmem:[#allocation25_spill] sm:$0xff]  ;;  %v2821_v1 = vunpack.c.l.s8.bf16 %v1061_v39  ;;  %v1044_v39 = vld [vmem:[%s7175_s16 + $0x1690] sm:$0xff] }
 0x730   : > { %6123 = vmatpush1.bf16.msra.mxu1 %v2848_v26  ;;  %v5789_v51 = vpop.f32.mrf.mxu0  ;;  %6083 = vmatprep.subr.bf16.mxu0 %v2781_v57  ;;  %v1057_v26 = vld [vmem:[%s7175_s16 + $0x16f8] sm:$0xff] }
 0x731   : > { %v5830_v28 = vpop.f32.mrf.mxu1  ;;  %6124 = vmatprep.subr.bf16.mxu1 %v2845_v42  ;;  %v8687_v6 = vadd.f32 %v5828_v63, %v5788_v21  ;;  %v5790_v49 = vadd.f32 %v5789_v51, %v8650_v15  ;;  %6113 = vmatprep.mubr.bf16.mxu0 %v8994_v16  ;;  %v2773_v15 = vunpack.c.l.s8.bf16 %v1037_v50  ;;  %v1089_v57 = vld [vmem:[%s7175_s16 + $0x17f8] sm:$0xff]  ;;  %v2756_v42 = vunpack.c.l.s8.bf16 %v1028_v54  ;;  %v1056_v63 = vld [vmem:[%s7175_s16 + $0x16f0] sm:$0xff] }
 0x732   : > { %6154 = vmatprep.mubr.bf16.mxu1 %v8995_v27  ;;  %v5791_v62 = vpop.f32.mrf.mxu0  ;;  %v2820_v50 = vunpack.c.l.s8.bf16 %v1060_v37  ;;  %v2817_v35 = vunpack.c.h.s8.bf16 %v1057_v26  ;;  %v2881_v2 = vunpack.c.h.s8.bf16 %v1089_v57  ;;  %v2816_v13 = vunpack.c.h.s8.bf16 %v1056_v63  ;;  %v1053_v51 = vld [vmem:[%s7175_s16 + $0x16d8] sm:$0xff]  ;;  %v1084_v16 = vld [vmem:[%s7175_s16 + $0x17d0] sm:$0xff] }
 0x733   : > { %v5832_v56 = vpop.f32.mrf.mxu1  ;;  %v8692_v32 = vadd.f32 %v5830_v28, %v5790_v49  ;;  %6084 = vmatpush1.bf16.msra.mxu0 %v2780_v22  ;;  %v2880_v21 = vunpack.c.h.s8.bf16 %v1088_v12  ;;  %v2813_v22 = vunpack.c.l.s8.bf16 %v1057_v26  ;;  %v1085_v28 = vld [vmem:[%s7175_s16 + $0x17d8] sm:$0xff]  ;;  %v2809_v61 = vunpack.c.h.s8.bf16 %v1053_v51  ;;  %v1052_v49 = vld [vmem:[%s7175_s16 + $0x16d0] sm:$0xff] }
 0x734   : > { %6125 = vmatpush1.bf16.msra.mxu1 %v2844_v31  ;;  %v5792_v8 = vpop.f32.mrf.mxu0  ;;  %6085 = vmatprep.subr.bf16.mxu0 %v2777_v43  ;;  %v2877_v31 = vunpack.c.l.s8.bf16 %v1089_v57  ;;  %v2812_v43 = vunpack.c.l.s8.bf16 %v1056_v63  ;;  %v2873_v53 = vunpack.c.h.s8.bf16 %v1085_v28  ;;  %v2808_v27 = vunpack.c.h.s8.bf16 %v1052_v49  ;;  %v1105_v37 = vld [vmem:[%s7175_s16 + $0x1878] sm:$0xff]  ;;  %v1104_v57 = vld [vmem:[%s7175_s16 + $0x1870] sm:$0xff] }
 0x735   : > { %v5833_v19 = vpop.f32.mrf.mxu1  ;;  %6126 = vmatprep.subr.bf16.mxu1 %v2841_v52  ;;  %v2876_v52 = vunpack.c.l.s8.bf16 %v1088_v12  ;;  %v2872_v62 = vunpack.c.h.s8.bf16 %v1084_v16  ;;  %v2805_v56 = vunpack.c.l.s8.bf16 %v1053_v51  ;;  %v1081_v8 = vld [vmem:[%s7175_s16 + $0x17b8] sm:$0xff] }
 0x736   : > { %v2804_v19 = vunpack.c.l.s8.bf16 %v1052_v49  ;;  %v2865_v4 = vunpack.c.h.s8.bf16 %v1081_v8  ;;  %v2861_v45 = vunpack.c.l.s8.bf16 %v1081_v8  ;;  %v1101_v12 = vld [vmem:[%s7175_s16 + $0x1858] sm:$0xff] }
 0x737   : > { %6086 = vmatpush1.bf16.msra.mxu0 %v2776_v3  ;;  %v2869_v3 = vunpack.c.l.s8.bf16 %v1085_v28  ;;  %v8997_v51 = vld [vmem:[#allocation28_spill] sm:$0xff]  ;;  %v2905_v49 = vunpack.c.h.s8.bf16 %v1101_v12 }
 0x738   : > { %6127 = vmatpush1.bf16.msra.mxu1 %v2840_v34  ;;  %6087 = vmatprep.subr.bf16.mxu0 %v2773_v15  ;;  %v1049_v34 = vld [vmem:[%s7175_s16 + $0x16b8] sm:$0xff]  ;;  %v2868_v15 = vunpack.c.l.s8.bf16 %v1084_v16 }
 0x739   : > { %6128 = vmatprep.subr.bf16.mxu1 %v2837_v10  ;;  %v2801_v10 = vunpack.c.h.s8.bf16 %v1049_v34 }
 0x73b   : > { %6088 = vmatpush1.bf16.msra.mxu0 %v2772_v41  ;;  %v1080_v41 = vld [vmem:[%s7175_s16 + $0x17b0] sm:$0xff] }
 0x73c   : > { %6129 = vmatpush1.bf16.msra.mxu1 %v2836_v18  ;;  %6089 = vmatprep.subr.bf16.mxu0 %v2769_v30  ;;  %v2800_v18 = vunpack.c.h.s8.bf16 %v1048_v58  ;;  %v2864_v30 = vunpack.c.h.s8.bf16 %v1080_v41 }
 0x73d   : > { %6130 = vmatprep.subr.bf16.mxu1 %v2833_v40  ;;  %v2797_v40 = vunpack.c.l.s8.bf16 %v1049_v34  ;;  %v8998_v34 = vld [vmem:[#allocation27_spill] sm:$0xff] }
 0x73f   : > { %6090 = vmatpush1.bf16.msra.mxu0 %v2768_v48  ;;  %v1077_v48 = vld [vmem:[%s7175_s16 + $0x1798] sm:$0xff] }
 0x740   : > { %6131 = vmatpush1.bf16.msra.mxu1 %v2832_v59  ;;  %6091 = vmatprep.subr.bf16.mxu0 %v2765_v25  ;;  %v2796_v59 = vunpack.c.l.s8.bf16 %v1048_v58  ;;  %v2860_v25 = vunpack.c.l.s8.bf16 %v1080_v41  ;;  %v2857_v29 = vunpack.c.h.s8.bf16 %v1077_v48  ;;  %v2853_v54 = vunpack.c.l.s8.bf16 %v1077_v48 }
 0x741   : > { %6132 = vmatprep.subr.bf16.mxu1 %v2829_v20  ;;  %v2793_v20 = vunpack.c.h.s8.bf16 %v1045_v23 }
 0x743   : > { %6092 = vmatpush1.bf16.msra.mxu0 %v2764_v46  ;;  %v1076_v46 = vld [vmem:[%s7175_s16 + $0x1790] sm:$0xff] }
 0x744   : > { %6133 = vmatpush1.bf16.msra.mxu1 %v2828_v5  ;;  %6093 = vmatprep.subr.bf16.mxu0 %v2761_v44  ;;  %v2792_v5 = vunpack.c.h.s8.bf16 %v1044_v39  ;;  %v2856_v44 = vunpack.c.h.s8.bf16 %v1076_v46 }
 0x745   : > { %6134 = vmatprep.subr.bf16.mxu1 %v2825_v11  ;;  %v2789_v11 = vunpack.c.l.s8.bf16 %v1045_v23 }
 0x747   : > { %6094 = vmatpush1.bf16.msra.mxu0 %v2760_v33  ;;  %v1137_v33 = vld [vmem:[%s7175_s16 + $0x1978] sm:$0xff] }
 0x748   : > { %6135 = vmatpush1.bf16.msra.mxu1 %v2824_v47  ;;  %6095 = vmatprep.subr.bf16.mxu0 %v2757_v0  ;;  %v2788_v47 = vunpack.c.l.s8.bf16 %v1044_v39  ;;  %v2852_v0 = vunpack.c.l.s8.bf16 %v1076_v46  ;;  %v2977_v26 = vunpack.c.h.s8.bf16 %v1137_v33  ;;  %v2973_v63 = vunpack.c.l.s8.bf16 %v1137_v33 }
 0x749   : > { %6136 = vmatprep.subr.bf16.mxu1 %v2821_v1  ;;  %v2913_v1 = vunpack.c.h.s8.bf16 %v1105_v37 }
 0x74b   : > { %6096 = vmatpush1.bf16.msra.mxu0 %v2756_v42  ;;  %v1136_v42 = vld [vmem:[%s7175_s16 + $0x1970] sm:$0xff] }
 0x74c   : > { %6137 = vmatpush1.bf16.msra.mxu1 %v2820_v50  ;;  %6097 = vmatprep.subr.bf16.mxu0 %v2817_v35  ;;  %v2912_v50 = vunpack.c.h.s8.bf16 %v1104_v57  ;;  %v2976_v35 = vunpack.c.h.s8.bf16 %v1136_v42 }
 0x74d   : > { %6138 = vmatprep.subr.bf16.mxu1 %v2881_v2  ;;  %v2909_v2 = vunpack.c.l.s8.bf16 %v1105_v37 }
 0x74f   : > { %6098 = vmatpush2.bf16.msra.mxu0 %v2816_v13  ;;  %v1133_v13 = vld [vmem:[%s7175_s16 + $0x1958] sm:$0xff] }
 0x750   : > { %6139 = vmatpush2.bf16.msra.mxu1 %v2880_v21  ;;  %6099 = vmatprep.subr.bf16.mxu0 %v2813_v22  ;;  %v2969_v16 = vunpack.c.h.s8.bf16 %v1133_v13 }
 0x751   : > { %6140 = vmatprep.subr.bf16.mxu1 %v2877_v31  ;;  %v8996_v31 = vld [vmem:[#allocation26_spill] sm:$0xff] }
 0x753   : > { %6100 = vmatpush2.bf16.msra.mxu0 %v2812_v43  ;;  %v2908_v43 = vunpack.c.l.s8.bf16 %v1104_v57 }
 0x754   : > { %6141 = vmatpush2.bf16.msra.mxu1 %v2876_v52  ;;  %6101 = vmatprep.subr.bf16.mxu0 %v2809_v61  ;;  %v2972_v52 = vunpack.c.l.s8.bf16 %v1136_v42 }
 0x755   : > { %6142 = vmatprep.subr.bf16.mxu1 %v2873_v53 }
 0x757   : > { %6102 = vmatpush2.bf16.msra.mxu0 %v2808_v27  ;;  %v1100_v27 = vld [vmem:[%s7175_s16 + $0x1850] sm:$0xff] }
 0x758   : > { %6143 = vmatpush2.bf16.msra.mxu1 %v2872_v62  ;;  %6103 = vmatprep.subr.bf16.mxu0 %v2805_v56  ;;  %v1132_v62 = vld [vmem:[%s7175_s16 + $0x1950] sm:$0xff] }
 0x759   : > { %6144 = vmatprep.subr.bf16.mxu1 %v2869_v3  ;;  %v2964_v23 = vunpack.c.l.s8.bf16 %v1132_v62 }
 0x75b   : > { %6104 = vmatpush2.bf16.msra.mxu0 %v2804_v19 }
 0x75c   : > { %6145 = vmatpush2.bf16.msra.mxu1 %v2868_v15  ;;  %6105 = vmatprep.subr.bf16.mxu0 %v2801_v10  ;;  %v2904_v10 = vunpack.c.h.s8.bf16 %v1100_v27 }
 0x75d   : > { %6146 = vmatprep.subr.bf16.mxu1 %v2865_v4  ;;  %v2968_v4 = vunpack.c.h.s8.bf16 %v1132_v62 }
 0x75f   : > { %6106 = vmatpush2.bf16.msra.mxu0 %v2800_v18  ;;  %v2965_v18 = vunpack.c.l.s8.bf16 %v1133_v13 }
 0x760   : > { %6147 = vmatpush2.bf16.msra.mxu1 %v2864_v30  ;;  %6107 = vmatprep.subr.bf16.mxu0 %v2797_v40  ;;  %v1097_v30 = vld [vmem:[%s7175_s16 + $0x1838] sm:$0xff] }
 0x761   : > { %6148 = vmatprep.subr.bf16.mxu1 %v2861_v45  ;;  %v1129_v40 = vld [vmem:[%s7175_s16 + $0x1938] sm:$0xff]  ;;  %v2900_v45 = vunpack.c.l.s8.bf16 %v1100_v27  ;;  %v2897_v48 = vunpack.c.h.s8.bf16 %v1097_v30  ;;  %v2893_v46 = vunpack.c.l.s8.bf16 %v1097_v30 }
 0x763   : > { %6108 = vmatpush2.bf16.msra.mxu0 %v2796_v59  ;;  %v2961_v59 = vunpack.c.h.s8.bf16 %v1129_v40 }
 0x764   : > { %6149 = vmatpush2.bf16.msra.mxu1 %v2860_v25  ;;  %6109 = vmatprep.subr.bf16.mxu0 %v2793_v20  ;;  %v1096_v25 = vld [vmem:[%s7175_s16 + $0x1830] sm:$0xff] }
 0x765   : > { %6150 = vmatprep.subr.bf16.mxu1 %v2857_v29  ;;  %v1128_v20 = vld [vmem:[%s7175_s16 + $0x1930] sm:$0xff]  ;;  %v2896_v29 = vunpack.c.h.s8.bf16 %v1096_v25 }
 0x766   : > { %v2960_v39 = vunpack.c.h.s8.bf16 %v1128_v20  ;;  %v2956_v37 = vunpack.c.l.s8.bf16 %v1128_v20  ;;  %v1109_v20 = vld [vmem:[%s7175_s16 + $0x1898] sm:$0xff] }
 0x767   : > { %6110 = vmatpush2.bf16.msra.mxu0 %v2792_v5  ;;  %v2957_v5 = vunpack.c.l.s8.bf16 %v1129_v40  ;;  %v1112_v40 = vld [vmem:[%s7175_s16 + $0x18b0] sm:$0xff] }
 0x768   : > { %6151 = vmatpush2.bf16.msra.mxu1 %v2856_v44  ;;  %6111 = vmatprep.subr.bf16.mxu0 %v2789_v11  ;;  %v1093_v44 = vld [vmem:[%s7175_s16 + $0x1818] sm:$0xff] }
 0x769   : > { %6152 = vmatprep.subr.bf16.mxu1 %v2853_v54  ;;  %v1125_v11 = vld [vmem:[%s7175_s16 + $0x1918] sm:$0xff]  ;;  %v2892_v54 = vunpack.c.l.s8.bf16 %v1096_v25  ;;  %v2889_v33 = vunpack.c.h.s8.bf16 %v1093_v44  ;;  %v2885_v42 = vunpack.c.l.s8.bf16 %v1093_v44 }
 0x76b   : > { %6112 = vmatpush2.bf16.msra.mxu0 %v2788_v47  ;;  %v2953_v47 = vunpack.c.h.s8.bf16 %v1125_v11 }
 0x76c   : > { %6153 = vmatpush2.bf16.msra.mxu1 %v2852_v0  ;;  %6163 = vmatprep.subr.bf16.mxu0 %v2913_v1  ;;  %v1092_v0 = vld [vmem:[%s7175_s16 + $0x1810] sm:$0xff] }
 0x76d   : > { %6204 = vmatprep.subr.bf16.mxu1 %v2977_v26  ;;  %v1124_v1 = vld [vmem:[%s7175_s16 + $0x1910] sm:$0xff]  ;;  %v2888_v26 = vunpack.c.h.s8.bf16 %v1092_v0 }
 0x76e   : > { %v5869_v21 = vpop.f32.mrf.mxu0  ;;  %6114 = vmatmul.mubr.bf16.vlgmr.msra.gmra.mxu0 %v8996_v31  ;;  %v2952_v57 = vunpack.c.h.s8.bf16 %v1124_v1  ;;  %v1152_v31 = vld [vmem:[%s7175_s16 + $0x19f0] sm:$0xff] }
 0x76f   : > { %v5910_v22 = vpop.f32.mrf.mxu1  ;;  %6155 = vmatmul.mubr.bf16.vlgmr.msra.gmra.mxu1 %v8997_v51  ;;  %v5870_v28 = vadd.f32 %v5869_v21, %v8687_v6  ;;  %6164 = vmatpush1.bf16.msra.mxu0 %v2912_v50  ;;  %v8999_v6 = vld [vmem:[#allocation29_spill] sm:$0xff]  ;;  %v2949_v50 = vunpack.c.l.s8.bf16 %v1125_v11  ;;  %v1108_v11 = vld [vmem:[%s7175_s16 + $0x1890] sm:$0xff] }
 0x770   : > { %6205 = vmatpush1.bf16.msra.mxu1 %v2976_v35  ;;  %v5871_v61 = vpop.f32.mrf.mxu0  ;;  %6165 = vmatprep.subr.bf16.mxu0 %v2909_v2  ;;  %v1121_v35 = vld [vmem:[%s7175_s16 + $0x18f8] sm:$0xff] }
 0x771   : > { %v5912_v53 = vpop.f32.mrf.mxu1  ;;  %6206 = vmatprep.subr.bf16.mxu1 %v2973_v63  ;;  %v8729_v56 = vadd.f32 %v5910_v22, %v5870_v28  ;;  %v5872_v3 = vadd.f32 %v5871_v61, %v8692_v32  ;;  %6195 = vmatprep.mubr.bf16.mxu0 %v8998_v34  ;;  %v2901_v32 = vunpack.c.l.s8.bf16 %v1101_v12  ;;  %v1153_v2 = vld [vmem:[%s7175_s16 + $0x19f8] sm:$0xff]  ;;  %v2884_v63 = vunpack.c.l.s8.bf16 %v1092_v0  ;;  %v1120_v22 = vld [vmem:[%s7175_s16 + $0x18f0] sm:$0xff] }
 0x772   : > { %6236 = vmatprep.mubr.bf16.mxu1 %v8999_v6  ;;  %v5873_v8 = vpop.f32.mrf.mxu0  ;;  %v2948_v12 = vunpack.c.l.s8.bf16 %v1124_v1  ;;  %v2945_v13 = vunpack.c.h.s8.bf16 %v1121_v35  ;;  %v3009_v21 = vunpack.c.h.s8.bf16 %v1153_v2  ;;  %v2944_v51 = vunpack.c.h.s8.bf16 %v1120_v22  ;;  %v1117_v61 = vld [vmem:[%s7175_s16 + $0x18d8] sm:$0xff]  ;;  %v1148_v34 = vld [vmem:[%s7175_s16 + $0x19d0] sm:$0xff] }
 0x773   : > { %v5914_v19 = vpop.f32.mrf.mxu1  ;;  %v8734_v15 = vadd.f32 %v5912_v53, %v5872_v3  ;;  %6166 = vmatpush1.bf16.msra.mxu0 %v2908_v43  ;;  %v3008_v28 = vunpack.c.h.s8.bf16 %v1152_v31  ;;  %v2941_v43 = vunpack.c.l.s8.bf16 %v1121_v35  ;;  %v1149_v53 = vld [vmem:[%s7175_s16 + $0x19d8] sm:$0xff]  ;;  %v2937_v27 = vunpack.c.h.s8.bf16 %v1117_v61  ;;  %v1116_v3 = vld [vmem:[%s7175_s16 + $0x18d0] sm:$0xff] }
 0x774   : > { %6207 = vmatpush1.bf16.msra.mxu1 %v2972_v52  ;;  %v5874_v58 = vpop.f32.mrf.mxu0  ;;  %6167 = vmatprep.subr.bf16.mxu0 %v2905_v49  ;;  %v3005_v52 = vunpack.c.l.s8.bf16 %v1153_v2  ;;  %v2940_v49 = vunpack.c.l.s8.bf16 %v1120_v22  ;;  %v3001_v62 = vunpack.c.h.s8.bf16 %v1149_v53  ;;  %v2936_v6 = vunpack.c.h.s8.bf16 %v1116_v3  ;;  %v1169_v1 = vld [vmem:[%s7175_s16 + $0x1a78] sm:$0xff]  ;;  %v1168_v2 = vld [vmem:[%s7175_s16 + $0x1a70] sm:$0xff] }
 0x775   : > { %v5915_v41 = vpop.f32.mrf.mxu1  ;;  %6208 = vmatprep.subr.bf16.mxu1 %v2969_v16  ;;  %v3004_v16 = vunpack.c.l.s8.bf16 %v1152_v31  ;;  %v3000_v8 = vunpack.c.h.s8.bf16 %v1148_v34  ;;  %v2933_v19 = vunpack.c.l.s8.bf16 %v1117_v61  ;;  %v1145_v58 = vld [vmem:[%s7175_s16 + $0x19b8] sm:$0xff] }
 0x776   : > { %v2932_v41 = vunpack.c.l.s8.bf16 %v1116_v3  ;;  %v2993_v30 = vunpack.c.h.s8.bf16 %v1145_v58  ;;  %v2989_v25 = vunpack.c.l.s8.bf16 %v1145_v58  ;;  %v1165_v31 = vld [vmem:[%s7175_s16 + $0x1a58] sm:$0xff] }
 0x777   : > { %6168 = vmatpush1.bf16.msra.mxu0 %v2904_v10  ;;  %v2997_v10 = vunpack.c.l.s8.bf16 %v1149_v53  ;;  %v9001_v61 = vld [vmem:[#allocation32_spill] sm:$0xff]  ;;  %v3033_v3 = vunpack.c.h.s8.bf16 %v1165_v31 }
 0x778   : > { %6209 = vmatpush1.bf16.msra.mxu1 %v2968_v4  ;;  %6169 = vmatprep.subr.bf16.mxu0 %v2901_v32  ;;  %v1113_v4 = vld [vmem:[%s7175_s16 + $0x18b8] sm:$0xff]  ;;  %v2996_v32 = vunpack.c.l.s8.bf16 %v1148_v34 }
 0x779   : > { %6210 = vmatprep.subr.bf16.mxu1 %v2965_v18  ;;  %v2929_v18 = vunpack.c.h.s8.bf16 %v1113_v4 }
 0x77b   : > { %6170 = vmatpush1.bf16.msra.mxu0 %v2900_v45  ;;  %v1144_v45 = vld [vmem:[%s7175_s16 + $0x19b0] sm:$0xff] }
 0x77c   : > { %6211 = vmatpush1.bf16.msra.mxu1 %v2964_v23  ;;  %6171 = vmatprep.subr.bf16.mxu0 %v2897_v48  ;;  %v2928_v23 = vunpack.c.h.s8.bf16 %v1112_v40  ;;  %v2992_v48 = vunpack.c.h.s8.bf16 %v1144_v45 }
 0x77d   : > { %6212 = vmatprep.subr.bf16.mxu1 %v2961_v59  ;;  %v2925_v59 = vunpack.c.l.s8.bf16 %v1113_v4  ;;  %v9002_v4 = vld [vmem:[#allocation31_spill] sm:$0xff] }
 0x77f   : > { %6172 = vmatpush1.bf16.msra.mxu0 %v2896_v29  ;;  %v1141_v29 = vld [vmem:[%s7175_s16 + $0x1998] sm:$0xff] }
 0x780   : > { %6213 = vmatpush1.bf16.msra.mxu1 %v2960_v39  ;;  %6173 = vmatprep.subr.bf16.mxu0 %v2893_v46  ;;  %v2924_v39 = vunpack.c.l.s8.bf16 %v1112_v40  ;;  %v2988_v46 = vunpack.c.l.s8.bf16 %v1144_v45  ;;  %v2985_v44 = vunpack.c.h.s8.bf16 %v1141_v29  ;;  %v2981_v0 = vunpack.c.l.s8.bf16 %v1141_v29 }
 0x781   : > { %6214 = vmatprep.subr.bf16.mxu1 %v2957_v5  ;;  %v2921_v5 = vunpack.c.h.s8.bf16 %v1109_v20 }
 0x783   : > { %6174 = vmatpush1.bf16.msra.mxu0 %v2892_v54  ;;  %v1140_v54 = vld [vmem:[%s7175_s16 + $0x1990] sm:$0xff] }
 0x784   : > { %6215 = vmatpush1.bf16.msra.mxu1 %v2956_v37  ;;  %6175 = vmatprep.subr.bf16.mxu0 %v2889_v33  ;;  %v2920_v37 = vunpack.c.h.s8.bf16 %v1108_v11  ;;  %v2984_v33 = vunpack.c.h.s8.bf16 %v1140_v54 }
 0x785   : > { %6216 = vmatprep.subr.bf16.mxu1 %v2953_v47  ;;  %v2917_v47 = vunpack.c.l.s8.bf16 %v1109_v20 }
 0x787   : > { %6176 = vmatpush1.bf16.msra.mxu0 %v2888_v26  ;;  %v1201_v26 = vld [vmem:[%s7175_s16 + $0x1b78] sm:$0xff] }
 0x788   : > { %6217 = vmatpush1.bf16.msra.mxu1 %v2952_v57  ;;  %6177 = vmatprep.subr.bf16.mxu0 %v2885_v42  ;;  %v2916_v57 = vunpack.c.l.s8.bf16 %v1108_v11  ;;  %v2980_v42 = vunpack.c.l.s8.bf16 %v1140_v54  ;;  %v3105_v35 = vunpack.c.h.s8.bf16 %v1201_v26  ;;  %v3101_v22 = vunpack.c.l.s8.bf16 %v1201_v26 }
 0x789   : > { %6218 = vmatprep.subr.bf16.mxu1 %v2949_v50  ;;  %v3041_v50 = vunpack.c.h.s8.bf16 %v1169_v1 }
 0x78b   : > { %6178 = vmatpush1.bf16.msra.mxu0 %v2884_v63  ;;  %v1200_v63 = vld [vmem:[%s7175_s16 + $0x1b70] sm:$0xff] }
 0x78c   : > { %6219 = vmatpush1.bf16.msra.mxu1 %v2948_v12  ;;  %6179 = vmatprep.subr.bf16.mxu0 %v2945_v13  ;;  %v3040_v12 = vunpack.c.h.s8.bf16 %v1168_v2  ;;  %v3104_v13 = vunpack.c.h.s8.bf16 %v1200_v63 }
 0x78d   : > { %6220 = vmatprep.subr.bf16.mxu1 %v3009_v21  ;;  %v3037_v21 = vunpack.c.l.s8.bf16 %v1169_v1 }
 0x78f   : > { %6180 = vmatpush2.bf16.msra.mxu0 %v2944_v51  ;;  %v1197_v51 = vld [vmem:[%s7175_s16 + $0x1b58] sm:$0xff] }
 0x790   : > { %6221 = vmatpush2.bf16.msra.mxu1 %v3008_v28  ;;  %6181 = vmatprep.subr.bf16.mxu0 %v2941_v43  ;;  %v3097_v34 = vunpack.c.h.s8.bf16 %v1197_v51 }
 0x791   : > { %6222 = vmatprep.subr.bf16.mxu1 %v3005_v52  ;;  %v9000_v52 = vld [vmem:[#allocation30_spill] sm:$0xff] }
 0x793   : > { %6182 = vmatpush2.bf16.msra.mxu0 %v2940_v49  ;;  %v3036_v49 = vunpack.c.l.s8.bf16 %v1168_v2 }
 0x794   : > { %6223 = vmatpush2.bf16.msra.mxu1 %v3004_v16  ;;  %6183 = vmatprep.subr.bf16.mxu0 %v2937_v27  ;;  %v3100_v16 = vunpack.c.l.s8.bf16 %v1200_v63 }
 0x795   : > { %6224 = vmatprep.subr.bf16.mxu1 %v3001_v62 }
 0x797   : > { %6184 = vmatpush2.bf16.msra.mxu0 %v2936_v6  ;;  %v1164_v6 = vld [vmem:[%s7175_s16 + $0x1a50] sm:$0xff] }
 0x798   : > { %6225 = vmatpush2.bf16.msra.mxu1 %v3000_v8  ;;  %6185 = vmatprep.subr.bf16.mxu0 %v2933_v19  ;;  %v1196_v8 = vld [vmem:[%s7175_s16 + $0x1b50] sm:$0xff] }
 0x799   : > { %6226 = vmatprep.subr.bf16.mxu1 %v2997_v10  ;;  %v3092_v20 = vunpack.c.l.s8.bf16 %v1196_v8 }
 0x79b   : > { %6186 = vmatpush2.bf16.msra.mxu0 %v2932_v41 }
 0x79c   : > { %6227 = vmatpush2.bf16.msra.mxu1 %v2996_v32  ;;  %6187 = vmatprep.subr.bf16.mxu0 %v2929_v18  ;;  %v3032_v18 = vunpack.c.h.s8.bf16 %v1164_v6 }
 0x79d   : > { %6228 = vmatprep.subr.bf16.mxu1 %v2993_v30  ;;  %v3096_v30 = vunpack.c.h.s8.bf16 %v1196_v8 }
 0x79f   : > { %6188 = vmatpush2.bf16.msra.mxu0 %v2928_v23  ;;  %v3093_v23 = vunpack.c.l.s8.bf16 %v1197_v51 }
 0x7a0   : > { %6229 = vmatpush2.bf16.msra.mxu1 %v2992_v48  ;;  %6189 = vmatprep.subr.bf16.mxu0 %v2925_v59  ;;  %v1161_v48 = vld [vmem:[%s7175_s16 + $0x1a38] sm:$0xff] }
 0x7a1   : > { %6230 = vmatprep.subr.bf16.mxu1 %v2989_v25  ;;  %v1193_v59 = vld [vmem:[%s7175_s16 + $0x1b38] sm:$0xff]  ;;  %v3028_v25 = vunpack.c.l.s8.bf16 %v1164_v6  ;;  %v3025_v29 = vunpack.c.h.s8.bf16 %v1161_v48  ;;  %v3021_v54 = vunpack.c.l.s8.bf16 %v1161_v48 }
 0x7a3   : > { %6190 = vmatpush2.bf16.msra.mxu0 %v2924_v39  ;;  %v3089_v39 = vunpack.c.h.s8.bf16 %v1193_v59 }
 0x7a4   : > { %6231 = vmatpush2.bf16.msra.mxu1 %v2988_v46  ;;  %6191 = vmatprep.subr.bf16.mxu0 %v2921_v5  ;;  %v1160_v46 = vld [vmem:[%s7175_s16 + $0x1a30] sm:$0xff] }
 0x7a5   : > { %6232 = vmatprep.subr.bf16.mxu1 %v2985_v44  ;;  %v1192_v5 = vld [vmem:[%s7175_s16 + $0x1b30] sm:$0xff]  ;;  %v3024_v44 = vunpack.c.h.s8.bf16 %v1160_v46 }
 0x7a6   : > { %v3088_v11 = vunpack.c.h.s8.bf16 %v1192_v5  ;;  %v3084_v1 = vunpack.c.l.s8.bf16 %v1192_v5  ;;  %v1173_v5 = vld [vmem:[%s7175_s16 + $0x1a98] sm:$0xff] }
 0x7a7   : > { %6192 = vmatpush2.bf16.msra.mxu0 %v2920_v37  ;;  %v3085_v37 = vunpack.c.l.s8.bf16 %v1193_v59  ;;  %v1176_v59 = vld [vmem:[%s7175_s16 + $0x1ab0] sm:$0xff] }
 0x7a8   : > { %6233 = vmatpush2.bf16.msra.mxu1 %v2984_v33  ;;  %6193 = vmatprep.subr.bf16.mxu0 %v2917_v47  ;;  %v1157_v33 = vld [vmem:[%s7175_s16 + $0x1a18] sm:$0xff] }
 0x7a9   : > { %6234 = vmatprep.subr.bf16.mxu1 %v2981_v0  ;;  %v1189_v47 = vld [vmem:[%s7175_s16 + $0x1b18] sm:$0xff]  ;;  %v3020_v0 = vunpack.c.l.s8.bf16 %v1160_v46  ;;  %v3017_v26 = vunpack.c.h.s8.bf16 %v1157_v33  ;;  %v3013_v63 = vunpack.c.l.s8.bf16 %v1157_v33 }
 0x7ab   : > { %6194 = vmatpush2.bf16.msra.mxu0 %v2916_v57  ;;  %v3081_v57 = vunpack.c.h.s8.bf16 %v1189_v47 }
 0x7ac   : > { %6235 = vmatpush2.bf16.msra.mxu1 %v2980_v42  ;;  %6245 = vmatprep.subr.bf16.mxu0 %v3041_v50  ;;  %v1156_v42 = vld [vmem:[%s7175_s16 + $0x1a10] sm:$0xff] }
 0x7ad   : > { %6286 = vmatprep.subr.bf16.mxu1 %v3105_v35  ;;  %v1188_v50 = vld [vmem:[%s7175_s16 + $0x1b10] sm:$0xff]  ;;  %v3016_v35 = vunpack.c.h.s8.bf16 %v1156_v42 }
 0x7ae   : > { %v5951_v28 = vpop.f32.mrf.mxu0  ;;  %6196 = vmatmul.mubr.bf16.vlgmr.msra.gmra.mxu0 %v9000_v52  ;;  %v3080_v2 = vunpack.c.h.s8.bf16 %v1188_v50  ;;  %v1216_v52 = vld [vmem:[%s7175_s16 + $0x1bf0] sm:$0xff] }
 0x7af   : > { %v5992_v43 = vpop.f32.mrf.mxu1  ;;  %6237 = vmatmul.mubr.bf16.vlgmr.msra.gmra.mxu1 %v9001_v61  ;;  %v5952_v53 = vadd.f32 %v5951_v28, %v8729_v56  ;;  %6246 = vmatpush1.bf16.msra.mxu0 %v3040_v12  ;;  %v9003_v56 = vld [vmem:[#allocation33_spill] sm:$0xff]  ;;  %v3077_v12 = vunpack.c.l.s8.bf16 %v1189_v47  ;;  %v1172_v47 = vld [vmem:[%s7175_s16 + $0x1a90] sm:$0xff] }
 0x7b0   : > { %6287 = vmatpush1.bf16.msra.mxu1 %v3104_v13  ;;  %v5953_v27 = vpop.f32.mrf.mxu0  ;;  %6247 = vmatprep.subr.bf16.mxu0 %v3037_v21  ;;  %v1185_v13 = vld [vmem:[%s7175_s16 + $0x1af8] sm:$0xff] }
 0x7b1   : > { %v5994_v62 = vpop.f32.mrf.mxu1  ;;  %6288 = vmatprep.subr.bf16.mxu1 %v3101_v22  ;;  %v8771_v19 = vadd.f32 %v5992_v43, %v5952_v53  ;;  %v5954_v10 = vadd.f32 %v5953_v27, %v8734_v15  ;;  %6277 = vmatprep.mubr.bf16.mxu0 %v9002_v4  ;;  %v3029_v15 = vunpack.c.l.s8.bf16 %v1165_v31  ;;  %v1217_v21 = vld [vmem:[%s7175_s16 + $0x1bf8] sm:$0xff]  ;;  %v3012_v22 = vunpack.c.l.s8.bf16 %v1156_v42  ;;  %v1184_v43 = vld [vmem:[%s7175_s16 + $0x1af0] sm:$0xff] }
 0x7b2   : > { %6318 = vmatprep.mubr.bf16.mxu1 %v9003_v56  ;;  %v5955_v58 = vpop.f32.mrf.mxu0  ;;  %v3076_v31 = vunpack.c.l.s8.bf16 %v1188_v50  ;;  %v3073_v51 = vunpack.c.h.s8.bf16 %v1185_v13  ;;  %v3137_v28 = vunpack.c.h.s8.bf16 %v1217_v21  ;;  %v3072_v61 = vunpack.c.h.s8.bf16 %v1184_v43  ;;  %v1181_v27 = vld [vmem:[%s7175_s16 + $0x1ad8] sm:$0xff]  ;;  %v1212_v4 = vld [vmem:[%s7175_s16 + $0x1bd0] sm:$0xff] }
 0x7b3   : > { %v5996_v41 = vpop.f32.mrf.mxu1  ;;  %v8776_v32 = vadd.f32 %v5994_v62, %v5954_v10  ;;  %6248 = vmatpush1.bf16.msra.mxu0 %v3036_v49  ;;  %v3136_v53 = vunpack.c.h.s8.bf16 %v1216_v52  ;;  %v3069_v49 = vunpack.c.l.s8.bf16 %v1185_v13  ;;  %v1213_v62 = vld [vmem:[%s7175_s16 + $0x1bd8] sm:$0xff]  ;;  %v3065_v6 = vunpack.c.h.s8.bf16 %v1181_v27  ;;  %v1180_v10 = vld [vmem:[%s7175_s16 + $0x1ad0] sm:$0xff] }
 0x7b4   : > { %6289 = vmatpush1.bf16.msra.mxu1 %v3100_v16  ;;  %v5956_v40 = vpop.f32.mrf.mxu0  ;;  %6249 = vmatprep.subr.bf16.mxu0 %v3033_v3  ;;  %v3133_v16 = vunpack.c.l.s8.bf16 %v1217_v21  ;;  %v3068_v3 = vunpack.c.l.s8.bf16 %v1184_v43  ;;  %v3129_v8 = vunpack.c.h.s8.bf16 %v1213_v62  ;;  %v3064_v56 = vunpack.c.h.s8.bf16 %v1180_v10  ;;  %v1233_v50 = vld [vmem:[%s7175_s16 + $0x1c78] sm:$0xff]  ;;  %v1232_v21 = vld [vmem:[%s7175_s16 + $0x1c70] sm:$0xff] }
 0x7b5   : > { %v5997_v45 = vpop.f32.mrf.mxu1  ;;  %6290 = vmatprep.subr.bf16.mxu1 %v3097_v34  ;;  %v3132_v34 = vunpack.c.l.s8.bf16 %v1216_v52  ;;  %v3128_v58 = vunpack.c.h.s8.bf16 %v1212_v4  ;;  %v3061_v41 = vunpack.c.l.s8.bf16 %v1181_v27  ;;  %v1209_v40 = vld [vmem:[%s7175_s16 + $0x1bb8] sm:$0xff] }
 0x7b6   : > { %v3060_v45 = vunpack.c.l.s8.bf16 %v1180_v10  ;;  %v3121_v48 = vunpack.c.h.s8.bf16 %v1209_v40  ;;  %v3117_v46 = vunpack.c.l.s8.bf16 %v1209_v40  ;;  %v1229_v52 = vld [vmem:[%s7175_s16 + $0x1c58] sm:$0xff] }
 0x7b7   : > { %6250 = vmatpush1.bf16.msra.mxu0 %v3032_v18  ;;  %v3125_v18 = vunpack.c.l.s8.bf16 %v1213_v62  ;;  %v3164_v62 = vunpack.c.l.s8.bf16 %v1232_v21 }
 0x7b8   : > { %6291 = vmatpush1.bf16.msra.mxu1 %v3096_v30  ;;  %6251 = vmatprep.subr.bf16.mxu0 %v3029_v15  ;;  %v1177_v30 = vld [vmem:[%s7175_s16 + $0x1ab8] sm:$0xff]  ;;  %v3124_v15 = vunpack.c.l.s8.bf16 %v1212_v4  ;;  %v1228_v4 = vld [vmem:[%s7175_s16 + $0x1c50] sm:$0xff] }
 0x7b9   : > { %6292 = vmatprep.subr.bf16.mxu1 %v3093_v23  ;;  %v3057_v23 = vunpack.c.h.s8.bf16 %v1177_v30 }
 0x7bb   : > { %6252 = vmatpush1.bf16.msra.mxu0 %v3028_v25  ;;  %v1208_v25 = vld [vmem:[%s7175_s16 + $0x1bb0] sm:$0xff] }
 0x7bc   : > { %6293 = vmatpush1.bf16.msra.mxu1 %v3092_v20  ;;  %6253 = vmatprep.subr.bf16.mxu0 %v3025_v29  ;;  %v3056_v20 = vunpack.c.h.s8.bf16 %v1176_v59  ;;  %v3120_v29 = vunpack.c.h.s8.bf16 %v1208_v25 }
 0x7bd   : > { %6294 = vmatprep.subr.bf16.mxu1 %v3089_v39  ;;  %v3053_v39 = vunpack.c.l.s8.bf16 %v1177_v30 }
 0x7bf   : > { %6254 = vmatpush1.bf16.msra.mxu0 %v3024_v44  ;;  %v1205_v44 = vld [vmem:[%s7175_s16 + $0x1b98] sm:$0xff] }
 0x7c0   : > { %6295 = vmatpush1.bf16.msra.mxu1 %v3088_v11  ;;  %6255 = vmatprep.subr.bf16.mxu0 %v3021_v54  ;;  %v3052_v11 = vunpack.c.l.s8.bf16 %v1176_v59  ;;  %v3116_v54 = vunpack.c.l.s8.bf16 %v1208_v25  ;;  %v3113_v33 = vunpack.c.h.s8.bf16 %v1205_v44  ;;  %v3109_v42 = vunpack.c.l.s8.bf16 %v1205_v44  ;;  %v1225_v25 = vld [vmem:[%s7175_s16 + $0x1c38] sm:$0xff]  ;;  %v1224_v44 = vld [vmem:[%s7175_s16 + $0x1c30] sm:$0xff] }
 0x7c1   : > { %6296 = vmatprep.subr.bf16.mxu1 %v3085_v37  ;;  %v3049_v37 = vunpack.c.h.s8.bf16 %v1173_v5 }
 0x7c3   : > { %6256 = vmatpush1.bf16.msra.mxu0 %v3020_v0  ;;  %v1204_v0 = vld [vmem:[%s7175_s16 + $0x1b90] sm:$0xff] }
 0x7c4   : > { %6297 = vmatpush1.bf16.msra.mxu1 %v3084_v1  ;;  %6257 = vmatprep.subr.bf16.mxu0 %v3017_v26  ;;  %v3048_v1 = vunpack.c.h.s8.bf16 %v1172_v47  ;;  %v3112_v26 = vunpack.c.h.s8.bf16 %v1204_v0 }
 0x7c5   : > { %6298 = vmatprep.subr.bf16.mxu1 %v3081_v57  ;;  %v3045_v57 = vunpack.c.l.s8.bf16 %v1173_v5 }
 0x7c7   : > { %6258 = vmatpush1.bf16.msra.mxu0 %v3016_v35  ;;  %v1265_v35 = vld [vmem:[%s7175_s16 + $0x1d78] sm:$0xff] }
 0x7c8   : > { %6299 = vmatpush1.bf16.msra.mxu1 %v3080_v2  ;;  %6259 = vmatprep.subr.bf16.mxu0 %v3013_v63  ;;  %v3044_v2 = vunpack.c.l.s8.bf16 %v1172_v47  ;;  %v3108_v63 = vunpack.c.l.s8.bf16 %v1204_v0  ;;  %v3233_v13 = vunpack.c.h.s8.bf16 %v1265_v35  ;;  %v3229_v43 = vunpack.c.l.s8.bf16 %v1265_v35  ;;  %v1221_v0 = vld [vmem:[%s7175_s16 + $0x1c18] sm:$0xff]  ;;  %v1220_v35 = vld [vmem:[%s7175_s16 + $0x1c10] sm:$0xff] }
 0x7c9   : > { %6300 = vmatprep.subr.bf16.mxu1 %v3077_v12  ;;  %v3169_v12 = vunpack.c.h.s8.bf16 %v1233_v50 }
 0x7cb   : > { %6260 = vmatpush1.bf16.msra.mxu0 %v3012_v22  ;;  %v1264_v22 = vld [vmem:[%s7175_s16 + $0x1d70] sm:$0xff] }
 0x7cc   : > { %6301 = vmatpush1.bf16.msra.mxu1 %v3076_v31  ;;  %6261 = vmatprep.subr.bf16.mxu0 %v3073_v51  ;;  %v3168_v31 = vunpack.c.h.s8.bf16 %v1232_v21  ;;  %v3232_v51 = vunpack.c.h.s8.bf16 %v1264_v22 }
 0x7cd   : > { %6302 = vmatprep.subr.bf16.mxu1 %v3137_v28  ;;  %v3165_v28 = vunpack.c.l.s8.bf16 %v1233_v50 }
 0x7cf   : > { %6262 = vmatpush2.bf16.msra.mxu0 %v3072_v61  ;;  %v1261_v61 = vld [vmem:[%s7175_s16 + $0x1d58] sm:$0xff] }
 0x7d0   : > { %6303 = vmatpush2.bf16.msra.mxu1 %v3136_v53  ;;  %6263 = vmatprep.subr.bf16.mxu0 %v3069_v49  ;;  %v3225_v10 = vunpack.c.h.s8.bf16 %v1261_v61  ;;  %v3221_v59 = vunpack.c.l.s8.bf16 %v1261_v61  ;;  %v1248_v61 = vld [vmem:[%s7175_s16 + $0x1cf0] sm:$0xff] }
 0x7d1   : > { %6304 = vmatprep.subr.bf16.mxu1 %v3133_v16  ;;  %v9004_v16 = vld [vmem:[#allocation34_spill] sm:$0xff] }
 0x7d3   : > { %6264 = vmatpush2.bf16.msra.mxu0 %v3068_v3  ;;  %v3228_v3 = vunpack.c.l.s8.bf16 %v1264_v22  ;;  %v1249_v22 = vld [vmem:[%s7175_s16 + $0x1cf8] sm:$0xff] }
 0x7d4   : > { %6305 = vmatpush2.bf16.msra.mxu1 %v3132_v34  ;;  %6265 = vmatprep.subr.bf16.mxu0 %v3065_v6 }
 0x7d5   : > { %6306 = vmatprep.subr.bf16.mxu1 %v3129_v8  ;;  %v3161_v8 = vunpack.c.h.s8.bf16 %v1229_v52 }
 0x7d7   : > { %6266 = vmatpush2.bf16.msra.mxu0 %v3064_v56  ;;  %v1260_v56 = vld [vmem:[%s7175_s16 + $0x1d50] sm:$0xff] }
 0x7d8   : > { %6307 = vmatpush2.bf16.msra.mxu1 %v3128_v58  ;;  %6267 = vmatprep.subr.bf16.mxu0 %v3061_v41 }
 0x7d9   : > { %6308 = vmatprep.subr.bf16.mxu1 %v3125_v18  ;;  %v9005_v18 = vld [vmem:[#allocation35_spill] sm:$0xff] }
 0x7db   : > { %6268 = vmatpush2.bf16.msra.mxu0 %v3060_v45  ;;  %v3160_v45 = vunpack.c.h.s8.bf16 %v1228_v4 }
 0x7dc   : > { %6309 = vmatpush2.bf16.msra.mxu1 %v3124_v15  ;;  %6269 = vmatprep.subr.bf16.mxu0 %v3057_v23  ;;  %v3224_v15 = vunpack.c.h.s8.bf16 %v1260_v56 }
 0x7dd   : > { %6310 = vmatprep.subr.bf16.mxu1 %v3121_v48 }
 0x7df   : > { %6270 = vmatpush2.bf16.msra.mxu0 %v3056_v20  ;;  %v1257_v20 = vld [vmem:[%s7175_s16 + $0x1d38] sm:$0xff] }
 0x7e0   : > { %6311 = vmatpush2.bf16.msra.mxu1 %v3120_v29  ;;  %6271 = vmatprep.subr.bf16.mxu0 %v3053_v39  ;;  %v3156_v29 = vunpack.c.l.s8.bf16 %v1228_v4  ;;  %v3220_v39 = vunpack.c.l.s8.bf16 %v1260_v56  ;;  %v3217_v5 = vunpack.c.h.s8.bf16 %v1257_v20  ;;  %v3213_v47 = vunpack.c.l.s8.bf16 %v1257_v20  ;;  %v1244_v56 = vld [vmem:[%s7175_s16 + $0x1cd0] sm:$0xff] }
 0x7e1   : > { %6312 = vmatprep.subr.bf16.mxu1 %v3117_v46  ;;  %v3153_v46 = vunpack.c.h.s8.bf16 %v1225_v25  ;;  %v1272_v20 = vld [vmem:[%s7175_s16 + $0x1db0] sm:$0xff] }
 0x7e3   : > { %6272 = vmatpush2.bf16.msra.mxu0 %v3052_v11  ;;  %v1256_v11 = vld [vmem:[%s7175_s16 + $0x1d30] sm:$0xff] }
 0x7e4   : > { %6313 = vmatpush2.bf16.msra.mxu1 %v3116_v54  ;;  %6273 = vmatprep.subr.bf16.mxu0 %v3049_v37  ;;  %v3152_v54 = vunpack.c.h.s8.bf16 %v1224_v44  ;;  %v3216_v37 = vunpack.c.h.s8.bf16 %v1256_v11 }
 0x7e5   : > { %6314 = vmatprep.subr.bf16.mxu1 %v3113_v33  ;;  %v3149_v33 = vunpack.c.l.s8.bf16 %v1225_v25  ;;  %v1240_v25 = vld [vmem:[%s7175_s16 + $0x1cb0] sm:$0xff] }
 0x7e7   : > { %6274 = vmatpush2.bf16.msra.mxu0 %v3048_v1  ;;  %v1253_v1 = vld [vmem:[%s7175_s16 + $0x1d18] sm:$0xff] }
 0x7e8   : > { %6315 = vmatpush2.bf16.msra.mxu1 %v3112_v26  ;;  %6275 = vmatprep.subr.bf16.mxu0 %v3045_v57  ;;  %v3148_v26 = vunpack.c.l.s8.bf16 %v1224_v44  ;;  %v3212_v57 = vunpack.c.l.s8.bf16 %v1256_v11  ;;  %v3209_v50 = vunpack.c.h.s8.bf16 %v1253_v1  ;;  %v3205_v21 = vunpack.c.l.s8.bf16 %v1253_v1  ;;  %v1237_v44 = vld [vmem:[%s7175_s16 + $0x1c98] sm:$0xff]  ;;  %v1268_v1 = vld [vmem:[%s7175_s16 + $0x1d90] sm:$0xff] }
 0x7e9   : > { %6316 = vmatprep.subr.bf16.mxu1 %v3109_v42  ;;  %v3145_v42 = vunpack.c.h.s8.bf16 %v1221_v0  ;;  %v1269_v11 = vld [vmem:[%s7175_s16 + $0x1d98] sm:$0xff] }
 0x7eb   : > { %6276 = vmatpush2.bf16.msra.mxu0 %v3044_v2  ;;  %v1252_v2 = vld [vmem:[%s7175_s16 + $0x1d10] sm:$0xff] }
 0x7ec   : > { %6317 = vmatpush2.bf16.msra.mxu1 %v3108_v63  ;;  %6327 = vmatprep.subr.bf16.mxu0 %v3169_v12  ;;  %v3144_v63 = vunpack.c.h.s8.bf16 %v1220_v35  ;;  %v3208_v12 = vunpack.c.h.s8.bf16 %v1252_v2 }
 0x7ed   : > { %6368 = vmatprep.subr.bf16.mxu1 %v3233_v13  ;;  %v3141_v13 = vunpack.c.l.s8.bf16 %v1221_v0  ;;  %v1236_v0 = vld [vmem:[%s7175_s16 + $0x1c90] sm:$0xff] }
 0x7ee   : > { %v6033_v53 = vpop.f32.mrf.mxu0  ;;  %6278 = vmatmul.mubr.bf16.vlgmr.msra.gmra.mxu0 %v9004_v16 }
 0x7ef   : > { %v6074_v49 = vpop.f32.mrf.mxu1  ;;  %6319 = vmatmul.mubr.bf16.vlgmr.msra.gmra.mxu1 %v8098_v7  ;;  %v6034_v27 = vadd.f32 %v6033_v53, %v8771_v19  ;;  %6328 = vmatpush1.bf16.msra.mxu0 %v3168_v31  ;;  %v9006_v7 = vld [vmem:[#allocation36_spill] sm:$0xff]  ;;  %v1280_v53 = vld [vmem:[%s7175_s16 + $0x1df0] sm:$0xff] }
 0x7f0   : > { %6369 = vmatpush1.bf16.msra.mxu1 %v3232_v51  ;;  %v6035_v34 = vpop.f32.mrf.mxu0  ;;  %6329 = vmatprep.subr.bf16.mxu0 %v3165_v28  ;;  %v1281_v31 = vld [vmem:[%s7175_s16 + $0x1df8] sm:$0xff]  ;;  %v3140_v51 = vunpack.c.l.s8.bf16 %v1220_v35  ;;  %v3204_v28 = vunpack.c.l.s8.bf16 %v1252_v2  ;;  %v3264_v16 = vunpack.c.h.s8.bf16 %v1280_v53 }
 0x7f1   : > { %v6076_v6 = vpop.f32.mrf.mxu1  ;;  %6370 = vmatprep.subr.bf16.mxu1 %v3229_v43  ;;  %v8813_v58 = vadd.f32 %v6074_v49, %v6034_v27  ;;  %v6036_v41 = vadd.f32 %v6035_v34, %v8776_v32  ;;  %6359 = vmatprep.mubr.bf16.mxu0 %v9005_v18  ;;  %v3157_v32 = vunpack.c.l.s8.bf16 %v1229_v52  ;;  %v3201_v43 = vunpack.c.h.s8.bf16 %v1249_v22  ;;  %v1277_v34 = vld [vmem:[%s7175_s16 + $0x1dd8] sm:$0xff] }
 0x7f2   : > { %6400 = vmatprep.mubr.bf16.mxu1 %v9006_v7  ;;  %v6037_v19 = vpop.f32.mrf.mxu0  ;;  %v3265_v52 = vunpack.c.h.s8.bf16 %v1281_v31  ;;  %v3200_v49 = vunpack.c.h.s8.bf16 %v1248_v61  ;;  %v3197_v27 = vunpack.c.l.s8.bf16 %v1249_v22  ;;  %v3257_v4 = vunpack.c.h.s8.bf16 %v1277_v34  ;;  %v1297_v35 = vld [vmem:[%s7175_s16 + $0x1e78] sm:$0xff]  ;;  %v1296_v22 = vld [vmem:[%s7175_s16 + $0x1e70] sm:$0xff] }
 0x7f3   : > { %v6078_v30 = vpop.f32.mrf.mxu1  ;;  %v8818_v40 = vadd.f32 %v6076_v6, %v6036_v41  ;;  %6330 = vmatpush1.bf16.msra.mxu0 %v3164_v62  ;;  %v3261_v62 = vunpack.c.l.s8.bf16 %v1281_v31  ;;  %v3196_v6 = vunpack.c.l.s8.bf16 %v1248_v61  ;;  %v1276_v41 = vld [vmem:[%s7175_s16 + $0x1dd0] sm:$0xff]  ;;  %v3192_v18 = vunpack.c.h.s8.bf16 %v1244_v56  ;;  %v1329_v2 = vld [vmem:[%s7175_s16 + $0x1f78] sm:$0xff] }
 0x7f4   : > { %6371 = vmatpush1.bf16.msra.mxu1 %v3228_v3  ;;  %v6038_v23 = vpop.f32.mrf.mxu0  ;;  %6331 = vmatprep.subr.bf16.mxu0 %v3161_v8  ;;  %v1245_v3 = vld [vmem:[%s7175_s16 + $0x1cd8] sm:$0xff]  ;;  %v3260_v8 = vunpack.c.l.s8.bf16 %v1280_v53  ;;  %v3256_v7 = vunpack.c.h.s8.bf16 %v1276_v41  ;;  %v3253_v30 = vunpack.c.l.s8.bf16 %v1277_v34  ;;  %v1328_v31 = vld [vmem:[%s7175_s16 + $0x1f70] sm:$0xff] }
 0x7f5   : > { %v6079_v48 = vpop.f32.mrf.mxu1  ;;  %6372 = vmatprep.subr.bf16.mxu1 %v3225_v10  ;;  %v3193_v10 = vunpack.c.h.s8.bf16 %v1245_v3  ;;  %v3189_v19 = vunpack.c.l.s8.bf16 %v1245_v3  ;;  %v3188_v23 = vunpack.c.l.s8.bf16 %v1244_v56  ;;  %v1293_v61 = vld [vmem:[%s7175_s16 + $0x1e58] sm:$0xff]  ;;  %v3292_v3 = vunpack.c.l.s8.bf16 %v1296_v22  ;;  %v1292_v56 = vld [vmem:[%s7175_s16 + $0x1e50] sm:$0xff] }
 0x7f6   : > { %v3252_v48 = vunpack.c.l.s8.bf16 %v1276_v41  ;;  %v1325_v53 = vld [vmem:[%s7175_s16 + $0x1f58] sm:$0xff]  ;;  %v3356_v34 = vunpack.c.l.s8.bf16 %v1328_v31  ;;  %v1324_v41 = vld [vmem:[%s7175_s16 + $0x1f50] sm:$0xff] }
 0x7f7   : > { %6332 = vmatpush1.bf16.msra.mxu0 %v3160_v45  ;;  %v1241_v45 = vld [vmem:[%s7175_s16 + $0x1cb8] sm:$0xff] }
 0x7f8   : > { %6373 = vmatpush1.bf16.msra.mxu1 %v3224_v15  ;;  %6333 = vmatprep.subr.bf16.mxu0 %v3157_v32  ;;  %v1273_v15 = vld [vmem:[%s7175_s16 + $0x1db8] sm:$0xff]  ;;  %v3185_v32 = vunpack.c.h.s8.bf16 %v1241_v45 }
 0x7f9   : > { %6374 = vmatprep.subr.bf16.mxu1 %v3221_v59  ;;  %v3249_v59 = vunpack.c.h.s8.bf16 %v1273_v15 }
 0x7fb   : > { %6334 = vmatpush1.bf16.msra.mxu0 %v3156_v29  ;;  %v3184_v29 = vunpack.c.h.s8.bf16 %v1240_v25 }
 0x7fc   : > { %6375 = vmatpush1.bf16.msra.mxu1 %v3220_v39  ;;  %6335 = vmatprep.subr.bf16.mxu0 %v3153_v46  ;;  %v3248_v39 = vunpack.c.h.s8.bf16 %v1272_v20  ;;  %v3181_v46 = vunpack.c.l.s8.bf16 %v1241_v45  ;;  %v3352_v45 = vunpack.c.h.s8.bf16 %v1324_v41 }
 0x7fd   : > { %6376 = vmatprep.subr.bf16.mxu1 %v3217_v5  ;;  %v3245_v5 = vunpack.c.l.s8.bf16 %v1273_v15 }
 0x7ff   : > { %6336 = vmatpush1.bf16.msra.mxu0 %v3152_v54  ;;  %v3180_v54 = vunpack.c.l.s8.bf16 %v1240_v25 }
 0x800   : > { %6377 = vmatpush1.bf16.msra.mxu1 %v3216_v37  ;;  %6337 = vmatprep.subr.bf16.mxu0 %v3149_v33  ;;  %v3244_v37 = vunpack.c.l.s8.bf16 %v1272_v20  ;;  %v3177_v33 = vunpack.c.h.s8.bf16 %v1237_v44 }
 0x801   : > { %6378 = vmatprep.subr.bf16.mxu1 %v3213_v47  ;;  %v3241_v47 = vunpack.c.h.s8.bf16 %v1269_v11 }
 0x803   : > { %6338 = vmatpush1.bf16.msra.mxu0 %v3148_v26  ;;  %v3176_v26 = vunpack.c.h.s8.bf16 %v1236_v0 }
 0x804   : > { %6379 = vmatpush1.bf16.msra.mxu1 %v3212_v57  ;;  %6339 = vmatprep.subr.bf16.mxu0 %v3145_v42  ;;  %v3240_v57 = vunpack.c.h.s8.bf16 %v1268_v1  ;;  %v3173_v42 = vunpack.c.l.s8.bf16 %v1237_v44 }
 0x805   : > { %6380 = vmatprep.subr.bf16.mxu1 %v3209_v50  ;;  %v3237_v50 = vunpack.c.l.s8.bf16 %v1269_v11 }
 0x807   : > { %6340 = vmatpush1.bf16.msra.mxu0 %v3144_v63  ;;  %v3172_v63 = vunpack.c.l.s8.bf16 %v1236_v0 }
 0x808   : > { %6381 = vmatpush1.bf16.msra.mxu1 %v3208_v12  ;;  %6341 = vmatprep.subr.bf16.mxu0 %v3141_v13  ;;  %v3236_v12 = vunpack.c.l.s8.bf16 %v1268_v1  ;;  %v3297_v13 = vunpack.c.h.s8.bf16 %v1297_v35 }
 0x809   : > { %6382 = vmatprep.subr.bf16.mxu1 %v3205_v21  ;;  %v3361_v21 = vunpack.c.h.s8.bf16 %v1329_v2 }
 0x80b   : > { %6342 = vmatpush1.bf16.msra.mxu0 %v3140_v51  ;;  %v3296_v51 = vunpack.c.h.s8.bf16 %v1296_v22 }
 0x80c   : > { %6383 = vmatpush1.bf16.msra.mxu1 %v3204_v28  ;;  %6343 = vmatprep.subr.bf16.mxu0 %v3201_v43  ;;  %v3360_v28 = vunpack.c.h.s8.bf16 %v1328_v31  ;;  %v3293_v43 = vunpack.c.l.s8.bf16 %v1297_v35 }
 0x80d   : > { %6384 = vmatprep.subr.bf16.mxu1 %v3265_v52  ;;  %v3357_v52 = vunpack.c.l.s8.bf16 %v1329_v2 }
 0x80f   : > { %6344 = vmatpush2.bf16.msra.mxu0 %v3200_v49 }
 0x810   : > { %6385 = vmatpush2.bf16.msra.mxu1 %v3264_v16  ;;  %6345 = vmatprep.subr.bf16.mxu0 %v3197_v27  ;;  %v9007_v27 = vld [vmem:[#allocation37_spill] sm:$0xff] }
 0x811   : > { %6386 = vmatprep.subr.bf16.mxu1 %v3261_v62 }
 0x813   : > { %6346 = vmatpush2.bf16.msra.mxu0 %v3196_v6 }
 0x814   : > { %6387 = vmatpush2.bf16.msra.mxu1 %v3260_v8  ;;  %6347 = vmatprep.subr.bf16.mxu0 %v3193_v10  ;;  %v3289_v10 = vunpack.c.h.s8.bf16 %v1293_v61 }
 0x815   : > { %6388 = vmatprep.subr.bf16.mxu1 %v3257_v4  ;;  %v3353_v4 = vunpack.c.h.s8.bf16 %v1325_v53 }
 0x817   : > { %6348 = vmatpush2.bf16.msra.mxu0 %v3192_v18 }
 0x818   : > { %6389 = vmatpush2.bf16.msra.mxu1 %v3256_v7  ;;  %6349 = vmatprep.subr.bf16.mxu0 %v3189_v19 }
 0x819   : > { %6390 = vmatprep.subr.bf16.mxu1 %v3253_v30  ;;  %v3288_v30 = vunpack.c.h.s8.bf16 %v1292_v56 }
 0x81b   : > { %6350 = vmatpush2.bf16.msra.mxu0 %v3188_v23 }
 0x81c   : > { %6391 = vmatpush2.bf16.msra.mxu1 %v3252_v48  ;;  %6351 = vmatprep.subr.bf16.mxu0 %v3185_v32  ;;  %v3349_v48 = vunpack.c.l.s8.bf16 %v1325_v53  ;;  %v1321_v32 = vld [vmem:[%s7175_s16 + $0x1f38] sm:$0xff] }
 0x81d   : > { %6392 = vmatprep.subr.bf16.mxu1 %v3249_v59  ;;  %v3348_v59 = vunpack.c.l.s8.bf16 %v1324_v41  ;;  %v3345_v20 = vunpack.c.h.s8.bf16 %v1321_v32  ;;  %v3341_v11 = vunpack.c.l.s8.bf16 %v1321_v32 }
 0x81f   : > { %6352 = vmatpush2.bf16.msra.mxu0 %v3184_v29  ;;  %v1288_v29 = vld [vmem:[%s7175_s16 + $0x1e30] sm:$0xff] }
 0x820   : > { %6393 = vmatpush2.bf16.msra.mxu1 %v3248_v39  ;;  %6353 = vmatprep.subr.bf16.mxu0 %v3181_v46  ;;  %v1320_v39 = vld [vmem:[%s7175_s16 + $0x1f30] sm:$0xff]  ;;  %v3280_v46 = vunpack.c.h.s8.bf16 %v1288_v29 }
 0x821   : > { %6394 = vmatprep.subr.bf16.mxu1 %v3245_v5  ;;  %v3344_v5 = vunpack.c.h.s8.bf16 %v1320_v39 }
 0x823   : > { %6354 = vmatpush2.bf16.msra.mxu0 %v3180_v54  ;;  %v1285_v54 = vld [vmem:[%s7175_s16 + $0x1e18] sm:$0xff] }
 0x824   : > { %6395 = vmatpush2.bf16.msra.mxu1 %v3244_v37  ;;  %6355 = vmatprep.subr.bf16.mxu0 %v3177_v33  ;;  %v1317_v37 = vld [vmem:[%s7175_s16 + $0x1f18] sm:$0xff]  ;;  %v3276_v33 = vunpack.c.l.s8.bf16 %v1288_v29  ;;  %v3273_v0 = vunpack.c.h.s8.bf16 %v1285_v54  ;;  %v3269_v35 = vunpack.c.l.s8.bf16 %v1285_v54 }
 0x825   : > { %6396 = vmatprep.subr.bf16.mxu1 %v3241_v47  ;;  %v3340_v47 = vunpack.c.l.s8.bf16 %v1320_v39  ;;  %v3337_v1 = vunpack.c.h.s8.bf16 %v1317_v37  ;;  %v3333_v2 = vunpack.c.l.s8.bf16 %v1317_v37 }
 0x827   : > { %6356 = vmatpush2.bf16.msra.mxu0 %v3176_v26  ;;  %v1284_v26 = vld [vmem:[%s7175_s16 + $0x1e10] sm:$0xff] }
 0x828   : > { %6397 = vmatpush2.bf16.msra.mxu1 %v3240_v57  ;;  %6357 = vmatprep.subr.bf16.mxu0 %v3173_v42  ;;  %v1316_v57 = vld [vmem:[%s7175_s16 + $0x1f10] sm:$0xff]  ;;  %v3272_v42 = vunpack.c.h.s8.bf16 %v1284_v26 }
 0x829   : > { %6398 = vmatprep.subr.bf16.mxu1 %v3237_v50  ;;  %v3336_v50 = vunpack.c.h.s8.bf16 %v1316_v57 }
 0x82b   : > { %6358 = vmatpush2.bf16.msra.mxu0 %v3172_v63  ;;  %v1313_v63 = vld [vmem:[%s7175_s16 + $0x1ef8] sm:$0xff] }
 0x82c   : > { %6399 = vmatpush2.bf16.msra.mxu1 %v3236_v12  ;;  %6409 = vmatprep.subr.bf16.mxu0 %v3297_v13  ;;  %v1345_v12 = vld [vmem:[%s7175_s16 + $0x1ff8] sm:$0xff]  ;;  %v3268_v13 = vunpack.c.l.s8.bf16 %v1284_v26  ;;  %v3329_v22 = vunpack.c.h.s8.bf16 %v1313_v63 }
 0x82d   : > { %6450 = vmatprep.subr.bf16.mxu1 %v3361_v21  ;;  %v3332_v21 = vunpack.c.l.s8.bf16 %v1316_v57  ;;  %v3393_v31 = vunpack.c.h.s8.bf16 %v1345_v12  ;;  %v3389_v53 = vunpack.c.l.s8.bf16 %v1345_v12 }
 0x82e   : > { %v6115_v49 = vpop.f32.mrf.mxu0  ;;  %6360 = vmatmul.mubr.bf16.vlgmr.msra.gmra.mxu0 %v9007_v27 }
 0x82f   : > { %v6156_v16 = vpop.f32.mrf.mxu1  ;;  %6401 = vmatmul.mubr.bf16.vlgmr.msra.gmra.mxu1 %v8162_v9  ;;  %v6116_v62 = vadd.f32 %v6115_v49, %v8813_v58  ;;  %6410 = vmatpush1.bf16.msra.mxu0 %v3296_v51  ;;  %v1312_v51 = vld [vmem:[%s7175_s16 + $0x1ef0] sm:$0xff]  ;;  %v1309_v49 = vld [vmem:[%s7175_s16 + $0x1ed8] sm:$0xff] }
 0x830   : > { %6451 = vmatpush1.bf16.msra.mxu1 %v3360_v28  ;;  %v6117_v6 = vpop.f32.mrf.mxu0  ;;  %6411 = vmatprep.subr.bf16.mxu0 %v3293_v43  ;;  %v1344_v28 = vld [vmem:[%s7175_s16 + $0x1ff0] sm:$0xff]  ;;  %v3328_v43 = vunpack.c.h.s8.bf16 %v1312_v51  ;;  %v3324_v27 = vunpack.c.l.s8.bf16 %v1312_v51 }
 0x831   : > { %v6158_v8 = vpop.f32.mrf.mxu1  ;;  %6452 = vmatprep.subr.bf16.mxu1 %v3357_v52  ;;  %v8855_v18 = vadd.f32 %v6156_v16, %v6116_v62  ;;  %v6118_v7 = vadd.f32 %v6117_v6, %v8818_v40  ;;  %6441 = vmatprep.mubr.bf16.mxu0 %v8158_v60  ;;  %v3285_v40 = vunpack.c.l.s8.bf16 %v1293_v61  ;;  %v1289_v60 = vld [vmem:[%s7175_s16 + $0x1e38] sm:$0xff]  ;;  %v3392_v52 = vunpack.c.h.s8.bf16 %v1344_v28  ;;  %v1308_v6 = vld [vmem:[%s7175_s16 + $0x1ed0] sm:$0xff] }
 0x832   : > { %6482 = vmatprep.mubr.bf16.mxu1 %v8168_v38  ;;  %v6119_v9 = vpop.f32.mrf.mxu0  ;;  %v3284_v38 = vunpack.c.l.s8.bf16 %v1292_v56  ;;  %v3281_v25 = vunpack.c.h.s8.bf16 %v1289_v60  ;;  %v3277_v44 = vunpack.c.l.s8.bf16 %v1289_v60  ;;  %v3325_v61 = vunpack.c.l.s8.bf16 %v1313_v63  ;;  %v1341_v16 = vld [vmem:[%s7175_s16 + $0x1fd8] sm:$0xff] }
 0x833   : > { %v6160_v58 = vpop.f32.mrf.mxu1  ;;  %v8860_v19 = vadd.f32 %v6158_v8, %v6118_v7  ;;  %6412 = vmatpush1.bf16.msra.mxu0 %v3292_v3  ;;  %v3388_v62 = vunpack.c.l.s8.bf16 %v1344_v28  ;;  %v3321_v3 = vunpack.c.h.s8.bf16 %v1309_v49  ;;  %v1340_v8 = vld [vmem:[%s7175_s16 + $0x1fd0] sm:$0xff]  ;;  %v3317_v56 = vunpack.c.l.s8.bf16 %v1309_v49  ;;  %v1305_v7 = vld [vmem:[%s7175_s16 + $0x1eb8] sm:$0xff] }
 0x834   : > { %6453 = vmatpush1.bf16.msra.mxu1 %v3356_v34  ;;  %v6120_v15 = vpop.f32.mrf.mxu0  ;;  %6413 = vmatprep.subr.bf16.mxu0 %v3289_v10  ;;  %v3385_v34 = vunpack.c.h.s8.bf16 %v1341_v16  ;;  %v3320_v10 = vunpack.c.h.s8.bf16 %v1308_v6  ;;  %v3381_v41 = vunpack.c.l.s8.bf16 %v1341_v16  ;;  %v1337_v9 = vld [vmem:[%s7175_s16 + $0x1fb8] sm:$0xff]  ;;  %v3316_v58 = vunpack.c.l.s8.bf16 %v1308_v6 }
 0x835   : > { %v6161_v23 = vpop.f32.mrf.mxu1  ;;  %6454 = vmatprep.subr.bf16.mxu1 %v3353_v4  ;;  %v3384_v4 = vunpack.c.h.s8.bf16 %v1340_v8  ;;  %v3377_v15 = vunpack.c.h.s8.bf16 %v1337_v9  ;;  %v3309_v32 = vunpack.c.l.s8.bf16 %v1305_v7 }
 0x836   : > { %v1304_v23 = vld [vmem:[%s7175_s16 + $0x1eb0] sm:$0xff] }
 0x837   : > { %6414 = vmatpush1.bf16.msra.mxu0 %v3288_v30  ;;  %v3380_v30 = vunpack.c.l.s8.bf16 %v1340_v8 }
 0x838   : > { %6455 = vmatpush1.bf16.msra.mxu1 %v3352_v45  ;;  %6415 = vmatprep.subr.bf16.mxu0 %v3285_v40  ;;  %v3313_v45 = vunpack.c.h.s8.bf16 %v1305_v7  ;;  %v1336_v40 = vld [vmem:[%s7175_s16 + $0x1fb0] sm:$0xff] }
 0x839   : > { %6456 = vmatprep.subr.bf16.mxu1 %v3349_v48  ;;  %v3312_v48 = vunpack.c.h.s8.bf16 %v1304_v23  ;;  %v3376_v60 = vunpack.c.h.s8.bf16 %v1336_v40  ;;  %v3372_v29 = vunpack.c.l.s8.bf16 %v1336_v40 }
 0x83b   : > { %6416 = vmatpush1.bf16.msra.mxu0 %v3284_v38  ;;  %v3373_v38 = vunpack.c.l.s8.bf16 %v1337_v9 }
 0x83c   : > { %6457 = vmatpush1.bf16.msra.mxu1 %v3348_v59  ;;  %6417 = vmatprep.subr.bf16.mxu0 %v3281_v25  ;;  %v1301_v59 = vld [vmem:[%s7175_s16 + $0x1e98] sm:$0xff] }
 0x83d   : > { %6458 = vmatprep.subr.bf16.mxu1 %v3345_v20  ;;  %v1333_v25 = vld [vmem:[%s7175_s16 + $0x1f98] sm:$0xff]  ;;  %v3308_v20 = vunpack.c.l.s8.bf16 %v1304_v23  ;;  %v3305_v39 = vunpack.c.h.s8.bf16 %v1301_v59  ;;  %v3301_v37 = vunpack.c.l.s8.bf16 %v1301_v59  ;;  %v9008_v59 = vld [vmem:[#allocation14_spill] sm:$0xff] }
 0x83f   : > { %6418 = vmatpush1.bf16.msra.mxu0 %v3280_v46  ;;  %v3369_v46 = vunpack.c.h.s8.bf16 %v1333_v25 }
 0x840   : > { %6459 = vmatpush1.bf16.msra.mxu1 %v3344_v5  ;;  %6419 = vmatprep.subr.bf16.mxu0 %v3277_v44  ;;  %v1300_v5 = vld [vmem:[%s7175_s16 + $0x1e90] sm:$0xff] }
 0x841   : > { %6460 = vmatprep.subr.bf16.mxu1 %v3341_v11  ;;  %v1332_v44 = vld [vmem:[%s7175_s16 + $0x1f90] sm:$0xff]  ;;  %v3304_v11 = vunpack.c.h.s8.bf16 %v1300_v5 }
 0x842   : > { %v3368_v54 = vunpack.c.h.s8.bf16 %v1332_v44 }
 0x843   : > { %6420 = vmatpush1.bf16.msra.mxu0 %v3276_v33  ;;  %v3365_v33 = vunpack.c.l.s8.bf16 %v1333_v25 }
 0x844   : > { %6461 = vmatpush1.bf16.msra.mxu1 %v3340_v47  ;;  %6421 = vmatprep.subr.bf16.mxu0 %v3273_v0  ;;  %v3300_v47 = vunpack.c.l.s8.bf16 %v1300_v5  ;;  %v3364_v0 = vunpack.c.l.s8.bf16 %v1332_v44 }
 0x845   : > { %6462 = vmatprep.subr.bf16.mxu1 %v3337_v1 }
 0x847   : > { %6422 = vmatpush1.bf16.msra.mxu0 %v3272_v42 }
 0x848   : > { %6463 = vmatpush1.bf16.msra.mxu1 %v3336_v50  ;;  %6423 = vmatprep.subr.bf16.mxu0 %v3269_v35 }
 0x849   : > { %6464 = vmatprep.subr.bf16.mxu1 %v3333_v2 }
 0x84b   : > { %6424 = vmatpush1.bf16.msra.mxu0 %v3268_v13 }
 0x84c   : > { %6465 = vmatpush1.bf16.msra.mxu1 %v3332_v21  ;;  %6425 = vmatprep.subr.bf16.mxu0 %v3329_v22 }
 0x84d   : > { %6466 = vmatprep.subr.bf16.mxu1 %v3393_v31 }
 0x84f   : > { %6426 = vmatpush2.bf16.msra.mxu0 %v3328_v43 }
 0x850   : > { %6467 = vmatpush2.bf16.msra.mxu1 %v3392_v52  ;;  %6427 = vmatprep.subr.bf16.mxu0 %v3325_v61 }
 0x851   : > { %6468 = vmatprep.subr.bf16.mxu1 %v3389_v53 }
 0x853   : > { %6428 = vmatpush2.bf16.msra.mxu0 %v3324_v27 }
 0x854   : > { %6469 = vmatpush2.bf16.msra.mxu1 %v3388_v62  ;;  %6429 = vmatprep.subr.bf16.mxu0 %v3321_v3 }
 0x855   : > { %6470 = vmatprep.subr.bf16.mxu1 %v3385_v34 }
 0x857   : > { %6430 = vmatpush2.bf16.msra.mxu0 %v3320_v10 }
 0x858   : > { %6471 = vmatpush2.bf16.msra.mxu1 %v3384_v4  ;;  %6431 = vmatprep.subr.bf16.mxu0 %v3317_v56 }
 0x859   : > { %6472 = vmatprep.subr.bf16.mxu1 %v3381_v41  ;;  %v7009_v41 = vmov 1983009808  }
 0x85a   : > { %v6498_v7 = vunpack.c.l.s4 %v7009_v41 }
 0x85b   : > { %6432 = vmatpush2.bf16.msra.mxu0 %v3316_v58 }
 0x85c   : > { %6473 = vmatpush2.bf16.msra.mxu1 %v3380_v30  ;;  %6433 = vmatprep.subr.bf16.mxu0 %v3313_v45  ;;  %v6499_v45 = vunpack.c.0.s8 %v6498_v7 }
 0x85d   : > { %6474 = vmatprep.subr.bf16.mxu1 %v3377_v15 }
 0x85e   : > { %v6502_v25 = vsub.s32 %v6499_v45, %v9008_v59 }
 0x85f   : > { %6434 = vmatpush2.bf16.msra.mxu0 %v3312_v48 }
 0x860   : > { %6475 = vmatpush2.bf16.msra.mxu1 %v3376_v60  ;;  %6435 = vmatprep.subr.bf16.mxu0 %v3309_v32  ;;  %v6503_v44 = vrot.slane %v6495_v55, %v6502_v25 }
 0x861   : > { %6476 = vmatprep.subr.bf16.mxu1 %v3373_v38 }
 0x863   : > { %6436 = vmatpush2.bf16.msra.mxu0 %v3308_v20 }
 0x864   : > { %6477 = vmatpush2.bf16.msra.mxu1 %v3372_v29  ;;  %6437 = vmatprep.subr.bf16.mxu0 %v3305_v39 }
 0x865   : > { %6478 = vmatprep.subr.bf16.mxu1 %v3369_v46 }
 0x867   : > { %6438 = vmatpush2.bf16.msra.mxu0 %v3304_v11 }
 0x868   : > { %6479 = vmatpush2.bf16.msra.mxu1 %v3368_v54  ;;  %6439 = vmatprep.subr.bf16.mxu0 %v3301_v37  ;;  %v3394_v54 = vld [vmem:[#allocation2] sm:$0xff] }
 0x869   : > { %6480 = vmatprep.subr.bf16.mxu1 %v3365_v33 }
 0x86b   : > { %6440 = vmatpush2.bf16.msra.mxu0 %v3300_v47 }
 0x86c   : > { %6481 = vmatpush2.bf16.msra.mxu1 %v3364_v0 }
 0x86e   : > { %v6197_v1 = vpop.f32.mrf.mxu0  ;;  %6442 = vmatmul.mubr.bf16.vlgmr.msra.gmra.mxu0 %v8210_v24 }
 0x86f   : > { %v6238_v26 = vpop.f32.mrf.mxu1  ;;  %6483 = vmatmul.mubr.bf16.vlgmr.msra.gmra.mxu1 %v8216_v14  ;;  %v6198_v57 = vadd.f32 %v6197_v1, %v8855_v18 }
 0x870   : > { %v6199_v42 = vpop.f32.mrf.mxu0 }
 0x871   : > { %v6240_v50 = vpop.f32.mrf.mxu1  ;;  %v6239_v35 = vadd.f32 %v6238_v26, %v6198_v57  ;;  %v6200_v2 = vadd.f32 %v6199_v42, %v8860_v19 }
 0x872   : > { %v6201_v63 = vpop.f32.mrf.mxu0 }
 0x873   : > { %v6242_v12 = vpop.f32.mrf.mxu1  ;;  %v6241_v13 = vadd.f32 %v6240_v50, %v6200_v2 }
 0x874   : > { %v6202_v21 = vpop.f32.mrf.mxu0 }
 0x875   : > { %v6243_v22 = vpop.f32.mrf.mxu1 }
 0x8ae   : > { %v6279_v31 = vpop.f32.mrf.mxu0 }
 0x8af   : > { %v6320_v51 = vpop.f32.mrf.mxu1  ;;  %v6280_v28 = vadd.f32 %v6279_v31, %v6239_v35 }
 0x8b0   : > { %v6281_v43 = vpop.f32.mrf.mxu0 }
 0x8b1   : > { %v6322_v52 = vpop.f32.mrf.mxu1  ;;  %v6321_v24 = vadd.f32 %v6320_v51, %v6280_v28  ;;  %v6282_v61 = vadd.f32 %v6281_v43, %v6241_v13 }
 0x8b2   : > { %v6283_v14 = vpop.f32.mrf.mxu0 }
 0x8b3   : > { %v6324_v53 = vpop.f32.mrf.mxu1  ;;  %v6323_v18 = vadd.f32 %v6322_v52, %v6282_v61 }
 0x8b4   : > { %v6284_v49 = vpop.f32.mrf.mxu0 }
 0x8b5   : > { %v6325_v16 = vpop.f32.mrf.mxu1 }
 0x8ee   : > { %v6361_v27 = vpop.f32.mrf.mxu0 }
 0x8ef   : > { %v6402_v62 = vpop.f32.mrf.mxu1  ;;  %v6362_v19 = vadd.f32 %v6361_v27, %v6321_v24 }
 0x8f0   : > { %v6363_v3 = vpop.f32.mrf.mxu0 }
 0x8f1   : > { %v6404_v34 = vpop.f32.mrf.mxu1  ;;  %v6403_v6 = vadd.f32 %v6402_v62, %v6362_v19  ;;  %v6364_v9 = vadd.f32 %v6363_v3, %v6323_v18 }
 0x8f2   : > { %v6365_v8 = vpop.f32.mrf.mxu0 }
 0x8f3   : > { %v6406_v10 = vpop.f32.mrf.mxu1  ;;  %v6405_v15 = vadd.f32 %v6404_v34, %v6364_v9 }
 0x8f4   : > { %v6366_v4 = vpop.f32.mrf.mxu0 }
 0x8f5   : > { %v6407_v56 = vpop.f32.mrf.mxu1 }
 0x92e   : > { %v6443_v58 = vpop.f32.mrf.mxu0 }
 0x92f   : > { %v6484_v30 = vpop.f32.mrf.mxu1  ;;  %v6444_v23 = vadd.f32 %v6443_v58, %v6403_v6 }
 0x930   : > { %v6445_v40 = vpop.f32.mrf.mxu0 }
 0x931   : > { %v6486_v48 = vpop.f32.mrf.mxu1  ;;  %v6446_v60 = vadd.f32 %v6445_v40, %v6405_v15  ;;  %v6485_v20 = vadd.f32 %v6484_v30, %v6444_v23 }
 0x932   : > { %v6447_v32 = vpop.f32.mrf.mxu0 }
 0x933   : > { %v6488_v38 = vpop.f32.mrf.mxu1  ;;  %v6487_v29 = vadd.f32 %v6486_v48, %v6446_v60 }
 0x934   : > { %v6448_v39 = vpop.f32.mrf.mxu0 }
 0x935   : > { %v6489_v46 = vpop.f32.mrf.mxu1  ;;  %v6496_v5 = vcombine.low %v6485_v20, %v6487_v29 }
 0x937   : > { %v6510_v11 = vrot.slane %v6496_v5, %v6502_v25 }
 0x939   : > { %v6511_v37 = vcombine.low %v6503_v44, %v6510_v11  ;;  %6518 = sbr.rel (%p6763_p2) target bundleno = 2538 (0x9ea), region = 68 }
 0x93b   : > { %v6513_v33 = vadd.f32 %v6511_v37, %v3394_v54 }
 0x93d   : > { %6514 = vst [vmem:[#allocation2] sm:$0xff] %v6513_v33 }
 0x93e   : > { %v6520_v47 = vld [vmem:[#allocation6] sm:$0xf]  ;;  %v9009_v0 = vld [vmem:[#allocation14_spill] sm:$0xff]  ;;  %v6557_v50 = vld [vmem:[#allocation8] sm:$0xf]  ;;  %vm6654_vm0 = vcmask 1041408   ;;  %v6665_v59 = vstv %s6664_s5 }
 0x93f   : > { %v6524_v1 = vsub.s32 0, %v9009_v0  ;;  %v6528_v26 = vsub.s32 1, %v9009_v0  ;;  %v6532_v57 = vsub.s32 2, %v9009_v0  ;;  %v6536_v42 = vsub.s32 3, %v9009_v0  ;;  %v6595_v17 = vld [vmem:[#allocation9] sm:$0xf] }
 0x940   : > { %vm6667_vm1 = vcmask 1024  }
 0x941   : > { %v6525_v36 = vrot.slane %v6520_v47, %v6524_v1  ;;  %v6529_v55 = vrot.slane %v6520_v47, %v6528_v26  ;;  %v6533_v35 = vrot.slane %v6520_v47, %v6532_v57  ;;  %v6562_v2 = vrot.slane %v6557_v50, %v6524_v1 }
 0x942   : > { %v6537_v63 = vrot.slane %v6520_v47, %v6536_v42  ;;  %v6566_v12 = vrot.slane %v6557_v50, %v6528_v26  ;;  %v6570_v13 = vrot.slane %v6557_v50, %v6532_v57  ;;  %v6574_v21 = vrot.slane %v6557_v50, %v6536_v42 }
 0x943   : > { %v6538_v22 = vcombine.low %v6525_v36, %v6529_v55  ;;  %v6600_v31 = vrot.slane %v6595_v17, %v6524_v1  ;;  %v6604_v51 = vrot.slane %v6595_v17, %v6528_v26  ;;  %v6608_v28 = vrot.slane %v6595_v17, %v6532_v57 }
 0x944   : > { %v6539_v43 = vcombine.low %v6533_v35, %v6537_v63  ;;  %v6575_v52 = vcombine.low %v6562_v2, %v6566_v12  ;;  %v6576_v24 = vcombine.low %v6570_v13, %v6574_v21  ;;  %v6612_v61 = vrot.slane %v6595_v17, %v6536_v42  ;;  %v6519_v62 = vld [vmem:[#allocation2] sm:$0xff] }
 0x945   : > { %v6546_v14 = vrot.slane %v6538_v22, %v6502_v25  ;;  %v6613_v53 = vcombine.low %v6600_v31, %v6604_v51 }
 0x946   : > { %v6553_v18 = vrot.slane %v6539_v43, %v6502_v25  ;;  %v6583_v49 = vrot.slane %v6575_v52, %v6502_v25  ;;  %v6590_v16 = vrot.slane %v6576_v24, %v6502_v25  ;;  %v6614_v27 = vcombine.low %v6608_v28, %v6612_v61 }
 0x947   : > { %v6621_v34 = vrot.slane %v6613_v53, %v6502_v25 }
 0x948   : > { %v6554_v19 = vcombine.low %v6546_v14, %v6553_v18  ;;  %v6591_v3 = vcombine.low %v6583_v49, %v6590_v16  ;;  %v6628_v6 = vrot.slane %v6614_v27, %v6502_v25 }
 0x94a   : > { %v6556_v8 = vmul.f32 %v6554_v19, %v6519_v62  ;;  %v6629_v4 = vcombine.low %v6621_v34, %v6628_v6 }
 0x94c   : > { %v6593_v10 = vadd.f32 %v6591_v3, %v6556_v8 }
 0x94e   : > { %v6594_v56 = vmax.f32 %v6593_v10, 0.0 }
 0x950   : > { %v6631_v41 = vmul.f32 %v6629_v4, %v6594_v56 }
 0x952   : > { %v6633_v7 = vcombine.high %v6631_v41, %v6631_v41  ;;  %v6640_v9 = vrot.slane %v6631_v41, %v6502_v25 }
 0x954   : > { %v6647_v58 = vrot.slane %v6633_v7, %v6502_v25  ;;  %v6648_v30 = vcombine.high %v6640_v9, %v6640_v9  ;;  %v6655_v45 = vsel %vm6654_vm0, %v6640_v9, 0.0 }
 0x956   : > { %v6649_v15 = vcombine.high %v6647_v58, %v6647_v58  ;;  %v6656_v23 = vsel %vm6654_vm0, %v6648_v30, 0.0  ;;  %v6658_v40 = vsel %vm6654_vm0, %v6647_v58, 0.0 }
 0x957   : > { %v6657_v48 = vadd.f32 %v6656_v23, %v6655_v45 }
 0x958   : > { %v6660_v60 = vsel %vm6654_vm0, %v6649_v15, 0.0 }
 0x959   : > { %v6659_v32 = vadd.f32 %v6658_v40, %v6657_v48 }
 0x95b   : > { %v6661_v38 = vadd.f32 %v6660_v60, %v6659_v32 }
 0x95d   : > { %6662 = vadd.xlane.f32.xlu0 %v6661_v38 }
 0x9e6   : > { %v6663_v20 = vpop.xlane.xlu0 %6662 }
 0x9e7   : > { %v6666_v29 = vadd.f32 %v6665_v59, %v6663_v20 }
 0x9e9   : > { %6668 = vst.msk [vmem:[%s8921_s6] sm:$0x3] %vm6667_vm1, %v6666_v29 }
 0x9ea PF: > { %p19_p3 = scmp.ge.s32.totalorder %s7126_s21, 4   ;;  %s9010_s23 = smov %s6991_s24 }
 0x9eb   : > { %s9011_s24 = smov %s6995_s25  ;;  %s9012_s25 = smov %s7136_s29 }
 0x9ec   : > { %s9013_s26 = smov %s7126_s21  ;;  %21 = sbr.rel (!%p19_p3) target bundleno = 7 (0x7), region = 103 }
 0x9f1   :  { %6680 = vsyncpa [#allocation5], 1 }
 0x9f2   :  { %6682 = vsyncpa [#allocation5 + $0x1], 1 }
 0x9f3   :  { %6683 = vsyncpa [#allocation7], 1 }
 0x9f4   :  { %6684 = vsyncpa [#allocation10], 1 }

</bundles_post_ra>
